<compile_context>
chip_gen: v7x
topology: tpu7x:2x2x1
jax: 0.10.0
libtpu: 0.0.40
codegen_flags: <defaults>
</compile_context>

<pallas_src>
import numpy as np

import jax
import jax.numpy as jnp
from jax.experimental import pallas as pl


# ----------------------------------------------------------------------------
# The single fused kernel
# ----------------------------------------------------------------------------
def _net_kernel(x4_ref, w1_ref, b1_ref, w2_ref, b2_ref,
                wf1_ref, bf1_ref, wf2_ref, bf2_ref, wf3_ref, bf3_ref, o_ref):
    """Whole LeNet forward, one invocation, everything VMEM-resident.

    x4_ref : (4, B, 8, 96)  f32  input rows split by (row % 4); lanes = (w, ic)
    w1_ref : (2, 5, 96, 84) bf16 conv1 lowered weights [col-phase, kh, K, N]
    b1_ref : (1, 84)        f32  conv1 bias tiled over pooled cols
    w2_ref : (2, 5, 84, 80) bf16 conv2 lowered weights
    b2_ref : (1, 80)        f32
    wf1_ref: (5, 80, 120)   bf16 fc1 weights, torch (c,h,w) flatten folded in
    bf*_ref: (1, N)         f32  fc biases
    o_ref  : (B, 10)        f32  logits
    """
    f32, bf16 = jnp.float32, jnp.bfloat16
    B = x4_ref.shape[1]

    b1 = b1_ref[...]
    b2 = b2_ref[...]
    bf1 = bf1_ref[...]
    bf2 = bf2_ref[...]
    bf3 = bf3_ref[...]

    for b in range(B):                                   # B is static & tiny
        ximg = [x4_ref[j, b] for j in range(4)]          # 4 x (8, 96) f32

        # ---- conv1 + ReLU + 2x2 maxpool -------------------------------------
        # Pooled output rows p = 2t + s are produced parity-split (s = 0, 1) so
        # conv2 can slice them with static contiguous slices.
        # Image row needed for pooled row p, row-phase dy, tap kh is
        #   4t + c  with  c = 2s + dy + kh  ->  ximg[c % 4][c//4 + t].
        h1 = []
        for s in range(2):
            phase = []
            for dy in range(2):
                xs = []
                for kh in range(5):
                    c = 2 * s + dy + kh
                    xs.append(ximg[c % 4][c // 4:c // 4 + 7, :].astype(bf16))
                for dx in range(2):                      # col-phase via weights
                    acc = jnp.dot(xs[0], w1_ref[dx, 0],
                                  preferred_element_type=f32)
                    for kh in range(1, 5):
                        acc = acc + jnp.dot(xs[kh], w1_ref[dx, kh],
                                            preferred_element_type=f32)
                    phase.append(acc)                    # (7, 84) f32
            pooled = jnp.maximum(jnp.maximum(phase[0], phase[1]),
                                 jnp.maximum(phase[2], phase[3]))
            h1.append(jnp.maximum(pooled + b1, 0.0))     # (7, 84) f32, lanes=(q,oc)

        # ---- conv2 + ReLU + 2x2 maxpool -------------------------------------
        # h1 row needed for pooled row p2, row-phase dy, tap kh is
        #   2*p2 + dy + kh  ->  h1[(dy+kh) % 2][(dy+kh)//2 + p2].
        phase2 = []
        for dy in range(2):
            xs = []
            for kh in range(5):
                c = dy + kh
                xs.append(h1[c % 2][c // 2:c // 2 + 5, :].astype(bf16))
            for dx in range(2):
                acc = jnp.dot(xs[0], w2_ref[dx, 0], preferred_element_type=f32)
                for kh in range(1, 5):
                    acc = acc + jnp.dot(xs[kh], w2_ref[dx, kh],
                                        preferred_element_type=f32)
                phase2.append(acc)                       # (5, 80) f32
        pooled2 = jnp.maximum(jnp.maximum(phase2[0], phase2[1]),
                              jnp.maximum(phase2[2], phase2[3]))
        h2 = jnp.maximum(pooled2 + b2, 0.0)              # (5, 80) f32, lanes=(q,oc)

        # ---- fc1 + ReLU (torch flatten permutation baked into wf1) ----------
        acc = jnp.dot(h2[0:1, :].astype(bf16), wf1_ref[0],
                      preferred_element_type=f32)
        for p in range(1, 5):
            acc = acc + jnp.dot(h2[p:p + 1, :].astype(bf16), wf1_ref[p],
                                preferred_element_type=f32)
        f1 = jnp.maximum(acc + bf1, 0.0).astype(bf16)    # (1, 120)

        # ---- fc2 + ReLU ------------------------------------------------------
        f2 = jnp.dot(f1, wf2_ref[...], preferred_element_type=f32) + bf2
        f2 = jnp.maximum(f2, 0.0).astype(bf16)           # (1, 84)

        # ---- fc3 --------------------------------------------------------------
        logits = jnp.dot(f2, wf3_ref[...], preferred_element_type=f32) + bf3
        o_ref[pl.ds(b, 1), :] = logits.astype(o_ref.dtype)


# ----------------------------------------------------------------------------
# Forward wrapper: one cheap input relayout + ONE pallas_call
# ----------------------------------------------------------------------------
def net_forward(kp, x_nchw):
    B = x_nchw.shape[0]
    assert x_nchw.shape[1:] == (3, 32, 32), x_nchw.shape

    # NCHW -> NHWC -> rows split by residue mod 4, lanes = (w, ic), ic minor.
    # This is a single cheap relayout of the raw 24 KB input (no 25x im2col).
    x = jnp.transpose(x_nchw, (0, 2, 3, 1)).astype(jnp.float32)   # (B,32,32,3)
    x4 = jnp.transpose(x.reshape(B, 8, 4, 96), (2, 0, 1, 3))      # (4,B,8,96)

    return pl.pallas_call(
        _net_kernel,
        out_shape=jax.ShapeDtypeStruct((B, 10), jnp.float32),
    )(x4, kp["w1l"], kp["b1r"], kp["w2l"], kp["b2r"],
      kp["wf1"], kp["bf1"], kp["wf2"], kp["bf2"], kp["wf3"], kp["bf3"])


# ----------------------------------------------------------------------------
# Params: PyTorch-style init + one-time re-layout into kernel form
# ----------------------------------------------------------------------------
def init_params(key):
    def uniform(k, shape, fan_in):
        bound = 1.0 / jnp.sqrt(jnp.float32(fan_in))
        return jax.random.uniform(k, shape, jnp.float32, -bound, bound)

    ks = jax.random.split(key, 10)
    return {
        "conv1_w": uniform(ks[0], (6, 3, 5, 5), 3 * 5 * 5),
        "conv1_b": uniform(ks[1], (6,), 3 * 5 * 5),
        "conv2_w": uniform(ks[2], (16, 6, 5, 5), 6 * 5 * 5),
        "conv2_b": uniform(ks[3], (16,), 6 * 5 * 5),
        "fc1_w": uniform(ks[4], (120, 16 * 5 * 5), 16 * 5 * 5),
        "fc1_b": uniform(ks[5], (120,), 16 * 5 * 5),
        "fc2_w": uniform(ks[6], (84, 120), 120),
        "fc2_b": uniform(ks[7], (84,), 120),
        "fc3_w": uniform(ks[8], (10, 84), 84),
        "fc3_b": uniform(ks[9], (10,), 84),
    }


def prepare_params(params):
    """One-time conversion of PyTorch-layout params into kernel layout."""
    f32 = np.float32

    def lower_conv(w, in_w, out_wp):
        # (OC,IC,KH,KW) -> (2, KH, in_w*IC, out_wp*OC) lowered (Toeplitz) weights.
        # wl[dx, kh, col*IC+ic, q*OC+oc] = w[oc, ic, kh, col - 2q - dx]
        OC, IC, KH, KW = w.shape
        wl = np.zeros((2, KH, in_w * IC, out_wp * OC), f32)
        for dx in range(2):
            for kh in range(KH):
                for q in range(out_wp):
                    for kw in range(KW):
                        col = 2 * q + dx + kw
                        wl[dx, kh, col * IC:(col + 1) * IC,
                           q * OC:(q + 1) * OC] = w[:, :, kh, kw].T
        return wl

    c1w = np.asarray(params["conv1_w"], f32)            # (6,3,5,5)
    c2w = np.asarray(params["conv2_w"], f32)            # (16,6,5,5)

    # fc1 with torch's x.view(-1, 16*5*5) (c,h,w) permutation folded into rows:
    # our h2 layout is rows=h (5), lanes=(w,oc) with oc minor.
    fw1 = np.asarray(params["fc1_w"], f32)               # (120, 400)
    wf1 = np.zeros((5, 80, 120), f32)
    for p in range(5):
        for q in range(5):
            for oc in range(16):
                wf1[p, q * 16 + oc, :] = fw1[:, oc * 25 + p * 5 + q]

    bf16 = jnp.bfloat16
    return {
        "w1l": jnp.asarray(lower_conv(c1w, 32, 14), bf16),          # (2,5,96,84)
        "b1r": jnp.asarray(np.tile(np.asarray(params["conv1_b"], f32), 14)
                           .reshape(1, 84)),
        "w2l": jnp.asarray(lower_conv(c2w, 14, 5), bf16),           # (2,5,84,80)
        "b2r": jnp.asarray(np.tile(np.asarray(params["conv2_b"], f32), 5)
                           .reshape(1, 80)),
        "wf1": jnp.asarray(wf1, bf16),                               # (5,80,120)
        "bf1": jnp.asarray(params["fc1_b"], jnp.float32).reshape(1, 120),
        "wf2": jnp.asarray(np.asarray(params["fc2_w"], f32).T, bf16),  # (120,84)
        "bf2": jnp.asarray(params["fc2_b"], jnp.float32).reshape(1, 84),
        "wf3": jnp.asarray(np.asarray(params["fc3_w"], f32).T, bf16),  # (84,10)
        "bf3": jnp.asarray(params["fc3_b"], jnp.float32).reshape(1, 10),
    }


def net_reference(params, x_nchw):
    """Pure-JAX (XLA, f32) reference mirroring the PyTorch module."""
    def conv(x, w, b):
        y = jax.lax.conv_general_dilated(
            x, w, window_strides=(1, 1), padding="VALID",
            dimension_numbers=("NCHW", "OIHW", "NCHW"))
        return jax.nn.relu(y + b[None, :, None, None])

    def pool(x):
        return jax.lax.reduce_window(x, -jnp.inf, jax.lax.max,
                                     (1, 1, 2, 2), (1, 1, 2, 2), "VALID")

    x = pool(conv(x_nchw, params["conv1_w"], params["conv1_b"]))
    x = pool(conv(x, params["conv2_w"], params["conv2_b"]))
    x = x.reshape(x.shape[0], -1)
    x = jax.nn.relu(x @ params["fc1_w"].T + params["fc1_b"])
    x = jax.nn.relu(x @ params["fc2_w"].T + params["fc2_b"])
    return x @ params["fc3_w"].T + params["fc3_b"]


if __name__ == "__main__":
    key = jax.random.PRNGKey(0)
    pkey, xkey = jax.random.split(key)
    params = init_params(pkey)
    kparams = prepare_params(params)      # one-time weight lowering (host side)

    # fc1's 16*5*5 input implies 32x32 spatial (CIFAR-10); keep batch small.
    x = jax.random.normal(xkey, (2, 3, 32, 32), jnp.float32)

    out = jax.block_until_ready(jax.jit(net_forward)(kparams, x))
    assert out.shape == (2, 10), out.shape
    assert bool(jnp.all(jnp.isfinite(out)))

    # Validate against the pure-XLA f32 reference.  The kernel uses bf16 MXU
    # operands with f32 accumulation, so use a bf16-appropriate tolerance.
    ref = jax.block_until_ready(jax.jit(net_reference)(params, x))
    max_err = float(jnp.max(jnp.abs(out - ref)))
    assert bool(jnp.allclose(out, ref, rtol=5e-2, atol=5e-2)), max_err

    print("KERNEL_OK")
</pallas_src>

<mosaic_0001>
module attributes {stable_mosaic.version = 11 : i64} {
  func.func @_net_kernel(%arg0: memref<4x2x8x96xf32, #tpu.memory_space<vmem>>, %arg1: memref<2x5x96x84xbf16, #tpu.memory_space<vmem>>, %arg2: memref<1x84xf32, #tpu.memory_space<vmem>>, %arg3: memref<2x5x84x80xbf16, #tpu.memory_space<vmem>>, %arg4: memref<1x80xf32, #tpu.memory_space<vmem>>, %arg5: memref<5x80x120xbf16, #tpu.memory_space<vmem>>, %arg6: memref<1x120xf32, #tpu.memory_space<vmem>>, %arg7: memref<120x84xbf16, #tpu.memory_space<vmem>>, %arg8: memref<1x84xf32, #tpu.memory_space<vmem>>, %arg9: memref<84x10xbf16, #tpu.memory_space<vmem>>, %arg10: memref<1x10xf32, #tpu.memory_space<vmem>>, %arg11: memref<2x10xf32, #tpu.memory_space<vmem>>) attributes {dimension_semantics = [], scalar_prefetch = 0 : i64, scratch_operands = 0 : i64, tpu.core_type = #tpu.core_type<tc>} {
    %c0 = arith.constant 0 : index
    %c0_0 = arith.constant 0 : index
    %0 = vector.load %arg2[%c0, %c0_0] : memref<1x84xf32, #tpu.memory_space<vmem>>, vector<1x84xf32>
    %c0_1 = arith.constant 0 : index
    %c0_2 = arith.constant 0 : index
    %1 = vector.load %arg4[%c0_1, %c0_2] : memref<1x80xf32, #tpu.memory_space<vmem>>, vector<1x80xf32>
    %c0_3 = arith.constant 0 : index
    %c0_4 = arith.constant 0 : index
    %2 = vector.load %arg6[%c0_3, %c0_4] : memref<1x120xf32, #tpu.memory_space<vmem>>, vector<1x120xf32>
    %c0_5 = arith.constant 0 : index
    %c0_6 = arith.constant 0 : index
    %3 = vector.load %arg8[%c0_5, %c0_6] : memref<1x84xf32, #tpu.memory_space<vmem>>, vector<1x84xf32>
    %c0_7 = arith.constant 0 : index
    %c0_8 = arith.constant 0 : index
    %4 = vector.load %arg10[%c0_7, %c0_8] : memref<1x10xf32, #tpu.memory_space<vmem>>, vector<1x10xf32>
    %c0_9 = arith.constant 0 : index
    %c0_10 = arith.constant 0 : index
    %c0_11 = arith.constant 0 : index
    %c0_12 = arith.constant 0 : index
    %5 = vector.load %arg0[%c0_9, %c0_10, %c0_11, %c0_12] : memref<4x2x8x96xf32, #tpu.memory_space<vmem>>, vector<1x1x8x96xf32>
    %6 = vector.shape_cast %5 : vector<1x1x8x96xf32> to vector<8x96xf32>
    %c1 = arith.constant 1 : index
    %c0_13 = arith.constant 0 : index
    %c0_14 = arith.constant 0 : index
    %c0_15 = arith.constant 0 : index
    %7 = vector.load %arg0[%c1, %c0_13, %c0_14, %c0_15] : memref<4x2x8x96xf32, #tpu.memory_space<vmem>>, vector<1x1x8x96xf32>
    %8 = vector.shape_cast %7 : vector<1x1x8x96xf32> to vector<8x96xf32>
    %c2 = arith.constant 2 : index
    %c0_16 = arith.constant 0 : index
    %c0_17 = arith.constant 0 : index
    %c0_18 = arith.constant 0 : index
    %9 = vector.load %arg0[%c2, %c0_16, %c0_17, %c0_18] : memref<4x2x8x96xf32, #tpu.memory_space<vmem>>, vector<1x1x8x96xf32>
    %10 = vector.shape_cast %9 : vector<1x1x8x96xf32> to vector<8x96xf32>
    %c3 = arith.constant 3 : index
    %c0_19 = arith.constant 0 : index
    %c0_20 = arith.constant 0 : index
    %c0_21 = arith.constant 0 : index
    %11 = vector.load %arg0[%c3, %c0_19, %c0_20, %c0_21] : memref<4x2x8x96xf32, #tpu.memory_space<vmem>>, vector<1x1x8x96xf32>
    %12 = vector.shape_cast %11 : vector<1x1x8x96xf32> to vector<8x96xf32>
    %13 = vector.extract_strided_slice %6 {offsets = [0, 0], sizes = [7, 96], strides = [1, 1]} : vector<8x96xf32> to vector<7x96xf32>
    %14 = arith.truncf %13 : vector<7x96xf32> to vector<7x96xbf16>
    %15 = vector.extract_strided_slice %8 {offsets = [0, 0], sizes = [7, 96], strides = [1, 1]} : vector<8x96xf32> to vector<7x96xf32>
    %16 = arith.truncf %15 : vector<7x96xf32> to vector<7x96xbf16>
    %17 = vector.extract_strided_slice %10 {offsets = [0, 0], sizes = [7, 96], strides = [1, 1]} : vector<8x96xf32> to vector<7x96xf32>
    %18 = arith.truncf %17 : vector<7x96xf32> to vector<7x96xbf16>
    %19 = vector.extract_strided_slice %12 {offsets = [0, 0], sizes = [7, 96], strides = [1, 1]} : vector<8x96xf32> to vector<7x96xf32>
    %20 = arith.truncf %19 : vector<7x96xf32> to vector<7x96xbf16>
    %21 = vector.extract_strided_slice %6 {offsets = [1, 0], sizes = [7, 96], strides = [1, 1]} : vector<8x96xf32> to vector<7x96xf32>
    %22 = arith.truncf %21 : vector<7x96xf32> to vector<7x96xbf16>
    %c0_22 = arith.constant 0 : index
    %c0_23 = arith.constant 0 : index
    %c0_24 = arith.constant 0 : index
    %c0_25 = arith.constant 0 : index
    %23 = vector.load %arg1[%c0_22, %c0_23, %c0_24, %c0_25] : memref<2x5x96x84xbf16, #tpu.memory_space<vmem>>, vector<1x1x96x84xbf16>
    %24 = vector.shape_cast %23 : vector<1x1x96x84xbf16> to vector<96x84xbf16>
    %cst = arith.constant dense<0.000000e+00> : vector<7x84xf32>
    %25 = tpu.matmul %14, %24, %cst {dimension_numbers = #tpu.dot_dimension_numbers<[1], [0], [0], [1], [0, 0, 1, 1], [], []>} : vector<7x96xbf16>, vector<96x84xbf16>, vector<7x84xf32> -> vector<7x84xf32>
    %c0_26 = arith.constant 0 : index
    %c1_27 = arith.constant 1 : index
    %c0_28 = arith.constant 0 : index
    %c0_29 = arith.constant 0 : index
    %26 = vector.load %arg1[%c0_26, %c1_27, %c0_28, %c0_29] : memref<2x5x96x84xbf16, #tpu.memory_space<vmem>>, vector<1x1x96x84xbf16>
    %27 = vector.shape_cast %26 : vector<1x1x96x84xbf16> to vector<96x84xbf16>
    %cst_30 = arith.constant dense<0.000000e+00> : vector<7x84xf32>
    %28 = tpu.matmul %16, %27, %cst_30 {dimension_numbers = #tpu.dot_dimension_numbers<[1], [0], [0], [1], [0, 0, 1, 1], [], []>} : vector<7x96xbf16>, vector<96x84xbf16>, vector<7x84xf32> -> vector<7x84xf32>
    %29 = arith.addf %25, %28 : vector<7x84xf32>
    %c0_31 = arith.constant 0 : index
    %c2_32 = arith.constant 2 : index
    %c0_33 = arith.constant 0 : index
    %c0_34 = arith.constant 0 : index
    %30 = vector.load %arg1[%c0_31, %c2_32, %c0_33, %c0_34] : memref<2x5x96x84xbf16, #tpu.memory_space<vmem>>, vector<1x1x96x84xbf16>
    %31 = vector.shape_cast %30 : vector<1x1x96x84xbf16> to vector<96x84xbf16>
    %cst_35 = arith.constant dense<0.000000e+00> : vector<7x84xf32>
    %32 = tpu.matmul %18, %31, %cst_35 {dimension_numbers = #tpu.dot_dimension_numbers<[1], [0], [0], [1], [0, 0, 1, 1], [], []>} : vector<7x96xbf16>, vector<96x84xbf16>, vector<7x84xf32> -> vector<7x84xf32>
    %33 = arith.addf %29, %32 : vector<7x84xf32>
    %c0_36 = arith.constant 0 : index
    %c3_37 = arith.constant 3 : index
    %c0_38 = arith.constant 0 : index
    %c0_39 = arith.constant 0 : index
    %34 = vector.load %arg1[%c0_36, %c3_37, %c0_38, %c0_39] : memref<2x5x96x84xbf16, #tpu.memory_space<vmem>>, vector<1x1x96x84xbf16>
    %35 = vector.shape_cast %34 : vector<1x1x96x84xbf16> to vector<96x84xbf16>
    %cst_40 = arith.constant dense<0.000000e+00> : vector<7x84xf32>
    %36 = tpu.matmul %20, %35, %cst_40 {dimension_numbers = #tpu.dot_dimension_numbers<[1], [0], [0], [1], [0, 0, 1, 1], [], []>} : vector<7x96xbf16>, vector<96x84xbf16>, vector<7x84xf32> -> vector<7x84xf32>
    %37 = arith.addf %33, %36 : vector<7x84xf32>
    %c0_41 = arith.constant 0 : index
    %c4 = arith.constant 4 : index
    %c0_42 = arith.constant 0 : index
    %c0_43 = arith.constant 0 : index
    %38 = vector.load %arg1[%c0_41, %c4, %c0_42, %c0_43] : memref<2x5x96x84xbf16, #tpu.memory_space<vmem>>, vector<1x1x96x84xbf16>
    %39 = vector.shape_cast %38 : vector<1x1x96x84xbf16> to vector<96x84xbf16>
    %cst_44 = arith.constant dense<0.000000e+00> : vector<7x84xf32>
    %40 = tpu.matmul %22, %39, %cst_44 {dimension_numbers = #tpu.dot_dimension_numbers<[1], [0], [0], [1], [0, 0, 1, 1], [], []>} : vector<7x96xbf16>, vector<96x84xbf16>, vector<7x84xf32> -> vector<7x84xf32>
    %41 = arith.addf %37, %40 : vector<7x84xf32>
    %c1_45 = arith.constant 1 : index
    %c0_46 = arith.constant 0 : index
    %c0_47 = arith.constant 0 : index
    %c0_48 = arith.constant 0 : index
    %42 = vector.load %arg1[%c1_45, %c0_46, %c0_47, %c0_48] : memref<2x5x96x84xbf16, #tpu.memory_space<vmem>>, vector<1x1x96x84xbf16>
    %43 = vector.shape_cast %42 : vector<1x1x96x84xbf16> to vector<96x84xbf16>
    %cst_49 = arith.constant dense<0.000000e+00> : vector<7x84xf32>
    %44 = tpu.matmul %14, %43, %cst_49 {dimension_numbers = #tpu.dot_dimension_numbers<[1], [0], [0], [1], [0, 0, 1, 1], [], []>} : vector<7x96xbf16>, vector<96x84xbf16>, vector<7x84xf32> -> vector<7x84xf32>
    %c1_50 = arith.constant 1 : index
    %c1_51 = arith.constant 1 : index
    %c0_52 = arith.constant 0 : index
    %c0_53 = arith.constant 0 : index
    %45 = vector.load %arg1[%c1_50, %c1_51, %c0_52, %c0_53] : memref<2x5x96x84xbf16, #tpu.memory_space<vmem>>, vector<1x1x96x84xbf16>
    %46 = vector.shape_cast %45 : vector<1x1x96x84xbf16> to vector<96x84xbf16>
    %cst_54 = arith.constant dense<0.000000e+00> : vector<7x84xf32>
    %47 = tpu.matmul %16, %46, %cst_54 {dimension_numbers = #tpu.dot_dimension_numbers<[1], [0], [0], [1], [0, 0, 1, 1], [], []>} : vector<7x96xbf16>, vector<96x84xbf16>, vector<7x84xf32> -> vector<7x84xf32>
    %48 = arith.addf %44, %47 : vector<7x84xf32>
    %c1_55 = arith.constant 1 : index
    %c2_56 = arith.constant 2 : index
    %c0_57 = arith.constant 0 : index
    %c0_58 = arith.constant 0 : index
    %49 = vector.load %arg1[%c1_55, %c2_56, %c0_57, %c0_58] : memref<2x5x96x84xbf16, #tpu.memory_space<vmem>>, vector<1x1x96x84xbf16>
    %50 = vector.shape_cast %49 : vector<1x1x96x84xbf16> to vector<96x84xbf16>
    %cst_59 = arith.constant dense<0.000000e+00> : vector<7x84xf32>
    %51 = tpu.matmul %18, %50, %cst_59 {dimension_numbers = #tpu.dot_dimension_numbers<[1], [0], [0], [1], [0, 0, 1, 1], [], []>} : vector<7x96xbf16>, vector<96x84xbf16>, vector<7x84xf32> -> vector<7x84xf32>
    %52 = arith.addf %48, %51 : vector<7x84xf32>
    %c1_60 = arith.constant 1 : index
    %c3_61 = arith.constant 3 : index
    %c0_62 = arith.constant 0 : index
    %c0_63 = arith.constant 0 : index
    %53 = vector.load %arg1[%c1_60, %c3_61, %c0_62, %c0_63] : memref<2x5x96x84xbf16, #tpu.memory_space<vmem>>, vector<1x1x96x84xbf16>
    %54 = vector.shape_cast %53 : vector<1x1x96x84xbf16> to vector<96x84xbf16>
    %cst_64 = arith.constant dense<0.000000e+00> : vector<7x84xf32>
    %55 = tpu.matmul %20, %54, %cst_64 {dimension_numbers = #tpu.dot_dimension_numbers<[1], [0], [0], [1], [0, 0, 1, 1], [], []>} : vector<7x96xbf16>, vector<96x84xbf16>, vector<7x84xf32> -> vector<7x84xf32>
    %56 = arith.addf %52, %55 : vector<7x84xf32>
    %c1_65 = arith.constant 1 : index
    %c4_66 = arith.constant 4 : index
    %c0_67 = arith.constant 0 : index
    %c0_68 = arith.constant 0 : index
    %57 = vector.load %arg1[%c1_65, %c4_66, %c0_67, %c0_68] : memref<2x5x96x84xbf16, #tpu.memory_space<vmem>>, vector<1x1x96x84xbf16>
    %58 = vector.shape_cast %57 : vector<1x1x96x84xbf16> to vector<96x84xbf16>
    %cst_69 = arith.constant dense<0.000000e+00> : vector<7x84xf32>
    %59 = tpu.matmul %22, %58, %cst_69 {dimension_numbers = #tpu.dot_dimension_numbers<[1], [0], [0], [1], [0, 0, 1, 1], [], []>} : vector<7x96xbf16>, vector<96x84xbf16>, vector<7x84xf32> -> vector<7x84xf32>
    %60 = arith.addf %56, %59 : vector<7x84xf32>
    %61 = vector.extract_strided_slice %8 {offsets = [0, 0], sizes = [7, 96], strides = [1, 1]} : vector<8x96xf32> to vector<7x96xf32>
    %62 = arith.truncf %61 : vector<7x96xf32> to vector<7x96xbf16>
    %63 = vector.extract_strided_slice %10 {offsets = [0, 0], sizes = [7, 96], strides = [1, 1]} : vector<8x96xf32> to vector<7x96xf32>
    %64 = arith.truncf %63 : vector<7x96xf32> to vector<7x96xbf16>
    %65 = vector.extract_strided_slice %12 {offsets = [0, 0], sizes = [7, 96], strides = [1, 1]} : vector<8x96xf32> to vector<7x96xf32>
    %66 = arith.truncf %65 : vector<7x96xf32> to vector<7x96xbf16>
    %67 = vector.extract_strided_slice %6 {offsets = [1, 0], sizes = [7, 96], strides = [1, 1]} : vector<8x96xf32> to vector<7x96xf32>
    %68 = arith.truncf %67 : vector<7x96xf32> to vector<7x96xbf16>
    %69 = vector.extract_strided_slice %8 {offsets = [1, 0], sizes = [7, 96], strides = [1, 1]} : vector<8x96xf32> to vector<7x96xf32>
    %70 = arith.truncf %69 : vector<7x96xf32> to vector<7x96xbf16>
    %c0_70 = arith.constant 0 : index
    %c0_71 = arith.constant 0 : index
    %c0_72 = arith.constant 0 : index
    %c0_73 = arith.constant 0 : index
    %71 = vector.load %arg1[%c0_70, %c0_71, %c0_72, %c0_73] : memref<2x5x96x84xbf16, #tpu.memory_space<vmem>>, vector<1x1x96x84xbf16>
    %72 = vector.shape_cast %71 : vector<1x1x96x84xbf16> to vector<96x84xbf16>
    %cst_74 = arith.constant dense<0.000000e+00> : vector<7x84xf32>
    %73 = tpu.matmul %62, %72, %cst_74 {dimension_numbers = #tpu.dot_dimension_numbers<[1], [0], [0], [1], [0, 0, 1, 1], [], []>} : vector<7x96xbf16>, vector<96x84xbf16>, vector<7x84xf32> -> vector<7x84xf32>
    %c0_75 = arith.constant 0 : index
    %c1_76 = arith.constant 1 : index
    %c0_77 = arith.constant 0 : index
    %c0_78 = arith.constant 0 : index
    %74 = vector.load %arg1[%c0_75, %c1_76, %c0_77, %c0_78] : memref<2x5x96x84xbf16, #tpu.memory_space<vmem>>, vector<1x1x96x84xbf16>
    %75 = vector.shape_cast %74 : vector<1x1x96x84xbf16> to vector<96x84xbf16>
    %cst_79 = arith.constant dense<0.000000e+00> : vector<7x84xf32>
    %76 = tpu.matmul %64, %75, %cst_79 {dimension_numbers = #tpu.dot_dimension_numbers<[1], [0], [0], [1], [0, 0, 1, 1], [], []>} : vector<7x96xbf16>, vector<96x84xbf16>, vector<7x84xf32> -> vector<7x84xf32>
    %77 = arith.addf %73, %76 : vector<7x84xf32>
    %c0_80 = arith.constant 0 : index
    %c2_81 = arith.constant 2 : index
    %c0_82 = arith.constant 0 : index
    %c0_83 = arith.constant 0 : index
    %78 = vector.load %arg1[%c0_80, %c2_81, %c0_82, %c0_83] : memref<2x5x96x84xbf16, #tpu.memory_space<vmem>>, vector<1x1x96x84xbf16>
    %79 = vector.shape_cast %78 : vector<1x1x96x84xbf16> to vector<96x84xbf16>
    %cst_84 = arith.constant dense<0.000000e+00> : vector<7x84xf32>
    %80 = tpu.matmul %66, %79, %cst_84 {dimension_numbers = #tpu.dot_dimension_numbers<[1], [0], [0], [1], [0, 0, 1, 1], [], []>} : vector<7x96xbf16>, vector<96x84xbf16>, vector<7x84xf32> -> vector<7x84xf32>
    %81 = arith.addf %77, %80 : vector<7x84xf32>
    %c0_85 = arith.constant 0 : index
    %c3_86 = arith.constant 3 : index
    %c0_87 = arith.constant 0 : index
    %c0_88 = arith.constant 0 : index
    %82 = vector.load %arg1[%c0_85, %c3_86, %c0_87, %c0_88] : memref<2x5x96x84xbf16, #tpu.memory_space<vmem>>, vector<1x1x96x84xbf16>
    %83 = vector.shape_cast %82 : vector<1x1x96x84xbf16> to vector<96x84xbf16>
    %cst_89 = arith.constant dense<0.000000e+00> : vector<7x84xf32>
    %84 = tpu.matmul %68, %83, %cst_89 {dimension_numbers = #tpu.dot_dimension_numbers<[1], [0], [0], [1], [0, 0, 1, 1], [], []>} : vector<7x96xbf16>, vector<96x84xbf16>, vector<7x84xf32> -> vector<7x84xf32>
    %85 = arith.addf %81, %84 : vector<7x84xf32>
    %c0_90 = arith.constant 0 : index
    %c4_91 = arith.constant 4 : index
    %c0_92 = arith.constant 0 : index
    %c0_93 = arith.constant 0 : index
    %86 = vector.load %arg1[%c0_90, %c4_91, %c0_92, %c0_93] : memref<2x5x96x84xbf16, #tpu.memory_space<vmem>>, vector<1x1x96x84xbf16>
    %87 = vector.shape_cast %86 : vector<1x1x96x84xbf16> to vector<96x84xbf16>
    %cst_94 = arith.constant dense<0.000000e+00> : vector<7x84xf32>
    %88 = tpu.matmul %70, %87, %cst_94 {dimension_numbers = #tpu.dot_dimension_numbers<[1], [0], [0], [1], [0, 0, 1, 1], [], []>} : vector<7x96xbf16>, vector<96x84xbf16>, vector<7x84xf32> -> vector<7x84xf32>
    %89 = arith.addf %85, %88 : vector<7x84xf32>
    %c1_95 = arith.constant 1 : index
    %c0_96 = arith.constant 0 : index
    %c0_97 = arith.constant 0 : index
    %c0_98 = arith.constant 0 : index
    %90 = vector.load %arg1[%c1_95, %c0_96, %c0_97, %c0_98] : memref<2x5x96x84xbf16, #tpu.memory_space<vmem>>, vector<1x1x96x84xbf16>
    %91 = vector.shape_cast %90 : vector<1x1x96x84xbf16> to vector<96x84xbf16>
    %cst_99 = arith.constant dense<0.000000e+00> : vector<7x84xf32>
    %92 = tpu.matmul %62, %91, %cst_99 {dimension_numbers = #tpu.dot_dimension_numbers<[1], [0], [0], [1], [0, 0, 1, 1], [], []>} : vector<7x96xbf16>, vector<96x84xbf16>, vector<7x84xf32> -> vector<7x84xf32>
    %c1_100 = arith.constant 1 : index
    %c1_101 = arith.constant 1 : index
    %c0_102 = arith.constant 0 : index
    %c0_103 = arith.constant 0 : index
    %93 = vector.load %arg1[%c1_100, %c1_101, %c0_102, %c0_103] : memref<2x5x96x84xbf16, #tpu.memory_space<vmem>>, vector<1x1x96x84xbf16>
    %94 = vector.shape_cast %93 : vector<1x1x96x84xbf16> to vector<96x84xbf16>
    %cst_104 = arith.constant dense<0.000000e+00> : vector<7x84xf32>
    %95 = tpu.matmul %64, %94, %cst_104 {dimension_numbers = #tpu.dot_dimension_numbers<[1], [0], [0], [1], [0, 0, 1, 1], [], []>} : vector<7x96xbf16>, vector<96x84xbf16>, vector<7x84xf32> -> vector<7x84xf32>
    %96 = arith.addf %92, %95 : vector<7x84xf32>
    %c1_105 = arith.constant 1 : index
    %c2_106 = arith.constant 2 : index
    %c0_107 = arith.constant 0 : index
    %c0_108 = arith.constant 0 : index
    %97 = vector.load %arg1[%c1_105, %c2_106, %c0_107, %c0_108] : memref<2x5x96x84xbf16, #tpu.memory_space<vmem>>, vector<1x1x96x84xbf16>
    %98 = vector.shape_cast %97 : vector<1x1x96x84xbf16> to vector<96x84xbf16>
    %cst_109 = arith.constant dense<0.000000e+00> : vector<7x84xf32>
    %99 = tpu.matmul %66, %98, %cst_109 {dimension_numbers = #tpu.dot_dimension_numbers<[1], [0], [0], [1], [0, 0, 1, 1], [], []>} : vector<7x96xbf16>, vector<96x84xbf16>, vector<7x84xf32> -> vector<7x84xf32>
    %100 = arith.addf %96, %99 : vector<7x84xf32>
    %c1_110 = arith.constant 1 : index
    %c3_111 = arith.constant 3 : index
    %c0_112 = arith.constant 0 : index
    %c0_113 = arith.constant 0 : index
    %101 = vector.load %arg1[%c1_110, %c3_111, %c0_112, %c0_113] : memref<2x5x96x84xbf16, #tpu.memory_space<vmem>>, vector<1x1x96x84xbf16>
    %102 = vector.shape_cast %101 : vector<1x1x96x84xbf16> to vector<96x84xbf16>
    %cst_114 = arith.constant dense<0.000000e+00> : vector<7x84xf32>
    %103 = tpu.matmul %68, %102, %cst_114 {dimension_numbers = #tpu.dot_dimension_numbers<[1], [0], [0], [1], [0, 0, 1, 1], [], []>} : vector<7x96xbf16>, vector<96x84xbf16>, vector<7x84xf32> -> vector<7x84xf32>
    %104 = arith.addf %100, %103 : vector<7x84xf32>
    %c1_115 = arith.constant 1 : index
    %c4_116 = arith.constant 4 : index
    %c0_117 = arith.constant 0 : index
    %c0_118 = arith.constant 0 : index
    %105 = vector.load %arg1[%c1_115, %c4_116, %c0_117, %c0_118] : memref<2x5x96x84xbf16, #tpu.memory_space<vmem>>, vector<1x1x96x84xbf16>
    %106 = vector.shape_cast %105 : vector<1x1x96x84xbf16> to vector<96x84xbf16>
    %cst_119 = arith.constant dense<0.000000e+00> : vector<7x84xf32>
    %107 = tpu.matmul %70, %106, %cst_119 {dimension_numbers = #tpu.dot_dimension_numbers<[1], [0], [0], [1], [0, 0, 1, 1], [], []>} : vector<7x96xbf16>, vector<96x84xbf16>, vector<7x84xf32> -> vector<7x84xf32>
    %108 = arith.addf %104, %107 : vector<7x84xf32>
    %109 = arith.maximumf %41, %60 : vector<7x84xf32>
    %110 = arith.maximumf %89, %108 : vector<7x84xf32>
    %111 = arith.maximumf %109, %110 : vector<7x84xf32>
    %112 = vector.broadcast %0 : vector<1x84xf32> to vector<7x84xf32>
    %113 = arith.addf %111, %112 : vector<7x84xf32>
    %cst_120 = arith.constant 0.000000e+00 : f32
    %114 = vector.broadcast %cst_120 : f32 to vector<7x84xf32>
    %115 = arith.maximumf %113, %114 : vector<7x84xf32>
    %116 = vector.extract_strided_slice %10 {offsets = [0, 0], sizes = [7, 96], strides = [1, 1]} : vector<8x96xf32> to vector<7x96xf32>
    %117 = arith.truncf %116 : vector<7x96xf32> to vector<7x96xbf16>
    %118 = vector.extract_strided_slice %12 {offsets = [0, 0], sizes = [7, 96], strides = [1, 1]} : vector<8x96xf32> to vector<7x96xf32>
    %119 = arith.truncf %118 : vector<7x96xf32> to vector<7x96xbf16>
    %120 = vector.extract_strided_slice %6 {offsets = [1, 0], sizes = [7, 96], strides = [1, 1]} : vector<8x96xf32> to vector<7x96xf32>
    %121 = arith.truncf %120 : vector<7x96xf32> to vector<7x96xbf16>
    %122 = vector.extract_strided_slice %8 {offsets = [1, 0], sizes = [7, 96], strides = [1, 1]} : vector<8x96xf32> to vector<7x96xf32>
    %123 = arith.truncf %122 : vector<7x96xf32> to vector<7x96xbf16>
    %124 = vector.extract_strided_slice %10 {offsets = [1, 0], sizes = [7, 96], strides = [1, 1]} : vector<8x96xf32> to vector<7x96xf32>
    %125 = arith.truncf %124 : vector<7x96xf32> to vector<7x96xbf16>
    %c0_121 = arith.constant 0 : index
    %c0_122 = arith.constant 0 : index
    %c0_123 = arith.constant 0 : index
    %c0_124 = arith.constant 0 : index
    %126 = vector.load %arg1[%c0_121, %c0_122, %c0_123, %c0_124] : memref<2x5x96x84xbf16, #tpu.memory_space<vmem>>, vector<1x1x96x84xbf16>
    %127 = vector.shape_cast %126 : vector<1x1x96x84xbf16> to vector<96x84xbf16>
    %cst_125 = arith.constant dense<0.000000e+00> : vector<7x84xf32>
    %128 = tpu.matmul %117, %127, %cst_125 {dimension_numbers = #tpu.dot_dimension_numbers<[1], [0], [0], [1], [0, 0, 1, 1], [], []>} : vector<7x96xbf16>, vector<96x84xbf16>, vector<7x84xf32> -> vector<7x84xf32>
    %c0_126 = arith.constant 0 : index
    %c1_127 = arith.constant 1 : index
    %c0_128 = arith.constant 0 : index
    %c0_129 = arith.constant 0 : index
    %129 = vector.load %arg1[%c0_126, %c1_127, %c0_128, %c0_129] : memref<2x5x96x84xbf16, #tpu.memory_space<vmem>>, vector<1x1x96x84xbf16>
    %130 = vector.shape_cast %129 : vector<1x1x96x84xbf16> to vector<96x84xbf16>
    %cst_130 = arith.constant dense<0.000000e+00> : vector<7x84xf32>
    %131 = tpu.matmul %119, %130, %cst_130 {dimension_numbers = #tpu.dot_dimension_numbers<[1], [0], [0], [1], [0, 0, 1, 1], [], []>} : vector<7x96xbf16>, vector<96x84xbf16>, vector<7x84xf32> -> vector<7x84xf32>
    %132 = arith.addf %128, %131 : vector<7x84xf32>
    %c0_131 = arith.constant 0 : index
    %c2_132 = arith.constant 2 : index
    %c0_133 = arith.constant 0 : index
    %c0_134 = arith.constant 0 : index
    %133 = vector.load %arg1[%c0_131, %c2_132, %c0_133, %c0_134] : memref<2x5x96x84xbf16, #tpu.memory_space<vmem>>, vector<1x1x96x84xbf16>
    %134 = vector.shape_cast %133 : vector<1x1x96x84xbf16> to vector<96x84xbf16>
    %cst_135 = arith.constant dense<0.000000e+00> : vector<7x84xf32>
    %135 = tpu.matmul %121, %134, %cst_135 {dimension_numbers = #tpu.dot_dimension_numbers<[1], [0], [0], [1], [0, 0, 1, 1], [], []>} : vector<7x96xbf16>, vector<96x84xbf16>, vector<7x84xf32> -> vector<7x84xf32>
    %136 = arith.addf %132, %135 : vector<7x84xf32>
    %c0_136 = arith.constant 0 : index
    %c3_137 = arith.constant 3 : index
    %c0_138 = arith.constant 0 : index
    %c0_139 = arith.constant 0 : index
    %137 = vector.load %arg1[%c0_136, %c3_137, %c0_138, %c0_139] : memref<2x5x96x84xbf16, #tpu.memory_space<vmem>>, vector<1x1x96x84xbf16>
    %138 = vector.shape_cast %137 : vector<1x1x96x84xbf16> to vector<96x84xbf16>
    %cst_140 = arith.constant dense<0.000000e+00> : vector<7x84xf32>
    %139 = tpu.matmul %123, %138, %cst_140 {dimension_numbers = #tpu.dot_dimension_numbers<[1], [0], [0], [1], [0, 0, 1, 1], [], []>} : vector<7x96xbf16>, vector<96x84xbf16>, vector<7x84xf32> -> vector<7x84xf32>
    %140 = arith.addf %136, %139 : vector<7x84xf32>
    %c0_141 = arith.constant 0 : index
    %c4_142 = arith.constant 4 : index
    %c0_143 = arith.constant 0 : index
    %c0_144 = arith.constant 0 : index
    %141 = vector.load %arg1[%c0_141, %c4_142, %c0_143, %c0_144] : memref<2x5x96x84xbf16, #tpu.memory_space<vmem>>, vector<1x1x96x84xbf16>
    %142 = vector.shape_cast %141 : vector<1x1x96x84xbf16> to vector<96x84xbf16>
    %cst_145 = arith.constant dense<0.000000e+00> : vector<7x84xf32>
    %143 = tpu.matmul %125, %142, %cst_145 {dimension_numbers = #tpu.dot_dimension_numbers<[1], [0], [0], [1], [0, 0, 1, 1], [], []>} : vector<7x96xbf16>, vector<96x84xbf16>, vector<7x84xf32> -> vector<7x84xf32>
    %144 = arith.addf %140, %143 : vector<7x84xf32>
    %c1_146 = arith.constant 1 : index
    %c0_147 = arith.constant 0 : index
    %c0_148 = arith.constant 0 : index
    %c0_149 = arith.constant 0 : index
    %145 = vector.load %arg1[%c1_146, %c0_147, %c0_148, %c0_149] : memref<2x5x96x84xbf16, #tpu.memory_space<vmem>>, vector<1x1x96x84xbf16>
    %146 = vector.shape_cast %145 : vector<1x1x96x84xbf16> to vector<96x84xbf16>
    %cst_150 = arith.constant dense<0.000000e+00> : vector<7x84xf32>
    %147 = tpu.matmul %117, %146, %cst_150 {dimension_numbers = #tpu.dot_dimension_numbers<[1], [0], [0], [1], [0, 0, 1, 1], [], []>} : vector<7x96xbf16>, vector<96x84xbf16>, vector<7x84xf32> -> vector<7x84xf32>
    %c1_151 = arith.constant 1 : index
    %c1_152 = arith.constant 1 : index
    %c0_153 = arith.constant 0 : index
    %c0_154 = arith.constant 0 : index
    %148 = vector.load %arg1[%c1_151, %c1_152, %c0_153, %c0_154] : memref<2x5x96x84xbf16, #tpu.memory_space<vmem>>, vector<1x1x96x84xbf16>
    %149 = vector.shape_cast %148 : vector<1x1x96x84xbf16> to vector<96x84xbf16>
    %cst_155 = arith.constant dense<0.000000e+00> : vector<7x84xf32>
    %150 = tpu.matmul %119, %149, %cst_155 {dimension_numbers = #tpu.dot_dimension_numbers<[1], [0], [0], [1], [0, 0, 1, 1], [], []>} : vector<7x96xbf16>, vector<96x84xbf16>, vector<7x84xf32> -> vector<7x84xf32>
    %151 = arith.addf %147, %150 : vector<7x84xf32>
    %c1_156 = arith.constant 1 : index
    %c2_157 = arith.constant 2 : index
    %c0_158 = arith.constant 0 : index
    %c0_159 = arith.constant 0 : index
    %152 = vector.load %arg1[%c1_156, %c2_157, %c0_158, %c0_159] : memref<2x5x96x84xbf16, #tpu.memory_space<vmem>>, vector<1x1x96x84xbf16>
    %153 = vector.shape_cast %152 : vector<1x1x96x84xbf16> to vector<96x84xbf16>
    %cst_160 = arith.constant dense<0.000000e+00> : vector<7x84xf32>
    %154 = tpu.matmul %121, %153, %cst_160 {dimension_numbers = #tpu.dot_dimension_numbers<[1], [0], [0], [1], [0, 0, 1, 1], [], []>} : vector<7x96xbf16>, vector<96x84xbf16>, vector<7x84xf32> -> vector<7x84xf32>
    %155 = arith.addf %151, %154 : vector<7x84xf32>
    %c1_161 = arith.constant 1 : index
    %c3_162 = arith.constant 3 : index
    %c0_163 = arith.constant 0 : index
    %c0_164 = arith.constant 0 : index
    %156 = vector.load %arg1[%c1_161, %c3_162, %c0_163, %c0_164] : memref<2x5x96x84xbf16, #tpu.memory_space<vmem>>, vector<1x1x96x84xbf16>
    %157 = vector.shape_cast %156 : vector<1x1x96x84xbf16> to vector<96x84xbf16>
    %cst_165 = arith.constant dense<0.000000e+00> : vector<7x84xf32>
    %158 = tpu.matmul %123, %157, %cst_165 {dimension_numbers = #tpu.dot_dimension_numbers<[1], [0], [0], [1], [0, 0, 1, 1], [], []>} : vector<7x96xbf16>, vector<96x84xbf16>, vector<7x84xf32> -> vector<7x84xf32>
    %159 = arith.addf %155, %158 : vector<7x84xf32>
    %c1_166 = arith.constant 1 : index
    %c4_167 = arith.constant 4 : index
    %c0_168 = arith.constant 0 : index
    %c0_169 = arith.constant 0 : index
    %160 = vector.load %arg1[%c1_166, %c4_167, %c0_168, %c0_169] : memref<2x5x96x84xbf16, #tpu.memory_space<vmem>>, vector<1x1x96x84xbf16>
    %161 = vector.shape_cast %160 : vector<1x1x96x84xbf16> to vector<96x84xbf16>
    %cst_170 = arith.constant dense<0.000000e+00> : vector<7x84xf32>
    %162 = tpu.matmul %125, %161, %cst_170 {dimension_numbers = #tpu.dot_dimension_numbers<[1], [0], [0], [1], [0, 0, 1, 1], [], []>} : vector<7x96xbf16>, vector<96x84xbf16>, vector<7x84xf32> -> vector<7x84xf32>
    %163 = arith.addf %159, %162 : vector<7x84xf32>
    %164 = vector.extract_strided_slice %12 {offsets = [0, 0], sizes = [7, 96], strides = [1, 1]} : vector<8x96xf32> to vector<7x96xf32>
    %165 = arith.truncf %164 : vector<7x96xf32> to vector<7x96xbf16>
    %166 = vector.extract_strided_slice %6 {offsets = [1, 0], sizes = [7, 96], strides = [1, 1]} : vector<8x96xf32> to vector<7x96xf32>
    %167 = arith.truncf %166 : vector<7x96xf32> to vector<7x96xbf16>
    %168 = vector.extract_strided_slice %8 {offsets = [1, 0], sizes = [7, 96], strides = [1, 1]} : vector<8x96xf32> to vector<7x96xf32>
    %169 = arith.truncf %168 : vector<7x96xf32> to vector<7x96xbf16>
    %170 = vector.extract_strided_slice %10 {offsets = [1, 0], sizes = [7, 96], strides = [1, 1]} : vector<8x96xf32> to vector<7x96xf32>
    %171 = arith.truncf %170 : vector<7x96xf32> to vector<7x96xbf16>
    %172 = vector.extract_strided_slice %12 {offsets = [1, 0], sizes = [7, 96], strides = [1, 1]} : vector<8x96xf32> to vector<7x96xf32>
    %173 = arith.truncf %172 : vector<7x96xf32> to vector<7x96xbf16>
    %c0_171 = arith.constant 0 : index
    %c0_172 = arith.constant 0 : index
    %c0_173 = arith.constant 0 : index
    %c0_174 = arith.constant 0 : index
    %174 = vector.load %arg1[%c0_171, %c0_172, %c0_173, %c0_174] : memref<2x5x96x84xbf16, #tpu.memory_space<vmem>>, vector<1x1x96x84xbf16>
    %175 = vector.shape_cast %174 : vector<1x1x96x84xbf16> to vector<96x84xbf16>
    %cst_175 = arith.constant dense<0.000000e+00> : vector<7x84xf32>
    %176 = tpu.matmul %165, %175, %cst_175 {dimension_numbers = #tpu.dot_dimension_numbers<[1], [0], [0], [1], [0, 0, 1, 1], [], []>} : vector<7x96xbf16>, vector<96x84xbf16>, vector<7x84xf32> -> vector<7x84xf32>
    %c0_176 = arith.constant 0 : index
    %c1_177 = arith.constant 1 : index
    %c0_178 = arith.constant 0 : index
    %c0_179 = arith.constant 0 : index
    %177 = vector.load %arg1[%c0_176, %c1_177, %c0_178, %c0_179] : memref<2x5x96x84xbf16, #tpu.memory_space<vmem>>, vector<1x1x96x84xbf16>
    %178 = vector.shape_cast %177 : vector<1x1x96x84xbf16> to vector<96x84xbf16>
    %cst_180 = arith.constant dense<0.000000e+00> : vector<7x84xf32>
    %179 = tpu.matmul %167, %178, %cst_180 {dimension_numbers = #tpu.dot_dimension_numbers<[1], [0], [0], [1], [0, 0, 1, 1], [], []>} : vector<7x96xbf16>, vector<96x84xbf16>, vector<7x84xf32> -> vector<7x84xf32>
    %180 = arith.addf %176, %179 : vector<7x84xf32>
    %c0_181 = arith.constant 0 : index
    %c2_182 = arith.constant 2 : index
    %c0_183 = arith.constant 0 : index
    %c0_184 = arith.constant 0 : index
    %181 = vector.load %arg1[%c0_181, %c2_182, %c0_183, %c0_184] : memref<2x5x96x84xbf16, #tpu.memory_space<vmem>>, vector<1x1x96x84xbf16>
    %182 = vector.shape_cast %181 : vector<1x1x96x84xbf16> to vector<96x84xbf16>
    %cst_185 = arith.constant dense<0.000000e+00> : vector<7x84xf32>
    %183 = tpu.matmul %169, %182, %cst_185 {dimension_numbers = #tpu.dot_dimension_numbers<[1], [0], [0], [1], [0, 0, 1, 1], [], []>} : vector<7x96xbf16>, vector<96x84xbf16>, vector<7x84xf32> -> vector<7x84xf32>
    %184 = arith.addf %180, %183 : vector<7x84xf32>
    %c0_186 = arith.constant 0 : index
    %c3_187 = arith.constant 3 : index
    %c0_188 = arith.constant 0 : index
    %c0_189 = arith.constant 0 : index
    %185 = vector.load %arg1[%c0_186, %c3_187, %c0_188, %c0_189] : memref<2x5x96x84xbf16, #tpu.memory_space<vmem>>, vector<1x1x96x84xbf16>
    %186 = vector.shape_cast %185 : vector<1x1x96x84xbf16> to vector<96x84xbf16>
    %cst_190 = arith.constant dense<0.000000e+00> : vector<7x84xf32>
    %187 = tpu.matmul %171, %186, %cst_190 {dimension_numbers = #tpu.dot_dimension_numbers<[1], [0], [0], [1], [0, 0, 1, 1], [], []>} : vector<7x96xbf16>, vector<96x84xbf16>, vector<7x84xf32> -> vector<7x84xf32>
    %188 = arith.addf %184, %187 : vector<7x84xf32>
    %c0_191 = arith.constant 0 : index
    %c4_192 = arith.constant 4 : index
    %c0_193 = arith.constant 0 : index
    %c0_194 = arith.constant 0 : index
    %189 = vector.load %arg1[%c0_191, %c4_192, %c0_193, %c0_194] : memref<2x5x96x84xbf16, #tpu.memory_space<vmem>>, vector<1x1x96x84xbf16>
    %190 = vector.shape_cast %189 : vector<1x1x96x84xbf16> to vector<96x84xbf16>
    %cst_195 = arith.constant dense<0.000000e+00> : vector<7x84xf32>
    %191 = tpu.matmul %173, %190, %cst_195 {dimension_numbers = #tpu.dot_dimension_numbers<[1], [0], [0], [1], [0, 0, 1, 1], [], []>} : vector<7x96xbf16>, vector<96x84xbf16>, vector<7x84xf32> -> vector<7x84xf32>
    %192 = arith.addf %188, %191 : vector<7x84xf32>
    %c1_196 = arith.constant 1 : index
    %c0_197 = arith.constant 0 : index
    %c0_198 = arith.constant 0 : index
    %c0_199 = arith.constant 0 : index
    %193 = vector.load %arg1[%c1_196, %c0_197, %c0_198, %c0_199] : memref<2x5x96x84xbf16, #tpu.memory_space<vmem>>, vector<1x1x96x84xbf16>
    %194 = vector.shape_cast %193 : vector<1x1x96x84xbf16> to vector<96x84xbf16>
    %cst_200 = arith.constant dense<0.000000e+00> : vector<7x84xf32>
    %195 = tpu.matmul %165, %194, %cst_200 {dimension_numbers = #tpu.dot_dimension_numbers<[1], [0], [0], [1], [0, 0, 1, 1], [], []>} : vector<7x96xbf16>, vector<96x84xbf16>, vector<7x84xf32> -> vector<7x84xf32>
    %c1_201 = arith.constant 1 : index
    %c1_202 = arith.constant 1 : index
    %c0_203 = arith.constant 0 : index
    %c0_204 = arith.constant 0 : index
    %196 = vector.load %arg1[%c1_201, %c1_202, %c0_203, %c0_204] : memref<2x5x96x84xbf16, #tpu.memory_space<vmem>>, vector<1x1x96x84xbf16>
    %197 = vector.shape_cast %196 : vector<1x1x96x84xbf16> to vector<96x84xbf16>
    %cst_205 = arith.constant dense<0.000000e+00> : vector<7x84xf32>
    %198 = tpu.matmul %167, %197, %cst_205 {dimension_numbers = #tpu.dot_dimension_numbers<[1], [0], [0], [1], [0, 0, 1, 1], [], []>} : vector<7x96xbf16>, vector<96x84xbf16>, vector<7x84xf32> -> vector<7x84xf32>
    %199 = arith.addf %195, %198 : vector<7x84xf32>
    %c1_206 = arith.constant 1 : index
    %c2_207 = arith.constant 2 : index
    %c0_208 = arith.constant 0 : index
    %c0_209 = arith.constant 0 : index
    %200 = vector.load %arg1[%c1_206, %c2_207, %c0_208, %c0_209] : memref<2x5x96x84xbf16, #tpu.memory_space<vmem>>, vector<1x1x96x84xbf16>
    %201 = vector.shape_cast %200 : vector<1x1x96x84xbf16> to vector<96x84xbf16>
    %cst_210 = arith.constant dense<0.000000e+00> : vector<7x84xf32>
    %202 = tpu.matmul %169, %201, %cst_210 {dimension_numbers = #tpu.dot_dimension_numbers<[1], [0], [0], [1], [0, 0, 1, 1], [], []>} : vector<7x96xbf16>, vector<96x84xbf16>, vector<7x84xf32> -> vector<7x84xf32>
    %203 = arith.addf %199, %202 : vector<7x84xf32>
    %c1_211 = arith.constant 1 : index
    %c3_212 = arith.constant 3 : index
    %c0_213 = arith.constant 0 : index
    %c0_214 = arith.constant 0 : index
    %204 = vector.load %arg1[%c1_211, %c3_212, %c0_213, %c0_214] : memref<2x5x96x84xbf16, #tpu.memory_space<vmem>>, vector<1x1x96x84xbf16>
    %205 = vector.shape_cast %204 : vector<1x1x96x84xbf16> to vector<96x84xbf16>
    %cst_215 = arith.constant dense<0.000000e+00> : vector<7x84xf32>
    %206 = tpu.matmul %171, %205, %cst_215 {dimension_numbers = #tpu.dot_dimension_numbers<[1], [0], [0], [1], [0, 0, 1, 1], [], []>} : vector<7x96xbf16>, vector<96x84xbf16>, vector<7x84xf32> -> vector<7x84xf32>
    %207 = arith.addf %203, %206 : vector<7x84xf32>
    %c1_216 = arith.constant 1 : index
    %c4_217 = arith.constant 4 : index
    %c0_218 = arith.constant 0 : index
    %c0_219 = arith.constant 0 : index
    %208 = vector.load %arg1[%c1_216, %c4_217, %c0_218, %c0_219] : memref<2x5x96x84xbf16, #tpu.memory_space<vmem>>, vector<1x1x96x84xbf16>
    %209 = vector.shape_cast %208 : vector<1x1x96x84xbf16> to vector<96x84xbf16>
    %cst_220 = arith.constant dense<0.000000e+00> : vector<7x84xf32>
    %210 = tpu.matmul %173, %209, %cst_220 {dimension_numbers = #tpu.dot_dimension_numbers<[1], [0], [0], [1], [0, 0, 1, 1], [], []>} : vector<7x96xbf16>, vector<96x84xbf16>, vector<7x84xf32> -> vector<7x84xf32>
    %211 = arith.addf %207, %210 : vector<7x84xf32>
    %212 = arith.maximumf %144, %163 : vector<7x84xf32>
    %213 = arith.maximumf %192, %211 : vector<7x84xf32>
    %214 = arith.maximumf %212, %213 : vector<7x84xf32>
    %215 = vector.broadcast %0 : vector<1x84xf32> to vector<7x84xf32>
    %216 = arith.addf %214, %215 : vector<7x84xf32>
    %cst_221 = arith.constant 0.000000e+00 : f32
    %217 = vector.broadcast %cst_221 : f32 to vector<7x84xf32>
    %218 = arith.maximumf %216, %217 : vector<7x84xf32>
    %219 = vector.extract_strided_slice %115 {offsets = [0, 0], sizes = [5, 84], strides = [1, 1]} : vector<7x84xf32> to vector<5x84xf32>
    %220 = arith.truncf %219 : vector<5x84xf32> to vector<5x84xbf16>
    %221 = vector.extract_strided_slice %218 {offsets = [0, 0], sizes = [5, 84], strides = [1, 1]} : vector<7x84xf32> to vector<5x84xf32>
    %222 = arith.truncf %221 : vector<5x84xf32> to vector<5x84xbf16>
    %223 = vector.extract_strided_slice %115 {offsets = [1, 0], sizes = [5, 84], strides = [1, 1]} : vector<7x84xf32> to vector<5x84xf32>
    %224 = arith.truncf %223 : vector<5x84xf32> to vector<5x84xbf16>
    %225 = vector.extract_strided_slice %218 {offsets = [1, 0], sizes = [5, 84], strides = [1, 1]} : vector<7x84xf32> to vector<5x84xf32>
    %226 = arith.truncf %225 : vector<5x84xf32> to vector<5x84xbf16>
    %227 = vector.extract_strided_slice %115 {offsets = [2, 0], sizes = [5, 84], strides = [1, 1]} : vector<7x84xf32> to vector<5x84xf32>
    %228 = arith.truncf %227 : vector<5x84xf32> to vector<5x84xbf16>
    %c0_222 = arith.constant 0 : index
    %c0_223 = arith.constant 0 : index
    %c0_224 = arith.constant 0 : index
    %c0_225 = arith.constant 0 : index
    %229 = vector.load %arg3[%c0_222, %c0_223, %c0_224, %c0_225] : memref<2x5x84x80xbf16, #tpu.memory_space<vmem>>, vector<1x1x84x80xbf16>
    %230 = vector.shape_cast %229 : vector<1x1x84x80xbf16> to vector<84x80xbf16>
    %cst_226 = arith.constant dense<0.000000e+00> : vector<5x80xf32>
    %231 = tpu.matmul %220, %230, %cst_226 {dimension_numbers = #tpu.dot_dimension_numbers<[1], [0], [0], [1], [0, 0, 1, 1], [], []>} : vector<5x84xbf16>, vector<84x80xbf16>, vector<5x80xf32> -> vector<5x80xf32>
    %c0_227 = arith.constant 0 : index
    %c1_228 = arith.constant 1 : index
    %c0_229 = arith.constant 0 : index
    %c0_230 = arith.constant 0 : index
    %232 = vector.load %arg3[%c0_227, %c1_228, %c0_229, %c0_230] : memref<2x5x84x80xbf16, #tpu.memory_space<vmem>>, vector<1x1x84x80xbf16>
    %233 = vector.shape_cast %232 : vector<1x1x84x80xbf16> to vector<84x80xbf16>
    %cst_231 = arith.constant dense<0.000000e+00> : vector<5x80xf32>
    %234 = tpu.matmul %222, %233, %cst_231 {dimension_numbers = #tpu.dot_dimension_numbers<[1], [0], [0], [1], [0, 0, 1, 1], [], []>} : vector<5x84xbf16>, vector<84x80xbf16>, vector<5x80xf32> -> vector<5x80xf32>
    %235 = arith.addf %231, %234 : vector<5x80xf32>
    %c0_232 = arith.constant 0 : index
    %c2_233 = arith.constant 2 : index
    %c0_234 = arith.constant 0 : index
    %c0_235 = arith.constant 0 : index
    %236 = vector.load %arg3[%c0_232, %c2_233, %c0_234, %c0_235] : memref<2x5x84x80xbf16, #tpu.memory_space<vmem>>, vector<1x1x84x80xbf16>
    %237 = vector.shape_cast %236 : vector<1x1x84x80xbf16> to vector<84x80xbf16>
    %cst_236 = arith.constant dense<0.000000e+00> : vector<5x80xf32>
    %238 = tpu.matmul %224, %237, %cst_236 {dimension_numbers = #tpu.dot_dimension_numbers<[1], [0], [0], [1], [0, 0, 1, 1], [], []>} : vector<5x84xbf16>, vector<84x80xbf16>, vector<5x80xf32> -> vector<5x80xf32>
    %239 = arith.addf %235, %238 : vector<5x80xf32>
    %c0_237 = arith.constant 0 : index
    %c3_238 = arith.constant 3 : index
    %c0_239 = arith.constant 0 : index
    %c0_240 = arith.constant 0 : index
    %240 = vector.load %arg3[%c0_237, %c3_238, %c0_239, %c0_240] : memref<2x5x84x80xbf16, #tpu.memory_space<vmem>>, vector<1x1x84x80xbf16>
    %241 = vector.shape_cast %240 : vector<1x1x84x80xbf16> to vector<84x80xbf16>
    %cst_241 = arith.constant dense<0.000000e+00> : vector<5x80xf32>
    %242 = tpu.matmul %226, %241, %cst_241 {dimension_numbers = #tpu.dot_dimension_numbers<[1], [0], [0], [1], [0, 0, 1, 1], [], []>} : vector<5x84xbf16>, vector<84x80xbf16>, vector<5x80xf32> -> vector<5x80xf32>
    %243 = arith.addf %239, %242 : vector<5x80xf32>
    %c0_242 = arith.constant 0 : index
    %c4_243 = arith.constant 4 : index
    %c0_244 = arith.constant 0 : index
    %c0_245 = arith.constant 0 : index
    %244 = vector.load %arg3[%c0_242, %c4_243, %c0_244, %c0_245] : memref<2x5x84x80xbf16, #tpu.memory_space<vmem>>, vector<1x1x84x80xbf16>
    %245 = vector.shape_cast %244 : vector<1x1x84x80xbf16> to vector<84x80xbf16>
    %cst_246 = arith.constant dense<0.000000e+00> : vector<5x80xf32>
    %246 = tpu.matmul %228, %245, %cst_246 {dimension_numbers = #tpu.dot_dimension_numbers<[1], [0], [0], [1], [0, 0, 1, 1], [], []>} : vector<5x84xbf16>, vector<84x80xbf16>, vector<5x80xf32> -> vector<5x80xf32>
    %247 = arith.addf %243, %246 : vector<5x80xf32>
    %c1_247 = arith.constant 1 : index
    %c0_248 = arith.constant 0 : index
    %c0_249 = arith.constant 0 : index
    %c0_250 = arith.constant 0 : index
    %248 = vector.load %arg3[%c1_247, %c0_248, %c0_249, %c0_250] : memref<2x5x84x80xbf16, #tpu.memory_space<vmem>>, vector<1x1x84x80xbf16>
    %249 = vector.shape_cast %248 : vector<1x1x84x80xbf16> to vector<84x80xbf16>
    %cst_251 = arith.constant dense<0.000000e+00> : vector<5x80xf32>
    %250 = tpu.matmul %220, %249, %cst_251 {dimension_numbers = #tpu.dot_dimension_numbers<[1], [0], [0], [1], [0, 0, 1, 1], [], []>} : vector<5x84xbf16>, vector<84x80xbf16>, vector<5x80xf32> -> vector<5x80xf32>
    %c1_252 = arith.constant 1 : index
    %c1_253 = arith.constant 1 : index
    %c0_254 = arith.constant 0 : index
    %c0_255 = arith.constant 0 : index
    %251 = vector.load %arg3[%c1_252, %c1_253, %c0_254, %c0_255] : memref<2x5x84x80xbf16, #tpu.memory_space<vmem>>, vector<1x1x84x80xbf16>
    %252 = vector.shape_cast %251 : vector<1x1x84x80xbf16> to vector<84x80xbf16>
    %cst_256 = arith.constant dense<0.000000e+00> : vector<5x80xf32>
    %253 = tpu.matmul %222, %252, %cst_256 {dimension_numbers = #tpu.dot_dimension_numbers<[1], [0], [0], [1], [0, 0, 1, 1], [], []>} : vector<5x84xbf16>, vector<84x80xbf16>, vector<5x80xf32> -> vector<5x80xf32>
    %254 = arith.addf %250, %253 : vector<5x80xf32>
    %c1_257 = arith.constant 1 : index
    %c2_258 = arith.constant 2 : index
    %c0_259 = arith.constant 0 : index
    %c0_260 = arith.constant 0 : index
    %255 = vector.load %arg3[%c1_257, %c2_258, %c0_259, %c0_260] : memref<2x5x84x80xbf16, #tpu.memory_space<vmem>>, vector<1x1x84x80xbf16>
    %256 = vector.shape_cast %255 : vector<1x1x84x80xbf16> to vector<84x80xbf16>
    %cst_261 = arith.constant dense<0.000000e+00> : vector<5x80xf32>
    %257 = tpu.matmul %224, %256, %cst_261 {dimension_numbers = #tpu.dot_dimension_numbers<[1], [0], [0], [1], [0, 0, 1, 1], [], []>} : vector<5x84xbf16>, vector<84x80xbf16>, vector<5x80xf32> -> vector<5x80xf32>
    %258 = arith.addf %254, %257 : vector<5x80xf32>
    %c1_262 = arith.constant 1 : index
    %c3_263 = arith.constant 3 : index
    %c0_264 = arith.constant 0 : index
    %c0_265 = arith.constant 0 : index
    %259 = vector.load %arg3[%c1_262, %c3_263, %c0_264, %c0_265] : memref<2x5x84x80xbf16, #tpu.memory_space<vmem>>, vector<1x1x84x80xbf16>
    %260 = vector.shape_cast %259 : vector<1x1x84x80xbf16> to vector<84x80xbf16>
    %cst_266 = arith.constant dense<0.000000e+00> : vector<5x80xf32>
    %261 = tpu.matmul %226, %260, %cst_266 {dimension_numbers = #tpu.dot_dimension_numbers<[1], [0], [0], [1], [0, 0, 1, 1], [], []>} : vector<5x84xbf16>, vector<84x80xbf16>, vector<5x80xf32> -> vector<5x80xf32>
    %262 = arith.addf %258, %261 : vector<5x80xf32>
    %c1_267 = arith.constant 1 : index
    %c4_268 = arith.constant 4 : index
    %c0_269 = arith.constant 0 : index
    %c0_270 = arith.constant 0 : index
    %263 = vector.load %arg3[%c1_267, %c4_268, %c0_269, %c0_270] : memref<2x5x84x80xbf16, #tpu.memory_space<vmem>>, vector<1x1x84x80xbf16>
    %264 = vector.shape_cast %263 : vector<1x1x84x80xbf16> to vector<84x80xbf16>
    %cst_271 = arith.constant dense<0.000000e+00> : vector<5x80xf32>
    %265 = tpu.matmul %228, %264, %cst_271 {dimension_numbers = #tpu.dot_dimension_numbers<[1], [0], [0], [1], [0, 0, 1, 1], [], []>} : vector<5x84xbf16>, vector<84x80xbf16>, vector<5x80xf32> -> vector<5x80xf32>
    %266 = arith.addf %262, %265 : vector<5x80xf32>
    %267 = vector.extract_strided_slice %218 {offsets = [0, 0], sizes = [5, 84], strides = [1, 1]} : vector<7x84xf32> to vector<5x84xf32>
    %268 = arith.truncf %267 : vector<5x84xf32> to vector<5x84xbf16>
    %269 = vector.extract_strided_slice %115 {offsets = [1, 0], sizes = [5, 84], strides = [1, 1]} : vector<7x84xf32> to vector<5x84xf32>
    %270 = arith.truncf %269 : vector<5x84xf32> to vector<5x84xbf16>
    %271 = vector.extract_strided_slice %218 {offsets = [1, 0], sizes = [5, 84], strides = [1, 1]} : vector<7x84xf32> to vector<5x84xf32>
    %272 = arith.truncf %271 : vector<5x84xf32> to vector<5x84xbf16>
    %273 = vector.extract_strided_slice %115 {offsets = [2, 0], sizes = [5, 84], strides = [1, 1]} : vector<7x84xf32> to vector<5x84xf32>
    %274 = arith.truncf %273 : vector<5x84xf32> to vector<5x84xbf16>
    %275 = vector.extract_strided_slice %218 {offsets = [2, 0], sizes = [5, 84], strides = [1, 1]} : vector<7x84xf32> to vector<5x84xf32>
    %276 = arith.truncf %275 : vector<5x84xf32> to vector<5x84xbf16>
    %c0_272 = arith.constant 0 : index
    %c0_273 = arith.constant 0 : index
    %c0_274 = arith.constant 0 : index
    %c0_275 = arith.constant 0 : index
    %277 = vector.load %arg3[%c0_272, %c0_273, %c0_274, %c0_275] : memref<2x5x84x80xbf16, #tpu.memory_space<vmem>>, vector<1x1x84x80xbf16>
    %278 = vector.shape_cast %277 : vector<1x1x84x80xbf16> to vector<84x80xbf16>
    %cst_276 = arith.constant dense<0.000000e+00> : vector<5x80xf32>
    %279 = tpu.matmul %268, %278, %cst_276 {dimension_numbers = #tpu.dot_dimension_numbers<[1], [0], [0], [1], [0, 0, 1, 1], [], []>} : vector<5x84xbf16>, vector<84x80xbf16>, vector<5x80xf32> -> vector<5x80xf32>
    %c0_277 = arith.constant 0 : index
    %c1_278 = arith.constant 1 : index
    %c0_279 = arith.constant 0 : index
    %c0_280 = arith.constant 0 : index
    %280 = vector.load %arg3[%c0_277, %c1_278, %c0_279, %c0_280] : memref<2x5x84x80xbf16, #tpu.memory_space<vmem>>, vector<1x1x84x80xbf16>
    %281 = vector.shape_cast %280 : vector<1x1x84x80xbf16> to vector<84x80xbf16>
    %cst_281 = arith.constant dense<0.000000e+00> : vector<5x80xf32>
    %282 = tpu.matmul %270, %281, %cst_281 {dimension_numbers = #tpu.dot_dimension_numbers<[1], [0], [0], [1], [0, 0, 1, 1], [], []>} : vector<5x84xbf16>, vector<84x80xbf16>, vector<5x80xf32> -> vector<5x80xf32>
    %283 = arith.addf %279, %282 : vector<5x80xf32>
    %c0_282 = arith.constant 0 : index
    %c2_283 = arith.constant 2 : index
    %c0_284 = arith.constant 0 : index
    %c0_285 = arith.constant 0 : index
    %284 = vector.load %arg3[%c0_282, %c2_283, %c0_284, %c0_285] : memref<2x5x84x80xbf16, #tpu.memory_space<vmem>>, vector<1x1x84x80xbf16>
    %285 = vector.shape_cast %284 : vector<1x1x84x80xbf16> to vector<84x80xbf16>
    %cst_286 = arith.constant dense<0.000000e+00> : vector<5x80xf32>
    %286 = tpu.matmul %272, %285, %cst_286 {dimension_numbers = #tpu.dot_dimension_numbers<[1], [0], [0], [1], [0, 0, 1, 1], [], []>} : vector<5x84xbf16>, vector<84x80xbf16>, vector<5x80xf32> -> vector<5x80xf32>
    %287 = arith.addf %283, %286 : vector<5x80xf32>
    %c0_287 = arith.constant 0 : index
    %c3_288 = arith.constant 3 : index
    %c0_289 = arith.constant 0 : index
    %c0_290 = arith.constant 0 : index
    %288 = vector.load %arg3[%c0_287, %c3_288, %c0_289, %c0_290] : memref<2x5x84x80xbf16, #tpu.memory_space<vmem>>, vector<1x1x84x80xbf16>
    %289 = vector.shape_cast %288 : vector<1x1x84x80xbf16> to vector<84x80xbf16>
    %cst_291 = arith.constant dense<0.000000e+00> : vector<5x80xf32>
    %290 = tpu.matmul %274, %289, %cst_291 {dimension_numbers = #tpu.dot_dimension_numbers<[1], [0], [0], [1], [0, 0, 1, 1], [], []>} : vector<5x84xbf16>, vector<84x80xbf16>, vector<5x80xf32> -> vector<5x80xf32>
    %291 = arith.addf %287, %290 : vector<5x80xf32>
    %c0_292 = arith.constant 0 : index
    %c4_293 = arith.constant 4 : index
    %c0_294 = arith.constant 0 : index
    %c0_295 = arith.constant 0 : index
    %292 = vector.load %arg3[%c0_292, %c4_293, %c0_294, %c0_295] : memref<2x5x84x80xbf16, #tpu.memory_space<vmem>>, vector<1x1x84x80xbf16>
    %293 = vector.shape_cast %292 : vector<1x1x84x80xbf16> to vector<84x80xbf16>
    %cst_296 = arith.constant dense<0.000000e+00> : vector<5x80xf32>
    %294 = tpu.matmul %276, %293, %cst_296 {dimension_numbers = #tpu.dot_dimension_numbers<[1], [0], [0], [1], [0, 0, 1, 1], [], []>} : vector<5x84xbf16>, vector<84x80xbf16>, vector<5x80xf32> -> vector<5x80xf32>
    %295 = arith.addf %291, %294 : vector<5x80xf32>
    %c1_297 = arith.constant 1 : index
    %c0_298 = arith.constant 0 : index
    %c0_299 = arith.constant 0 : index
    %c0_300 = arith.constant 0 : index
    %296 = vector.load %arg3[%c1_297, %c0_298, %c0_299, %c0_300] : memref<2x5x84x80xbf16, #tpu.memory_space<vmem>>, vector<1x1x84x80xbf16>
    %297 = vector.shape_cast %296 : vector<1x1x84x80xbf16> to vector<84x80xbf16>
    %cst_301 = arith.constant dense<0.000000e+00> : vector<5x80xf32>
    %298 = tpu.matmul %268, %297, %cst_301 {dimension_numbers = #tpu.dot_dimension_numbers<[1], [0], [0], [1], [0, 0, 1, 1], [], []>} : vector<5x84xbf16>, vector<84x80xbf16>, vector<5x80xf32> -> vector<5x80xf32>
    %c1_302 = arith.constant 1 : index
    %c1_303 = arith.constant 1 : index
    %c0_304 = arith.constant 0 : index
    %c0_305 = arith.constant 0 : index
    %299 = vector.load %arg3[%c1_302, %c1_303, %c0_304, %c0_305] : memref<2x5x84x80xbf16, #tpu.memory_space<vmem>>, vector<1x1x84x80xbf16>
    %300 = vector.shape_cast %299 : vector<1x1x84x80xbf16> to vector<84x80xbf16>
    %cst_306 = arith.constant dense<0.000000e+00> : vector<5x80xf32>
    %301 = tpu.matmul %270, %300, %cst_306 {dimension_numbers = #tpu.dot_dimension_numbers<[1], [0], [0], [1], [0, 0, 1, 1], [], []>} : vector<5x84xbf16>, vector<84x80xbf16>, vector<5x80xf32> -> vector<5x80xf32>
    %302 = arith.addf %298, %301 : vector<5x80xf32>
    %c1_307 = arith.constant 1 : index
    %c2_308 = arith.constant 2 : index
    %c0_309 = arith.constant 0 : index
    %c0_310 = arith.constant 0 : index
    %303 = vector.load %arg3[%c1_307, %c2_308, %c0_309, %c0_310] : memref<2x5x84x80xbf16, #tpu.memory_space<vmem>>, vector<1x1x84x80xbf16>
    %304 = vector.shape_cast %303 : vector<1x1x84x80xbf16> to vector<84x80xbf16>
    %cst_311 = arith.constant dense<0.000000e+00> : vector<5x80xf32>
    %305 = tpu.matmul %272, %304, %cst_311 {dimension_numbers = #tpu.dot_dimension_numbers<[1], [0], [0], [1], [0, 0, 1, 1], [], []>} : vector<5x84xbf16>, vector<84x80xbf16>, vector<5x80xf32> -> vector<5x80xf32>
    %306 = arith.addf %302, %305 : vector<5x80xf32>
    %c1_312 = arith.constant 1 : index
    %c3_313 = arith.constant 3 : index
    %c0_314 = arith.constant 0 : index
    %c0_315 = arith.constant 0 : index
    %307 = vector.load %arg3[%c1_312, %c3_313, %c0_314, %c0_315] : memref<2x5x84x80xbf16, #tpu.memory_space<vmem>>, vector<1x1x84x80xbf16>
    %308 = vector.shape_cast %307 : vector<1x1x84x80xbf16> to vector<84x80xbf16>
    %cst_316 = arith.constant dense<0.000000e+00> : vector<5x80xf32>
    %309 = tpu.matmul %274, %308, %cst_316 {dimension_numbers = #tpu.dot_dimension_numbers<[1], [0], [0], [1], [0, 0, 1, 1], [], []>} : vector<5x84xbf16>, vector<84x80xbf16>, vector<5x80xf32> -> vector<5x80xf32>
    %310 = arith.addf %306, %309 : vector<5x80xf32>
    %c1_317 = arith.constant 1 : index
    %c4_318 = arith.constant 4 : index
    %c0_319 = arith.constant 0 : index
    %c0_320 = arith.constant 0 : index
    %311 = vector.load %arg3[%c1_317, %c4_318, %c0_319, %c0_320] : memref<2x5x84x80xbf16, #tpu.memory_space<vmem>>, vector<1x1x84x80xbf16>
    %312 = vector.shape_cast %311 : vector<1x1x84x80xbf16> to vector<84x80xbf16>
    %cst_321 = arith.constant dense<0.000000e+00> : vector<5x80xf32>
    %313 = tpu.matmul %276, %312, %cst_321 {dimension_numbers = #tpu.dot_dimension_numbers<[1], [0], [0], [1], [0, 0, 1, 1], [], []>} : vector<5x84xbf16>, vector<84x80xbf16>, vector<5x80xf32> -> vector<5x80xf32>
    %314 = arith.addf %310, %313 : vector<5x80xf32>
    %315 = arith.maximumf %247, %266 : vector<5x80xf32>
    %316 = arith.maximumf %295, %314 : vector<5x80xf32>
    %317 = arith.maximumf %315, %316 : vector<5x80xf32>
    %318 = vector.broadcast %1 : vector<1x80xf32> to vector<5x80xf32>
    %319 = arith.addf %317, %318 : vector<5x80xf32>
    %cst_322 = arith.constant 0.000000e+00 : f32
    %320 = vector.broadcast %cst_322 : f32 to vector<5x80xf32>
    %321 = arith.maximumf %319, %320 : vector<5x80xf32>
    %322 = vector.extract_strided_slice %321 {offsets = [0, 0], sizes = [1, 80], strides = [1, 1]} : vector<5x80xf32> to vector<1x80xf32>
    %323 = arith.truncf %322 : vector<1x80xf32> to vector<1x80xbf16>
    %c0_323 = arith.constant 0 : index
    %c0_324 = arith.constant 0 : index
    %c0_325 = arith.constant 0 : index
    %324 = vector.load %arg5[%c0_323, %c0_324, %c0_325] : memref<5x80x120xbf16, #tpu.memory_space<vmem>>, vector<1x80x120xbf16>
    %325 = vector.shape_cast %324 : vector<1x80x120xbf16> to vector<80x120xbf16>
    %cst_326 = arith.constant dense<0.000000e+00> : vector<1x120xf32>
    %326 = tpu.matmul %323, %325, %cst_326 {dimension_numbers = #tpu.dot_dimension_numbers<[1], [0], [0], [1], [0, 0, 1, 1], [], []>} : vector<1x80xbf16>, vector<80x120xbf16>, vector<1x120xf32> -> vector<1x120xf32>
    %327 = vector.extract_strided_slice %321 {offsets = [1, 0], sizes = [1, 80], strides = [1, 1]} : vector<5x80xf32> to vector<1x80xf32>
    %328 = arith.truncf %327 : vector<1x80xf32> to vector<1x80xbf16>
    %c1_327 = arith.constant 1 : index
    %c0_328 = arith.constant 0 : index
    %c0_329 = arith.constant 0 : index
    %329 = vector.load %arg5[%c1_327, %c0_328, %c0_329] : memref<5x80x120xbf16, #tpu.memory_space<vmem>>, vector<1x80x120xbf16>
    %330 = vector.shape_cast %329 : vector<1x80x120xbf16> to vector<80x120xbf16>
    %cst_330 = arith.constant dense<0.000000e+00> : vector<1x120xf32>
    %331 = tpu.matmul %328, %330, %cst_330 {dimension_numbers = #tpu.dot_dimension_numbers<[1], [0], [0], [1], [0, 0, 1, 1], [], []>} : vector<1x80xbf16>, vector<80x120xbf16>, vector<1x120xf32> -> vector<1x120xf32>
    %332 = arith.addf %326, %331 : vector<1x120xf32>
    %333 = vector.extract_strided_slice %321 {offsets = [2, 0], sizes = [1, 80], strides = [1, 1]} : vector<5x80xf32> to vector<1x80xf32>
    %334 = arith.truncf %333 : vector<1x80xf32> to vector<1x80xbf16>
    %c2_331 = arith.constant 2 : index
    %c0_332 = arith.constant 0 : index
    %c0_333 = arith.constant 0 : index
    %335 = vector.load %arg5[%c2_331, %c0_332, %c0_333] : memref<5x80x120xbf16, #tpu.memory_space<vmem>>, vector<1x80x120xbf16>
    %336 = vector.shape_cast %335 : vector<1x80x120xbf16> to vector<80x120xbf16>
    %cst_334 = arith.constant dense<0.000000e+00> : vector<1x120xf32>
    %337 = tpu.matmul %334, %336, %cst_334 {dimension_numbers = #tpu.dot_dimension_numbers<[1], [0], [0], [1], [0, 0, 1, 1], [], []>} : vector<1x80xbf16>, vector<80x120xbf16>, vector<1x120xf32> -> vector<1x120xf32>
    %338 = arith.addf %332, %337 : vector<1x120xf32>
    %339 = vector.extract_strided_slice %321 {offsets = [3, 0], sizes = [1, 80], strides = [1, 1]} : vector<5x80xf32> to vector<1x80xf32>
    %340 = arith.truncf %339 : vector<1x80xf32> to vector<1x80xbf16>
    %c3_335 = arith.constant 3 : index
    %c0_336 = arith.constant 0 : index
    %c0_337 = arith.constant 0 : index
    %341 = vector.load %arg5[%c3_335, %c0_336, %c0_337] : memref<5x80x120xbf16, #tpu.memory_space<vmem>>, vector<1x80x120xbf16>
    %342 = vector.shape_cast %341 : vector<1x80x120xbf16> to vector<80x120xbf16>
    %cst_338 = arith.constant dense<0.000000e+00> : vector<1x120xf32>
    %343 = tpu.matmul %340, %342, %cst_338 {dimension_numbers = #tpu.dot_dimension_numbers<[1], [0], [0], [1], [0, 0, 1, 1], [], []>} : vector<1x80xbf16>, vector<80x120xbf16>, vector<1x120xf32> -> vector<1x120xf32>
    %344 = arith.addf %338, %343 : vector<1x120xf32>
    %345 = vector.extract_strided_slice %321 {offsets = [4, 0], sizes = [1, 80], strides = [1, 1]} : vector<5x80xf32> to vector<1x80xf32>
    %346 = arith.truncf %345 : vector<1x80xf32> to vector<1x80xbf16>
    %c4_339 = arith.constant 4 : index
    %c0_340 = arith.constant 0 : index
    %c0_341 = arith.constant 0 : index
    %347 = vector.load %arg5[%c4_339, %c0_340, %c0_341] : memref<5x80x120xbf16, #tpu.memory_space<vmem>>, vector<1x80x120xbf16>
    %348 = vector.shape_cast %347 : vector<1x80x120xbf16> to vector<80x120xbf16>
    %cst_342 = arith.constant dense<0.000000e+00> : vector<1x120xf32>
    %349 = tpu.matmul %346, %348, %cst_342 {dimension_numbers = #tpu.dot_dimension_numbers<[1], [0], [0], [1], [0, 0, 1, 1], [], []>} : vector<1x80xbf16>, vector<80x120xbf16>, vector<1x120xf32> -> vector<1x120xf32>
    %350 = arith.addf %344, %349 : vector<1x120xf32>
    %351 = arith.addf %350, %2 : vector<1x120xf32>
    %cst_343 = arith.constant 0.000000e+00 : f32
    %352 = vector.broadcast %cst_343 : f32 to vector<1x120xf32>
    %353 = arith.maximumf %351, %352 : vector<1x120xf32>
    %354 = arith.truncf %353 : vector<1x120xf32> to vector<1x120xbf16>
    %c0_344 = arith.constant 0 : index
    %c0_345 = arith.constant 0 : index
    %355 = vector.load %arg7[%c0_344, %c0_345] : memref<120x84xbf16, #tpu.memory_space<vmem>>, vector<120x84xbf16>
    %cst_346 = arith.constant dense<0.000000e+00> : vector<1x84xf32>
    %356 = tpu.matmul %354, %355, %cst_346 {dimension_numbers = #tpu.dot_dimension_numbers<[1], [0], [0], [1], [0, 0, 1, 1], [], []>} : vector<1x120xbf16>, vector<120x84xbf16>, vector<1x84xf32> -> vector<1x84xf32>
    %357 = arith.addf %356, %3 : vector<1x84xf32>
    %cst_347 = arith.constant 0.000000e+00 : f32
    %358 = vector.broadcast %cst_347 : f32 to vector<1x84xf32>
    %359 = arith.maximumf %357, %358 : vector<1x84xf32>
    %360 = arith.truncf %359 : vector<1x84xf32> to vector<1x84xbf16>
    %c0_348 = arith.constant 0 : index
    %c0_349 = arith.constant 0 : index
    %361 = vector.load %arg9[%c0_348, %c0_349] : memref<84x10xbf16, #tpu.memory_space<vmem>>, vector<84x10xbf16>
    %cst_350 = arith.constant dense<0.000000e+00> : vector<1x10xf32>
    %362 = tpu.matmul %360, %361, %cst_350 {dimension_numbers = #tpu.dot_dimension_numbers<[1], [0], [0], [1], [0, 0, 1, 1], [], []>} : vector<1x84xbf16>, vector<84x10xbf16>, vector<1x10xf32> -> vector<1x10xf32>
    %363 = arith.addf %362, %4 : vector<1x10xf32>
    %c0_351 = arith.constant 0 : index
    %c0_352 = arith.constant 0 : index
    %364 = vector.load %arg11[%c0_351, %c0_352] : memref<2x10xf32, #tpu.memory_space<vmem>>, vector<1x10xf32>
    tpu.vector_store %arg11[%c0_351, %c0_352], %363 {strides = array<i32>} : memref<2x10xf32, #tpu.memory_space<vmem>>, vector<1x10xf32>,
    %c0_353 = arith.constant 0 : index
    %c1_354 = arith.constant 1 : index
    %c0_355 = arith.constant 0 : index
    %c0_356 = arith.constant 0 : index
    %365 = vector.load %arg0[%c0_353, %c1_354, %c0_355, %c0_356] : memref<4x2x8x96xf32, #tpu.memory_space<vmem>>, vector<1x1x8x96xf32>
    %366 = vector.shape_cast %365 : vector<1x1x8x96xf32> to vector<8x96xf32>
    %c1_357 = arith.constant 1 : index
    %c1_358 = arith.constant 1 : index
    %c0_359 = arith.constant 0 : index
    %c0_360 = arith.constant 0 : index
    %367 = vector.load %arg0[%c1_357, %c1_358, %c0_359, %c0_360] : memref<4x2x8x96xf32, #tpu.memory_space<vmem>>, vector<1x1x8x96xf32>
    %368 = vector.shape_cast %367 : vector<1x1x8x96xf32> to vector<8x96xf32>
    %c2_361 = arith.constant 2 : index
    %c1_362 = arith.constant 1 : index
    %c0_363 = arith.constant 0 : index
    %c0_364 = arith.constant 0 : index
    %369 = vector.load %arg0[%c2_361, %c1_362, %c0_363, %c0_364] : memref<4x2x8x96xf32, #tpu.memory_space<vmem>>, vector<1x1x8x96xf32>
    %370 = vector.shape_cast %369 : vector<1x1x8x96xf32> to vector<8x96xf32>
    %c3_365 = arith.constant 3 : index
    %c1_366 = arith.constant 1 : index
    %c0_367 = arith.constant 0 : index
    %c0_368 = arith.constant 0 : index
    %371 = vector.load %arg0[%c3_365, %c1_366, %c0_367, %c0_368] : memref<4x2x8x96xf32, #tpu.memory_space<vmem>>, vector<1x1x8x96xf32>
    %372 = vector.shape_cast %371 : vector<1x1x8x96xf32> to vector<8x96xf32>
    %373 = vector.extract_strided_slice %366 {offsets = [0, 0], sizes = [7, 96], strides = [1, 1]} : vector<8x96xf32> to vector<7x96xf32>
    %374 = arith.truncf %373 : vector<7x96xf32> to vector<7x96xbf16>
    %375 = vector.extract_strided_slice %368 {offsets = [0, 0], sizes = [7, 96], strides = [1, 1]} : vector<8x96xf32> to vector<7x96xf32>
    %376 = arith.truncf %375 : vector<7x96xf32> to vector<7x96xbf16>
    %377 = vector.extract_strided_slice %370 {offsets = [0, 0], sizes = [7, 96], strides = [1, 1]} : vector<8x96xf32> to vector<7x96xf32>
    %378 = arith.truncf %377 : vector<7x96xf32> to vector<7x96xbf16>
    %379 = vector.extract_strided_slice %372 {offsets = [0, 0], sizes = [7, 96], strides = [1, 1]} : vector<8x96xf32> to vector<7x96xf32>
    %380 = arith.truncf %379 : vector<7x96xf32> to vector<7x96xbf16>
    %381 = vector.extract_strided_slice %366 {offsets = [1, 0], sizes = [7, 96], strides = [1, 1]} : vector<8x96xf32> to vector<7x96xf32>
    %382 = arith.truncf %381 : vector<7x96xf32> to vector<7x96xbf16>
    %c0_369 = arith.constant 0 : index
    %c0_370 = arith.constant 0 : index
    %c0_371 = arith.constant 0 : index
    %c0_372 = arith.constant 0 : index
    %383 = vector.load %arg1[%c0_369, %c0_370, %c0_371, %c0_372] : memref<2x5x96x84xbf16, #tpu.memory_space<vmem>>, vector<1x1x96x84xbf16>
    %384 = vector.shape_cast %383 : vector<1x1x96x84xbf16> to vector<96x84xbf16>
    %cst_373 = arith.constant dense<0.000000e+00> : vector<7x84xf32>
    %385 = tpu.matmul %374, %384, %cst_373 {dimension_numbers = #tpu.dot_dimension_numbers<[1], [0], [0], [1], [0, 0, 1, 1], [], []>} : vector<7x96xbf16>, vector<96x84xbf16>, vector<7x84xf32> -> vector<7x84xf32>
    %c0_374 = arith.constant 0 : index
    %c1_375 = arith.constant 1 : index
    %c0_376 = arith.constant 0 : index
    %c0_377 = arith.constant 0 : index
    %386 = vector.load %arg1[%c0_374, %c1_375, %c0_376, %c0_377] : memref<2x5x96x84xbf16, #tpu.memory_space<vmem>>, vector<1x1x96x84xbf16>
    %387 = vector.shape_cast %386 : vector<1x1x96x84xbf16> to vector<96x84xbf16>
    %cst_378 = arith.constant dense<0.000000e+00> : vector<7x84xf32>
    %388 = tpu.matmul %376, %387, %cst_378 {dimension_numbers = #tpu.dot_dimension_numbers<[1], [0], [0], [1], [0, 0, 1, 1], [], []>} : vector<7x96xbf16>, vector<96x84xbf16>, vector<7x84xf32> -> vector<7x84xf32>
    %389 = arith.addf %385, %388 : vector<7x84xf32>
    %c0_379 = arith.constant 0 : index
    %c2_380 = arith.constant 2 : index
    %c0_381 = arith.constant 0 : index
    %c0_382 = arith.constant 0 : index
    %390 = vector.load %arg1[%c0_379, %c2_380, %c0_381, %c0_382] : memref<2x5x96x84xbf16, #tpu.memory_space<vmem>>, vector<1x1x96x84xbf16>
    %391 = vector.shape_cast %390 : vector<1x1x96x84xbf16> to vector<96x84xbf16>
    %cst_383 = arith.constant dense<0.000000e+00> : vector<7x84xf32>
    %392 = tpu.matmul %378, %391, %cst_383 {dimension_numbers = #tpu.dot_dimension_numbers<[1], [0], [0], [1], [0, 0, 1, 1], [], []>} : vector<7x96xbf16>, vector<96x84xbf16>, vector<7x84xf32> -> vector<7x84xf32>
    %393 = arith.addf %389, %392 : vector<7x84xf32>
    %c0_384 = arith.constant 0 : index
    %c3_385 = arith.constant 3 : index
    %c0_386 = arith.constant 0 : index
    %c0_387 = arith.constant 0 : index
    %394 = vector.load %arg1[%c0_384, %c3_385, %c0_386, %c0_387] : memref<2x5x96x84xbf16, #tpu.memory_space<vmem>>, vector<1x1x96x84xbf16>
    %395 = vector.shape_cast %394 : vector<1x1x96x84xbf16> to vector<96x84xbf16>
    %cst_388 = arith.constant dense<0.000000e+00> : vector<7x84xf32>
    %396 = tpu.matmul %380, %395, %cst_388 {dimension_numbers = #tpu.dot_dimension_numbers<[1], [0], [0], [1], [0, 0, 1, 1], [], []>} : vector<7x96xbf16>, vector<96x84xbf16>, vector<7x84xf32> -> vector<7x84xf32>
    %397 = arith.addf %393, %396 : vector<7x84xf32>
    %c0_389 = arith.constant 0 : index
    %c4_390 = arith.constant 4 : index
    %c0_391 = arith.constant 0 : index
    %c0_392 = arith.constant 0 : index
    %398 = vector.load %arg1[%c0_389, %c4_390, %c0_391, %c0_392] : memref<2x5x96x84xbf16, #tpu.memory_space<vmem>>, vector<1x1x96x84xbf16>
    %399 = vector.shape_cast %398 : vector<1x1x96x84xbf16> to vector<96x84xbf16>
    %cst_393 = arith.constant dense<0.000000e+00> : vector<7x84xf32>
    %400 = tpu.matmul %382, %399, %cst_393 {dimension_numbers = #tpu.dot_dimension_numbers<[1], [0], [0], [1], [0, 0, 1, 1], [], []>} : vector<7x96xbf16>, vector<96x84xbf16>, vector<7x84xf32> -> vector<7x84xf32>
    %401 = arith.addf %397, %400 : vector<7x84xf32>
    %c1_394 = arith.constant 1 : index
    %c0_395 = arith.constant 0 : index
    %c0_396 = arith.constant 0 : index
    %c0_397 = arith.constant 0 : index
    %402 = vector.load %arg1[%c1_394, %c0_395, %c0_396, %c0_397] : memref<2x5x96x84xbf16, #tpu.memory_space<vmem>>, vector<1x1x96x84xbf16>
    %403 = vector.shape_cast %402 : vector<1x1x96x84xbf16> to vector<96x84xbf16>
    %cst_398 = arith.constant dense<0.000000e+00> : vector<7x84xf32>
    %404 = tpu.matmul %374, %403, %cst_398 {dimension_numbers = #tpu.dot_dimension_numbers<[1], [0], [0], [1], [0, 0, 1, 1], [], []>} : vector<7x96xbf16>, vector<96x84xbf16>, vector<7x84xf32> -> vector<7x84xf32>
    %c1_399 = arith.constant 1 : index
    %c1_400 = arith.constant 1 : index
    %c0_401 = arith.constant 0 : index
    %c0_402 = arith.constant 0 : index
    %405 = vector.load %arg1[%c1_399, %c1_400, %c0_401, %c0_402] : memref<2x5x96x84xbf16, #tpu.memory_space<vmem>>, vector<1x1x96x84xbf16>
    %406 = vector.shape_cast %405 : vector<1x1x96x84xbf16> to vector<96x84xbf16>
    %cst_403 = arith.constant dense<0.000000e+00> : vector<7x84xf32>
    %407 = tpu.matmul %376, %406, %cst_403 {dimension_numbers = #tpu.dot_dimension_numbers<[1], [0], [0], [1], [0, 0, 1, 1], [], []>} : vector<7x96xbf16>, vector<96x84xbf16>, vector<7x84xf32> -> vector<7x84xf32>
    %408 = arith.addf %404, %407 : vector<7x84xf32>
    %c1_404 = arith.constant 1 : index
    %c2_405 = arith.constant 2 : index
    %c0_406 = arith.constant 0 : index
    %c0_407 = arith.constant 0 : index
    %409 = vector.load %arg1[%c1_404, %c2_405, %c0_406, %c0_407] : memref<2x5x96x84xbf16, #tpu.memory_space<vmem>>, vector<1x1x96x84xbf16>
    %410 = vector.shape_cast %409 : vector<1x1x96x84xbf16> to vector<96x84xbf16>
    %cst_408 = arith.constant dense<0.000000e+00> : vector<7x84xf32>
    %411 = tpu.matmul %378, %410, %cst_408 {dimension_numbers = #tpu.dot_dimension_numbers<[1], [0], [0], [1], [0, 0, 1, 1], [], []>} : vector<7x96xbf16>, vector<96x84xbf16>, vector<7x84xf32> -> vector<7x84xf32>
    %412 = arith.addf %408, %411 : vector<7x84xf32>
    %c1_409 = arith.constant 1 : index
    %c3_410 = arith.constant 3 : index
    %c0_411 = arith.constant 0 : index
    %c0_412 = arith.constant 0 : index
    %413 = vector.load %arg1[%c1_409, %c3_410, %c0_411, %c0_412] : memref<2x5x96x84xbf16, #tpu.memory_space<vmem>>, vector<1x1x96x84xbf16>
    %414 = vector.shape_cast %413 : vector<1x1x96x84xbf16> to vector<96x84xbf16>
    %cst_413 = arith.constant dense<0.000000e+00> : vector<7x84xf32>
    %415 = tpu.matmul %380, %414, %cst_413 {dimension_numbers = #tpu.dot_dimension_numbers<[1], [0], [0], [1], [0, 0, 1, 1], [], []>} : vector<7x96xbf16>, vector<96x84xbf16>, vector<7x84xf32> -> vector<7x84xf32>
    %416 = arith.addf %412, %415 : vector<7x84xf32>
    %c1_414 = arith.constant 1 : index
    %c4_415 = arith.constant 4 : index
    %c0_416 = arith.constant 0 : index
    %c0_417 = arith.constant 0 : index
    %417 = vector.load %arg1[%c1_414, %c4_415, %c0_416, %c0_417] : memref<2x5x96x84xbf16, #tpu.memory_space<vmem>>, vector<1x1x96x84xbf16>
    %418 = vector.shape_cast %417 : vector<1x1x96x84xbf16> to vector<96x84xbf16>
    %cst_418 = arith.constant dense<0.000000e+00> : vector<7x84xf32>
    %419 = tpu.matmul %382, %418, %cst_418 {dimension_numbers = #tpu.dot_dimension_numbers<[1], [0], [0], [1], [0, 0, 1, 1], [], []>} : vector<7x96xbf16>, vector<96x84xbf16>, vector<7x84xf32> -> vector<7x84xf32>
    %420 = arith.addf %416, %419 : vector<7x84xf32>
    %421 = vector.extract_strided_slice %368 {offsets = [0, 0], sizes = [7, 96], strides = [1, 1]} : vector<8x96xf32> to vector<7x96xf32>
    %422 = arith.truncf %421 : vector<7x96xf32> to vector<7x96xbf16>
    %423 = vector.extract_strided_slice %370 {offsets = [0, 0], sizes = [7, 96], strides = [1, 1]} : vector<8x96xf32> to vector<7x96xf32>
    %424 = arith.truncf %423 : vector<7x96xf32> to vector<7x96xbf16>
    %425 = vector.extract_strided_slice %372 {offsets = [0, 0], sizes = [7, 96], strides = [1, 1]} : vector<8x96xf32> to vector<7x96xf32>
    %426 = arith.truncf %425 : vector<7x96xf32> to vector<7x96xbf16>
    %427 = vector.extract_strided_slice %366 {offsets = [1, 0], sizes = [7, 96], strides = [1, 1]} : vector<8x96xf32> to vector<7x96xf32>
    %428 = arith.truncf %427 : vector<7x96xf32> to vector<7x96xbf16>
    %429 = vector.extract_strided_slice %368 {offsets = [1, 0], sizes = [7, 96], strides = [1, 1]} : vector<8x96xf32> to vector<7x96xf32>
    %430 = arith.truncf %429 : vector<7x96xf32> to vector<7x96xbf16>
    %c0_419 = arith.constant 0 : index
    %c0_420 = arith.constant 0 : index
    %c0_421 = arith.constant 0 : index
    %c0_422 = arith.constant 0 : index
    %431 = vector.load %arg1[%c0_419, %c0_420, %c0_421, %c0_422] : memref<2x5x96x84xbf16, #tpu.memory_space<vmem>>, vector<1x1x96x84xbf16>
    %432 = vector.shape_cast %431 : vector<1x1x96x84xbf16> to vector<96x84xbf16>
    %cst_423 = arith.constant dense<0.000000e+00> : vector<7x84xf32>
    %433 = tpu.matmul %422, %432, %cst_423 {dimension_numbers = #tpu.dot_dimension_numbers<[1], [0], [0], [1], [0, 0, 1, 1], [], []>} : vector<7x96xbf16>, vector<96x84xbf16>, vector<7x84xf32> -> vector<7x84xf32>
    %c0_424 = arith.constant 0 : index
    %c1_425 = arith.constant 1 : index
    %c0_426 = arith.constant 0 : index
    %c0_427 = arith.constant 0 : index
    %434 = vector.load %arg1[%c0_424, %c1_425, %c0_426, %c0_427] : memref<2x5x96x84xbf16, #tpu.memory_space<vmem>>, vector<1x1x96x84xbf16>
    %435 = vector.shape_cast %434 : vector<1x1x96x84xbf16> to vector<96x84xbf16>
    %cst_428 = arith.constant dense<0.000000e+00> : vector<7x84xf32>
    %436 = tpu.matmul %424, %435, %cst_428 {dimension_numbers = #tpu.dot_dimension_numbers<[1], [0], [0], [1], [0, 0, 1, 1], [], []>} : vector<7x96xbf16>, vector<96x84xbf16>, vector<7x84xf32> -> vector<7x84xf32>
    %437 = arith.addf %433, %436 : vector<7x84xf32>
    %c0_429 = arith.constant 0 : index
    %c2_430 = arith.constant 2 : index
    %c0_431 = arith.constant 0 : index
    %c0_432 = arith.constant 0 : index
    %438 = vector.load %arg1[%c0_429, %c2_430, %c0_431, %c0_432] : memref<2x5x96x84xbf16, #tpu.memory_space<vmem>>, vector<1x1x96x84xbf16>
    %439 = vector.shape_cast %438 : vector<1x1x96x84xbf16> to vector<96x84xbf16>
    %cst_433 = arith.constant dense<0.000000e+00> : vector<7x84xf32>
    %440 = tpu.matmul %426, %439, %cst_433 {dimension_numbers = #tpu.dot_dimension_numbers<[1], [0], [0], [1], [0, 0, 1, 1], [], []>} : vector<7x96xbf16>, vector<96x84xbf16>, vector<7x84xf32> -> vector<7x84xf32>
    %441 = arith.addf %437, %440 : vector<7x84xf32>
    %c0_434 = arith.constant 0 : index
    %c3_435 = arith.constant 3 : index
    %c0_436 = arith.constant 0 : index
    %c0_437 = arith.constant 0 : index
    %442 = vector.load %arg1[%c0_434, %c3_435, %c0_436, %c0_437] : memref<2x5x96x84xbf16, #tpu.memory_space<vmem>>, vector<1x1x96x84xbf16>
    %443 = vector.shape_cast %442 : vector<1x1x96x84xbf16> to vector<96x84xbf16>
    %cst_438 = arith.constant dense<0.000000e+00> : vector<7x84xf32>
    %444 = tpu.matmul %428, %443, %cst_438 {dimension_numbers = #tpu.dot_dimension_numbers<[1], [0], [0], [1], [0, 0, 1, 1], [], []>} : vector<7x96xbf16>, vector<96x84xbf16>, vector<7x84xf32> -> vector<7x84xf32>
    %445 = arith.addf %441, %444 : vector<7x84xf32>
    %c0_439 = arith.constant 0 : index
    %c4_440 = arith.constant 4 : index
    %c0_441 = arith.constant 0 : index
    %c0_442 = arith.constant 0 : index
    %446 = vector.load %arg1[%c0_439, %c4_440, %c0_441, %c0_442] : memref<2x5x96x84xbf16, #tpu.memory_space<vmem>>, vector<1x1x96x84xbf16>
    %447 = vector.shape_cast %446 : vector<1x1x96x84xbf16> to vector<96x84xbf16>
    %cst_443 = arith.constant dense<0.000000e+00> : vector<7x84xf32>
    %448 = tpu.matmul %430, %447, %cst_443 {dimension_numbers = #tpu.dot_dimension_numbers<[1], [0], [0], [1], [0, 0, 1, 1], [], []>} : vector<7x96xbf16>, vector<96x84xbf16>, vector<7x84xf32> -> vector<7x84xf32>
    %449 = arith.addf %445, %448 : vector<7x84xf32>
    %c1_444 = arith.constant 1 : index
    %c0_445 = arith.constant 0 : index
    %c0_446 = arith.constant 0 : index
    %c0_447 = arith.constant 0 : index
    %450 = vector.load %arg1[%c1_444, %c0_445, %c0_446, %c0_447] : memref<2x5x96x84xbf16, #tpu.memory_space<vmem>>, vector<1x1x96x84xbf16>
    %451 = vector.shape_cast %450 : vector<1x1x96x84xbf16> to vector<96x84xbf16>
    %cst_448 = arith.constant dense<0.000000e+00> : vector<7x84xf32>
    %452 = tpu.matmul %422, %451, %cst_448 {dimension_numbers = #tpu.dot_dimension_numbers<[1], [0], [0], [1], [0, 0, 1, 1], [], []>} : vector<7x96xbf16>, vector<96x84xbf16>, vector<7x84xf32> -> vector<7x84xf32>
    %c1_449 = arith.constant 1 : index
    %c1_450 = arith.constant 1 : index
    %c0_451 = arith.constant 0 : index
    %c0_452 = arith.constant 0 : index
    %453 = vector.load %arg1[%c1_449, %c1_450, %c0_451, %c0_452] : memref<2x5x96x84xbf16, #tpu.memory_space<vmem>>, vector<1x1x96x84xbf16>
    %454 = vector.shape_cast %453 : vector<1x1x96x84xbf16> to vector<96x84xbf16>
    %cst_453 = arith.constant dense<0.000000e+00> : vector<7x84xf32>
    %455 = tpu.matmul %424, %454, %cst_453 {dimension_numbers = #tpu.dot_dimension_numbers<[1], [0], [0], [1], [0, 0, 1, 1], [], []>} : vector<7x96xbf16>, vector<96x84xbf16>, vector<7x84xf32> -> vector<7x84xf32>
    %456 = arith.addf %452, %455 : vector<7x84xf32>
    %c1_454 = arith.constant 1 : index
    %c2_455 = arith.constant 2 : index
    %c0_456 = arith.constant 0 : index
    %c0_457 = arith.constant 0 : index
    %457 = vector.load %arg1[%c1_454, %c2_455, %c0_456, %c0_457] : memref<2x5x96x84xbf16, #tpu.memory_space<vmem>>, vector<1x1x96x84xbf16>
    %458 = vector.shape_cast %457 : vector<1x1x96x84xbf16> to vector<96x84xbf16>
    %cst_458 = arith.constant dense<0.000000e+00> : vector<7x84xf32>
    %459 = tpu.matmul %426, %458, %cst_458 {dimension_numbers = #tpu.dot_dimension_numbers<[1], [0], [0], [1], [0, 0, 1, 1], [], []>} : vector<7x96xbf16>, vector<96x84xbf16>, vector<7x84xf32> -> vector<7x84xf32>
    %460 = arith.addf %456, %459 : vector<7x84xf32>
    %c1_459 = arith.constant 1 : index
    %c3_460 = arith.constant 3 : index
    %c0_461 = arith.constant 0 : index
    %c0_462 = arith.constant 0 : index
    %461 = vector.load %arg1[%c1_459, %c3_460, %c0_461, %c0_462] : memref<2x5x96x84xbf16, #tpu.memory_space<vmem>>, vector<1x1x96x84xbf16>
    %462 = vector.shape_cast %461 : vector<1x1x96x84xbf16> to vector<96x84xbf16>
    %cst_463 = arith.constant dense<0.000000e+00> : vector<7x84xf32>
    %463 = tpu.matmul %428, %462, %cst_463 {dimension_numbers = #tpu.dot_dimension_numbers<[1], [0], [0], [1], [0, 0, 1, 1], [], []>} : vector<7x96xbf16>, vector<96x84xbf16>, vector<7x84xf32> -> vector<7x84xf32>
    %464 = arith.addf %460, %463 : vector<7x84xf32>
    %c1_464 = arith.constant 1 : index
    %c4_465 = arith.constant 4 : index
    %c0_466 = arith.constant 0 : index
    %c0_467 = arith.constant 0 : index
    %465 = vector.load %arg1[%c1_464, %c4_465, %c0_466, %c0_467] : memref<2x5x96x84xbf16, #tpu.memory_space<vmem>>, vector<1x1x96x84xbf16>
    %466 = vector.shape_cast %465 : vector<1x1x96x84xbf16> to vector<96x84xbf16>
    %cst_468 = arith.constant dense<0.000000e+00> : vector<7x84xf32>
    %467 = tpu.matmul %430, %466, %cst_468 {dimension_numbers = #tpu.dot_dimension_numbers<[1], [0], [0], [1], [0, 0, 1, 1], [], []>} : vector<7x96xbf16>, vector<96x84xbf16>, vector<7x84xf32> -> vector<7x84xf32>
    %468 = arith.addf %464, %467 : vector<7x84xf32>
    %469 = arith.maximumf %401, %420 : vector<7x84xf32>
    %470 = arith.maximumf %449, %468 : vector<7x84xf32>
    %471 = arith.maximumf %469, %470 : vector<7x84xf32>
    %472 = vector.broadcast %0 : vector<1x84xf32> to vector<7x84xf32>
    %473 = arith.addf %471, %472 : vector<7x84xf32>
    %cst_469 = arith.constant 0.000000e+00 : f32
    %474 = vector.broadcast %cst_469 : f32 to vector<7x84xf32>
    %475 = arith.maximumf %473, %474 : vector<7x84xf32>
    %476 = vector.extract_strided_slice %370 {offsets = [0, 0], sizes = [7, 96], strides = [1, 1]} : vector<8x96xf32> to vector<7x96xf32>
    %477 = arith.truncf %476 : vector<7x96xf32> to vector<7x96xbf16>
    %478 = vector.extract_strided_slice %372 {offsets = [0, 0], sizes = [7, 96], strides = [1, 1]} : vector<8x96xf32> to vector<7x96xf32>
    %479 = arith.truncf %478 : vector<7x96xf32> to vector<7x96xbf16>
    %480 = vector.extract_strided_slice %366 {offsets = [1, 0], sizes = [7, 96], strides = [1, 1]} : vector<8x96xf32> to vector<7x96xf32>
    %481 = arith.truncf %480 : vector<7x96xf32> to vector<7x96xbf16>
    %482 = vector.extract_strided_slice %368 {offsets = [1, 0], sizes = [7, 96], strides = [1, 1]} : vector<8x96xf32> to vector<7x96xf32>
    %483 = arith.truncf %482 : vector<7x96xf32> to vector<7x96xbf16>
    %484 = vector.extract_strided_slice %370 {offsets = [1, 0], sizes = [7, 96], strides = [1, 1]} : vector<8x96xf32> to vector<7x96xf32>
    %485 = arith.truncf %484 : vector<7x96xf32> to vector<7x96xbf16>
    %c0_470 = arith.constant 0 : index
    %c0_471 = arith.constant 0 : index
    %c0_472 = arith.constant 0 : index
    %c0_473 = arith.constant 0 : index
    %486 = vector.load %arg1[%c0_470, %c0_471, %c0_472, %c0_473] : memref<2x5x96x84xbf16, #tpu.memory_space<vmem>>, vector<1x1x96x84xbf16>
    %487 = vector.shape_cast %486 : vector<1x1x96x84xbf16> to vector<96x84xbf16>
    %cst_474 = arith.constant dense<0.000000e+00> : vector<7x84xf32>
    %488 = tpu.matmul %477, %487, %cst_474 {dimension_numbers = #tpu.dot_dimension_numbers<[1], [0], [0], [1], [0, 0, 1, 1], [], []>} : vector<7x96xbf16>, vector<96x84xbf16>, vector<7x84xf32> -> vector<7x84xf32>
    %c0_475 = arith.constant 0 : index
    %c1_476 = arith.constant 1 : index
    %c0_477 = arith.constant 0 : index
    %c0_478 = arith.constant 0 : index
    %489 = vector.load %arg1[%c0_475, %c1_476, %c0_477, %c0_478] : memref<2x5x96x84xbf16, #tpu.memory_space<vmem>>, vector<1x1x96x84xbf16>
    %490 = vector.shape_cast %489 : vector<1x1x96x84xbf16> to vector<96x84xbf16>
    %cst_479 = arith.constant dense<0.000000e+00> : vector<7x84xf32>
    %491 = tpu.matmul %479, %490, %cst_479 {dimension_numbers = #tpu.dot_dimension_numbers<[1], [0], [0], [1], [0, 0, 1, 1], [], []>} : vector<7x96xbf16>, vector<96x84xbf16>, vector<7x84xf32> -> vector<7x84xf32>
    %492 = arith.addf %488, %491 : vector<7x84xf32>
    %c0_480 = arith.constant 0 : index
    %c2_481 = arith.constant 2 : index
    %c0_482 = arith.constant 0 : index
    %c0_483 = arith.constant 0 : index
    %493 = vector.load %arg1[%c0_480, %c2_481, %c0_482, %c0_483] : memref<2x5x96x84xbf16, #tpu.memory_space<vmem>>, vector<1x1x96x84xbf16>
    %494 = vector.shape_cast %493 : vector<1x1x96x84xbf16> to vector<96x84xbf16>
    %cst_484 = arith.constant dense<0.000000e+00> : vector<7x84xf32>
    %495 = tpu.matmul %481, %494, %cst_484 {dimension_numbers = #tpu.dot_dimension_numbers<[1], [0], [0], [1], [0, 0, 1, 1], [], []>} : vector<7x96xbf16>, vector<96x84xbf16>, vector<7x84xf32> -> vector<7x84xf32>
    %496 = arith.addf %492, %495 : vector<7x84xf32>
    %c0_485 = arith.constant 0 : index
    %c3_486 = arith.constant 3 : index
    %c0_487 = arith.constant 0 : index
    %c0_488 = arith.constant 0 : index
    %497 = vector.load %arg1[%c0_485, %c3_486, %c0_487, %c0_488] : memref<2x5x96x84xbf16, #tpu.memory_space<vmem>>, vector<1x1x96x84xbf16>
    %498 = vector.shape_cast %497 : vector<1x1x96x84xbf16> to vector<96x84xbf16>
    %cst_489 = arith.constant dense<0.000000e+00> : vector<7x84xf32>
    %499 = tpu.matmul %483, %498, %cst_489 {dimension_numbers = #tpu.dot_dimension_numbers<[1], [0], [0], [1], [0, 0, 1, 1], [], []>} : vector<7x96xbf16>, vector<96x84xbf16>, vector<7x84xf32> -> vector<7x84xf32>
    %500 = arith.addf %496, %499 : vector<7x84xf32>
    %c0_490 = arith.constant 0 : index
    %c4_491 = arith.constant 4 : index
    %c0_492 = arith.constant 0 : index
    %c0_493 = arith.constant 0 : index
    %501 = vector.load %arg1[%c0_490, %c4_491, %c0_492, %c0_493] : memref<2x5x96x84xbf16, #tpu.memory_space<vmem>>, vector<1x1x96x84xbf16>
    %502 = vector.shape_cast %501 : vector<1x1x96x84xbf16> to vector<96x84xbf16>
    %cst_494 = arith.constant dense<0.000000e+00> : vector<7x84xf32>
    %503 = tpu.matmul %485, %502, %cst_494 {dimension_numbers = #tpu.dot_dimension_numbers<[1], [0], [0], [1], [0, 0, 1, 1], [], []>} : vector<7x96xbf16>, vector<96x84xbf16>, vector<7x84xf32> -> vector<7x84xf32>
    %504 = arith.addf %500, %503 : vector<7x84xf32>
    %c1_495 = arith.constant 1 : index
    %c0_496 = arith.constant 0 : index
    %c0_497 = arith.constant 0 : index
    %c0_498 = arith.constant 0 : index
    %505 = vector.load %arg1[%c1_495, %c0_496, %c0_497, %c0_498] : memref<2x5x96x84xbf16, #tpu.memory_space<vmem>>, vector<1x1x96x84xbf16>
    %506 = vector.shape_cast %505 : vector<1x1x96x84xbf16> to vector<96x84xbf16>
    %cst_499 = arith.constant dense<0.000000e+00> : vector<7x84xf32>
    %507 = tpu.matmul %477, %506, %cst_499 {dimension_numbers = #tpu.dot_dimension_numbers<[1], [0], [0], [1], [0, 0, 1, 1], [], []>} : vector<7x96xbf16>, vector<96x84xbf16>, vector<7x84xf32> -> vector<7x84xf32>
    %c1_500 = arith.constant 1 : index
    %c1_501 = arith.constant 1 : index
    %c0_502 = arith.constant 0 : index
    %c0_503 = arith.constant 0 : index
    %508 = vector.load %arg1[%c1_500, %c1_501, %c0_502, %c0_503] : memref<2x5x96x84xbf16, #tpu.memory_space<vmem>>, vector<1x1x96x84xbf16>
    %509 = vector.shape_cast %508 : vector<1x1x96x84xbf16> to vector<96x84xbf16>
    %cst_504 = arith.constant dense<0.000000e+00> : vector<7x84xf32>
    %510 = tpu.matmul %479, %509, %cst_504 {dimension_numbers = #tpu.dot_dimension_numbers<[1], [0], [0], [1], [0, 0, 1, 1], [], []>} : vector<7x96xbf16>, vector<96x84xbf16>, vector<7x84xf32> -> vector<7x84xf32>
    %511 = arith.addf %507, %510 : vector<7x84xf32>
    %c1_505 = arith.constant 1 : index
    %c2_506 = arith.constant 2 : index
    %c0_507 = arith.constant 0 : index
    %c0_508 = arith.constant 0 : index
    %512 = vector.load %arg1[%c1_505, %c2_506, %c0_507, %c0_508] : memref<2x5x96x84xbf16, #tpu.memory_space<vmem>>, vector<1x1x96x84xbf16>
    %513 = vector.shape_cast %512 : vector<1x1x96x84xbf16> to vector<96x84xbf16>
    %cst_509 = arith.constant dense<0.000000e+00> : vector<7x84xf32>
    %514 = tpu.matmul %481, %513, %cst_509 {dimension_numbers = #tpu.dot_dimension_numbers<[1], [0], [0], [1], [0, 0, 1, 1], [], []>} : vector<7x96xbf16>, vector<96x84xbf16>, vector<7x84xf32> -> vector<7x84xf32>
    %515 = arith.addf %511, %514 : vector<7x84xf32>
    %c1_510 = arith.constant 1 : index
    %c3_511 = arith.constant 3 : index
    %c0_512 = arith.constant 0 : index
    %c0_513 = arith.constant 0 : index
    %516 = vector.load %arg1[%c1_510, %c3_511, %c0_512, %c0_513] : memref<2x5x96x84xbf16, #tpu.memory_space<vmem>>, vector<1x1x96x84xbf16>
    %517 = vector.shape_cast %516 : vector<1x1x96x84xbf16> to vector<96x84xbf16>
    %cst_514 = arith.constant dense<0.000000e+00> : vector<7x84xf32>
    %518 = tpu.matmul %483, %517, %cst_514 {dimension_numbers = #tpu.dot_dimension_numbers<[1], [0], [0], [1], [0, 0, 1, 1], [], []>} : vector<7x96xbf16>, vector<96x84xbf16>, vector<7x84xf32> -> vector<7x84xf32>
    %519 = arith.addf %515, %518 : vector<7x84xf32>
    %c1_515 = arith.constant 1 : index
    %c4_516 = arith.constant 4 : index
    %c0_517 = arith.constant 0 : index
    %c0_518 = arith.constant 0 : index
    %520 = vector.load %arg1[%c1_515, %c4_516, %c0_517, %c0_518] : memref<2x5x96x84xbf16, #tpu.memory_space<vmem>>, vector<1x1x96x84xbf16>
    %521 = vector.shape_cast %520 : vector<1x1x96x84xbf16> to vector<96x84xbf16>
    %cst_519 = arith.constant dense<0.000000e+00> : vector<7x84xf32>
    %522 = tpu.matmul %485, %521, %cst_519 {dimension_numbers = #tpu.dot_dimension_numbers<[1], [0], [0], [1], [0, 0, 1, 1], [], []>} : vector<7x96xbf16>, vector<96x84xbf16>, vector<7x84xf32> -> vector<7x84xf32>
    %523 = arith.addf %519, %522 : vector<7x84xf32>
    %524 = vector.extract_strided_slice %372 {offsets = [0, 0], sizes = [7, 96], strides = [1, 1]} : vector<8x96xf32> to vector<7x96xf32>
    %525 = arith.truncf %524 : vector<7x96xf32> to vector<7x96xbf16>
    %526 = vector.extract_strided_slice %366 {offsets = [1, 0], sizes = [7, 96], strides = [1, 1]} : vector<8x96xf32> to vector<7x96xf32>
    %527 = arith.truncf %526 : vector<7x96xf32> to vector<7x96xbf16>
    %528 = vector.extract_strided_slice %368 {offsets = [1, 0], sizes = [7, 96], strides = [1, 1]} : vector<8x96xf32> to vector<7x96xf32>
    %529 = arith.truncf %528 : vector<7x96xf32> to vector<7x96xbf16>
    %530 = vector.extract_strided_slice %370 {offsets = [1, 0], sizes = [7, 96], strides = [1, 1]} : vector<8x96xf32> to vector<7x96xf32>
    %531 = arith.truncf %530 : vector<7x96xf32> to vector<7x96xbf16>
    %532 = vector.extract_strided_slice %372 {offsets = [1, 0], sizes = [7, 96], strides = [1, 1]} : vector<8x96xf32> to vector<7x96xf32>
    %533 = arith.truncf %532 : vector<7x96xf32> to vector<7x96xbf16>
    %c0_520 = arith.constant 0 : index
    %c0_521 = arith.constant 0 : index
    %c0_522 = arith.constant 0 : index
    %c0_523 = arith.constant 0 : index
    %534 = vector.load %arg1[%c0_520, %c0_521, %c0_522, %c0_523] : memref<2x5x96x84xbf16, #tpu.memory_space<vmem>>, vector<1x1x96x84xbf16>
    %535 = vector.shape_cast %534 : vector<1x1x96x84xbf16> to vector<96x84xbf16>
    %cst_524 = arith.constant dense<0.000000e+00> : vector<7x84xf32>
    %536 = tpu.matmul %525, %535, %cst_524 {dimension_numbers = #tpu.dot_dimension_numbers<[1], [0], [0], [1], [0, 0, 1, 1], [], []>} : vector<7x96xbf16>, vector<96x84xbf16>, vector<7x84xf32> -> vector<7x84xf32>
    %c0_525 = arith.constant 0 : index
    %c1_526 = arith.constant 1 : index
    %c0_527 = arith.constant 0 : index
    %c0_528 = arith.constant 0 : index
    %537 = vector.load %arg1[%c0_525, %c1_526, %c0_527, %c0_528] : memref<2x5x96x84xbf16, #tpu.memory_space<vmem>>, vector<1x1x96x84xbf16>
    %538 = vector.shape_cast %537 : vector<1x1x96x84xbf16> to vector<96x84xbf16>
    %cst_529 = arith.constant dense<0.000000e+00> : vector<7x84xf32>
    %539 = tpu.matmul %527, %538, %cst_529 {dimension_numbers = #tpu.dot_dimension_numbers<[1], [0], [0], [1], [0, 0, 1, 1], [], []>} : vector<7x96xbf16>, vector<96x84xbf16>, vector<7x84xf32> -> vector<7x84xf32>
    %540 = arith.addf %536, %539 : vector<7x84xf32>
    %c0_530 = arith.constant 0 : index
    %c2_531 = arith.constant 2 : index
    %c0_532 = arith.constant 0 : index
    %c0_533 = arith.constant 0 : index
    %541 = vector.load %arg1[%c0_530, %c2_531, %c0_532, %c0_533] : memref<2x5x96x84xbf16, #tpu.memory_space<vmem>>, vector<1x1x96x84xbf16>
    %542 = vector.shape_cast %541 : vector<1x1x96x84xbf16> to vector<96x84xbf16>
    %cst_534 = arith.constant dense<0.000000e+00> : vector<7x84xf32>
    %543 = tpu.matmul %529, %542, %cst_534 {dimension_numbers = #tpu.dot_dimension_numbers<[1], [0], [0], [1], [0, 0, 1, 1], [], []>} : vector<7x96xbf16>, vector<96x84xbf16>, vector<7x84xf32> -> vector<7x84xf32>
    %544 = arith.addf %540, %543 : vector<7x84xf32>
    %c0_535 = arith.constant 0 : index
    %c3_536 = arith.constant 3 : index
    %c0_537 = arith.constant 0 : index
    %c0_538 = arith.constant 0 : index
    %545 = vector.load %arg1[%c0_535, %c3_536, %c0_537, %c0_538] : memref<2x5x96x84xbf16, #tpu.memory_space<vmem>>, vector<1x1x96x84xbf16>
    %546 = vector.shape_cast %545 : vector<1x1x96x84xbf16> to vector<96x84xbf16>
    %cst_539 = arith.constant dense<0.000000e+00> : vector<7x84xf32>
    %547 = tpu.matmul %531, %546, %cst_539 {dimension_numbers = #tpu.dot_dimension_numbers<[1], [0], [0], [1], [0, 0, 1, 1], [], []>} : vector<7x96xbf16>, vector<96x84xbf16>, vector<7x84xf32> -> vector<7x84xf32>
    %548 = arith.addf %544, %547 : vector<7x84xf32>
    %c0_540 = arith.constant 0 : index
    %c4_541 = arith.constant 4 : index
    %c0_542 = arith.constant 0 : index
    %c0_543 = arith.constant 0 : index
    %549 = vector.load %arg1[%c0_540, %c4_541, %c0_542, %c0_543] : memref<2x5x96x84xbf16, #tpu.memory_space<vmem>>, vector<1x1x96x84xbf16>
    %550 = vector.shape_cast %549 : vector<1x1x96x84xbf16> to vector<96x84xbf16>
    %cst_544 = arith.constant dense<0.000000e+00> : vector<7x84xf32>
    %551 = tpu.matmul %533, %550, %cst_544 {dimension_numbers = #tpu.dot_dimension_numbers<[1], [0], [0], [1], [0, 0, 1, 1], [], []>} : vector<7x96xbf16>, vector<96x84xbf16>, vector<7x84xf32> -> vector<7x84xf32>
    %552 = arith.addf %548, %551 : vector<7x84xf32>
    %c1_545 = arith.constant 1 : index
    %c0_546 = arith.constant 0 : index
    %c0_547 = arith.constant 0 : index
    %c0_548 = arith.constant 0 : index
    %553 = vector.load %arg1[%c1_545, %c0_546, %c0_547, %c0_548] : memref<2x5x96x84xbf16, #tpu.memory_space<vmem>>, vector<1x1x96x84xbf16>
    %554 = vector.shape_cast %553 : vector<1x1x96x84xbf16> to vector<96x84xbf16>
    %cst_549 = arith.constant dense<0.000000e+00> : vector<7x84xf32>
    %555 = tpu.matmul %525, %554, %cst_549 {dimension_numbers = #tpu.dot_dimension_numbers<[1], [0], [0], [1], [0, 0, 1, 1], [], []>} : vector<7x96xbf16>, vector<96x84xbf16>, vector<7x84xf32> -> vector<7x84xf32>
    %c1_550 = arith.constant 1 : index
    %c1_551 = arith.constant 1 : index
    %c0_552 = arith.constant 0 : index
    %c0_553 = arith.constant 0 : index
    %556 = vector.load %arg1[%c1_550, %c1_551, %c0_552, %c0_553] : memref<2x5x96x84xbf16, #tpu.memory_space<vmem>>, vector<1x1x96x84xbf16>
    %557 = vector.shape_cast %556 : vector<1x1x96x84xbf16> to vector<96x84xbf16>
    %cst_554 = arith.constant dense<0.000000e+00> : vector<7x84xf32>
    %558 = tpu.matmul %527, %557, %cst_554 {dimension_numbers = #tpu.dot_dimension_numbers<[1], [0], [0], [1], [0, 0, 1, 1], [], []>} : vector<7x96xbf16>, vector<96x84xbf16>, vector<7x84xf32> -> vector<7x84xf32>
    %559 = arith.addf %555, %558 : vector<7x84xf32>
    %c1_555 = arith.constant 1 : index
    %c2_556 = arith.constant 2 : index
    %c0_557 = arith.constant 0 : index
    %c0_558 = arith.constant 0 : index
    %560 = vector.load %arg1[%c1_555, %c2_556, %c0_557, %c0_558] : memref<2x5x96x84xbf16, #tpu.memory_space<vmem>>, vector<1x1x96x84xbf16>
    %561 = vector.shape_cast %560 : vector<1x1x96x84xbf16> to vector<96x84xbf16>
    %cst_559 = arith.constant dense<0.000000e+00> : vector<7x84xf32>
    %562 = tpu.matmul %529, %561, %cst_559 {dimension_numbers = #tpu.dot_dimension_numbers<[1], [0], [0], [1], [0, 0, 1, 1], [], []>} : vector<7x96xbf16>, vector<96x84xbf16>, vector<7x84xf32> -> vector<7x84xf32>
    %563 = arith.addf %559, %562 : vector<7x84xf32>
    %c1_560 = arith.constant 1 : index
    %c3_561 = arith.constant 3 : index
    %c0_562 = arith.constant 0 : index
    %c0_563 = arith.constant 0 : index
    %564 = vector.load %arg1[%c1_560, %c3_561, %c0_562, %c0_563] : memref<2x5x96x84xbf16, #tpu.memory_space<vmem>>, vector<1x1x96x84xbf16>
    %565 = vector.shape_cast %564 : vector<1x1x96x84xbf16> to vector<96x84xbf16>
    %cst_564 = arith.constant dense<0.000000e+00> : vector<7x84xf32>
    %566 = tpu.matmul %531, %565, %cst_564 {dimension_numbers = #tpu.dot_dimension_numbers<[1], [0], [0], [1], [0, 0, 1, 1], [], []>} : vector<7x96xbf16>, vector<96x84xbf16>, vector<7x84xf32> -> vector<7x84xf32>
    %567 = arith.addf %563, %566 : vector<7x84xf32>
    %c1_565 = arith.constant 1 : index
    %c4_566 = arith.constant 4 : index
    %c0_567 = arith.constant 0 : index
    %c0_568 = arith.constant 0 : index
    %568 = vector.load %arg1[%c1_565, %c4_566, %c0_567, %c0_568] : memref<2x5x96x84xbf16, #tpu.memory_space<vmem>>, vector<1x1x96x84xbf16>
    %569 = vector.shape_cast %568 : vector<1x1x96x84xbf16> to vector<96x84xbf16>
    %cst_569 = arith.constant dense<0.000000e+00> : vector<7x84xf32>
    %570 = tpu.matmul %533, %569, %cst_569 {dimension_numbers = #tpu.dot_dimension_numbers<[1], [0], [0], [1], [0, 0, 1, 1], [], []>} : vector<7x96xbf16>, vector<96x84xbf16>, vector<7x84xf32> -> vector<7x84xf32>
    %571 = arith.addf %567, %570 : vector<7x84xf32>
    %572 = arith.maximumf %504, %523 : vector<7x84xf32>
    %573 = arith.maximumf %552, %571 : vector<7x84xf32>
    %574 = arith.maximumf %572, %573 : vector<7x84xf32>
    %575 = vector.broadcast %0 : vector<1x84xf32> to vector<7x84xf32>
    %576 = arith.addf %574, %575 : vector<7x84xf32>
    %cst_570 = arith.constant 0.000000e+00 : f32
    %577 = vector.broadcast %cst_570 : f32 to vector<7x84xf32>
    %578 = arith.maximumf %576, %577 : vector<7x84xf32>
    %579 = vector.extract_strided_slice %475 {offsets = [0, 0], sizes = [5, 84], strides = [1, 1]} : vector<7x84xf32> to vector<5x84xf32>
    %580 = arith.truncf %579 : vector<5x84xf32> to vector<5x84xbf16>
    %581 = vector.extract_strided_slice %578 {offsets = [0, 0], sizes = [5, 84], strides = [1, 1]} : vector<7x84xf32> to vector<5x84xf32>
    %582 = arith.truncf %581 : vector<5x84xf32> to vector<5x84xbf16>
    %583 = vector.extract_strided_slice %475 {offsets = [1, 0], sizes = [5, 84], strides = [1, 1]} : vector<7x84xf32> to vector<5x84xf32>
    %584 = arith.truncf %583 : vector<5x84xf32> to vector<5x84xbf16>
    %585 = vector.extract_strided_slice %578 {offsets = [1, 0], sizes = [5, 84], strides = [1, 1]} : vector<7x84xf32> to vector<5x84xf32>
    %586 = arith.truncf %585 : vector<5x84xf32> to vector<5x84xbf16>
    %587 = vector.extract_strided_slice %475 {offsets = [2, 0], sizes = [5, 84], strides = [1, 1]} : vector<7x84xf32> to vector<5x84xf32>
    %588 = arith.truncf %587 : vector<5x84xf32> to vector<5x84xbf16>
    %c0_571 = arith.constant 0 : index
    %c0_572 = arith.constant 0 : index
    %c0_573 = arith.constant 0 : index
    %c0_574 = arith.constant 0 : index
    %589 = vector.load %arg3[%c0_571, %c0_572, %c0_573, %c0_574] : memref<2x5x84x80xbf16, #tpu.memory_space<vmem>>, vector<1x1x84x80xbf16>
    %590 = vector.shape_cast %589 : vector<1x1x84x80xbf16> to vector<84x80xbf16>
    %cst_575 = arith.constant dense<0.000000e+00> : vector<5x80xf32>
    %591 = tpu.matmul %580, %590, %cst_575 {dimension_numbers = #tpu.dot_dimension_numbers<[1], [0], [0], [1], [0, 0, 1, 1], [], []>} : vector<5x84xbf16>, vector<84x80xbf16>, vector<5x80xf32> -> vector<5x80xf32>
    %c0_576 = arith.constant 0 : index
    %c1_577 = arith.constant 1 : index
    %c0_578 = arith.constant 0 : index
    %c0_579 = arith.constant 0 : index
    %592 = vector.load %arg3[%c0_576, %c1_577, %c0_578, %c0_579] : memref<2x5x84x80xbf16, #tpu.memory_space<vmem>>, vector<1x1x84x80xbf16>
    %593 = vector.shape_cast %592 : vector<1x1x84x80xbf16> to vector<84x80xbf16>
    %cst_580 = arith.constant dense<0.000000e+00> : vector<5x80xf32>
    %594 = tpu.matmul %582, %593, %cst_580 {dimension_numbers = #tpu.dot_dimension_numbers<[1], [0], [0], [1], [0, 0, 1, 1], [], []>} : vector<5x84xbf16>, vector<84x80xbf16>, vector<5x80xf32> -> vector<5x80xf32>
    %595 = arith.addf %591, %594 : vector<5x80xf32>
    %c0_581 = arith.constant 0 : index
    %c2_582 = arith.constant 2 : index
    %c0_583 = arith.constant 0 : index
    %c0_584 = arith.constant 0 : index
    %596 = vector.load %arg3[%c0_581, %c2_582, %c0_583, %c0_584] : memref<2x5x84x80xbf16, #tpu.memory_space<vmem>>, vector<1x1x84x80xbf16>
    %597 = vector.shape_cast %596 : vector<1x1x84x80xbf16> to vector<84x80xbf16>
    %cst_585 = arith.constant dense<0.000000e+00> : vector<5x80xf32>
    %598 = tpu.matmul %584, %597, %cst_585 {dimension_numbers = #tpu.dot_dimension_numbers<[1], [0], [0], [1], [0, 0, 1, 1], [], []>} : vector<5x84xbf16>, vector<84x80xbf16>, vector<5x80xf32> -> vector<5x80xf32>
    %599 = arith.addf %595, %598 : vector<5x80xf32>
    %c0_586 = arith.constant 0 : index
    %c3_587 = arith.constant 3 : index
    %c0_588 = arith.constant 0 : index
    %c0_589 = arith.constant 0 : index
    %600 = vector.load %arg3[%c0_586, %c3_587, %c0_588, %c0_589] : memref<2x5x84x80xbf16, #tpu.memory_space<vmem>>, vector<1x1x84x80xbf16>
    %601 = vector.shape_cast %600 : vector<1x1x84x80xbf16> to vector<84x80xbf16>
    %cst_590 = arith.constant dense<0.000000e+00> : vector<5x80xf32>
    %602 = tpu.matmul %586, %601, %cst_590 {dimension_numbers = #tpu.dot_dimension_numbers<[1], [0], [0], [1], [0, 0, 1, 1], [], []>} : vector<5x84xbf16>, vector<84x80xbf16>, vector<5x80xf32> -> vector<5x80xf32>
    %603 = arith.addf %599, %602 : vector<5x80xf32>
    %c0_591 = arith.constant 0 : index
    %c4_592 = arith.constant 4 : index
    %c0_593 = arith.constant 0 : index
    %c0_594 = arith.constant 0 : index
    %604 = vector.load %arg3[%c0_591, %c4_592, %c0_593, %c0_594] : memref<2x5x84x80xbf16, #tpu.memory_space<vmem>>, vector<1x1x84x80xbf16>
    %605 = vector.shape_cast %604 : vector<1x1x84x80xbf16> to vector<84x80xbf16>
    %cst_595 = arith.constant dense<0.000000e+00> : vector<5x80xf32>
    %606 = tpu.matmul %588, %605, %cst_595 {dimension_numbers = #tpu.dot_dimension_numbers<[1], [0], [0], [1], [0, 0, 1, 1], [], []>} : vector<5x84xbf16>, vector<84x80xbf16>, vector<5x80xf32> -> vector<5x80xf32>
    %607 = arith.addf %603, %606 : vector<5x80xf32>
    %c1_596 = arith.constant 1 : index
    %c0_597 = arith.constant 0 : index
    %c0_598 = arith.constant 0 : index
    %c0_599 = arith.constant 0 : index
    %608 = vector.load %arg3[%c1_596, %c0_597, %c0_598, %c0_599] : memref<2x5x84x80xbf16, #tpu.memory_space<vmem>>, vector<1x1x84x80xbf16>
    %609 = vector.shape_cast %608 : vector<1x1x84x80xbf16> to vector<84x80xbf16>
    %cst_600 = arith.constant dense<0.000000e+00> : vector<5x80xf32>
    %610 = tpu.matmul %580, %609, %cst_600 {dimension_numbers = #tpu.dot_dimension_numbers<[1], [0], [0], [1], [0, 0, 1, 1], [], []>} : vector<5x84xbf16>, vector<84x80xbf16>, vector<5x80xf32> -> vector<5x80xf32>
    %c1_601 = arith.constant 1 : index
    %c1_602 = arith.constant 1 : index
    %c0_603 = arith.constant 0 : index
    %c0_604 = arith.constant 0 : index
    %611 = vector.load %arg3[%c1_601, %c1_602, %c0_603, %c0_604] : memref<2x5x84x80xbf16, #tpu.memory_space<vmem>>, vector<1x1x84x80xbf16>
    %612 = vector.shape_cast %611 : vector<1x1x84x80xbf16> to vector<84x80xbf16>
    %cst_605 = arith.constant dense<0.000000e+00> : vector<5x80xf32>
    %613 = tpu.matmul %582, %612, %cst_605 {dimension_numbers = #tpu.dot_dimension_numbers<[1], [0], [0], [1], [0, 0, 1, 1], [], []>} : vector<5x84xbf16>, vector<84x80xbf16>, vector<5x80xf32> -> vector<5x80xf32>
    %614 = arith.addf %610, %613 : vector<5x80xf32>
    %c1_606 = arith.constant 1 : index
    %c2_607 = arith.constant 2 : index
    %c0_608 = arith.constant 0 : index
    %c0_609 = arith.constant 0 : index
    %615 = vector.load %arg3[%c1_606, %c2_607, %c0_608, %c0_609] : memref<2x5x84x80xbf16, #tpu.memory_space<vmem>>, vector<1x1x84x80xbf16>
    %616 = vector.shape_cast %615 : vector<1x1x84x80xbf16> to vector<84x80xbf16>
    %cst_610 = arith.constant dense<0.000000e+00> : vector<5x80xf32>
    %617 = tpu.matmul %584, %616, %cst_610 {dimension_numbers = #tpu.dot_dimension_numbers<[1], [0], [0], [1], [0, 0, 1, 1], [], []>} : vector<5x84xbf16>, vector<84x80xbf16>, vector<5x80xf32> -> vector<5x80xf32>
    %618 = arith.addf %614, %617 : vector<5x80xf32>
    %c1_611 = arith.constant 1 : index
    %c3_612 = arith.constant 3 : index
    %c0_613 = arith.constant 0 : index
    %c0_614 = arith.constant 0 : index
    %619 = vector.load %arg3[%c1_611, %c3_612, %c0_613, %c0_614] : memref<2x5x84x80xbf16, #tpu.memory_space<vmem>>, vector<1x1x84x80xbf16>
    %620 = vector.shape_cast %619 : vector<1x1x84x80xbf16> to vector<84x80xbf16>
    %cst_615 = arith.constant dense<0.000000e+00> : vector<5x80xf32>
    %621 = tpu.matmul %586, %620, %cst_615 {dimension_numbers = #tpu.dot_dimension_numbers<[1], [0], [0], [1], [0, 0, 1, 1], [], []>} : vector<5x84xbf16>, vector<84x80xbf16>, vector<5x80xf32> -> vector<5x80xf32>
    %622 = arith.addf %618, %621 : vector<5x80xf32>
    %c1_616 = arith.constant 1 : index
    %c4_617 = arith.constant 4 : index
    %c0_618 = arith.constant 0 : index
    %c0_619 = arith.constant 0 : index
    %623 = vector.load %arg3[%c1_616, %c4_617, %c0_618, %c0_619] : memref<2x5x84x80xbf16, #tpu.memory_space<vmem>>, vector<1x1x84x80xbf16>
    %624 = vector.shape_cast %623 : vector<1x1x84x80xbf16> to vector<84x80xbf16>
    %cst_620 = arith.constant dense<0.000000e+00> : vector<5x80xf32>
    %625 = tpu.matmul %588, %624, %cst_620 {dimension_numbers = #tpu.dot_dimension_numbers<[1], [0], [0], [1], [0, 0, 1, 1], [], []>} : vector<5x84xbf16>, vector<84x80xbf16>, vector<5x80xf32> -> vector<5x80xf32>
    %626 = arith.addf %622, %625 : vector<5x80xf32>
    %627 = vector.extract_strided_slice %578 {offsets = [0, 0], sizes = [5, 84], strides = [1, 1]} : vector<7x84xf32> to vector<5x84xf32>
    %628 = arith.truncf %627 : vector<5x84xf32> to vector<5x84xbf16>
    %629 = vector.extract_strided_slice %475 {offsets = [1, 0], sizes = [5, 84], strides = [1, 1]} : vector<7x84xf32> to vector<5x84xf32>
    %630 = arith.truncf %629 : vector<5x84xf32> to vector<5x84xbf16>
    %631 = vector.extract_strided_slice %578 {offsets = [1, 0], sizes = [5, 84], strides = [1, 1]} : vector<7x84xf32> to vector<5x84xf32>
    %632 = arith.truncf %631 : vector<5x84xf32> to vector<5x84xbf16>
    %633 = vector.extract_strided_slice %475 {offsets = [2, 0], sizes = [5, 84], strides = [1, 1]} : vector<7x84xf32> to vector<5x84xf32>
    %634 = arith.truncf %633 : vector<5x84xf32> to vector<5x84xbf16>
    %635 = vector.extract_strided_slice %578 {offsets = [2, 0], sizes = [5, 84], strides = [1, 1]} : vector<7x84xf32> to vector<5x84xf32>
    %636 = arith.truncf %635 : vector<5x84xf32> to vector<5x84xbf16>
    %c0_621 = arith.constant 0 : index
    %c0_622 = arith.constant 0 : index
    %c0_623 = arith.constant 0 : index
    %c0_624 = arith.constant 0 : index
    %637 = vector.load %arg3[%c0_621, %c0_622, %c0_623, %c0_624] : memref<2x5x84x80xbf16, #tpu.memory_space<vmem>>, vector<1x1x84x80xbf16>
    %638 = vector.shape_cast %637 : vector<1x1x84x80xbf16> to vector<84x80xbf16>
    %cst_625 = arith.constant dense<0.000000e+00> : vector<5x80xf32>
    %639 = tpu.matmul %628, %638, %cst_625 {dimension_numbers = #tpu.dot_dimension_numbers<[1], [0], [0], [1], [0, 0, 1, 1], [], []>} : vector<5x84xbf16>, vector<84x80xbf16>, vector<5x80xf32> -> vector<5x80xf32>
    %c0_626 = arith.constant 0 : index
    %c1_627 = arith.constant 1 : index
    %c0_628 = arith.constant 0 : index
    %c0_629 = arith.constant 0 : index
    %640 = vector.load %arg3[%c0_626, %c1_627, %c0_628, %c0_629] : memref<2x5x84x80xbf16, #tpu.memory_space<vmem>>, vector<1x1x84x80xbf16>
    %641 = vector.shape_cast %640 : vector<1x1x84x80xbf16> to vector<84x80xbf16>
    %cst_630 = arith.constant dense<0.000000e+00> : vector<5x80xf32>
    %642 = tpu.matmul %630, %641, %cst_630 {dimension_numbers = #tpu.dot_dimension_numbers<[1], [0], [0], [1], [0, 0, 1, 1], [], []>} : vector<5x84xbf16>, vector<84x80xbf16>, vector<5x80xf32> -> vector<5x80xf32>
    %643 = arith.addf %639, %642 : vector<5x80xf32>
    %c0_631 = arith.constant 0 : index
    %c2_632 = arith.constant 2 : index
    %c0_633 = arith.constant 0 : index
    %c0_634 = arith.constant 0 : index
    %644 = vector.load %arg3[%c0_631, %c2_632, %c0_633, %c0_634] : memref<2x5x84x80xbf16, #tpu.memory_space<vmem>>, vector<1x1x84x80xbf16>
    %645 = vector.shape_cast %644 : vector<1x1x84x80xbf16> to vector<84x80xbf16>
    %cst_635 = arith.constant dense<0.000000e+00> : vector<5x80xf32>
    %646 = tpu.matmul %632, %645, %cst_635 {dimension_numbers = #tpu.dot_dimension_numbers<[1], [0], [0], [1], [0, 0, 1, 1], [], []>} : vector<5x84xbf16>, vector<84x80xbf16>, vector<5x80xf32> -> vector<5x80xf32>
    %647 = arith.addf %643, %646 : vector<5x80xf32>
    %c0_636 = arith.constant 0 : index
    %c3_637 = arith.constant 3 : index
    %c0_638 = arith.constant 0 : index
    %c0_639 = arith.constant 0 : index
    %648 = vector.load %arg3[%c0_636, %c3_637, %c0_638, %c0_639] : memref<2x5x84x80xbf16, #tpu.memory_space<vmem>>, vector<1x1x84x80xbf16>
    %649 = vector.shape_cast %648 : vector<1x1x84x80xbf16> to vector<84x80xbf16>
    %cst_640 = arith.constant dense<0.000000e+00> : vector<5x80xf32>
    %650 = tpu.matmul %634, %649, %cst_640 {dimension_numbers = #tpu.dot_dimension_numbers<[1], [0], [0], [1], [0, 0, 1, 1], [], []>} : vector<5x84xbf16>, vector<84x80xbf16>, vector<5x80xf32> -> vector<5x80xf32>
    %651 = arith.addf %647, %650 : vector<5x80xf32>
    %c0_641 = arith.constant 0 : index
    %c4_642 = arith.constant 4 : index
    %c0_643 = arith.constant 0 : index
    %c0_644 = arith.constant 0 : index
    %652 = vector.load %arg3[%c0_641, %c4_642, %c0_643, %c0_644] : memref<2x5x84x80xbf16, #tpu.memory_space<vmem>>, vector<1x1x84x80xbf16>
    %653 = vector.shape_cast %652 : vector<1x1x84x80xbf16> to vector<84x80xbf16>
    %cst_645 = arith.constant dense<0.000000e+00> : vector<5x80xf32>
    %654 = tpu.matmul %636, %653, %cst_645 {dimension_numbers = #tpu.dot_dimension_numbers<[1], [0], [0], [1], [0, 0, 1, 1], [], []>} : vector<5x84xbf16>, vector<84x80xbf16>, vector<5x80xf32> -> vector<5x80xf32>
    %655 = arith.addf %651, %654 : vector<5x80xf32>
    %c1_646 = arith.constant 1 : index
    %c0_647 = arith.constant 0 : index
    %c0_648 = arith.constant 0 : index
    %c0_649 = arith.constant 0 : index
    %656 = vector.load %arg3[%c1_646, %c0_647, %c0_648, %c0_649] : memref<2x5x84x80xbf16, #tpu.memory_space<vmem>>, vector<1x1x84x80xbf16>
    %657 = vector.shape_cast %656 : vector<1x1x84x80xbf16> to vector<84x80xbf16>
    %cst_650 = arith.constant dense<0.000000e+00> : vector<5x80xf32>
    %658 = tpu.matmul %628, %657, %cst_650 {dimension_numbers = #tpu.dot_dimension_numbers<[1], [0], [0], [1], [0, 0, 1, 1], [], []>} : vector<5x84xbf16>, vector<84x80xbf16>, vector<5x80xf32> -> vector<5x80xf32>
    %c1_651 = arith.constant 1 : index
    %c1_652 = arith.constant 1 : index
    %c0_653 = arith.constant 0 : index
    %c0_654 = arith.constant 0 : index
    %659 = vector.load %arg3[%c1_651, %c1_652, %c0_653, %c0_654] : memref<2x5x84x80xbf16, #tpu.memory_space<vmem>>, vector<1x1x84x80xbf16>
    %660 = vector.shape_cast %659 : vector<1x1x84x80xbf16> to vector<84x80xbf16>
    %cst_655 = arith.constant dense<0.000000e+00> : vector<5x80xf32>
    %661 = tpu.matmul %630, %660, %cst_655 {dimension_numbers = #tpu.dot_dimension_numbers<[1], [0], [0], [1], [0, 0, 1, 1], [], []>} : vector<5x84xbf16>, vector<84x80xbf16>, vector<5x80xf32> -> vector<5x80xf32>
    %662 = arith.addf %658, %661 : vector<5x80xf32>
    %c1_656 = arith.constant 1 : index
    %c2_657 = arith.constant 2 : index
    %c0_658 = arith.constant 0 : index
    %c0_659 = arith.constant 0 : index
    %663 = vector.load %arg3[%c1_656, %c2_657, %c0_658, %c0_659] : memref<2x5x84x80xbf16, #tpu.memory_space<vmem>>, vector<1x1x84x80xbf16>
    %664 = vector.shape_cast %663 : vector<1x1x84x80xbf16> to vector<84x80xbf16>
    %cst_660 = arith.constant dense<0.000000e+00> : vector<5x80xf32>
    %665 = tpu.matmul %632, %664, %cst_660 {dimension_numbers = #tpu.dot_dimension_numbers<[1], [0], [0], [1], [0, 0, 1, 1], [], []>} : vector<5x84xbf16>, vector<84x80xbf16>, vector<5x80xf32> -> vector<5x80xf32>
    %666 = arith.addf %662, %665 : vector<5x80xf32>
    %c1_661 = arith.constant 1 : index
    %c3_662 = arith.constant 3 : index
    %c0_663 = arith.constant 0 : index
    %c0_664 = arith.constant 0 : index
    %667 = vector.load %arg3[%c1_661, %c3_662, %c0_663, %c0_664] : memref<2x5x84x80xbf16, #tpu.memory_space<vmem>>, vector<1x1x84x80xbf16>
    %668 = vector.shape_cast %667 : vector<1x1x84x80xbf16> to vector<84x80xbf16>
    %cst_665 = arith.constant dense<0.000000e+00> : vector<5x80xf32>
    %669 = tpu.matmul %634, %668, %cst_665 {dimension_numbers = #tpu.dot_dimension_numbers<[1], [0], [0], [1], [0, 0, 1, 1], [], []>} : vector<5x84xbf16>, vector<84x80xbf16>, vector<5x80xf32> -> vector<5x80xf32>
    %670 = arith.addf %666, %669 : vector<5x80xf32>
    %c1_666 = arith.constant 1 : index
    %c4_667 = arith.constant 4 : index
    %c0_668 = arith.constant 0 : index
    %c0_669 = arith.constant 0 : index
    %671 = vector.load %arg3[%c1_666, %c4_667, %c0_668, %c0_669] : memref<2x5x84x80xbf16, #tpu.memory_space<vmem>>, vector<1x1x84x80xbf16>
    %672 = vector.shape_cast %671 : vector<1x1x84x80xbf16> to vector<84x80xbf16>
    %cst_670 = arith.constant dense<0.000000e+00> : vector<5x80xf32>
    %673 = tpu.matmul %636, %672, %cst_670 {dimension_numbers = #tpu.dot_dimension_numbers<[1], [0], [0], [1], [0, 0, 1, 1], [], []>} : vector<5x84xbf16>, vector<84x80xbf16>, vector<5x80xf32> -> vector<5x80xf32>
    %674 = arith.addf %670, %673 : vector<5x80xf32>
    %675 = arith.maximumf %607, %626 : vector<5x80xf32>
    %676 = arith.maximumf %655, %674 : vector<5x80xf32>
    %677 = arith.maximumf %675, %676 : vector<5x80xf32>
    %678 = vector.broadcast %1 : vector<1x80xf32> to vector<5x80xf32>
    %679 = arith.addf %677, %678 : vector<5x80xf32>
    %cst_671 = arith.constant 0.000000e+00 : f32
    %680 = vector.broadcast %cst_671 : f32 to vector<5x80xf32>
    %681 = arith.maximumf %679, %680 : vector<5x80xf32>
    %682 = vector.extract_strided_slice %681 {offsets = [0, 0], sizes = [1, 80], strides = [1, 1]} : vector<5x80xf32> to vector<1x80xf32>
    %683 = arith.truncf %682 : vector<1x80xf32> to vector<1x80xbf16>
    %c0_672 = arith.constant 0 : index
    %c0_673 = arith.constant 0 : index
    %c0_674 = arith.constant 0 : index
    %684 = vector.load %arg5[%c0_672, %c0_673, %c0_674] : memref<5x80x120xbf16, #tpu.memory_space<vmem>>, vector<1x80x120xbf16>
    %685 = vector.shape_cast %684 : vector<1x80x120xbf16> to vector<80x120xbf16>
    %cst_675 = arith.constant dense<0.000000e+00> : vector<1x120xf32>
    %686 = tpu.matmul %683, %685, %cst_675 {dimension_numbers = #tpu.dot_dimension_numbers<[1], [0], [0], [1], [0, 0, 1, 1], [], []>} : vector<1x80xbf16>, vector<80x120xbf16>, vector<1x120xf32> -> vector<1x120xf32>
    %687 = vector.extract_strided_slice %681 {offsets = [1, 0], sizes = [1, 80], strides = [1, 1]} : vector<5x80xf32> to vector<1x80xf32>
    %688 = arith.truncf %687 : vector<1x80xf32> to vector<1x80xbf16>
    %c1_676 = arith.constant 1 : index
    %c0_677 = arith.constant 0 : index
    %c0_678 = arith.constant 0 : index
    %689 = vector.load %arg5[%c1_676, %c0_677, %c0_678] : memref<5x80x120xbf16, #tpu.memory_space<vmem>>, vector<1x80x120xbf16>
    %690 = vector.shape_cast %689 : vector<1x80x120xbf16> to vector<80x120xbf16>
    %cst_679 = arith.constant dense<0.000000e+00> : vector<1x120xf32>
    %691 = tpu.matmul %688, %690, %cst_679 {dimension_numbers = #tpu.dot_dimension_numbers<[1], [0], [0], [1], [0, 0, 1, 1], [], []>} : vector<1x80xbf16>, vector<80x120xbf16>, vector<1x120xf32> -> vector<1x120xf32>
    %692 = arith.addf %686, %691 : vector<1x120xf32>
    %693 = vector.extract_strided_slice %681 {offsets = [2, 0], sizes = [1, 80], strides = [1, 1]} : vector<5x80xf32> to vector<1x80xf32>
    %694 = arith.truncf %693 : vector<1x80xf32> to vector<1x80xbf16>
    %c2_680 = arith.constant 2 : index
    %c0_681 = arith.constant 0 : index
    %c0_682 = arith.constant 0 : index
    %695 = vector.load %arg5[%c2_680, %c0_681, %c0_682] : memref<5x80x120xbf16, #tpu.memory_space<vmem>>, vector<1x80x120xbf16>
    %696 = vector.shape_cast %695 : vector<1x80x120xbf16> to vector<80x120xbf16>
    %cst_683 = arith.constant dense<0.000000e+00> : vector<1x120xf32>
    %697 = tpu.matmul %694, %696, %cst_683 {dimension_numbers = #tpu.dot_dimension_numbers<[1], [0], [0], [1], [0, 0, 1, 1], [], []>} : vector<1x80xbf16>, vector<80x120xbf16>, vector<1x120xf32> -> vector<1x120xf32>
    %698 = arith.addf %692, %697 : vector<1x120xf32>
    %699 = vector.extract_strided_slice %681 {offsets = [3, 0], sizes = [1, 80], strides = [1, 1]} : vector<5x80xf32> to vector<1x80xf32>
    %700 = arith.truncf %699 : vector<1x80xf32> to vector<1x80xbf16>
    %c3_684 = arith.constant 3 : index
    %c0_685 = arith.constant 0 : index
    %c0_686 = arith.constant 0 : index
    %701 = vector.load %arg5[%c3_684, %c0_685, %c0_686] : memref<5x80x120xbf16, #tpu.memory_space<vmem>>, vector<1x80x120xbf16>
    %702 = vector.shape_cast %701 : vector<1x80x120xbf16> to vector<80x120xbf16>
    %cst_687 = arith.constant dense<0.000000e+00> : vector<1x120xf32>
    %703 = tpu.matmul %700, %702, %cst_687 {dimension_numbers = #tpu.dot_dimension_numbers<[1], [0], [0], [1], [0, 0, 1, 1], [], []>} : vector<1x80xbf16>, vector<80x120xbf16>, vector<1x120xf32> -> vector<1x120xf32>
    %704 = arith.addf %698, %703 : vector<1x120xf32>
    %705 = vector.extract_strided_slice %681 {offsets = [4, 0], sizes = [1, 80], strides = [1, 1]} : vector<5x80xf32> to vector<1x80xf32>
    %706 = arith.truncf %705 : vector<1x80xf32> to vector<1x80xbf16>
    %c4_688 = arith.constant 4 : index
    %c0_689 = arith.constant 0 : index
    %c0_690 = arith.constant 0 : index
    %707 = vector.load %arg5[%c4_688, %c0_689, %c0_690] : memref<5x80x120xbf16, #tpu.memory_space<vmem>>, vector<1x80x120xbf16>
    %708 = vector.shape_cast %707 : vector<1x80x120xbf16> to vector<80x120xbf16>
    %cst_691 = arith.constant dense<0.000000e+00> : vector<1x120xf32>
    %709 = tpu.matmul %706, %708, %cst_691 {dimension_numbers = #tpu.dot_dimension_numbers<[1], [0], [0], [1], [0, 0, 1, 1], [], []>} : vector<1x80xbf16>, vector<80x120xbf16>, vector<1x120xf32> -> vector<1x120xf32>
    %710 = arith.addf %704, %709 : vector<1x120xf32>
    %711 = arith.addf %710, %2 : vector<1x120xf32>
    %cst_692 = arith.constant 0.000000e+00 : f32
    %712 = vector.broadcast %cst_692 : f32 to vector<1x120xf32>
    %713 = arith.maximumf %711, %712 : vector<1x120xf32>
    %714 = arith.truncf %713 : vector<1x120xf32> to vector<1x120xbf16>
    %c0_693 = arith.constant 0 : index
    %c0_694 = arith.constant 0 : index
    %715 = vector.load %arg7[%c0_693, %c0_694] : memref<120x84xbf16, #tpu.memory_space<vmem>>, vector<120x84xbf16>
    %cst_695 = arith.constant dense<0.000000e+00> : vector<1x84xf32>
    %716 = tpu.matmul %714, %715, %cst_695 {dimension_numbers = #tpu.dot_dimension_numbers<[1], [0], [0], [1], [0, 0, 1, 1], [], []>} : vector<1x120xbf16>, vector<120x84xbf16>, vector<1x84xf32> -> vector<1x84xf32>
    %717 = arith.addf %716, %3 : vector<1x84xf32>
    %cst_696 = arith.constant 0.000000e+00 : f32
    %718 = vector.broadcast %cst_696 : f32 to vector<1x84xf32>
    %719 = arith.maximumf %717, %718 : vector<1x84xf32>
    %720 = arith.truncf %719 : vector<1x84xf32> to vector<1x84xbf16>
    %c0_697 = arith.constant 0 : index
    %c0_698 = arith.constant 0 : index
    %721 = vector.load %arg9[%c0_697, %c0_698] : memref<84x10xbf16, #tpu.memory_space<vmem>>, vector<84x10xbf16>
    %cst_699 = arith.constant dense<0.000000e+00> : vector<1x10xf32>
    %722 = tpu.matmul %720, %721, %cst_699 {dimension_numbers = #tpu.dot_dimension_numbers<[1], [0], [0], [1], [0, 0, 1, 1], [], []>} : vector<1x84xbf16>, vector<84x10xbf16>, vector<1x10xf32> -> vector<1x10xf32>
    %723 = arith.addf %722, %4 : vector<1x10xf32>
    %c1_700 = arith.constant 1 : index
    %c0_701 = arith.constant 0 : index
    %724 = vector.load %arg11[%c1_700, %c0_701] : memref<2x10xf32, #tpu.memory_space<vmem>>, vector<1x10xf32>
    tpu.vector_store %arg11[%c1_700, %c0_701], %723 {strides = array<i32>} : memref<2x10xf32, #tpu.memory_space<vmem>>, vector<1x10xf32>,
    return
  }
}

</mosaic_0001>

<bundles_post_ra>
// kernel: net_forward.1
= control target key start
LH: loop header
LB: loop body
LE: loop exit
PB: predicated region body
PF: predicated region fallthrough
CT: control target
= control target key end

     0   :  { %v13177_v1 = vmov 0.0   ;;  %vm13178_vm0 = vmmov 0   ;;  %vm117_vm1 = vcmask 785408   ;;  %s17076_s0 = inlined_call_operand.vmem [shape: f32[4,2,8,96], index: 0, kind: input, shape index: {}]   ;;  %s17077_s1 = inlined_call_operand.vmem [shape: bf16[2,5,96,84], index: 1, kind: input, shape index: {}]   ;;  %s17078_s2 = inlined_call_operand.vmem [shape: f32[1,84], index: 2, kind: input, shape index: {}]   ;;  %s17079_s3 = inlined_call_operand.vmem [shape: bf16[2,5,84,80], index: 3, kind: input, shape index: {}]   ;;  %s17080_s4 = inlined_call_operand.vmem [shape: f32[1,80], index: 4, kind: input, shape index: {}]   ;;  %s17081_s5 = inlined_call_operand.vmem [shape: bf16[5,80,120], index: 5, kind: input, shape index: {}]   ;;  %s17082_s6 = inlined_call_operand.vmem [shape: f32[1,120], index: 6, kind: input, shape index: {}]   ;;  %s17083_s7 = inlined_call_operand.vmem [shape: bf16[120,84], index: 7, kind: input, shape index: {}]   ;;  %s17084_s8 = inlined_call_operand.vmem [shape: f32[1,84], index: 8, kind: input, shape index: {}]   ;;  %s17085_s9 = inlined_call_operand.vmem [shape: bf16[84,10], index: 9, kind: input, shape index: {}]   ;;  %s17086_s10 = inlined_call_operand.vmem [shape: f32[1,10], index: 10, kind: input, shape index: {}]   ;;  %s17087_s11 = inlined_call_operand.hbm [shape: f32[2,10], index: 11, kind: output, shape index: {}]  }
   0x1   :  { %v12753_v0 = vld [vmem:[%s17077_s1 + $0x30] sm:$0xff]   ;;  %10234 = vmatprep.subr.bf16.mxu0 %v13177_v1  ;;  %10314 = vmatprep.subr.bf16.mxu1 %v13177_v1  ;;  %v12754_v2 = vld [vmem:[%s17077_s1 + $0x120] sm:$0xff]   ;;  %v12755_v3 = vld [vmem:[%s17077_s1 + $0x38] sm:$0xff]  }
   0x2   :  { %10235 = vmatpush3.bf16.msra.mxu0 %v12753_v0  ;;  %10246 = vmatprep.mubr.msk.bf16.mxu0 %vm13178_vm0, %v13177_v1  ;;  %v12756_v4 = vld [vmem:[%s17077_s1 + $0x128] sm:$0xff]   ;;  %v12757_v5 = vld [vmem:[%s17077_s1 + $0x40] sm:$0xff]   ;;  %v12758_v6 = vld [vmem:[%s17077_s1 + $0x130] sm:$0xff]  }
   0x3   :  { %10315 = vmatpush3.bf16.msra.mxu1 %v12754_v2  ;;  %10236 = vmatprep.subr.bf16.mxu0 %v13177_v1  ;;  %v12759_v7 = vld [vmem:[%s17077_s1 + $0x48] sm:$0xff]   ;;  %v12760_v8 = vld [vmem:[%s17077_s1 + $0x138] sm:$0xff]   ;;  %v12761_v9 = vld [vmem:[%s17077_s1 + $0x50] sm:$0xff]  }
   0x4   :  { %10316 = vmatprep.subr.bf16.mxu1 %v13177_v1  ;;  %10326 = vmatprep.mubr.msk.bf16.mxu1 %vm13178_vm0, %v13177_v1  ;;  %v12762_v10 = vld [vmem:[%s17077_s1 + $0x140] sm:$0xff]   ;;  %v12763_v11 = vld [vmem:[%s17077_s1 + $0x58] sm:$0xff]   ;;  %v8347_v12 = vld [vmem:[%s17076_s0 + $0x10] sm:$0xff] }
   0x5   :  { %v12764_v13 = vld [vmem:[%s17077_s1 + $0x148] sm:$0xff]   ;;  %v13295_v14 = vpack.c.bf16 %v8347_v12, %v8347_v12  ;;  %v12765_v15 = vld [vmem:[%s17077_s1] sm:$0xff]   ;;  %v12766_v16 = vld [vmem:[%s17077_s1 + $0xf0] sm:$0xff]  }
   0x6   :  { %10237 = vmatpush3.bf16.msra.mxu0 %v12755_v3  ;;  %v12767_v17 = vld [vmem:[%s17077_s1 + $0x8] sm:$0xff]   ;;  %v12768_v18 = vld [vmem:[%s17077_s1 + $0xf8] sm:$0xff]   ;;  %v12769_v19 = vld [vmem:[%s17077_s1 + $0x10] sm:$0xff]  }
   0x7   :  { %10317 = vmatpush3.bf16.msra.mxu1 %v12756_v4  ;;  %10238 = vmatprep.subr.bf16.mxu0 %v13177_v1  ;;  %v12770_v20 = vld [vmem:[%s17077_s1 + $0x100] sm:$0xff]   ;;  %v12771_v21 = vld [vmem:[%s17077_s1 + $0x18] sm:$0xff]   ;;  %v12772_v22 = vld [vmem:[%s17077_s1 + $0x108] sm:$0xff]  }
   0x8   :  { %10318 = vmatprep.subr.bf16.mxu1 %v13177_v1  ;;  %v12773_v23 = vld [vmem:[%s17077_s1 + $0x20] sm:$0xff]   ;;  %v12774_v24 = vld [vmem:[%s17077_s1 + $0x110] sm:$0xff]   ;;  %v12775_v25 = vld [vmem:[%s17077_s1 + $0x28] sm:$0xff]  }
   0x9   :  { %v45_v26 = vld [vmem:[%s17076_s0] sm:$0xff]  ;;  %v12776_v27 = vld [vmem:[%s17077_s1 + $0x118] sm:$0xff]   ;;  %v12778_v30 = vld [vmem:[%s17077_s1 + $0x150] sm:$0xff]  }
   0xa   :  { %10239 = vmatpush3.bf16.msra.mxu0 %v12757_v5  ;;  %v13356_v28 = vpack.c.bf16 %v45_v26, %v45_v26  ;;  %v12777_v29 = vld [vmem:[%s17077_s1 + $0x60] sm:$0xff]   ;;  %v12779_v31 = vld [vmem:[%s17077_s1 + $0x68] sm:$0xff]   ;;  %v12780_v32 = vld [vmem:[%s17077_s1 + $0x158] sm:$0xff]  }
   0xb   :  { %10319 = vmatpush3.bf16.msra.mxu1 %v12758_v6  ;;  %10240 = vmatprep.subr.bf16.mxu0 %v13177_v1  ;;  %v12781_v33 = vld [vmem:[%s17077_s1 + $0x70] sm:$0xff]   ;;  %v12782_v34 = vld [vmem:[%s17077_s1 + $0x160] sm:$0xff]   ;;  %v12783_v35 = vld [vmem:[%s17077_s1 + $0x78] sm:$0xff]  }
   0xc   :  { %10320 = vmatprep.subr.bf16.mxu1 %v13177_v1  ;;  %v12784_v36 = vld [vmem:[%s17077_s1 + $0x168] sm:$0xff]   ;;  %v12785_v37 = vld [vmem:[%s17077_s1 + $0x80] sm:$0xff]   ;;  %v441_v38 = vshll.u32 %v13356_v28, 16  ;;  %v12786_v39 = vld [vmem:[%s17077_s1 + $0x170] sm:$0xff]   ;;  %v439_v3 = vshrl.u32 %v13356_v28, 16 }
   0xd   :  { %v12787_v40 = vld [vmem:[%s17077_s1 + $0x88] sm:$0xff]   ;;  %v8348_v41 = vld [vmem:[%s17076_s0 + $0x20] sm:$0xff]  ;;  %v12788_v42 = vld [vmem:[%s17077_s1 + $0x178] sm:$0xff]  }
   0xe   :  { %10241 = vmatpush3.bf16.msra.mxu0 %v12759_v7  ;;  %v12789_v43 = vld [vmem:[%s17077_s1 + $0x90] sm:$0xff]   ;;  %v13421_v44 = vpack.c.bf16 %v8348_v41, %v8348_v41  ;;  %v12790_v45 = vld [vmem:[%s17077_s1 + $0x180] sm:$0xff]   ;;  %v12791_v46 = vld [vmem:[%s17077_s1 + $0x98] sm:$0xff]   ;;  %v443_v5 = vrot.slane %v441_v38, 1 }
   0xf   :  { %10321 = vmatpush3.bf16.msra.mxu1 %v12760_v8  ;;  %10242 = vmatprep.subr.bf16.mxu0 %v13177_v1  ;;  %v12792_v47 = vld [vmem:[%s17077_s1 + $0x188] sm:$0xff]   ;;  %v12793_v48 = vld [vmem:[%s17077_s1 + $0xa0] sm:$0xff]   ;;  %v12794_v49 = vld [vmem:[%s17077_s1 + $0x190] sm:$0xff]  }
  0x10   :  { %10322 = vmatprep.subr.bf16.mxu1 %v13177_v1  ;;  %v12795_v50 = vld [vmem:[%s17077_s1 + $0xa8] sm:$0xff]   ;;  %v12796_v51 = vld [vmem:[%s17077_s1 + $0x198] sm:$0xff]   ;;  %v12797_v52 = vld [vmem:[%s17077_s1 + $0xb0] sm:$0xff]  }
  0x11   :  { %v12798_v53 = vld [vmem:[%s17077_s1 + $0x1a0] sm:$0xff]   ;;  %v12799_v54 = vld [vmem:[%s17077_s1 + $0xb8] sm:$0xff]   ;;  %v8349_v55 = vld [vmem:[%s17076_s0 + $0x30] sm:$0xff] }
  0x12   :  { %10243 = vmatpush3.bf16.msra.mxu0 %v12761_v9  ;;  %v12800_v56 = vld [vmem:[%s17077_s1 + $0x1a8] sm:$0xff]   ;;  %v12801_v57 = vld [vmem:[%s17077_s1 + $0xc0] sm:$0xff]   ;;  %v13482_v58 = vpack.c.bf16 %v8349_v55, %v8349_v55  ;;  %v12802_v59 = vld [vmem:[%s17077_s1 + $0x1b0] sm:$0xff]   ;;  %v13550_v9 = vor.u32 %v443_v5, %v439_v3 }
  0x13   :  { %10323 = vmatpush3.bf16.msra.mxu1 %v12762_v10  ;;  %10244 = vmatprep.subr.bf16.mxu0 %v13177_v1  ;;  %v12803_v60 = vld [vmem:[%s17077_s1 + $0xc8] sm:$0xff]   ;;  %v12804_v61 = vld [vmem:[%s17077_s1 + $0x1b8] sm:$0xff]   ;;  %v12805_v62 = vld [vmem:[%s17077_s1 + $0xd0] sm:$0xff]  }
  0x14   :  { %10324 = vmatprep.subr.bf16.mxu1 %v13177_v1  ;;  %v12806_v63 = vld [vmem:[%s17077_s1 + $0x1c0] sm:$0xff]   ;;  %v12807_v0 = vld [vmem:[%s17077_s1 + $0xd8] sm:$0xff]   ;;  %v12808_v2 = vld [vmem:[%s17077_s1 + $0x1c8] sm:$0xff]  }
  0x15   :  { %v13525_v4 = vld [vmem:[%s17077_s1 + $0xe0] sm:$0xff]   ;;  %v13532_v6 = vld [vmem:[%s17077_s1 + $0x1d0] sm:$0xff]   ;;  %v13539_v7 = vld [vmem:[%s17077_s1 + $0xe8] sm:$0xff]  }
  0x16   :  { %10245 = vmatpush3.bf16.msra.mxu0 %v12763_v11  ;;  %v13544_v8 = vld [vmem:[%s17077_s1 + $0x1d8] sm:$0xff]   ;;  %v13563_v10 = vld [vmem:[%s17077_s1 + $0x30] sm:$0xff]   ;;  %v13569_v11 = vld [vmem:[%s17077_s1 + $0x120] sm:$0xff]  }
  0x17   :  { %10325 = vmatpush3.bf16.msra.mxu1 %v12764_v13  ;;  %10250 = vmatprep.subr.bf16.mxu0 %v13177_v1  ;;  %v13581_v12 = vld [vmem:[%s17077_s1 + $0x38] sm:$0xff]   ;;  %v13587_v13 = vld [vmem:[%s17077_s1 + $0x128] sm:$0xff]  }
  0x18   :  { %10330 = vmatprep.subr.bf16.mxu1 %v13177_v1  ;;  %v13679_v26 = vld [vmem:[%s17077_s1 + $0xf8] sm:$0xff]  }
  0x19   :  { %10247 = vmatmul.mubr.msk.bf16.vlgmr.msra.gmra.mrb[0].mxu0 %vm117_vm1, %v13295_v14  ;;  %v13771_v38 = vld [vmem:[%s17077_s1 + $0x158] sm:$0xff]  }
  0x1a   :  { %10251 = vmatpush3.bf16.msra.mxu0 %v12765_v15  ;;  %10327 = vmatmul.mubr.msk.bf16.vlgmr.msra.gmra.mrb[0].mxu1 %vm117_vm1, %v13295_v14  ;;  %v13595_v15 = vld [vmem:[%s17077_s1 + $0x40] sm:$0xff]   ;;  %v13793_v41 = vld [vmem:[%s17077_s1 + $0x78] sm:$0xff]  }
  0x1b   :  { %10331 = vmatpush3.bf16.msra.mxu1 %v12766_v16  ;;  %10252 = vmatprep.subr.bf16.mxu0 %v13177_v1  ;;  %v13601_v16 = vld [vmem:[%s17077_s1 + $0x130] sm:$0xff]   ;;  %v13891_v55 = vld [vmem:[%s17077_s1 + $0x198] sm:$0xff]  }
  0x1c   :  { %10332 = vmatprep.subr.bf16.mxu1 %v13177_v1  ;;  %10262 = vmatprep.mubr.msk.bf16.mxu0 %vm13178_vm0, %v13177_v1 }
  0x1d   :  { %10342 = vmatprep.mubr.msk.bf16.mxu1 %vm13178_vm0, %v13177_v1 }
  0x1e   :  { %10253 = vmatpush3.bf16.msra.mxu0 %v12767_v17  ;;  %v13609_v17 = vld [vmem:[%s17077_s1 + $0x48] sm:$0xff]  }
  0x1f   :  { %10333 = vmatpush3.bf16.msra.mxu1 %v12768_v18  ;;  %10254 = vmatprep.subr.bf16.mxu0 %v13177_v1  ;;  %v13615_v18 = vld [vmem:[%s17077_s1 + $0x138] sm:$0xff]  }
  0x20   :  { %10334 = vmatprep.subr.bf16.mxu1 %v13177_v1 }
  0x22   :  { %10255 = vmatpush3.bf16.msra.mxu0 %v12769_v19  ;;  %v13623_v19 = vld [vmem:[%s17077_s1 + $0x50] sm:$0xff]  }
  0x23   :  { %10335 = vmatpush3.bf16.msra.mxu1 %v12770_v20  ;;  %10256 = vmatprep.subr.bf16.mxu0 %v13177_v1  ;;  %v13629_v20 = vld [vmem:[%s17077_s1 + $0x140] sm:$0xff]  }
  0x24   :  { %10336 = vmatprep.subr.bf16.mxu1 %v13177_v1 }
  0x26   :  { %10257 = vmatpush3.bf16.msra.mxu0 %v12771_v21  ;;  %v13637_v21 = vld [vmem:[%s17077_s1 + $0x58] sm:$0xff]  }
  0x27   :  { %10337 = vmatpush3.bf16.msra.mxu1 %v12772_v22  ;;  %10258 = vmatprep.subr.bf16.mxu0 %v13177_v1  ;;  %v13643_v22 = vld [vmem:[%s17077_s1 + $0x148] sm:$0xff]  }
  0x28   :  { %10338 = vmatprep.subr.bf16.mxu1 %v13177_v1 }
  0x2a   :  { %10259 = vmatpush3.bf16.msra.mxu0 %v12773_v23  ;;  %v13653_v23 = vld [vmem:[%s17077_s1] sm:$0xff]  }
  0x2b   :  { %10339 = vmatpush3.bf16.msra.mxu1 %v12774_v24  ;;  %10260 = vmatprep.subr.bf16.mxu0 %v13177_v1  ;;  %v13661_v24 = vld [vmem:[%s17077_s1 + $0xf0] sm:$0xff]  }
  0x2c   :  { %10340 = vmatprep.subr.bf16.mxu1 %v13177_v1 }
  0x2e   :  { %10261 = vmatpush3.bf16.msra.mxu0 %v12775_v25  ;;  %v13673_v25 = vld [vmem:[%s17077_s1 + $0x8] sm:$0xff]  }
  0x2f   :  { %10341 = vmatpush3.bf16.msra.mxu1 %v12776_v27  ;;  %10266 = vmatprep.subr.bf16.mxu0 %v13177_v1  ;;  %v13687_v27 = vld [vmem:[%s17077_s1 + $0x10] sm:$0xff]  }
  0x30   :  { %10346 = vmatprep.subr.bf16.mxu1 %v13177_v1 }
  0x31   :  { %10263 = vmatmul.mubr.msk.bf16.vlgmr.msra.gmra.mrb[0].mxu0 %vm117_vm1, %v13356_v28 }
  0x32   :  { %10267 = vmatpush3.bf16.msra.mxu0 %v12777_v29  ;;  %10343 = vmatmul.mubr.msk.bf16.vlgmr.msra.gmra.mrb[0].mxu1 %vm117_vm1, %v13356_v28  ;;  %v13693_v28 = vld [vmem:[%s17077_s1 + $0x100] sm:$0xff]   ;;  %v13701_v29 = vld [vmem:[%s17077_s1 + $0x18] sm:$0xff]  }
  0x33   :  { %10347 = vmatpush3.bf16.msra.mxu1 %v12778_v30  ;;  %10268 = vmatprep.subr.bf16.mxu0 %v13177_v1  ;;  %v13707_v30 = vld [vmem:[%s17077_s1 + $0x108] sm:$0xff]  }
  0x34   :  { %10348 = vmatprep.subr.bf16.mxu1 %v13177_v1  ;;  %10278 = vmatprep.mubr.msk.bf16.mxu0 %vm13178_vm0, %v13177_v1 }
  0x35   :  { %10358 = vmatprep.mubr.msk.bf16.mxu1 %vm13178_vm0, %v13177_v1 }
  0x36   :  { %10269 = vmatpush3.bf16.msra.mxu0 %v12779_v31  ;;  %v13715_v31 = vld [vmem:[%s17077_s1 + $0x20] sm:$0xff]  }
  0x37   :  { %10349 = vmatpush3.bf16.msra.mxu1 %v12780_v32  ;;  %10270 = vmatprep.subr.bf16.mxu0 %v13177_v1  ;;  %v13721_v32 = vld [vmem:[%s17077_s1 + $0x110] sm:$0xff]  }
  0x38   :  { %10350 = vmatprep.subr.bf16.mxu1 %v13177_v1 }
  0x3a   :  { %10271 = vmatpush3.bf16.msra.mxu0 %v12781_v33  ;;  %v13729_v33 = vld [vmem:[%s17077_s1 + $0x28] sm:$0xff]  }
  0x3b   :  { %10351 = vmatpush3.bf16.msra.mxu1 %v12782_v34  ;;  %10272 = vmatprep.subr.bf16.mxu0 %v13177_v1  ;;  %v13735_v34 = vld [vmem:[%s17077_s1 + $0x118] sm:$0xff]  }
  0x3c   :  { %10352 = vmatprep.subr.bf16.mxu1 %v13177_v1 }
  0x3e   :  { %10273 = vmatpush3.bf16.msra.mxu0 %v12783_v35  ;;  %v13745_v35 = vld [vmem:[%s17077_s1 + $0x60] sm:$0xff]  }
  0x3f   :  { %10353 = vmatpush3.bf16.msra.mxu1 %v12784_v36  ;;  %10274 = vmatprep.subr.bf16.mxu0 %v13177_v1  ;;  %v13753_v36 = vld [vmem:[%s17077_s1 + $0x150] sm:$0xff]  }
  0x40   :  { %10354 = vmatprep.subr.bf16.mxu1 %v13177_v1 }
  0x42   :  { %10275 = vmatpush3.bf16.msra.mxu0 %v12785_v37  ;;  %v13765_v37 = vld [vmem:[%s17077_s1 + $0x68] sm:$0xff]  }
  0x43   :  { %10355 = vmatpush3.bf16.msra.mxu1 %v12786_v39  ;;  %10276 = vmatprep.subr.bf16.mxu0 %v13177_v1  ;;  %v13779_v39 = vld [vmem:[%s17077_s1 + $0x70] sm:$0xff]  }
  0x44   :  { %10356 = vmatprep.subr.bf16.mxu1 %v13177_v1 }
  0x46   :  { %10277 = vmatpush3.bf16.msra.mxu0 %v12787_v40  ;;  %v13785_v40 = vld [vmem:[%s17077_s1 + $0x160] sm:$0xff]  }
  0x47   :  { %10357 = vmatpush3.bf16.msra.mxu1 %v12788_v42  ;;  %10282 = vmatprep.subr.bf16.mxu0 %v13177_v1  ;;  %v13799_v42 = vld [vmem:[%s17077_s1 + $0x168] sm:$0xff]  }
  0x48   :  { %10362 = vmatprep.subr.bf16.mxu1 %v13177_v1 }
  0x49   :  { %10279 = vmatmul.mubr.msk.bf16.vlgmr.msra.gmra.mrb[0].mxu0 %vm117_vm1, %v13421_v44 }
  0x4a   :  { %10283 = vmatpush3.bf16.msra.mxu0 %v12789_v43  ;;  %10359 = vmatmul.mubr.msk.bf16.vlgmr.msra.gmra.mrb[0].mxu1 %vm117_vm1, %v13421_v44  ;;  %v13807_v43 = vld [vmem:[%s17077_s1 + $0x80] sm:$0xff]  }
  0x4b   :  { %10363 = vmatpush3.bf16.msra.mxu1 %v12790_v45  ;;  %10284 = vmatprep.subr.bf16.mxu0 %v13177_v1  ;;  %v13813_v45 = vld [vmem:[%s17077_s1 + $0x170] sm:$0xff]  }
  0x4c   :  { %10364 = vmatprep.subr.bf16.mxu1 %v13177_v1  ;;  %10294 = vmatprep.mubr.msk.bf16.mxu0 %vm13178_vm0, %v13177_v1 }
  0x4d   :  { %10374 = vmatprep.mubr.msk.bf16.mxu1 %vm13178_vm0, %v13177_v1 }
  0x4e   :  { %10285 = vmatpush3.bf16.msra.mxu0 %v12791_v46  ;;  %v13821_v46 = vld [vmem:[%s17077_s1 + $0x88] sm:$0xff]  }
  0x4f   :  { %10365 = vmatpush3.bf16.msra.mxu1 %v12792_v47  ;;  %10286 = vmatprep.subr.bf16.mxu0 %v13177_v1  ;;  %v13827_v47 = vld [vmem:[%s17077_s1 + $0x178] sm:$0xff]  }
  0x50   :  { %10366 = vmatprep.subr.bf16.mxu1 %v13177_v1 }
  0x52   :  { %10287 = vmatpush3.bf16.msra.mxu0 %v12793_v48  ;;  %v13837_v48 = vld [vmem:[%s17077_s1 + $0x90] sm:$0xff]  }
  0x53   :  { %10367 = vmatpush3.bf16.msra.mxu1 %v12794_v49  ;;  %10288 = vmatprep.subr.bf16.mxu0 %v13177_v1  ;;  %v13845_v49 = vld [vmem:[%s17077_s1 + $0x180] sm:$0xff]  }
  0x54   :  { %10368 = vmatprep.subr.bf16.mxu1 %v13177_v1 }
  0x56   :  { %10289 = vmatpush3.bf16.msra.mxu0 %v12795_v50  ;;  %v13857_v50 = vld [vmem:[%s17077_s1 + $0x98] sm:$0xff]  }
  0x57   :  { %10369 = vmatpush3.bf16.msra.mxu1 %v12796_v51  ;;  %10290 = vmatprep.subr.bf16.mxu0 %v13177_v1  ;;  %v13863_v51 = vld [vmem:[%s17077_s1 + $0x188] sm:$0xff]  }
  0x58   :  { %10370 = vmatprep.subr.bf16.mxu1 %v13177_v1 }
  0x5a   :  { %10291 = vmatpush3.bf16.msra.mxu0 %v12797_v52  ;;  %v13871_v52 = vld [vmem:[%s17077_s1 + $0xa0] sm:$0xff]  }
  0x5b   :  { %10371 = vmatpush3.bf16.msra.mxu1 %v12798_v53  ;;  %10292 = vmatprep.subr.bf16.mxu0 %v13177_v1  ;;  %v13877_v53 = vld [vmem:[%s17077_s1 + $0x190] sm:$0xff]  }
  0x5c   :  { %10372 = vmatprep.subr.bf16.mxu1 %v13177_v1 }
  0x5e   :  { %10293 = vmatpush3.bf16.msra.mxu0 %v12799_v54  ;;  %v13885_v54 = vld [vmem:[%s17077_s1 + $0xa8] sm:$0xff]  }
  0x5f   :  { %10373 = vmatpush3.bf16.msra.mxu1 %v12800_v56  ;;  %10298 = vmatprep.subr.bf16.mxu0 %v13177_v1  ;;  %v13899_v56 = vld [vmem:[%s17077_s1 + $0xb0] sm:$0xff]  }
  0x60   :  { %10378 = vmatprep.subr.bf16.mxu1 %v13177_v1 }
  0x61   :  { %10295 = vmatmul.mubr.msk.bf16.vlgmr.msra.gmra.mrb[0].mxu0 %vm117_vm1, %v13482_v58 }
  0x62   :  { %10299 = vmatpush3.bf16.msra.mxu0 %v12801_v57  ;;  %10375 = vmatmul.mubr.msk.bf16.vlgmr.msra.gmra.mrb[0].mxu1 %vm117_vm1, %v13482_v58  ;;  %v13905_v57 = vld [vmem:[%s17077_s1 + $0x1a0] sm:$0xff]  }
  0x63   :  { %10379 = vmatpush3.bf16.msra.mxu1 %v12802_v59  ;;  %10300 = vmatprep.subr.bf16.mxu0 %v13177_v1  ;;  %v13913_v59 = vld [vmem:[%s17077_s1 + $0xb8] sm:$0xff]  }
  0x64   :  { %10380 = vmatprep.subr.bf16.mxu1 %v13177_v1  ;;  %10310 = vmatprep.mubr.msk.bf16.mxu0 %vm13178_vm0, %v13177_v1 }
  0x65   :  { %10390 = vmatprep.mubr.msk.bf16.mxu1 %vm13178_vm0, %v13177_v1 }
  0x66   :  { %10301 = vmatpush3.bf16.msra.mxu0 %v12803_v60  ;;  %v13919_v60 = vld [vmem:[%s17077_s1 + $0x1a8] sm:$0xff]  }
  0x67   :  { %10381 = vmatpush3.bf16.msra.mxu1 %v12804_v61  ;;  %10302 = vmatprep.subr.bf16.mxu0 %v13177_v1  ;;  %v13929_v61 = vld [vmem:[%s17077_s1 + $0xc0] sm:$0xff]  }
  0x68   :  { %10382 = vmatprep.subr.bf16.mxu1 %v13177_v1 }
  0x6a   :  { %10303 = vmatpush3.bf16.msra.mxu0 %v12805_v62  ;;  %v13937_v62 = vld [vmem:[%s17077_s1 + $0x1b0] sm:$0xff]  }
  0x6b   :  { %10383 = vmatpush3.bf16.msra.mxu1 %v12806_v63  ;;  %10304 = vmatprep.subr.bf16.mxu0 %v13177_v1  ;;  %v13949_v63 = vld [vmem:[%s17077_s1 + $0xc8] sm:$0xff]  }
  0x6c   :  { %10384 = vmatprep.subr.bf16.mxu1 %v13177_v1  ;;  %17116 = vst [vmem:[#allocation5_spill] sm:$0xff] %v13949_v63 }
  0x6e   :  { %10305 = vmatpush3.bf16.msra.mxu0 %v12807_v0  ;;  %v13955_v0 = vld [vmem:[%s17077_s1 + $0x1b8] sm:$0xff]  }
  0x6f   :  { %10385 = vmatpush3.bf16.msra.mxu1 %v12808_v2  ;;  %10306 = vmatprep.subr.bf16.mxu0 %v13177_v1  ;;  %17117 = vst [vmem:[#allocation6_spill] sm:$0xff] %v13955_v0  ;;  %v13963_v2 = vld [vmem:[%s17077_s1 + $0xd0] sm:$0xff]  }
  0x70   :  { %10386 = vmatprep.subr.bf16.mxu1 %v13177_v1  ;;  %17118 = vst [vmem:[#allocation7_spill] sm:$0xff] %v13963_v2 }
  0x72   :  { %10307 = vmatpush3.bf16.msra.mxu0 %v13525_v4 }
  0x73   :  { %10387 = vmatpush3.bf16.msra.mxu1 %v13532_v6  ;;  %10308 = vmatprep.subr.bf16.mxu0 %v13177_v1 }
  0x74   :  { %10388 = vmatprep.subr.bf16.mxu1 %v13177_v1 }
  0x76   :  { %10309 = vmatpush3.bf16.msra.mxu0 %v13539_v7 }
  0x77   :  { %10389 = vmatpush3.bf16.msra.mxu1 %v13544_v8  ;;  %10394 = vmatprep.subr.bf16.mxu0 %v13177_v1 }
  0x78   :  { %10474 = vmatprep.subr.bf16.mxu1 %v13177_v1 }
  0x79   :  { %10311 = vmatmul.mubr.msk.bf16.vlgmr.msra.gmra.mrb[0].mxu0 %vm117_vm1, %v13550_v9 }
  0x7a   :  { %10391 = vmatmul.mubr.msk.bf16.vlgmr.msra.gmra.mrb[0].mxu1 %vm117_vm1, %v13550_v9  ;;  %10395 = vmatpush3.bf16.msra.mxu0 %v13563_v10 }
  0x7b   :  { %10475 = vmatpush3.bf16.msra.mxu1 %v13569_v11  ;;  %10396 = vmatprep.subr.bf16.mxu0 %v13177_v1 }
  0x7c   :  { %10476 = vmatprep.subr.bf16.mxu1 %v13177_v1  ;;  %10406 = vmatprep.mubr.msk.bf16.mxu0 %vm13178_vm0, %v13177_v1 }
  0x7d   :  { %10486 = vmatprep.mubr.msk.bf16.mxu1 %vm13178_vm0, %v13177_v1 }
  0x7e   :  { %10397 = vmatpush3.bf16.msra.mxu0 %v13581_v12 }
  0x7f   :  { %10477 = vmatpush3.bf16.msra.mxu1 %v13587_v13  ;;  %10398 = vmatprep.subr.bf16.mxu0 %v13177_v1 }
  0x80   :  { %10478 = vmatprep.subr.bf16.mxu1 %v13177_v1 }
  0x82   :  { %10399 = vmatpush3.bf16.msra.mxu0 %v13595_v15 }
  0x83   :  { %10479 = vmatpush3.bf16.msra.mxu1 %v13601_v16  ;;  %10400 = vmatprep.subr.bf16.mxu0 %v13177_v1 }
  0x84   :  { %10480 = vmatprep.subr.bf16.mxu1 %v13177_v1 }
  0x86   :  { %10401 = vmatpush3.bf16.msra.mxu0 %v13609_v17 }
  0x87   :  { %10481 = vmatpush3.bf16.msra.mxu1 %v13615_v18  ;;  %10402 = vmatprep.subr.bf16.mxu0 %v13177_v1 }
  0x88   :  { %10482 = vmatprep.subr.bf16.mxu1 %v13177_v1 }
  0x8a   :  { %10403 = vmatpush3.bf16.msra.mxu0 %v13623_v19 }
  0x8b   :  { %10483 = vmatpush3.bf16.msra.mxu1 %v13629_v20  ;;  %10404 = vmatprep.subr.bf16.mxu0 %v13177_v1 }
  0x8c   :  { %10484 = vmatprep.subr.bf16.mxu1 %v13177_v1 }
  0x8e   :  { %10405 = vmatpush3.bf16.msra.mxu0 %v13637_v21 }
  0x8f   :  { %10485 = vmatpush3.bf16.msra.mxu1 %v13643_v22  ;;  %10410 = vmatprep.subr.bf16.mxu0 %v13177_v1 }
  0x90   :  { %10490 = vmatprep.subr.bf16.mxu1 %v13177_v1 }
  0x91   :  { %10407 = vmatmul.mubr.msk.bf16.vlgmr.msra.gmra.mrb[4].mxu0 %vm117_vm1, %v13421_v44 }
  0x92   :  { %10411 = vmatpush3.bf16.msra.mxu0 %v13653_v23  ;;  %10487 = vmatmul.mubr.msk.bf16.vlgmr.msra.gmra.mrb[4].mxu1 %vm117_vm1, %v13421_v44 }
  0x93   :  { %10491 = vmatpush3.bf16.msra.mxu1 %v13661_v24  ;;  %10412 = vmatprep.subr.bf16.mxu0 %v13177_v1 }
  0x94   :  { %10492 = vmatprep.subr.bf16.mxu1 %v13177_v1  ;;  %10422 = vmatprep.mubr.msk.bf16.mxu0 %vm13178_vm0, %v13177_v1 }
  0x95   :  { %10502 = vmatprep.mubr.msk.bf16.mxu1 %vm13178_vm0, %v13177_v1 }
  0x96   :  { %10413 = vmatpush3.bf16.msra.mxu0 %v13673_v25 }
  0x97   :  { %10493 = vmatpush3.bf16.msra.mxu1 %v13679_v26  ;;  %10414 = vmatprep.subr.bf16.mxu0 %v13177_v1 }
  0x98   :  { %10494 = vmatprep.subr.bf16.mxu1 %v13177_v1 }
  0x9a   :  { %10415 = vmatpush3.bf16.msra.mxu0 %v13687_v27 }
  0x9b   :  { %10495 = vmatpush3.bf16.msra.mxu1 %v13693_v28  ;;  %10416 = vmatprep.subr.bf16.mxu0 %v13177_v1 }
  0x9c   :  { %10496 = vmatprep.subr.bf16.mxu1 %v13177_v1 }
  0x9e   :  { %10417 = vmatpush3.bf16.msra.mxu0 %v13701_v29 }
  0x9f   :  { %10497 = vmatpush3.bf16.msra.mxu1 %v13707_v30  ;;  %10418 = vmatprep.subr.bf16.mxu0 %v13177_v1 }
  0xa0   :  { %10498 = vmatprep.subr.bf16.mxu1 %v13177_v1 }
  0xa2   :  { %10419 = vmatpush3.bf16.msra.mxu0 %v13715_v31 }
  0xa3   :  { %10499 = vmatpush3.bf16.msra.mxu1 %v13721_v32  ;;  %10420 = vmatprep.subr.bf16.mxu0 %v13177_v1 }
  0xa4   :  { %10500 = vmatprep.subr.bf16.mxu1 %v13177_v1 }
  0xa6   :  { %10421 = vmatpush3.bf16.msra.mxu0 %v13729_v33 }
  0xa7   :  { %10501 = vmatpush3.bf16.msra.mxu1 %v13735_v34  ;;  %10426 = vmatprep.subr.bf16.mxu0 %v13177_v1 }
  0xa8   :  { %10506 = vmatprep.subr.bf16.mxu1 %v13177_v1 }
  0xa9   :  { %10423 = vmatmul.mubr.msk.bf16.vlgmr.msra.gmra.mrb[4].mxu0 %vm117_vm1, %v13295_v14 }
  0xaa   :  { %10427 = vmatpush3.bf16.msra.mxu0 %v13745_v35  ;;  %10503 = vmatmul.mubr.msk.bf16.vlgmr.msra.gmra.mrb[4].mxu1 %vm117_vm1, %v13295_v14 }
  0xab   :  { %10507 = vmatpush3.bf16.msra.mxu1 %v13753_v36  ;;  %10428 = vmatprep.subr.bf16.mxu0 %v13177_v1 }
  0xac   :  { %10508 = vmatprep.subr.bf16.mxu1 %v13177_v1  ;;  %10438 = vmatprep.mubr.msk.bf16.mxu0 %vm13178_vm0, %v13177_v1 }
  0xad   :  { %10518 = vmatprep.mubr.msk.bf16.mxu1 %vm13178_vm0, %v13177_v1 }
  0xae   :  { %10429 = vmatpush3.bf16.msra.mxu0 %v13765_v37 }
  0xaf   :  { %10509 = vmatpush3.bf16.msra.mxu1 %v13771_v38  ;;  %10430 = vmatprep.subr.bf16.mxu0 %v13177_v1 }
  0xb0   :  { %10510 = vmatprep.subr.bf16.mxu1 %v13177_v1 }
  0xb2   :  { %10431 = vmatpush3.bf16.msra.mxu0 %v13779_v39 }
  0xb3   :  { %10511 = vmatpush3.bf16.msra.mxu1 %v13785_v40  ;;  %10432 = vmatprep.subr.bf16.mxu0 %v13177_v1 }
  0xb4   :  { %10512 = vmatprep.subr.bf16.mxu1 %v13177_v1 }
  0xb6   :  { %10433 = vmatpush3.bf16.msra.mxu0 %v13793_v41 }
  0xb7   :  { %10513 = vmatpush3.bf16.msra.mxu1 %v13799_v42  ;;  %10434 = vmatprep.subr.bf16.mxu0 %v13177_v1 }
  0xb8   :  { %10514 = vmatprep.subr.bf16.mxu1 %v13177_v1 }
  0xba   :  { %10435 = vmatpush3.bf16.msra.mxu0 %v13807_v43 }
  0xbb   :  { %10515 = vmatpush3.bf16.msra.mxu1 %v13813_v45  ;;  %10436 = vmatprep.subr.bf16.mxu0 %v13177_v1 }
  0xbc   :  { %10516 = vmatprep.subr.bf16.mxu1 %v13177_v1 }
  0xbe   :  { %10437 = vmatpush3.bf16.msra.mxu0 %v13821_v46 }
  0xbf   :  { %10517 = vmatpush3.bf16.msra.mxu1 %v13827_v47  ;;  %10442 = vmatprep.subr.bf16.mxu0 %v13177_v1 }
  0xc0   :  { %10522 = vmatprep.subr.bf16.mxu1 %v13177_v1 }
  0xc1   :  { %10439 = vmatmul.mubr.msk.bf16.vlgmr.msra.gmra.mrb[4].mxu0 %vm117_vm1, %v13482_v58 }
  0xc2   :  { %10443 = vmatpush3.bf16.msra.mxu0 %v13837_v48  ;;  %10519 = vmatmul.mubr.msk.bf16.vlgmr.msra.gmra.mrb[4].mxu1 %vm117_vm1, %v13482_v58 }
  0xc3   :  { %10523 = vmatpush3.bf16.msra.mxu1 %v13845_v49  ;;  %10444 = vmatprep.subr.bf16.mxu0 %v13177_v1 }
  0xc4   :  { %10524 = vmatprep.subr.bf16.mxu1 %v13177_v1  ;;  %10454 = vmatprep.mubr.msk.bf16.mxu0 %vm13178_vm0, %v13177_v1 }
  0xc5   :  { %10534 = vmatprep.mubr.msk.bf16.mxu1 %vm13178_vm0, %v13177_v1 }
  0xc6   :  { %10445 = vmatpush3.bf16.msra.mxu0 %v13857_v50 }
  0xc7   :  { %10525 = vmatpush3.bf16.msra.mxu1 %v13863_v51  ;;  %10446 = vmatprep.subr.bf16.mxu0 %v13177_v1 }
  0xc8   :  { %10526 = vmatprep.subr.bf16.mxu1 %v13177_v1 }
  0xca   :  { %10447 = vmatpush3.bf16.msra.mxu0 %v13871_v52 }
  0xcb   :  { %10527 = vmatpush3.bf16.msra.mxu1 %v13877_v53  ;;  %10448 = vmatprep.subr.bf16.mxu0 %v13177_v1 }
  0xcc   :  { %10528 = vmatprep.subr.bf16.mxu1 %v13177_v1 }
  0xce   :  { %10449 = vmatpush3.bf16.msra.mxu0 %v13885_v54 }
  0xcf   :  { %10529 = vmatpush3.bf16.msra.mxu1 %v13891_v55  ;;  %10450 = vmatprep.subr.bf16.mxu0 %v13177_v1 }
  0xd0   :  { %10530 = vmatprep.subr.bf16.mxu1 %v13177_v1 }
  0xd2   :  { %10451 = vmatpush3.bf16.msra.mxu0 %v13899_v56 }
  0xd3   :  { %10531 = vmatpush3.bf16.msra.mxu1 %v13905_v57  ;;  %10452 = vmatprep.subr.bf16.mxu0 %v13177_v1 }
  0xd4   :  { %10532 = vmatprep.subr.bf16.mxu1 %v13177_v1 }
  0xd6   :  { %10453 = vmatpush3.bf16.msra.mxu0 %v13913_v59 }
  0xd7   :  { %10533 = vmatpush3.bf16.msra.mxu1 %v13919_v60  ;;  %10458 = vmatprep.subr.bf16.mxu0 %v13177_v1 }
  0xd8   :  { %10538 = vmatprep.subr.bf16.mxu1 %v13177_v1 }
  0xd9   :  { %10455 = vmatmul.mubr.msk.bf16.vlgmr.msra.gmra.mrb[4].mxu0 %vm117_vm1, %v13550_v9 }
  0xda   :  { %10459 = vmatpush3.bf16.msra.mxu0 %v13929_v61  ;;  %10535 = vmatmul.mubr.msk.bf16.vlgmr.msra.gmra.mrb[4].mxu1 %vm117_vm1, %v13550_v9 }
  0xdb   :  { %10539 = vmatpush3.bf16.msra.mxu1 %v13937_v62  ;;  %10460 = vmatprep.subr.bf16.mxu0 %v13177_v1 }
  0xdc   :  { %10540 = vmatprep.subr.bf16.mxu1 %v13177_v1  ;;  %10470 = vmatprep.mubr.msk.bf16.mxu0 %vm13178_vm0, %v13177_v1 }
  0xdd   :  { %10550 = vmatprep.mubr.msk.bf16.mxu1 %vm13178_vm0, %v13177_v1 }
  0xde   :  { %10461 = vmatpush3.bf16.msra.mxu0 %v13949_v63 }
  0xdf   :  { %10541 = vmatpush3.bf16.msra.mxu1 %v13955_v0  ;;  %10462 = vmatprep.subr.bf16.mxu0 %v13177_v1 }
  0xe0   :  { %10542 = vmatprep.subr.bf16.mxu1 %v13177_v1 }
  0xe2   :  { %10463 = vmatpush3.bf16.msra.mxu0 %v13963_v2 }
  0xe3   :  { %16 = vsyncpa [#allocation3], 0  ;;  %v13969_v3 = vld [vmem:[%s17077_s1 + $0x1c0] sm:$0xff]   ;;  %10464 = vmatprep.subr.bf16.mxu0 %v13177_v1  ;;  %v1137_v5 = vshll.u32 %v13295_v14, 16  ;;  %v13978_v0 = vld [vmem:[%s17077_s1 + $0xd8] sm:$0xff]   ;;  %vm2296_vm2 = vcmask 1041408  }
  0xe4   :  { %17119 = vst [vmem:[#allocation8_spill] sm:$0xff] %v13969_v3  ;;  %10543 = vmatpush3.bf16.msra.mxu1 %v13969_v3  ;;  %17120 = vst [vmem:[#allocation9_spill] sm:$0xff] %v13978_v0  ;;  %v13984_v2 = vld [vmem:[%s17077_s1 + $0x1c8] sm:$0xff]   ;;  %v1135_v3 = vshrl.u32 %v13295_v14, 16  ;;  %vm2292_vm3 = vcmask 687104   ;;  %vm3629_vm4 = vcmask 654336  }
  0xe5   :  { %10544 = vmatprep.subr.bf16.mxu1 %v13177_v1  ;;  %v1139_v63 = vrot.slane %v1137_v5, 1  ;;  %v13134_v5 = vld [vmem:[%s17077_s1 + $0x128] sm:$0xff]   ;;  %vm4071_vm5 = vcmask 1043456   ;;  %vm4067_vm6 = vcmask 982016   ;;  %vm4207_vm7 = vcmask 73728  }
  0xe6   :  { %10465 = vmatpush3.bf16.msra.mxu0 %v13978_v0 }
  0xe7   :  { %10466 = vmatprep.subr.bf16.mxu0 %v13177_v1  ;;  %v13994_v0 = vor.u32 %v1139_v63, %v1135_v3  ;;  %v13132_v63 = vld [vmem:[%s17077_s1 + $0x120] sm:$0xff]   ;;  %v13133_v3 = vld [vmem:[%s17077_s1 + $0x38] sm:$0xff]  }
  0xe8   :  { %10545 = vmatpush3.bf16.msra.mxu1 %v13984_v2 }
  0xe9   :  { %10546 = vmatprep.subr.bf16.mxu1 %v13177_v1 }
  0xea   :  { %10467 = vmatpush3.bf16.msra.mxu0 %v13525_v4 }
  0xeb   :  { %10468 = vmatprep.subr.bf16.mxu0 %v13177_v1 }
  0xec   :  { %10547 = vmatpush3.bf16.msra.mxu1 %v13532_v6 }
  0xed   :  { %10548 = vmatprep.subr.bf16.mxu1 %v13177_v1 }
  0xee   :  { %10469 = vmatpush3.bf16.msra.mxu0 %v13539_v7 }
  0xef   :  { %10554 = vmatprep.subr.bf16.mxu0 %v13177_v1 }
  0xf0   :  { %10549 = vmatpush3.bf16.msra.mxu1 %v13544_v8 }
  0xf1   :  { %10634 = vmatprep.subr.bf16.mxu1 %v13177_v1  ;;  %10471 = vmatmul.mubr.msk.bf16.vlgmr.msra.gmra.mrb[4].mxu0 %vm117_vm1, %v13994_v0 }
  0xf2   :  { %10555 = vmatpush3.bf16.msra.mxu0 %v13563_v10  ;;  %10566 = vmatprep.mubr.msk.bf16.mxu0 %vm13178_vm0, %v13177_v1 }
  0xf3   :  { %10551 = vmatmul.mubr.msk.bf16.vlgmr.msra.gmra.mrb[4].mxu1 %vm117_vm1, %v13994_v0  ;;  %10556 = vmatprep.subr.bf16.mxu0 %v13177_v1 }
  0xf4   :  { %10635 = vmatpush3.bf16.msra.mxu1 %v13569_v11  ;;  %10646 = vmatprep.mubr.msk.bf16.mxu1 %vm13178_vm0, %v13177_v1 }
  0xf5   :  { %10636 = vmatprep.subr.bf16.mxu1 %v13177_v1 }
  0xf6   :  { %10557 = vmatpush3.bf16.msra.mxu0 %v13581_v12 }
  0xf7   :  { %10558 = vmatprep.subr.bf16.mxu0 %v13177_v1 }
  0xf8   :  { %10637 = vmatpush3.bf16.msra.mxu1 %v13587_v13 }
  0xf9   :  { %10638 = vmatprep.subr.bf16.mxu1 %v13177_v1 }
  0xfa   :  { %10559 = vmatpush3.bf16.msra.mxu0 %v13595_v15  ;;  %v17121_v15 = vld [vmem:[#allocation5_spill] sm:$0xff] }
  0xfb   :  { %10560 = vmatprep.subr.bf16.mxu0 %v13177_v1 }
  0xfc   :  { %10639 = vmatpush3.bf16.msra.mxu1 %v13601_v16  ;;  %v17122_v16 = vld [vmem:[#allocation6_spill] sm:$0xff] }
  0xfd   :  { %10640 = vmatprep.subr.bf16.mxu1 %v13177_v1 }
  0xfe   :  { %10561 = vmatpush3.bf16.msra.mxu0 %v13609_v17  ;;  %v17123_v17 = vld [vmem:[#allocation7_spill] sm:$0xff] }
  0xff   :  { %10562 = vmatprep.subr.bf16.mxu0 %v13177_v1 }
 0x100   :  { %10641 = vmatpush3.bf16.msra.mxu1 %v13615_v18  ;;  %v17124_v18 = vld [vmem:[#allocation8_spill] sm:$0xff] }
 0x101   :  { %10642 = vmatprep.subr.bf16.mxu1 %v13177_v1 }
 0x102   :  { %10563 = vmatpush3.bf16.msra.mxu0 %v13623_v19  ;;  %v1563_v19 = vshll.u32 %v13421_v44, 16 }
 0x103   :  { %10564 = vmatprep.subr.bf16.mxu0 %v13177_v1 }
 0x104   :  { %10643 = vmatpush3.bf16.msra.mxu1 %v13629_v20  ;;  %v17125_v20 = vld [vmem:[#allocation9_spill] sm:$0xff] }
 0x105   :  { %10644 = vmatprep.subr.bf16.mxu1 %v13177_v1 }
 0x106   :  { %10565 = vmatpush3.bf16.msra.mxu0 %v13637_v21  ;;  %v1561_v21 = vshrl.u32 %v13421_v44, 16 }
 0x107   :  { %10570 = vmatprep.subr.bf16.mxu0 %v13177_v1 }
 0x108   :  { %10645 = vmatpush3.bf16.msra.mxu1 %v13643_v22  ;;  %v1565_v22 = vrot.slane %v1563_v19, 1  ;;  %v13141_v19 = vld [vmem:[%s17077_s1 + $0x58] sm:$0xff]  }
 0x109   :  { %10650 = vmatprep.subr.bf16.mxu1 %v13177_v1  ;;  %10567 = vmatmul.mubr.msk.bf16.vlgmr.msra.gmra.mrb[8].mxu0 %vm117_vm1, %v13482_v58 }
 0x10a   :  { %10571 = vmatpush3.bf16.msra.mxu0 %v13653_v23  ;;  %10582 = vmatprep.mubr.msk.bf16.mxu0 %vm13178_vm0, %v13177_v1  ;;  %v14163_v23 = vld [vmem:[%s17077_s1 + $0xe0] sm:$0xff]  }
 0x10b   :  { %10647 = vmatmul.mubr.msk.bf16.vlgmr.msra.gmra.mrb[8].mxu1 %vm117_vm1, %v13482_v58  ;;  %10572 = vmatprep.subr.bf16.mxu0 %v13177_v1 }
 0x10c   :  { %10651 = vmatpush3.bf16.msra.mxu1 %v13661_v24  ;;  %10662 = vmatprep.mubr.msk.bf16.mxu1 %vm13178_vm0, %v13177_v1  ;;  %v14169_v24 = vld [vmem:[%s17077_s1 + $0x1d0] sm:$0xff]  }
 0x10d   :  { %10652 = vmatprep.subr.bf16.mxu1 %v13177_v1 }
 0x10e   :  { %10573 = vmatpush3.bf16.msra.mxu0 %v13673_v25  ;;  %v14179_v25 = vld [vmem:[%s17077_s1 + $0xe8] sm:$0xff]  }
 0x10f   :  { %10574 = vmatprep.subr.bf16.mxu0 %v13177_v1 }
 0x110   :  { %10653 = vmatpush3.bf16.msra.mxu1 %v13679_v26  ;;  %v14185_v26 = vld [vmem:[%s17077_s1 + $0x1d8] sm:$0xff]  }
 0x111   :  { %10654 = vmatprep.subr.bf16.mxu1 %v13177_v1 }
 0x112   :  { %10575 = vmatpush3.bf16.msra.mxu0 %v13687_v27  ;;  %v13131_v27 = vld [vmem:[%s17077_s1 + $0x30] sm:$0xff]  }
 0x113   :  { %10576 = vmatprep.subr.bf16.mxu0 %v13177_v1 }
 0x114   :  { %10655 = vmatpush3.bf16.msra.mxu1 %v13693_v28 }
 0x115   :  { %10656 = vmatprep.subr.bf16.mxu1 %v13177_v1 }
 0x116   :  { %10577 = vmatpush3.bf16.msra.mxu0 %v13701_v29 }
 0x117   :  { %10578 = vmatprep.subr.bf16.mxu0 %v13177_v1 }
 0x118   :  { %10657 = vmatpush3.bf16.msra.mxu1 %v13707_v30 }
 0x119   :  { %10658 = vmatprep.subr.bf16.mxu1 %v13177_v1 }
 0x11a   :  { %10579 = vmatpush3.bf16.msra.mxu0 %v13715_v31 }
 0x11b   :  { %10580 = vmatprep.subr.bf16.mxu0 %v13177_v1 }
 0x11c   :  { %10659 = vmatpush3.bf16.msra.mxu1 %v13721_v32 }
 0x11d   :  { %10660 = vmatprep.subr.bf16.mxu1 %v13177_v1 }
 0x11e   :  { %10581 = vmatpush3.bf16.msra.mxu0 %v13729_v33 }
 0x11f   :  { %10586 = vmatprep.subr.bf16.mxu0 %v13177_v1 }
 0x120   :  { %10661 = vmatpush3.bf16.msra.mxu1 %v13735_v34 }
 0x121   :  { %10666 = vmatprep.subr.bf16.mxu1 %v13177_v1  ;;  %10583 = vmatmul.mubr.msk.bf16.vlgmr.msra.gmra.mrb[8].mxu0 %vm117_vm1, %v13421_v44 }
 0x122   :  { %10587 = vmatpush3.bf16.msra.mxu0 %v13745_v35  ;;  %10598 = vmatprep.mubr.msk.bf16.mxu0 %vm13178_vm0, %v13177_v1 }
 0x123   :  { %10663 = vmatmul.mubr.msk.bf16.vlgmr.msra.gmra.mrb[8].mxu1 %vm117_vm1, %v13421_v44  ;;  %10588 = vmatprep.subr.bf16.mxu0 %v13177_v1  ;;  %v14174_v44 = vor.u32 %v1565_v22, %v1561_v21  ;;  %v13142_v21 = vld [vmem:[%s17077_s1 + $0x148] sm:$0xff]   ;;  %v13143_v22 = vld [vmem:[%s17077_s1] sm:$0xff]  }
 0x124   :  { %10667 = vmatpush3.bf16.msra.mxu1 %v13753_v36  ;;  %10678 = vmatprep.mubr.msk.bf16.mxu1 %vm13178_vm0, %v13177_v1 }
 0x125   :  { %10668 = vmatprep.subr.bf16.mxu1 %v13177_v1 }
 0x126   :  { %10589 = vmatpush3.bf16.msra.mxu0 %v13765_v37 }
 0x127   :  { %10590 = vmatprep.subr.bf16.mxu0 %v13177_v1 }
 0x128   :  { %10669 = vmatpush3.bf16.msra.mxu1 %v13771_v38 }
 0x129   :  { %10670 = vmatprep.subr.bf16.mxu1 %v13177_v1 }
 0x12a   :  { %10591 = vmatpush3.bf16.msra.mxu0 %v13779_v39 }
 0x12b   :  { %10592 = vmatprep.subr.bf16.mxu0 %v13177_v1 }
 0x12c   :  { %10671 = vmatpush3.bf16.msra.mxu1 %v13785_v40 }
 0x12d   :  { %10672 = vmatprep.subr.bf16.mxu1 %v13177_v1 }
 0x12e   :  { %10593 = vmatpush3.bf16.msra.mxu0 %v13793_v41 }
 0x12f   :  { %10594 = vmatprep.subr.bf16.mxu0 %v13177_v1 }
 0x130   :  { %10673 = vmatpush3.bf16.msra.mxu1 %v13799_v42 }
 0x131   :  { %10674 = vmatprep.subr.bf16.mxu1 %v13177_v1 }
 0x132   :  { %10595 = vmatpush3.bf16.msra.mxu0 %v13807_v43 }
 0x133   :  { %10596 = vmatprep.subr.bf16.mxu0 %v13177_v1 }
 0x134   :  { %10675 = vmatpush3.bf16.msra.mxu1 %v13813_v45 }
 0x135   :  { %10676 = vmatprep.subr.bf16.mxu1 %v13177_v1 }
 0x136   :  { %10597 = vmatpush3.bf16.msra.mxu0 %v13821_v46 }
 0x137   :  { %10602 = vmatprep.subr.bf16.mxu0 %v13177_v1 }
 0x138   :  { %10677 = vmatpush3.bf16.msra.mxu1 %v13827_v47 }
 0x139   :  { %10682 = vmatprep.subr.bf16.mxu1 %v13177_v1  ;;  %10599 = vmatmul.mubr.msk.bf16.vlgmr.msra.gmra.mrb[8].mxu0 %vm117_vm1, %v13550_v9 }
 0x13a   :  { %10603 = vmatpush3.bf16.msra.mxu0 %v13837_v48  ;;  %10614 = vmatprep.mubr.msk.bf16.mxu0 %vm13178_vm0, %v13177_v1 }
 0x13b   :  { %10679 = vmatmul.mubr.msk.bf16.vlgmr.msra.gmra.mrb[8].mxu1 %vm117_vm1, %v13550_v9  ;;  %10604 = vmatprep.subr.bf16.mxu0 %v13177_v1 }
 0x13c   :  { %10683 = vmatpush3.bf16.msra.mxu1 %v13845_v49  ;;  %10694 = vmatprep.mubr.msk.bf16.mxu1 %vm13178_vm0, %v13177_v1 }
 0x13d   :  { %10684 = vmatprep.subr.bf16.mxu1 %v13177_v1 }
 0x13e   :  { %10605 = vmatpush3.bf16.msra.mxu0 %v13857_v50 }
 0x13f   :  { %10606 = vmatprep.subr.bf16.mxu0 %v13177_v1 }
 0x140   :  { %10685 = vmatpush3.bf16.msra.mxu1 %v13863_v51 }
 0x141   :  { %10686 = vmatprep.subr.bf16.mxu1 %v13177_v1 }
 0x142   :  { %10607 = vmatpush3.bf16.msra.mxu0 %v13871_v52 }
 0x143   :  { %10608 = vmatprep.subr.bf16.mxu0 %v13177_v1 }
 0x144   :  { %10687 = vmatpush3.bf16.msra.mxu1 %v13877_v53 }
 0x145   :  { %10688 = vmatprep.subr.bf16.mxu1 %v13177_v1 }
 0x146   :  { %10609 = vmatpush3.bf16.msra.mxu0 %v13885_v54 }
 0x147   :  { %10610 = vmatprep.subr.bf16.mxu0 %v13177_v1 }
 0x148   :  { %10689 = vmatpush3.bf16.msra.mxu1 %v13891_v55 }
 0x149   :  { %10690 = vmatprep.subr.bf16.mxu1 %v13177_v1 }
 0x14a   :  { %10611 = vmatpush3.bf16.msra.mxu0 %v13899_v56 }
 0x14b   :  { %10612 = vmatprep.subr.bf16.mxu0 %v13177_v1 }
 0x14c   :  { %10691 = vmatpush3.bf16.msra.mxu1 %v13905_v57  ;;  %v14123_v14 = vpop.f32.mrb[0].mxu0 }
 0x14d   :  { %10692 = vmatprep.subr.bf16.mxu1 %v13177_v1  ;;  %v14126_v4 = vpop.f32.mrb[0].mxu1  ;;  %v10312_v6 = vpop.f32.mrb[1].mxu0 }
 0x14e   :  { %v1388_v7 = vmax.f32 %v14123_v14, %v14126_v4  ;;  %v10392_v8 = vpop.f32.mrb[1].mxu1  ;;  %v521_v10 = vpop.f32.mrb[2].mxu0  ;;  %10613 = vmatpush3.bf16.msra.mxu0 %v13913_v59  ;;  %v13135_v6 = vld [vmem:[%s17077_s1 + $0x40] sm:$0xff]  }
 0x14f   :  { %v969_v11 = vpop.f32.mrb[2].mxu1  ;;  %v10313_v12 = vpop.f32.mrb[3].mxu0  ;;  %10618 = vmatprep.subr.bf16.mxu0 %v13177_v1  ;;  %v13136_v8 = vld [vmem:[%s17077_s1 + $0x130] sm:$0xff]   ;;  %v13137_v10 = vld [vmem:[%s17077_s1 + $0x48] sm:$0xff]  }
 0x150   :  { %10693 = vmatpush3.bf16.msra.mxu1 %v13919_v60  ;;  %v10393_v13 = vpop.f32.mrb[3].mxu1  ;;  %v13138_v11 = vld [vmem:[%s17077_s1 + $0x138] sm:$0xff]   ;;  %v13139_v12 = vld [vmem:[%s17077_s1 + $0x50] sm:$0xff]  }
 0x151   :  { %10698 = vmatprep.subr.bf16.mxu1 %v13177_v1  ;;  %10615 = vmatmul.mubr.msk.bf16.vlgmr.msra.gmra.mrb[8].mxu0 %vm117_vm1, %v13994_v0  ;;  %v13140_v13 = vld [vmem:[%s17077_s1 + $0x140] sm:$0xff]  }
 0x152   :  { %10619 = vmatpush3.bf16.msra.mxu0 %v13929_v61  ;;  %10630 = vmatprep.mubr.msk.bf16.mxu0 %vm13178_vm0, %v13177_v1 }
 0x153   :  { %10695 = vmatmul.mubr.msk.bf16.vlgmr.msra.gmra.mrb[8].mxu1 %vm117_vm1, %v13994_v0  ;;  %10620 = vmatprep.subr.bf16.mxu0 %v13177_v1 }
 0x154   :  { %10699 = vmatpush3.bf16.msra.mxu1 %v13937_v62  ;;  %10710 = vmatprep.mubr.msk.bf16.mxu1 %vm13178_vm0, %v13177_v1 }
 0x155   :  { %10700 = vmatprep.subr.bf16.mxu1 %v13177_v1 }
 0x156   :  { %10621 = vmatpush3.bf16.msra.mxu0 %v17121_v15 }
 0x157   :  { %10622 = vmatprep.subr.bf16.mxu0 %v13177_v1 }
 0x158   :  { %10701 = vmatpush3.bf16.msra.mxu1 %v17122_v16 }
 0x159   :  { %10702 = vmatprep.subr.bf16.mxu1 %v13177_v1 }
 0x15a   :  { %10623 = vmatpush3.bf16.msra.mxu0 %v17123_v17 }
 0x15b   :  { %10624 = vmatprep.subr.bf16.mxu0 %v13177_v1 }
 0x15c   :  { %10703 = vmatpush3.bf16.msra.mxu1 %v17124_v18 }
 0x15d   :  { %10704 = vmatprep.subr.bf16.mxu1 %v13177_v1 }
 0x15e   :  { %10625 = vmatpush3.bf16.msra.mxu0 %v17125_v20 }
 0x15f   :  { %10626 = vmatprep.subr.bf16.mxu0 %v13177_v1 }
 0x160   :  { %10705 = vmatpush3.bf16.msra.mxu1 %v13984_v2 }
 0x161   :  { %10706 = vmatprep.subr.bf16.mxu1 %v13177_v1 }
 0x162   :  { %10627 = vmatpush3.bf16.msra.mxu0 %v14163_v23 }
 0x163   :  { %10628 = vmatprep.subr.bf16.mxu0 %v13177_v1 }
 0x164   :  { %10707 = vmatpush3.bf16.msra.mxu1 %v14169_v24 }
 0x165   :  { %10708 = vmatprep.subr.bf16.mxu1 %v13177_v1 }
 0x166   :  { %10629 = vmatpush3.bf16.msra.mxu0 %v14179_v25 }
 0x167   :  { %10714 = vmatprep.subr.bf16.mxu0 %v13177_v1 }
 0x168   :  { %10709 = vmatpush3.bf16.msra.mxu1 %v14185_v26 }
 0x169   :  { %10794 = vmatprep.subr.bf16.mxu1 %v13177_v1  ;;  %10631 = vmatmul.mubr.msk.bf16.vlgmr.msra.gmra.mrb[8].mxu0 %vm117_vm1, %v14174_v44 }
 0x16a   :  { %10715 = vmatpush3.bf16.msra.mxu0 %v13131_v27  ;;  %10726 = vmatprep.mubr.msk.bf16.mxu0 %vm13178_vm0, %v13177_v1  ;;  %v13144_v27 = vld [vmem:[%s17077_s1 + $0xf0] sm:$0xff]  }
 0x16b   :  { %10711 = vmatmul.mubr.msk.bf16.vlgmr.msra.gmra.mrb[8].mxu1 %vm117_vm1, %v14174_v44  ;;  %10716 = vmatprep.subr.bf16.mxu0 %v13177_v1 }
 0x16c   :  { %10795 = vmatpush3.bf16.msra.mxu1 %v13132_v63  ;;  %10806 = vmatprep.mubr.msk.bf16.mxu1 %vm13178_vm0, %v13177_v1  ;;  %v13145_v63 = vld [vmem:[%s17077_s1 + $0x8] sm:$0xff]  }
 0x16d   :  { %10796 = vmatprep.subr.bf16.mxu1 %v13177_v1 }
 0x16e   :  { %10717 = vmatpush3.bf16.msra.mxu0 %v13133_v3  ;;  %v13147_v3 = vld [vmem:[%s17077_s1 + $0x10] sm:$0xff]  }
 0x16f   :  { %10718 = vmatprep.subr.bf16.mxu0 %v13177_v1 }
 0x170   :  { %10797 = vmatpush3.bf16.msra.mxu1 %v13134_v5 }
 0x171   :  { %10798 = vmatprep.subr.bf16.mxu1 %v13177_v1 }
 0x172   :  { %10719 = vmatpush3.bf16.msra.mxu0 %v13135_v6  ;;  %v14489_v6 = vld [vmem:[%s17079_s3] sm:$0xff]  }
 0x173   :  { %10720 = vmatprep.subr.bf16.mxu0 %v13177_v1 }
 0x174   :  { %10799 = vmatpush3.bf16.msra.mxu1 %v13136_v8  ;;  %v14494_v8 = vld [vmem:[%s17079_s3 + $0xdc] sm:$0xff]  }
 0x175   :  { %10800 = vmatprep.subr.bf16.mxu1 %v13177_v1 }
 0x176   :  { %10721 = vmatpush3.bf16.msra.mxu0 %v13137_v10 }
 0x177   :  { %10722 = vmatprep.subr.bf16.mxu0 %v13177_v1 }
 0x178   :  { %10801 = vmatpush3.bf16.msra.mxu1 %v13138_v11  ;;  %v14507_v11 = vld [vmem:[%s17079_s3 + $0x8] sm:$0xff]  }
 0x179   :  { %10802 = vmatprep.subr.bf16.mxu1 %v13177_v1 }
 0x17a   :  { %10723 = vmatpush3.bf16.msra.mxu0 %v13139_v12  ;;  %v14512_v12 = vld [vmem:[%s17079_s3 + $0xe4] sm:$0xff]  }
 0x17b   :  { %10724 = vmatprep.subr.bf16.mxu0 %v13177_v1 }
 0x17c   :  { %10803 = vmatpush3.bf16.msra.mxu1 %v13140_v13  ;;  %v14525_v13 = vld [vmem:[%s17079_s3 + $0x10] sm:$0xff]  }
 0x17d   :  { %10804 = vmatprep.subr.bf16.mxu1 %v13177_v1 }
 0x17e   :  { %10725 = vmatpush3.bf16.msra.mxu0 %v13141_v19  ;;  %v14530_v19 = vld [vmem:[%s17079_s3 + $0xec] sm:$0xff]  }
 0x17f   :  { %10730 = vmatprep.subr.bf16.mxu0 %v13177_v1 }
 0x180   :  { %10805 = vmatpush3.bf16.msra.mxu1 %v13142_v21  ;;  %v14539_v21 = vld [vmem:[%s17079_s3 + $0x18] sm:$0xff]  }
 0x181   :  { %10810 = vmatprep.subr.bf16.mxu1 %v13177_v1  ;;  %10727 = vmatmul.mubr.msk.bf16.vlgmr.msra.gmra.mrb[12].mxu0 %vm117_vm1, %v13550_v9 }
 0x182   :  { %10731 = vmatpush3.bf16.msra.mxu0 %v13143_v22  ;;  %10742 = vmatprep.mubr.msk.bf16.mxu0 %vm13178_vm0, %v13177_v1  ;;  %v14544_v22 = vld [vmem:[%s17079_s3 + $0xf4] sm:$0xff]  }
 0x183   :  { %10807 = vmatmul.mubr.msk.bf16.vlgmr.msra.gmra.mrb[12].mxu1 %vm117_vm1, %v13550_v9  ;;  %10732 = vmatprep.subr.bf16.mxu0 %v13177_v1  ;;  %v13146_v9 = vld [vmem:[%s17077_s1 + $0xf8] sm:$0xff]  }
 0x184   :  { %10811 = vmatpush3.bf16.msra.mxu1 %v13144_v27  ;;  %10822 = vmatprep.mubr.msk.bf16.mxu1 %vm13178_vm0, %v13177_v1  ;;  %v14553_v27 = vld [vmem:[%s17079_s3 + $0x20] sm:$0xff]  }
 0x185   :  { %10812 = vmatprep.subr.bf16.mxu1 %v13177_v1 }
 0x186   :  { %10733 = vmatpush3.bf16.msra.mxu0 %v13145_v63  ;;  %v14558_v63 = vld [vmem:[%s17079_s3 + $0xfc] sm:$0xff]  }
 0x187   :  { %10734 = vmatprep.subr.bf16.mxu0 %v13177_v1 }
 0x188   :  { %10813 = vmatpush3.bf16.msra.mxu1 %v13146_v9 }
 0x189   :  { %10814 = vmatprep.subr.bf16.mxu1 %v13177_v1 }
 0x18a   :  { %10735 = vmatpush3.bf16.msra.mxu0 %v13147_v3  ;;  %v12835_v3 = vld [vmem:[%s17079_s3 + $0x28] ss:$0 sps:$4 sm:$0x33]  }
 0x18b   :  { %10736 = vmatprep.subr.bf16.mxu0 %v13177_v1 }
 0x18c   :  { %10815 = vmatpush3.bf16.msra.mxu1 %v13693_v28 }
 0x18d   :  { %10816 = vmatprep.subr.bf16.mxu1 %v13177_v1 }
 0x18e   :  { %10737 = vmatpush3.bf16.msra.mxu0 %v13701_v29 }
 0x18f   :  { %10738 = vmatprep.subr.bf16.mxu0 %v13177_v1 }
 0x190   :  { %10817 = vmatpush3.bf16.msra.mxu1 %v13707_v30 }
 0x191   :  { %10818 = vmatprep.subr.bf16.mxu1 %v13177_v1 }
 0x192   :  { %10739 = vmatpush3.bf16.msra.mxu0 %v13715_v31 }
 0x193   :  { %10740 = vmatprep.subr.bf16.mxu0 %v13177_v1 }
 0x194   :  { %10819 = vmatpush3.bf16.msra.mxu1 %v13721_v32 }
 0x195   :  { %10820 = vmatprep.subr.bf16.mxu1 %v13177_v1 }
 0x196   :  { %10741 = vmatpush3.bf16.msra.mxu0 %v13729_v33 }
 0x197   :  { %10746 = vmatprep.subr.bf16.mxu0 %v13177_v1 }
 0x198   :  { %10821 = vmatpush3.bf16.msra.mxu1 %v13735_v34 }
 0x199   :  { %10826 = vmatprep.subr.bf16.mxu1 %v13177_v1  ;;  %10743 = vmatmul.mubr.msk.bf16.vlgmr.msra.gmra.mrb[12].mxu0 %vm117_vm1, %v13482_v58 }
 0x19a   :  { %10747 = vmatpush3.bf16.msra.mxu0 %v13745_v35  ;;  %10758 = vmatprep.mubr.msk.bf16.mxu0 %vm13178_vm0, %v13177_v1 }
 0x19b   :  { %10823 = vmatmul.mubr.msk.bf16.vlgmr.msra.gmra.mrb[12].mxu1 %vm117_vm1, %v13482_v58  ;;  %10748 = vmatprep.subr.bf16.mxu0 %v13177_v1 }
 0x19c   :  { %10827 = vmatpush3.bf16.msra.mxu1 %v13753_v36  ;;  %10838 = vmatprep.mubr.msk.bf16.mxu1 %vm13178_vm0, %v13177_v1 }
 0x19d   :  { %10828 = vmatprep.subr.bf16.mxu1 %v13177_v1 }
 0x19e   :  { %10749 = vmatpush3.bf16.msra.mxu0 %v13765_v37 }
 0x19f   :  { %10750 = vmatprep.subr.bf16.mxu0 %v13177_v1 }
 0x1a0   :  { %10829 = vmatpush3.bf16.msra.mxu1 %v13771_v38  ;;  %v1978_v38 = vshll.u32 %v13482_v58, 16 }
 0x1a1   :  { %10830 = vmatprep.subr.bf16.mxu1 %v13177_v1 }
 0x1a2   :  { %10751 = vmatpush3.bf16.msra.mxu0 %v13779_v39  ;;  %v1976_v39 = vshrl.u32 %v13482_v58, 16  ;;  %v14398_v58 = vld [vmem:[%s17079_s3 + $0x108] sm:$0xff]  }
 0x1a3   :  { %10752 = vmatprep.subr.bf16.mxu0 %v13177_v1 }
 0x1a4   :  { %10831 = vmatpush3.bf16.msra.mxu1 %v13785_v40  ;;  %v1980_v40 = vrot.slane %v1978_v38, 1  ;;  %v14627_v38 = vld [vmem:[%s17079_s3 + $0x144] sm:$0xff]  }
 0x1a5   :  { %10832 = vmatprep.subr.bf16.mxu1 %v13177_v1 }
 0x1a6   :  { %10753 = vmatpush3.bf16.msra.mxu0 %v13793_v41  ;;  %v1981_v41 = vor.u32 %v1980_v40, %v1976_v39  ;;  %v14636_v39 = vld [vmem:[%s17079_s3 + $0x70] sm:$0xff]  }
 0x1a7   :  { %10754 = vmatprep.subr.bf16.mxu0 %v13177_v1  ;;  %v14641_v40 = vld [vmem:[%s17079_s3 + $0x14c] sm:$0xff]  }
 0x1a8   :  { %10833 = vmatpush3.bf16.msra.mxu1 %v13799_v42  ;;  %v14391_v42 = vld [vmem:[%s17079_s3 + $0x2c] sm:$0xff]  }
 0x1a9   :  { %10834 = vmatprep.subr.bf16.mxu1 %v13177_v1 }
 0x1aa   :  { %10755 = vmatpush3.bf16.msra.mxu0 %v13807_v43  ;;  %v14407_v43 = vld [vmem:[%s17079_s3 + $0x34] sm:$0xff]  }
 0x1ab   :  { %10756 = vmatprep.subr.bf16.mxu0 %v13177_v1 }
 0x1ac   :  { %10835 = vmatpush3.bf16.msra.mxu1 %v13813_v45  ;;  %v14414_v45 = vld [vmem:[%s17079_s3 + $0x110] sm:$0xff]  }
 0x1ad   :  { %10836 = vmatprep.subr.bf16.mxu1 %v13177_v1 }
 0x1ae   :  { %10757 = vmatpush3.bf16.msra.mxu0 %v13821_v46  ;;  %v14425_v46 = vld [vmem:[%s17079_s3 + $0x3c] sm:$0xff]  }
 0x1af   :  { %10762 = vmatprep.subr.bf16.mxu0 %v13177_v1 }
 0x1b0   :  { %10837 = vmatpush3.bf16.msra.mxu1 %v13827_v47  ;;  %v14432_v47 = vld [vmem:[%s17079_s3 + $0x118] sm:$0xff]  }
 0x1b1   :  { %10842 = vmatprep.subr.bf16.mxu1 %v13177_v1  ;;  %10759 = vmatmul.mubr.msk.bf16.vlgmr.msra.gmra.mrb[12].mxu0 %vm117_vm1, %v13994_v0 }
 0x1b2   :  { %10763 = vmatpush3.bf16.msra.mxu0 %v13837_v48  ;;  %10774 = vmatprep.mubr.msk.bf16.mxu0 %vm13178_vm0, %v13177_v1  ;;  %v14439_v48 = vld [vmem:[%s17079_s3 + $0x44] sm:$0xff]  }
 0x1b3   :  { %10839 = vmatmul.mubr.msk.bf16.vlgmr.msra.gmra.mrb[12].mxu1 %vm117_vm1, %v13994_v0  ;;  %10764 = vmatprep.subr.bf16.mxu0 %v13177_v1 }
 0x1b4   :  { %10843 = vmatpush3.bf16.msra.mxu1 %v13845_v49  ;;  %10854 = vmatprep.mubr.msk.bf16.mxu1 %vm13178_vm0, %v13177_v1  ;;  %v14446_v49 = vld [vmem:[%s17079_s3 + $0x120] sm:$0xff]  }
 0x1b5   :  { %10844 = vmatprep.subr.bf16.mxu1 %v13177_v1 }
 0x1b6   :  { %10765 = vmatpush3.bf16.msra.mxu0 %v13857_v50  ;;  %v14456_v50 = vld [vmem:[%s17079_s3 + $0x4c] sm:$0xff]  }
 0x1b7   :  { %10766 = vmatprep.subr.bf16.mxu0 %v13177_v1 }
 0x1b8   :  { %10845 = vmatpush3.bf16.msra.mxu1 %v13863_v51  ;;  %v14461_v51 = vld [vmem:[%s17079_s3 + $0x128] sm:$0xff]  }
 0x1b9   :  { %10846 = vmatprep.subr.bf16.mxu1 %v13177_v1 }
 0x1ba   :  { %10767 = vmatpush3.bf16.msra.mxu0 %v13871_v52  ;;  %v12823_v52 = vld [vmem:[%s17079_s3 + $0x54] ss:$0 sps:$4 sm:$0x33]  }
 0x1bb   :  { %10768 = vmatprep.subr.bf16.mxu0 %v13177_v1 }
 0x1bc   :  { %10847 = vmatpush3.bf16.msra.mxu1 %v13877_v53  ;;  %v12824_v53 = vld [vmem:[%s17079_s3 + $0x130] ss:$0 sps:$4 sm:$0x33]  }
 0x1bd   :  { %10848 = vmatprep.subr.bf16.mxu1 %v13177_v1 }
 0x1be   :  { %10769 = vmatpush3.bf16.msra.mxu0 %v13885_v54  ;;  %v14474_v54 = vsel %vm2296_vm2, %v12823_v52, 0  ;;  %v14655_v52 = vld [vmem:[%s17079_s3 + $0x154] sm:$0xff]  }
 0x1bf   :  { %10770 = vmatprep.subr.bf16.mxu0 %v13177_v1 }
 0x1c0   :  { %10849 = vmatpush3.bf16.msra.mxu1 %v13891_v55  ;;  %v14477_v55 = vsel %vm2296_vm2, %v12824_v53, 0 }
 0x1c1   :  { %10850 = vmatprep.subr.bf16.mxu1 %v13177_v1 }
 0x1c2   :  { %10771 = vmatpush3.bf16.msra.mxu0 %v13899_v56 }
 0x1c3   :  { %10772 = vmatprep.subr.bf16.mxu0 %v13177_v1 }
 0x1c4   :  { %10851 = vmatpush3.bf16.msra.mxu1 %v13905_v57  ;;  %v1178_v28 = vpop.f32.mrb[4].mxu0 }
 0x1c5   :  { %10852 = vmatprep.subr.bf16.mxu1 %v13177_v1  ;;  %v10472_v30 = vpop.f32.mrb[5].mxu0 }
 0x1c6   :  { %v1381_v29 = vpop.f32.mrb[4].mxu1  ;;  %v1181_v33 = vpop.f32.mrb[6].mxu0  ;;  %10773 = vmatpush3.bf16.msra.mxu0 %v13913_v59  ;;  %v14574_v30 = vsel %vm2296_vm2, %v12835_v3, 0 }
 0x1c7   :  { %v1389_v31 = vmax.f32 %v1178_v28, %v1381_v29  ;;  %v10552_v32 = vpop.f32.mrb[5].mxu1  ;;  %v10473_v35 = vpop.f32.mrb[7].mxu0  ;;  %10778 = vmatprep.subr.bf16.mxu0 %v13177_v1  ;;  %v12836_v28 = vld [vmem:[%s17079_s3 + $0x104] ss:$0 sps:$4 sm:$0x33]   ;;  %v14589_v33 = vld [vmem:[%s17079_s3 + $0x134] sm:$0xff]  }
 0x1c8   :  { %v1384_v34 = vpop.f32.mrb[6].mxu1  ;;  %10853 = vmatpush3.bf16.msra.mxu1 %v13919_v60  ;;  %v14584_v32 = vld [vmem:[%s17079_s3 + $0x58] sm:$0xff]   ;;  %v14604_v35 = vld [vmem:[%s17079_s3 + $0x60] sm:$0xff]  }
 0x1c9   :  { %v14354_v36 = vmax.f32 %v1388_v7, %v1389_v31  ;;  %v10553_v37 = vpop.f32.mrb[7].mxu1  ;;  %10858 = vmatprep.subr.bf16.mxu1 %v13177_v1  ;;  %10775 = vmatmul.mubr.msk.bf16.vlgmr.msra.gmra.mrb[12].mxu0 %vm117_vm1, %v14174_v44  ;;  %v14577_v31 = vsel %vm2296_vm2, %v12836_v28, 0  ;;  %v14780_v28 = vld [vmem:[%s17079_s3 + $0xb0] sm:$0xff]  }
 0x1ca   :  { %10779 = vmatpush3.bf16.msra.mxu0 %v13929_v61  ;;  %10790 = vmatprep.mubr.msk.bf16.mxu0 %vm13178_vm0, %v13177_v1  ;;  %v14622_v37 = vld [vmem:[%s17079_s3 + $0x68] sm:$0xff]  }
 0x1cb   :  { %10855 = vmatmul.mubr.msk.bf16.vlgmr.msra.gmra.mrb[12].mxu1 %vm117_vm1, %v14174_v44  ;;  %10780 = vmatprep.subr.bf16.mxu0 %v13177_v1 }
 0x1cc   :  { %10859 = vmatpush3.bf16.msra.mxu1 %v13937_v62  ;;  %10870 = vmatprep.mubr.msk.bf16.mxu1 %vm13178_vm0, %v13177_v1 }
 0x1cd   :  { %10860 = vmatprep.subr.bf16.mxu1 %v13177_v1 }
 0x1ce   :  { %10781 = vmatpush3.bf16.msra.mxu0 %v17121_v15 }
 0x1cf   :  { %10782 = vmatprep.subr.bf16.mxu0 %v13177_v1 }
 0x1d0   :  { %10861 = vmatpush3.bf16.msra.mxu1 %v17122_v16 }
 0x1d1   :  { %10862 = vmatprep.subr.bf16.mxu1 %v13177_v1 }
 0x1d2   :  { %10783 = vmatpush3.bf16.msra.mxu0 %v17123_v17 }
 0x1d3   :  { %10784 = vmatprep.subr.bf16.mxu0 %v13177_v1 }
 0x1d4   :  { %10863 = vmatpush3.bf16.msra.mxu1 %v17124_v18 }
 0x1d5   :  { %10864 = vmatprep.subr.bf16.mxu1 %v13177_v1 }
 0x1d6   :  { %10785 = vmatpush3.bf16.msra.mxu0 %v17125_v20 }
 0x1d7   :  { %10786 = vmatprep.subr.bf16.mxu0 %v13177_v1 }
 0x1d8   :  { %10865 = vmatpush3.bf16.msra.mxu1 %v13984_v2 }
 0x1d9   :  { %10866 = vmatprep.subr.bf16.mxu1 %v13177_v1 }
 0x1da   :  { %10787 = vmatpush3.bf16.msra.mxu0 %v14163_v23 }
 0x1db   :  { %10788 = vmatprep.subr.bf16.mxu0 %v13177_v1 }
 0x1dc   :  { %10867 = vmatpush3.bf16.msra.mxu1 %v14169_v24 }
 0x1dd   :  { %10868 = vmatprep.subr.bf16.mxu1 %v13177_v1 }
 0x1de   :  { %10789 = vmatpush3.bf16.msra.mxu0 %v14179_v25  ;;  %v8538_v25 = vld [vmem:[%s17078_s2] ss:$0 sm:$0xff] }
 0x1df   :  { %10874 = vmatprep.subr.bf16.mxu0 %v13177_v1  ;;  %v1397_v9 = vadd.f32 %v8538_v25, %v14354_v36  ;;  %v14609_v36 = vld [vmem:[%s17079_s3 + $0x13c] sm:$0xff]  }
 0x1e0   :  { %10869 = vmatpush3.bf16.msra.mxu1 %v14185_v26 }
 0x1e1   :  { %10954 = vmatprep.subr.bf16.mxu1 %v13177_v1  ;;  %10791 = vmatmul.mubr.msk.bf16.vlgmr.msra.gmra.mrb[12].mxu0 %vm117_vm1, %v1981_v41  ;;  %v1398_v29 = vmax.f32 %v1397_v9, 0.0 }
 0x1e2   :  { %10875 = vmatpush3.bf16.msra.mxu0 %v14391_v42  ;;  %10886 = vmatprep.mubr.msk.bf16.mxu0 %vm13178_vm0, %v13177_v1 }
 0x1e3   :  { %10871 = vmatmul.mubr.msk.bf16.vlgmr.msra.gmra.mrb[12].mxu1 %vm117_vm1, %v1981_v41  ;;  %10876 = vmatprep.subr.bf16.mxu0 %v13177_v1  ;;  %v14591_v34 = vpack.c.bf16 %v1398_v29, %v1398_v29  ;;  %v14650_v41 = vld [vmem:[%s17079_s3 + $0x78] sm:$0xff]   ;;  %v14785_v29 = vld [vmem:[%s17079_s3 + $0x18c] sm:$0xff]  }
 0x1e4   :  { %10955 = vmatpush3.bf16.msra.mxu1 %v14398_v58  ;;  %10966 = vmatprep.mubr.msk.bf16.mxu1 %vm13178_vm0, %v13177_v1 }
 0x1e5   :  { %10956 = vmatprep.subr.bf16.mxu1 %v13177_v1  ;;  %v2433_v53 = vshll.u32 %v14591_v34, 16 }
 0x1e6   :  { %10877 = vmatpush3.bf16.msra.mxu0 %v14407_v43 }
 0x1e7   :  { %10878 = vmatprep.subr.bf16.mxu0 %v13177_v1 }
 0x1e8   :  { %10957 = vmatpush3.bf16.msra.mxu1 %v14414_v45 }
 0x1e9   :  { %10958 = vmatprep.subr.bf16.mxu1 %v13177_v1 }
 0x1ea   :  { %10879 = vmatpush3.bf16.msra.mxu0 %v14425_v46 }
 0x1eb   :  { %10880 = vmatprep.subr.bf16.mxu0 %v13177_v1 }
 0x1ec   :  { %10959 = vmatpush3.bf16.msra.mxu1 %v14432_v47 }
 0x1ed   :  { %10960 = vmatprep.subr.bf16.mxu1 %v13177_v1 }
 0x1ee   :  { %10881 = vmatpush3.bf16.msra.mxu0 %v14439_v48 }
 0x1ef   :  { %10882 = vmatprep.subr.bf16.mxu0 %v13177_v1 }
 0x1f0   :  { %10961 = vmatpush3.bf16.msra.mxu1 %v14446_v49 }
 0x1f1   :  { %10962 = vmatprep.subr.bf16.mxu1 %v13177_v1 }
 0x1f2   :  { %10883 = vmatpush3.bf16.msra.mxu0 %v14456_v50 }
 0x1f3   :  { %10884 = vmatprep.subr.bf16.mxu0 %v13177_v1 }
 0x1f4   :  { %10963 = vmatpush3.bf16.msra.mxu1 %v14461_v51 }
 0x1f5   :  { %10964 = vmatprep.subr.bf16.mxu1 %v13177_v1 }
 0x1f6   :  { %10885 = vmatpush3.bf16.msra.mxu0 %v14474_v54 }
 0x1f7   :  { %10890 = vmatprep.subr.bf16.mxu0 %v13177_v1 }
 0x1f8   :  { %10965 = vmatpush3.bf16.msra.mxu1 %v14477_v55 }
 0x1f9   :  { %10970 = vmatprep.subr.bf16.mxu1 %v13177_v1 }
 0x23c   :  { %v1604_v56 = vpop.f32.mrb[8].mxu0 }
 0x23d   :  { %v10632_v59 = vpop.f32.mrb[9].mxu0 }
 0x23e   :  { %v1807_v57 = vpop.f32.mrb[8].mxu1  ;;  %v1607_v62 = vpop.f32.mrb[10].mxu0 }
 0x23f   :  { %v2229_v60 = vmax.f32 %v1604_v56, %v1807_v57  ;;  %v10712_v61 = vpop.f32.mrb[9].mxu1  ;;  %v10633_v2 = vpop.f32.mrb[11].mxu0  ;;  %v12847_v56 = vld [vmem:[%s17079_s3 + $0x80] ss:$0 sps:$4 sm:$0x33]   ;;  %v2431_v62 = vshrl.u32 %v14591_v34, 16 }
 0x240   :  { %v1810_v0 = vpop.f32.mrb[10].mxu1  ;;  %v12848_v57 = vld [vmem:[%s17079_s3 + $0x15c] ss:$0 sps:$4 sm:$0x33]   ;;  %v14671_v59 = vsel %vm2296_vm2, %v12847_v56, 0  ;;  %v2435_v61 = vrot.slane %v2433_v53, 1 }
 0x241   :  { %v10713_v14 = vpop.f32.mrb[11].mxu1  ;;  %v14682_v0 = vld [vmem:[%s17079_s3 + $0x84] sm:$0xff]   ;;  %v14800_v56 = vld [vmem:[%s17079_s3 + $0xb8] sm:$0xff]  }
 0x242   :  { %v14687_v2 = vld [vmem:[%s17079_s3 + $0x160] sm:$0xff]   ;;  %v14689_v14 = vor.u32 %v2435_v61, %v2431_v62 }
 0x243   :  { %v14818_v61 = vld [vmem:[%s17079_s3 + $0xc0] sm:$0xff]  }
 0x244   :  { %17126 = vst [vmem:[#allocation5_spill] sm:$0xff] %v14818_v61  ;;  %v14823_v62 = vld [vmem:[%s17079_s3 + $0x19c] sm:$0xff]  }
 0x245   :  { %17127 = vst [vmem:[#allocation6_spill] sm:$0xff] %v14823_v62 }
 0x2b4   :  { %v2019_v4 = vpop.f32.mrb[12].mxu0 }
 0x2b5   :  { %v10792_v15 = vpop.f32.mrb[13].mxu0 }
 0x2b6   :  { %v2222_v7 = vpop.f32.mrb[12].mxu1  ;;  %v2022_v18 = vpop.f32.mrb[14].mxu0  ;;  %v14720_v15 = vld [vmem:[%s17079_s3 + $0x94] sm:$0xff]  }
 0x2b7   :  { %v2230_v16 = vmax.f32 %v2019_v4, %v2222_v7  ;;  %v10872_v17 = vpop.f32.mrb[13].mxu1  ;;  %v10793_v23 = vpop.f32.mrb[15].mxu0  ;;  %v14702_v4 = vld [vmem:[%s17079_s3 + $0x8c] sm:$0xff]   ;;  %v14739_v18 = vld [vmem:[%s17079_s3 + $0x178] sm:$0xff]  }
 0x2b8   :  { %v2225_v20 = vpop.f32.mrb[14].mxu1  ;;  %v14707_v7 = vld [vmem:[%s17079_s3 + $0x168] sm:$0xff]   ;;  %v14734_v17 = vld [vmem:[%s17079_s3 + $0x9c] sm:$0xff]  }
 0x2b9   :  { %v2231_v24 = vmax.f32 %v2229_v60, %v2230_v16  ;;  %v10873_v44 = vpop.f32.mrb[15].mxu1  ;;  %v14674_v60 = vsel %vm2296_vm2, %v12848_v57, 0  ;;  %v14725_v16 = vld [vmem:[%s17079_s3 + $0x170] sm:$0xff]   ;;  %v14748_v20 = vld [vmem:[%s17079_s3 + $0xa4] sm:$0xff]  }
 0x2ba   :  { %v14753_v23 = vld [vmem:[%s17079_s3 + $0x180] sm:$0xff]   ;;  %v12860_v44 = vld [vmem:[%s17079_s3 + $0x188] ss:$0 sps:$4 sm:$0x33]   ;;  %v14805_v57 = vld [vmem:[%s17079_s3 + $0x194] sm:$0xff]  }
 0x2bb   :  { %v2232_v26 = vadd.f32 %v8538_v25, %v2231_v24  ;;  %v12859_v24 = vld [vmem:[%s17079_s3 + $0xac] ss:$0 sps:$4 sm:$0x33]  }
 0x2bd   :  { %v2233_v5 = vmax.f32 %v2232_v26, 0.0  ;;  %v14769_v26 = vsel %vm2296_vm2, %v12859_v24, 0  ;;  %v14832_v24 = vld [vmem:[%s17079_s3 + $0xc8] sm:$0xff]  }
 0x2be   :  { %17128 = vst [vmem:[#allocation7_spill] sm:$0xff] %v14832_v24 }
 0x2bf   :  { %v14496_v10 = vpack.c.bf16 %v2233_v5, %v2233_v5  ;;  %v14772_v5 = vsel %vm2296_vm2, %v12860_v44, 0  ;;  %v14837_v44 = vld [vmem:[%s17079_s3 + $0x1a4] sm:$0xff]  }
 0x2c0   :  { %17129 = vst [vmem:[#allocation8_spill] sm:$0xff] %v14837_v44 }
 0x2c1   :  { %10887 = vmatmul.mubr.msk.bf16.vlgmr.msra.gmra.mrb[16].mxu0 %vm2292_vm3, %v14496_v10  ;;  %10967 = vmatmul.mubr.msk.bf16.vlgmr.msra.gmra.mrb[16].mxu1 %vm2292_vm3, %v14496_v10  ;;  %v2531_v25 = vshll.u32 %v14496_v10, 16  ;;  %v2529_v3 = vshrl.u32 %v14496_v10, 16 }
 0x2c2   :  { %10891 = vmatpush3.bf16.msra.mxu0 %v14489_v6  ;;  %10971 = vmatpush3.bf16.msra.mxu1 %v14494_v8 }
 0x2c3   :  { %10892 = vmatprep.subr.bf16.mxu0 %v13177_v1  ;;  %10972 = vmatprep.subr.bf16.mxu1 %v13177_v1  ;;  %v2533_v9 = vrot.slane %v2531_v25, 1  ;;  %v14846_v25 = vld [vmem:[%s17079_s3 + $0xd0] sm:$0xff]  }
 0x2c4   :  { %10902 = vmatprep.mubr.msk.bf16.mxu0 %vm13178_vm0, %v13177_v1  ;;  %10982 = vmatprep.mubr.msk.bf16.mxu1 %vm13178_vm0, %v13177_v1 }
 0x2c5   :  { %v14787_v53 = vor.u32 %v2533_v9, %v2529_v3  ;;  %v14851_v9 = vld [vmem:[%s17079_s3 + $0x1ac] sm:$0xff]   ;;  %v12871_v3 = vld [vmem:[%s17079_s3 + $0xd8] ss:$0 sps:$4 sm:$0x33]  }
 0x2c6   :  { %10893 = vmatpush3.bf16.msra.mxu0 %v14507_v11  ;;  %10973 = vmatpush3.bf16.msra.mxu1 %v14512_v12 }
 0x2c7   :  { %10894 = vmatprep.subr.bf16.mxu0 %v13177_v1  ;;  %10974 = vmatprep.subr.bf16.mxu1 %v13177_v1 }
 0x2ca   :  { %10895 = vmatpush3.bf16.msra.mxu0 %v14525_v13  ;;  %10975 = vmatpush3.bf16.msra.mxu1 %v14530_v19 }
 0x2cb   :  { %10896 = vmatprep.subr.bf16.mxu0 %v13177_v1  ;;  %10976 = vmatprep.subr.bf16.mxu1 %v13177_v1 }
 0x2ce   :  { %10897 = vmatpush3.bf16.msra.mxu0 %v14539_v21  ;;  %10977 = vmatpush3.bf16.msra.mxu1 %v14544_v22 }
 0x2cf   :  { %10898 = vmatprep.subr.bf16.mxu0 %v13177_v1  ;;  %10978 = vmatprep.subr.bf16.mxu1 %v13177_v1 }
 0x2d2   :  { %10899 = vmatpush3.bf16.msra.mxu0 %v14553_v27  ;;  %10979 = vmatpush3.bf16.msra.mxu1 %v14558_v63 }
 0x2d3   :  { %10900 = vmatprep.subr.bf16.mxu0 %v13177_v1  ;;  %10980 = vmatprep.subr.bf16.mxu1 %v13177_v1 }
 0x2d6   :  { %10901 = vmatpush3.bf16.msra.mxu0 %v14574_v30  ;;  %10981 = vmatpush3.bf16.msra.mxu1 %v14577_v31 }
 0x2d7   :  { %10906 = vmatprep.subr.bf16.mxu0 %v13177_v1  ;;  %10986 = vmatprep.subr.bf16.mxu1 %v13177_v1 }
 0x2d9   :  { %10903 = vmatmul.mubr.msk.bf16.vlgmr.msra.gmra.mrb[16].mxu0 %vm2292_vm3, %v14591_v34  ;;  %10983 = vmatmul.mubr.msk.bf16.vlgmr.msra.gmra.mrb[16].mxu1 %vm2292_vm3, %v14591_v34 }
 0x2da   :  { %10907 = vmatpush3.bf16.msra.mxu0 %v14584_v32  ;;  %10987 = vmatpush3.bf16.msra.mxu1 %v14589_v33 }
 0x2db   :  { %10908 = vmatprep.subr.bf16.mxu0 %v13177_v1  ;;  %10988 = vmatprep.subr.bf16.mxu1 %v13177_v1 }
 0x2dc   :  { %10918 = vmatprep.mubr.msk.bf16.mxu0 %vm13178_vm0, %v13177_v1  ;;  %10998 = vmatprep.mubr.msk.bf16.mxu1 %vm13178_vm0, %v13177_v1 }
 0x2de   :  { %10909 = vmatpush3.bf16.msra.mxu0 %v14604_v35  ;;  %10989 = vmatpush3.bf16.msra.mxu1 %v14609_v36 }
 0x2df   :  { %10910 = vmatprep.subr.bf16.mxu0 %v13177_v1  ;;  %10990 = vmatprep.subr.bf16.mxu1 %v13177_v1 }
 0x2e2   :  { %10911 = vmatpush3.bf16.msra.mxu0 %v14622_v37  ;;  %10991 = vmatpush3.bf16.msra.mxu1 %v14627_v38 }
 0x2e3   :  { %10912 = vmatprep.subr.bf16.mxu0 %v13177_v1  ;;  %10992 = vmatprep.subr.bf16.mxu1 %v13177_v1 }
 0x2e6   :  { %10913 = vmatpush3.bf16.msra.mxu0 %v14636_v39  ;;  %10993 = vmatpush3.bf16.msra.mxu1 %v14641_v40 }
 0x2e7   :  { %10914 = vmatprep.subr.bf16.mxu0 %v13177_v1  ;;  %10994 = vmatprep.subr.bf16.mxu1 %v13177_v1 }
 0x2ea   :  { %10915 = vmatpush3.bf16.msra.mxu0 %v14650_v41  ;;  %10995 = vmatpush3.bf16.msra.mxu1 %v14655_v52 }
 0x2eb   :  { %10916 = vmatprep.subr.bf16.mxu0 %v13177_v1  ;;  %10996 = vmatprep.subr.bf16.mxu1 %v13177_v1 }
 0x2ee   :  { %10917 = vmatpush3.bf16.msra.mxu0 %v14671_v59  ;;  %10997 = vmatpush3.bf16.msra.mxu1 %v14674_v60 }
 0x2ef   :  { %10922 = vmatprep.subr.bf16.mxu0 %v13177_v1  ;;  %11002 = vmatprep.subr.bf16.mxu1 %v13177_v1 }
 0x2f1   :  { %10919 = vmatmul.mubr.msk.bf16.vlgmr.msra.gmra.mrb[16].mxu0 %vm2292_vm3, %v14689_v14  ;;  %10999 = vmatmul.mubr.msk.bf16.vlgmr.msra.gmra.mrb[16].mxu1 %vm2292_vm3, %v14689_v14 }
 0x2f2   :  { %10923 = vmatpush3.bf16.msra.mxu0 %v14682_v0  ;;  %11003 = vmatpush3.bf16.msra.mxu1 %v14687_v2 }
 0x2f3   :  { %10924 = vmatprep.subr.bf16.mxu0 %v13177_v1  ;;  %11004 = vmatprep.subr.bf16.mxu1 %v13177_v1 }
 0x2f4   :  { %10934 = vmatprep.mubr.msk.bf16.mxu0 %vm13178_vm0, %v13177_v1  ;;  %11014 = vmatprep.mubr.msk.bf16.mxu1 %vm13178_vm0, %v13177_v1 }
 0x2f6   :  { %10925 = vmatpush3.bf16.msra.mxu0 %v14702_v4  ;;  %11005 = vmatpush3.bf16.msra.mxu1 %v14707_v7 }
 0x2f7   :  { %10926 = vmatprep.subr.bf16.mxu0 %v13177_v1  ;;  %11006 = vmatprep.subr.bf16.mxu1 %v13177_v1 }
 0x2fa   :  { %10927 = vmatpush3.bf16.msra.mxu0 %v14720_v15  ;;  %11007 = vmatpush3.bf16.msra.mxu1 %v14725_v16 }
 0x2fb   :  { %10928 = vmatprep.subr.bf16.mxu0 %v13177_v1  ;;  %11008 = vmatprep.subr.bf16.mxu1 %v13177_v1 }
 0x2fe   :  { %10929 = vmatpush3.bf16.msra.mxu0 %v14734_v17  ;;  %11009 = vmatpush3.bf16.msra.mxu1 %v14739_v18 }
 0x2ff   :  { %10930 = vmatprep.subr.bf16.mxu0 %v13177_v1  ;;  %11010 = vmatprep.subr.bf16.mxu1 %v13177_v1 }
 0x302   :  { %10931 = vmatpush3.bf16.msra.mxu0 %v14748_v20  ;;  %11011 = vmatpush3.bf16.msra.mxu1 %v14753_v23 }
 0x303   :  { %10932 = vmatprep.subr.bf16.mxu0 %v13177_v1  ;;  %11012 = vmatprep.subr.bf16.mxu1 %v13177_v1 }
 0x306   :  { %10933 = vmatpush3.bf16.msra.mxu0 %v14769_v26  ;;  %11013 = vmatpush3.bf16.msra.mxu1 %v14772_v5 }
 0x307   :  { %10938 = vmatprep.subr.bf16.mxu0 %v13177_v1  ;;  %11018 = vmatprep.subr.bf16.mxu1 %v13177_v1 }
 0x309   :  { %10935 = vmatmul.mubr.msk.bf16.vlgmr.msra.gmra.mrb[16].mxu0 %vm2292_vm3, %v14787_v53  ;;  %11015 = vmatmul.mubr.msk.bf16.vlgmr.msra.gmra.mrb[16].mxu1 %vm2292_vm3, %v14787_v53 }
 0x30a   :  { %10939 = vmatpush3.bf16.msra.mxu0 %v14780_v28  ;;  %11019 = vmatpush3.bf16.msra.mxu1 %v14785_v29 }
 0x30b   :  { %10940 = vmatprep.subr.bf16.mxu0 %v13177_v1  ;;  %11020 = vmatprep.subr.bf16.mxu1 %v13177_v1 }
 0x30c   :  { %10950 = vmatprep.mubr.msk.bf16.mxu0 %vm13178_vm0, %v13177_v1  ;;  %11030 = vmatprep.mubr.msk.bf16.mxu1 %vm13178_vm0, %v13177_v1 }
 0x30e   :  { %10941 = vmatpush3.bf16.msra.mxu0 %v14800_v56  ;;  %11021 = vmatpush3.bf16.msra.mxu1 %v14805_v57 }
 0x30f   :  { %10942 = vmatprep.subr.bf16.mxu0 %v13177_v1  ;;  %11022 = vmatprep.subr.bf16.mxu1 %v13177_v1 }
 0x312   :  { %10943 = vmatpush3.bf16.msra.mxu0 %v14818_v61  ;;  %11023 = vmatpush3.bf16.msra.mxu1 %v14823_v62  ;;  %v14874_v61 = vrot.slane %v14591_v34, 1 }
 0x313   :  { %10944 = vmatprep.subr.bf16.mxu0 %v13177_v1  ;;  %11024 = vmatprep.subr.bf16.mxu1 %v13177_v1 }
 0x316   :  { %10945 = vmatpush3.bf16.msra.mxu0 %v14832_v24  ;;  %11025 = vmatpush3.bf16.msra.mxu1 %v14837_v44  ;;  %v12872_v44 = vld [vmem:[%s17079_s3 + $0x1b4] ss:$0 sps:$4 sm:$0x33]   ;;  %v14866_v24 = vsel %vm2296_vm2, %v12871_v3, 0  ;;  %v12903_v3 = vld [vmem:[%s17083_s7 + $0x28] sm:$0xff]  }
 0x317   :  { %10946 = vmatprep.subr.bf16.mxu0 %v13177_v1  ;;  %11026 = vmatprep.subr.bf16.mxu1 %v13177_v1  ;;  %v14869_v62 = vsel %vm2296_vm2, %v12872_v44, 0  ;;  %v12900_v44 = vld [vmem:[%s17083_s7 + $0x10] sm:$0xff]  }
 0x31a   :  { %10947 = vmatpush3.bf16.msra.mxu0 %v14846_v25  ;;  %11027 = vmatpush3.bf16.msra.mxu1 %v14851_v9 }
 0x31b   :  { %10948 = vmatprep.subr.bf16.mxu0 %v13177_v1  ;;  %11028 = vmatprep.subr.bf16.mxu1 %v13177_v1 }
 0x31e   :  { %10949 = vmatpush3.bf16.msra.mxu0 %v14866_v24  ;;  %11029 = vmatpush3.bf16.msra.mxu1 %v14869_v62 }
 0x31f   :  { %11034 = vmatprep.subr.bf16.mxu0 %v13177_v1  ;;  %11114 = vmatprep.subr.bf16.mxu1 %v13177_v1 }
 0x321   :  { %10951 = vmatmul.mubr.msk.bf16.vlgmr.msra.gmra.mrb[16].mxu0 %vm2292_vm3, %v14874_v61  ;;  %11031 = vmatmul.mubr.msk.bf16.vlgmr.msra.gmra.mrb[16].mxu1 %vm2292_vm3, %v14874_v61 }
 0x322   :  { %11035 = vmatpush3.bf16.msra.mxu0 %v14391_v42  ;;  %11115 = vmatpush3.bf16.msra.mxu1 %v14398_v58  ;;  %v17130_v42 = vld [vmem:[#allocation5_spill] sm:$0xff]  ;;  %v17131_v58 = vld [vmem:[#allocation6_spill] sm:$0xff] }
 0x323   :  { %11036 = vmatprep.subr.bf16.mxu0 %v13177_v1  ;;  %11116 = vmatprep.subr.bf16.mxu1 %v13177_v1 }
 0x324   :  { %11046 = vmatprep.mubr.msk.bf16.mxu0 %vm13178_vm0, %v13177_v1  ;;  %11126 = vmatprep.mubr.msk.bf16.mxu1 %vm13178_vm0, %v13177_v1 }
 0x326   :  { %11037 = vmatpush3.bf16.msra.mxu0 %v14407_v43  ;;  %11117 = vmatpush3.bf16.msra.mxu1 %v14414_v45  ;;  %v17132_v43 = vld [vmem:[#allocation7_spill] sm:$0xff]  ;;  %v17133_v45 = vld [vmem:[#allocation8_spill] sm:$0xff] }
 0x327   :  { %11038 = vmatprep.subr.bf16.mxu0 %v13177_v1  ;;  %11118 = vmatprep.subr.bf16.mxu1 %v13177_v1 }
 0x32a   :  { %11039 = vmatpush3.bf16.msra.mxu0 %v14425_v46  ;;  %11119 = vmatpush3.bf16.msra.mxu1 %v14432_v47  ;;  %v12873_v46 = vld [vmem:[%s17081_s5] sm:$0xff]   ;;  %v12874_v47 = vld [vmem:[%s17081_s5 + $0x28] sm:$0xff]  }
 0x32b   :  { %11040 = vmatprep.subr.bf16.mxu0 %v13177_v1  ;;  %11120 = vmatprep.subr.bf16.mxu1 %v13177_v1 }
 0x32e   :  { %11041 = vmatpush3.bf16.msra.mxu0 %v14439_v48  ;;  %11121 = vmatpush3.bf16.msra.mxu1 %v14446_v49  ;;  %v3315_v48 = vrot.slane %v14496_v10, 1  ;;  %v12875_v49 = vld [vmem:[%s17081_s5 + $0x8] sm:$0xff]  }
 0x32f   :  { %11042 = vmatprep.subr.bf16.mxu0 %v13177_v1  ;;  %11122 = vmatprep.subr.bf16.mxu1 %v13177_v1 }
 0x332   :  { %11043 = vmatpush3.bf16.msra.mxu0 %v14456_v50  ;;  %11123 = vmatpush3.bf16.msra.mxu1 %v14461_v51  ;;  %v12876_v50 = vld [vmem:[%s17081_s5 + $0x30] sm:$0xff]  }
 0x333   :  { %11044 = vmatprep.subr.bf16.mxu0 %v13177_v1  ;;  %11124 = vmatprep.subr.bf16.mxu1 %v13177_v1  ;;  %v12877_v51 = vld [vmem:[%s17081_s5 + $0x10] sm:$0xff]  }
 0x336   :  { %11045 = vmatpush3.bf16.msra.mxu0 %v14474_v54  ;;  %11125 = vmatpush3.bf16.msra.mxu1 %v14477_v55  ;;  %v12878_v54 = vld [vmem:[%s17081_s5 + $0x38] sm:$0xff]  }
 0x337   :  { %11050 = vmatprep.subr.bf16.mxu0 %v13177_v1  ;;  %11130 = vmatprep.subr.bf16.mxu1 %v13177_v1  ;;  %v12879_v55 = vld [vmem:[%s17081_s5 + $0x18] sm:$0xff]  }
 0x339   :  { %11047 = vmatmul.mubr.msk.bf16.vlgmr.msra.gmra.mrb[20].mxu0 %vm2292_vm3, %v14689_v14  ;;  %11127 = vmatmul.mubr.msk.bf16.vlgmr.msra.gmra.mrb[20].mxu1 %vm2292_vm3, %v14689_v14 }
 0x33a   :  { %11051 = vmatpush3.bf16.msra.mxu0 %v14489_v6  ;;  %11131 = vmatpush3.bf16.msra.mxu1 %v14494_v8  ;;  %v12880_v6 = vld [vmem:[%s17081_s5 + $0x40] sm:$0xff]  }
 0x33b   :  { %11052 = vmatprep.subr.bf16.mxu0 %v13177_v1  ;;  %11132 = vmatprep.subr.bf16.mxu1 %v13177_v1  ;;  %v12881_v8 = vld [vmem:[%s17081_s5 + $0x20] sm:$0xff]  }
 0x33c   :  { %11062 = vmatprep.mubr.msk.bf16.mxu0 %vm13178_vm0, %v13177_v1  ;;  %11142 = vmatprep.mubr.msk.bf16.mxu1 %vm13178_vm0, %v13177_v1 }
 0x33e   :  { %11053 = vmatpush3.bf16.msra.mxu0 %v14507_v11  ;;  %11133 = vmatpush3.bf16.msra.mxu1 %v14512_v12 }
 0x33f   :  { %11054 = vmatprep.subr.bf16.mxu0 %v13177_v1  ;;  %11134 = vmatprep.subr.bf16.mxu1 %v13177_v1 }
 0x342   :  { %11055 = vmatpush3.bf16.msra.mxu0 %v14525_v13  ;;  %11135 = vmatpush3.bf16.msra.mxu1 %v14530_v19 }
 0x343   :  { %11056 = vmatprep.subr.bf16.mxu0 %v13177_v1  ;;  %11136 = vmatprep.subr.bf16.mxu1 %v13177_v1 }
 0x346   :  { %11057 = vmatpush3.bf16.msra.mxu0 %v14539_v21  ;;  %11137 = vmatpush3.bf16.msra.mxu1 %v14544_v22 }
 0x347   :  { %11058 = vmatprep.subr.bf16.mxu0 %v13177_v1  ;;  %11138 = vmatprep.subr.bf16.mxu1 %v13177_v1 }
 0x34a   :  { %11059 = vmatpush3.bf16.msra.mxu0 %v14553_v27  ;;  %11139 = vmatpush3.bf16.msra.mxu1 %v14558_v63 }
 0x34b   :  { %11060 = vmatprep.subr.bf16.mxu0 %v13177_v1  ;;  %11140 = vmatprep.subr.bf16.mxu1 %v13177_v1 }
 0x34e   :  { %11061 = vmatpush3.bf16.msra.mxu0 %v14574_v30  ;;  %11141 = vmatpush3.bf16.msra.mxu1 %v14577_v31 }
 0x34f   :  { %11066 = vmatprep.subr.bf16.mxu0 %v13177_v1  ;;  %11146 = vmatprep.subr.bf16.mxu1 %v13177_v1 }
 0x351   :  { %11063 = vmatmul.mubr.msk.bf16.vlgmr.msra.gmra.mrb[20].mxu0 %vm2292_vm3, %v14496_v10  ;;  %11143 = vmatmul.mubr.msk.bf16.vlgmr.msra.gmra.mrb[20].mxu1 %vm2292_vm3, %v14496_v10  ;;  %v12882_v10 = vld [vmem:[%s17081_s5 + $0x48] sm:$0xff]  }
 0x352   :  { %11067 = vmatpush3.bf16.msra.mxu0 %v14584_v32  ;;  %11147 = vmatpush3.bf16.msra.mxu1 %v14589_v33 }
 0x353   :  { %11068 = vmatprep.subr.bf16.mxu0 %v13177_v1  ;;  %11148 = vmatprep.subr.bf16.mxu1 %v13177_v1 }
 0x354   :  { %11078 = vmatprep.mubr.msk.bf16.mxu0 %vm13178_vm0, %v13177_v1  ;;  %11158 = vmatprep.mubr.msk.bf16.mxu1 %vm13178_vm0, %v13177_v1 }
 0x356   :  { %11069 = vmatpush3.bf16.msra.mxu0 %v14604_v35  ;;  %11149 = vmatpush3.bf16.msra.mxu1 %v14609_v36  ;;  %v8738_v36 = vld [vmem:[%s17080_s4] ss:$0 sm:$0xff] }
 0x357   :  { %11070 = vmatprep.subr.bf16.mxu0 %v13177_v1  ;;  %11150 = vmatprep.subr.bf16.mxu1 %v13177_v1 }
 0x35a   :  { %11071 = vmatpush3.bf16.msra.mxu0 %v14622_v37  ;;  %11151 = vmatpush3.bf16.msra.mxu1 %v14627_v38 }
 0x35b   :  { %11072 = vmatprep.subr.bf16.mxu0 %v13177_v1  ;;  %11152 = vmatprep.subr.bf16.mxu1 %v13177_v1 }
 0x35e   :  { %11073 = vmatpush3.bf16.msra.mxu0 %v14636_v39  ;;  %11153 = vmatpush3.bf16.msra.mxu1 %v14641_v40 }
 0x35f   :  { %11074 = vmatprep.subr.bf16.mxu0 %v13177_v1  ;;  %11154 = vmatprep.subr.bf16.mxu1 %v13177_v1 }
 0x362   :  { %11075 = vmatpush3.bf16.msra.mxu0 %v14650_v41  ;;  %11155 = vmatpush3.bf16.msra.mxu1 %v14655_v52 }
 0x363   :  { %11076 = vmatprep.subr.bf16.mxu0 %v13177_v1  ;;  %11156 = vmatprep.subr.bf16.mxu1 %v13177_v1 }
 0x366   :  { %11077 = vmatpush3.bf16.msra.mxu0 %v14671_v59  ;;  %11157 = vmatpush3.bf16.msra.mxu1 %v14674_v60  ;;  %v12883_v60 = vld [vmem:[%s17081_s5 + $0x78] sm:$0xff]  }
 0x367   :  { %11082 = vmatprep.subr.bf16.mxu0 %v13177_v1  ;;  %11162 = vmatprep.subr.bf16.mxu1 %v13177_v1 }
 0x369   :  { %11079 = vmatmul.mubr.msk.bf16.vlgmr.msra.gmra.mrb[20].mxu0 %vm2292_vm3, %v14787_v53  ;;  %11159 = vmatmul.mubr.msk.bf16.vlgmr.msra.gmra.mrb[20].mxu1 %vm2292_vm3, %v14787_v53  ;;  %v12895_v53 = vld [vmem:[%s17081_s5 + $0xb0] sm:$0xff]  }
 0x36a   :  { %11083 = vmatpush3.bf16.msra.mxu0 %v14682_v0  ;;  %11163 = vmatpush3.bf16.msra.mxu1 %v14687_v2  ;;  %v12884_v2 = vld [vmem:[%s17081_s5 + $0x50] sm:$0xff]  }
 0x36b   :  { %11084 = vmatprep.subr.bf16.mxu0 %v13177_v1  ;;  %11164 = vmatprep.subr.bf16.mxu1 %v13177_v1 }
 0x36c   :  { %11094 = vmatprep.mubr.msk.bf16.mxu0 %vm13178_vm0, %v13177_v1  ;;  %11174 = vmatprep.mubr.msk.bf16.mxu1 %vm13178_vm0, %v13177_v1 }
 0x36e   :  { %11085 = vmatpush3.bf16.msra.mxu0 %v14702_v4  ;;  %11165 = vmatpush3.bf16.msra.mxu1 %v14707_v7  ;;  %v12885_v4 = vld [vmem:[%s17081_s5 + $0x80] sm:$0xff]   ;;  %v12886_v7 = vld [vmem:[%s17081_s5 + $0x58] sm:$0xff]  }
 0x36f   :  { %11086 = vmatprep.subr.bf16.mxu0 %v13177_v1  ;;  %11166 = vmatprep.subr.bf16.mxu1 %v13177_v1 }
 0x372   :  { %11087 = vmatpush3.bf16.msra.mxu0 %v14720_v15  ;;  %11167 = vmatpush3.bf16.msra.mxu1 %v14725_v16  ;;  %v12887_v15 = vld [vmem:[%s17081_s5 + $0x88] sm:$0xff]   ;;  %v12888_v16 = vld [vmem:[%s17081_s5 + $0x60] sm:$0xff]  }
 0x373   :  { %11088 = vmatprep.subr.bf16.mxu0 %v13177_v1  ;;  %11168 = vmatprep.subr.bf16.mxu1 %v13177_v1 }
 0x376   :  { %11089 = vmatpush3.bf16.msra.mxu0 %v14734_v17  ;;  %11169 = vmatpush3.bf16.msra.mxu1 %v14739_v18  ;;  %v12889_v17 = vld [vmem:[%s17081_s5 + $0x90] sm:$0xff]   ;;  %v12890_v18 = vld [vmem:[%s17081_s5 + $0x68] sm:$0xff]  }
 0x377   :  { %11090 = vmatprep.subr.bf16.mxu0 %v13177_v1  ;;  %11170 = vmatprep.subr.bf16.mxu1 %v13177_v1 }
 0x37a   :  { %11091 = vmatpush3.bf16.msra.mxu0 %v14748_v20  ;;  %11171 = vmatpush3.bf16.msra.mxu1 %v14753_v23  ;;  %v12891_v20 = vld [vmem:[%s17081_s5 + $0x98] sm:$0xff]   ;;  %v12892_v23 = vld [vmem:[%s17081_s5 + $0x70] sm:$0xff]  }
 0x37b   :  { %11092 = vmatprep.subr.bf16.mxu0 %v13177_v1  ;;  %11172 = vmatprep.subr.bf16.mxu1 %v13177_v1 }
 0x37e   :  { %11093 = vmatpush3.bf16.msra.mxu0 %v14769_v26  ;;  %11173 = vmatpush3.bf16.msra.mxu1 %v14772_v5  ;;  %v12893_v5 = vld [vmem:[%s17081_s5 + $0xa0] sm:$0xff]  }
 0x37f   :  { %11098 = vmatprep.subr.bf16.mxu0 %v13177_v1  ;;  %11178 = vmatprep.subr.bf16.mxu1 %v13177_v1 }
 0x381   :  { %11095 = vmatmul.mubr.msk.bf16.vlgmr.msra.gmra.mrb[20].mxu0 %vm2292_vm3, %v14874_v61  ;;  %11175 = vmatmul.mubr.msk.bf16.vlgmr.msra.gmra.mrb[20].mxu1 %vm2292_vm3, %v14874_v61 }
 0x382   :  { %11099 = vmatpush3.bf16.msra.mxu0 %v14780_v28  ;;  %11179 = vmatpush3.bf16.msra.mxu1 %v14785_v29  ;;  %v12894_v29 = vld [vmem:[%s17081_s5 + $0xa8] sm:$0xff]  }
 0x383   :  { %11100 = vmatprep.subr.bf16.mxu0 %v13177_v1  ;;  %11180 = vmatprep.subr.bf16.mxu1 %v13177_v1 }
 0x384   :  { %11110 = vmatprep.mubr.msk.bf16.mxu0 %vm13178_vm0, %v13177_v1  ;;  %11190 = vmatprep.mubr.msk.bf16.mxu1 %vm13178_vm0, %v13177_v1 }
 0x386   :  { %11101 = vmatpush3.bf16.msra.mxu0 %v14800_v56  ;;  %11181 = vmatpush3.bf16.msra.mxu1 %v14805_v57  ;;  %v12896_v56 = vld [vmem:[%s17081_s5 + $0xb8] sm:$0xff]   ;;  %v12897_v57 = vld [vmem:[%s17081_s5 + $0xc0] sm:$0xff]  }
 0x387   :  { %11102 = vmatprep.subr.bf16.mxu0 %v13177_v1  ;;  %11182 = vmatprep.subr.bf16.mxu1 %v13177_v1 }
 0x38a   :  { %11103 = vmatpush3.bf16.msra.mxu0 %v17130_v42  ;;  %11183 = vmatpush3.bf16.msra.mxu1 %v17131_v58  ;;  %v12904_v42 = vld [vmem:[%s17083_s7 + $0x30] sm:$0xff]   ;;  %v12905_v58 = vld [vmem:[%s17083_s7 + $0x38] ss:$0 sps:$4 sm:$0xff]  }
 0x38b   :  { %11104 = vmatprep.subr.bf16.mxu0 %v13177_v1  ;;  %11184 = vmatprep.subr.bf16.mxu1 %v13177_v1 }
 0x38e   :  { %11105 = vmatpush3.bf16.msra.mxu0 %v17132_v43  ;;  %11185 = vmatpush3.bf16.msra.mxu1 %v17133_v45  ;;  %v4073_v43 = vsel %vm4071_vm5, %v12905_v58, 0  ;;  %v12925_v45 = vld [vmem:[%s17085_s9] sm:$0xff]   ;;  %v12935_v58 = vld [vmem:[%s17085_s9 + $0x28] ss:$0 sps:$4 sm:$0x33]  }
 0x38f   :  { %11106 = vmatprep.subr.bf16.mxu0 %v13177_v1  ;;  %11186 = vmatprep.subr.bf16.mxu1 %v13177_v1 }
 0x392   :  { %11107 = vmatpush3.bf16.msra.mxu0 %v14846_v25  ;;  %11187 = vmatpush3.bf16.msra.mxu1 %v14851_v9  ;;  %v12901_v25 = vld [vmem:[%s17083_s7 + $0x18] sm:$0xff]   ;;  %v12902_v9 = vld [vmem:[%s17083_s7 + $0x20] sm:$0xff]  }
 0x393   :  { %11108 = vmatprep.subr.bf16.mxu0 %v13177_v1  ;;  %11188 = vmatprep.subr.bf16.mxu1 %v13177_v1 }
 0x396   :  { %11109 = vmatpush3.bf16.msra.mxu0 %v14866_v24  ;;  %11189 = vmatpush3.bf16.msra.mxu1 %v14869_v62  ;;  %v12898_v62 = vld [vmem:[%s17083_s7] sm:$0xff]   ;;  %v12899_v24 = vld [vmem:[%s17083_s7 + $0x8] sm:$0xff]  }
 0x397   :  { %11208 = vmatprep.subr.bf16.mxu1 %v13177_v1  ;;  %11194 = vmatprep.subr.bf16.mxu0 %v13177_v1 }
 0x399   :  { %11111 = vmatmul.mubr.msk.bf16.vlgmr.msra.gmra.mrb[20].mxu0 %vm2292_vm3, %v3315_v48  ;;  %11191 = vmatmul.mubr.msk.bf16.vlgmr.msra.gmra.mrb[20].mxu1 %vm2292_vm3, %v3315_v48 }
 0x39a   :  { %11209 = vmatpush3.bf16.msra.mxu1 %v12873_v46  ;;  %11195 = vmatpush3.bf16.msra.mxu0 %v12874_v47  ;;  %v12927_v47 = vld [vmem:[%s17085_s9 + $0x8] sm:$0xff]  }
 0x39b   :  { %11210 = vmatprep.subr.bf16.mxu1 %v13177_v1  ;;  %11196 = vmatprep.subr.bf16.mxu0 %v13177_v1 }
 0x39c   :  { %11218 = vmatprep.mubr.msk.bf16.mxu1 %vm13178_vm0, %v13177_v1  ;;  %11204 = vmatprep.mubr.msk.bf16.mxu0 %vm13178_vm0, %v13177_v1 }
 0x39e   :  { %11211 = vmatpush3.bf16.msra.mxu1 %v12875_v49  ;;  %11197 = vmatpush3.bf16.msra.mxu0 %v12876_v50 }
 0x39f   :  { %11212 = vmatprep.subr.bf16.mxu1 %v13177_v1  ;;  %11198 = vmatprep.subr.bf16.mxu0 %v13177_v1 }
 0x3a2   :  { %11213 = vmatpush3.bf16.msra.mxu1 %v12877_v51  ;;  %11199 = vmatpush3.bf16.msra.mxu0 %v12878_v54 }
 0x3a3   :  { %11214 = vmatprep.subr.bf16.mxu1 %v13177_v1  ;;  %11200 = vmatprep.subr.bf16.mxu0 %v13177_v1 }
 0x3a6   :  { %11215 = vmatpush3.bf16.msra.mxu1 %v12879_v55  ;;  %11201 = vmatpush3.bf16.msra.mxu0 %v12880_v6 }
 0x3a7   :  { %11216 = vmatprep.subr.bf16.mxu1 %v13177_v1  ;;  %11202 = vmatprep.subr.bf16.mxu0 %v13177_v1 }
 0x3aa   :  { %11217 = vmatpush3.bf16.msra.mxu1 %v12881_v8  ;;  %11203 = vmatpush3.bf16.msra.mxu0 %v12882_v10  ;;  %v12929_v8 = vld [vmem:[%s17085_s9 + $0x10] sm:$0xff]  }
 0x3ab   :  { %11236 = vmatprep.subr.bf16.mxu1 %v13177_v1  ;;  %11222 = vmatprep.subr.bf16.mxu0 %v13177_v1 }
 0x3f4   :  { %v2702_v11 = vpop.f32.mrb[16].mxu0  ;;  %v3145_v12 = vpop.f32.mrb[16].mxu1 }
 0x3f5   :  { %v3563_v13 = vmax.f32 %v2702_v11, %v3145_v12  ;;  %v10952_v19 = vpop.f32.mrb[17].mxu0  ;;  %v11032_v21 = vpop.f32.mrb[17].mxu1  ;;  %v12931_v11 = vld [vmem:[%s17085_s9 + $0x18] sm:$0xff]   ;;  %v12933_v12 = vld [vmem:[%s17085_s9 + $0x20] sm:$0xff]  }
 0x3f6   :  { %v2705_v22 = vpop.f32.mrb[18].mxu0  ;;  %v3148_v27 = vpop.f32.mrb[18].mxu1 }
 0x3f7   :  { %v10953_v63 = vpop.f32.mrb[19].mxu0  ;;  %v11033_v30 = vpop.f32.mrb[19].mxu1 }
 0x46c   :  { %v3353_v31 = vpop.f32.mrb[20].mxu0  ;;  %v3556_v32 = vpop.f32.mrb[20].mxu1 }
 0x46d   :  { %v3564_v33 = vmax.f32 %v3353_v31, %v3556_v32  ;;  %v11112_v34 = vpop.f32.mrb[21].mxu0  ;;  %v11192_v35 = vpop.f32.mrb[21].mxu1 }
 0x46e   :  { %v3356_v37 = vpop.f32.mrb[22].mxu0  ;;  %v3559_v38 = vpop.f32.mrb[22].mxu1  ;;  %v42_v34 = vld [vmem:[%s17082_s6] sm:$0x1] }
 0x46f   :  { %v3565_v39 = vmax.f32 %v3563_v13, %v3564_v33  ;;  %v11113_v40 = vpop.f32.mrb[23].mxu0  ;;  %v11193_v41 = vpop.f32.mrb[23].mxu1 }
 0x471   :  { %v3572_v52 = vadd.f32 %v8738_v36, %v3565_v39 }
 0x473   :  { %v3573_v59 = vmax.f32 %v3572_v52, 0.0  ;;  %v15222_v52 = vld [vmem:[%s17077_s1 + $0x30] sm:$0xff]  }
 0x475   :  { %v3574_v0 = vpack.c.bf16 %v3573_v59, %v3573_v59 }
 0x477   :  { %11219 = vmatmul.mubr.msk.bf16.vlgmr.msra.gmra.mrb[24].mxu1 %vm3629_vm4, %v3574_v0  ;;  %v3597_v14 = vshrl.u32 %v3574_v0, 16  ;;  %v3757_v28 = vrot.slane %v3574_v0, 1  ;;  %v3929_v61 = vrot.slane %v3574_v0, 2  ;;  %v15238_v0 = vld [vmem:[%s17077_s1 + $0x40] sm:$0xff]  }
 0x478   :  { %11237 = vmatpush3.bf16.msra.mxu1 %v12883_v60  ;;  %11246 = vmatprep.mubr.msk.bf16.mxu1 %vm13178_vm0, %v13177_v1  ;;  %v15229_v60 = vld [vmem:[%s17077_s1 + $0x38] sm:$0xff]  }
 0x479   :  { %11205 = vmatmul.mubr.msk.bf16.vlgmr.msra.gmra.mrb[24].mxu0 %vm3629_vm4, %v3597_v14  ;;  %11238 = vmatprep.subr.bf16.mxu1 %v13177_v1  ;;  %v3843_v26 = vrot.slane %v3597_v14, 1  ;;  %v15252_v14 = vld [vmem:[%s17077_s1 + $0x50] sm:$0xff]  }
 0x47a   :  { %11223 = vmatpush3.bf16.msra.mxu0 %v12884_v2  ;;  %11232 = vmatprep.mubr.msk.bf16.mxu0 %vm13178_vm0, %v13177_v1  ;;  %v15245_v2 = vld [vmem:[%s17077_s1 + $0x48] sm:$0xff]  }
 0x47b   :  { %11224 = vmatprep.subr.bf16.mxu0 %v13177_v1 }
 0x47c   :  { %11239 = vmatpush3.bf16.msra.mxu1 %v12885_v4  ;;  %v15259_v4 = vld [vmem:[%s17077_s1 + $0x58] sm:$0xff]  }
 0x47d   :  { %11240 = vmatprep.subr.bf16.mxu1 %v13177_v1 }
 0x47e   :  { %11225 = vmatpush3.bf16.msra.mxu0 %v12886_v7  ;;  %v8826_v7 = vld [vmem:[%s17076_s0 + $0x18] sm:$0xff] }
 0x47f   :  { %11226 = vmatprep.subr.bf16.mxu0 %v13177_v1 }
 0x480   :  { %11241 = vmatpush3.bf16.msra.mxu1 %v12887_v15  ;;  %v15265_v15 = vpack.c.bf16 %v8826_v7, %v8826_v7  ;;  %v15626_v7 = vld [vmem:[%s17077_s1 + $0xf8] sm:$0xff]  }
 0x481   :  { %11242 = vmatprep.subr.bf16.mxu1 %v13177_v1 }
 0x482   :  { %11227 = vmatpush3.bf16.msra.mxu0 %v12888_v16  ;;  %v15271_v16 = vld [vmem:[%s17077_s1] sm:$0xff]  }
 0x483   :  { %11228 = vmatprep.subr.bf16.mxu0 %v13177_v1 }
 0x484   :  { %11243 = vmatpush3.bf16.msra.mxu1 %v12889_v17  ;;  %v15280_v17 = vld [vmem:[%s17077_s1 + $0x8] sm:$0xff]  }
 0x485   :  { %11244 = vmatprep.subr.bf16.mxu1 %v13177_v1 }
 0x486   :  { %11229 = vmatpush3.bf16.msra.mxu0 %v12890_v18  ;;  %v15289_v18 = vld [vmem:[%s17077_s1 + $0x10] sm:$0xff]  }
 0x487   :  { %11230 = vmatprep.subr.bf16.mxu0 %v13177_v1 }
 0x488   :  { %11245 = vmatpush3.bf16.msra.mxu1 %v12891_v20  ;;  %v15296_v20 = vld [vmem:[%s17077_s1 + $0x18] sm:$0xff]  }
 0x489   :  { %11264 = vmatprep.subr.bf16.mxu1 %v13177_v1 }
 0x48a   :  { %11231 = vmatpush3.bf16.msra.mxu0 %v12892_v23  ;;  %v15303_v23 = vld [vmem:[%s17077_s1 + $0x20] sm:$0xff]  }
 0x48b   :  { %11247 = vmatmul.mubr.msk.bf16.vlgmr.msra.gmra.mrb[28].mxu1 %vm3629_vm4, %v3843_v26  ;;  %11250 = vmatprep.subr.bf16.mxu0 %v13177_v1  ;;  %v15310_v26 = vld [vmem:[%s17077_s1 + $0x28] sm:$0xff]  }
 0x48c   :  { %11280 = vmatprep.mubr.msk.bf16.mxu1 %vm13178_vm0, %v13177_v1  ;;  %11265 = vmatpush3.bf16.msra.mxu1 %v12898_v62  ;;  %v15361_v62 = vld [vmem:[%s17077_s1 + $0x88] sm:$0xff]  }
 0x48d   :  { %11233 = vmatmul.mubr.msk.bf16.vlgmr.msra.gmra.mrb[28].mxu0 %vm3629_vm4, %v3757_v28  ;;  %11266 = vmatprep.subr.bf16.mxu1 %v13177_v1 }
 0x48e   :  { %11251 = vmatpush3.bf16.msra.mxu0 %v12893_v5  ;;  %11260 = vmatprep.mubr.msk.bf16.mxu0 %vm13178_vm0, %v13177_v1  ;;  %v8825_v5 = vld [vmem:[%s17076_s0 + $0x8] sm:$0xff] }
 0x48f   :  { %11252 = vmatprep.subr.bf16.mxu0 %v13177_v1  ;;  %v15316_v28 = vpack.c.bf16 %v8825_v5, %v8825_v5  ;;  %v15637_v5 = vld [vmem:[%s17077_s1 + $0x100] sm:$0xff]  }
 0x490   :  { %11267 = vmatpush3.bf16.msra.mxu1 %v12899_v24  ;;  %v8827_v24 = vld [vmem:[%s17076_s0 + $0x28] sm:$0xff] }
 0x491   :  { %11268 = vmatprep.subr.bf16.mxu1 %v13177_v1 }
 0x492   :  { %11253 = vmatpush3.bf16.msra.mxu0 %v12894_v29  ;;  %v15322_v29 = vld [vmem:[%s17077_s1 + $0x60] sm:$0xff]  }
 0x493   :  { %11254 = vmatprep.subr.bf16.mxu0 %v13177_v1 }
 0x494   :  { %11269 = vmatpush3.bf16.msra.mxu1 %v12900_v44  ;;  %v15367_v44 = vpack.c.bf16 %v8827_v24, %v8827_v24  ;;  %v15646_v24 = vld [vmem:[%s17077_s1 + $0x108] sm:$0xff]  }
 0x495   :  { %11270 = vmatprep.subr.bf16.mxu1 %v13177_v1 }
 0x496   :  { %11255 = vmatpush3.bf16.msra.mxu0 %v12895_v53  ;;  %v15331_v53 = vld [vmem:[%s17077_s1 + $0x68] sm:$0xff]  }
 0x497   :  { %11256 = vmatprep.subr.bf16.mxu0 %v13177_v1 }
 0x498   :  { %11271 = vmatpush3.bf16.msra.mxu1 %v12901_v25  ;;  %v15373_v25 = vld [vmem:[%s17077_s1 + $0x90] sm:$0xff]  }
 0x499   :  { %11272 = vmatprep.subr.bf16.mxu1 %v13177_v1 }
 0x49a   :  { %11257 = vmatpush3.bf16.msra.mxu0 %v12896_v56  ;;  %v15340_v56 = vld [vmem:[%s17077_s1 + $0x70] sm:$0xff]  }
 0x49b   :  { %11258 = vmatprep.subr.bf16.mxu0 %v13177_v1 }
 0x49c   :  { %11273 = vmatpush3.bf16.msra.mxu1 %v12902_v9  ;;  %v15382_v9 = vld [vmem:[%s17077_s1 + $0x98] sm:$0xff]  }
 0x49d   :  { %11274 = vmatprep.subr.bf16.mxu1 %v13177_v1  ;;  %17134 = vst [vmem:[#allocation9_spill] sm:$0xff] %v15382_v9 }
 0x49e   :  { %11259 = vmatpush3.bf16.msra.mxu0 %v12897_v57  ;;  %v15347_v57 = vld [vmem:[%s17077_s1 + $0x78] sm:$0xff]  }
 0x49f   :  { %11284 = vmatprep.subr.bf16.mxu0 %v13177_v1 }
 0x4a0   :  { %11275 = vmatpush3.bf16.msra.mxu1 %v12903_v3  ;;  %v15391_v3 = vld [vmem:[%s17077_s1 + $0xa0] sm:$0xff]  }
 0x4a1   :  { %11261 = vmatmul.mubr.msk.bf16.vlgmr.msra.gmra.mrb[32].mxu0 %vm3629_vm4, %v3929_v61  ;;  %11276 = vmatprep.subr.bf16.mxu1 %v13177_v1  ;;  %v15354_v61 = vld [vmem:[%s17077_s1 + $0x80] sm:$0xff]   ;;  %17135 = vst [vmem:[#allocation5_spill] sm:$0xff] %v15391_v3 }
 0x4a2   :  { %11296 = vmatprep.mubr.msk.bf16.mxu0 %vm13178_vm0, %v13177_v1  ;;  %11285 = vmatpush3.bf16.msra.mxu0 %v12925_v45  ;;  %v4165_v45 = vsel %vm2296_vm2, %v12935_v58, 0  ;;  %v15655_v58 = vld [vmem:[%s17077_s1 + $0x110] sm:$0xff]  }
 0x4a3   :  { %11286 = vmatprep.subr.bf16.mxu0 %v13177_v1 }
 0x4a4   :  { %11277 = vmatpush3.bf16.msra.mxu1 %v12904_v42  ;;  %v15398_v42 = vld [vmem:[%s17077_s1 + $0xa8] sm:$0xff]  }
 0x4a5   :  { %11278 = vmatprep.subr.bf16.mxu1 %v13177_v1  ;;  %17136 = vst [vmem:[#allocation6_spill] sm:$0xff] %v15398_v42 }
 0x4a6   :  { %11287 = vmatpush3.bf16.msra.mxu0 %v12927_v47  ;;  %v8828_v47 = vld [vmem:[%s17076_s0 + $0x38] sm:$0xff] }
 0x4a7   :  { %11288 = vmatprep.subr.bf16.mxu0 %v13177_v1 }
 0x4a8   :  { %11279 = vmatpush3.bf16.msra.mxu1 %v4073_v43  ;;  %v15408_v43 = vld [vmem:[%s17077_s1 + $0xb0] sm:$0xff]  }
 0x4a9   :  { %11300 = vmatprep.subr.bf16.mxu1 %v13177_v1 }
 0x4aa   :  { %11289 = vmatpush3.bf16.msra.mxu0 %v12929_v8  ;;  %v4599_v8 = vshrl.u32 %v15316_v28, 16 }
 0x4ab   :  { %11290 = vmatprep.subr.bf16.mxu0 %v13177_v1 }
 0x4ae   :  { %11291 = vmatpush3.bf16.msra.mxu0 %v12931_v11  ;;  %v15470_v11 = vld [vmem:[%s17077_s1 + $0xe8] sm:$0xff]  }
 0x4af   :  { %11292 = vmatprep.subr.bf16.mxu0 %v13177_v1 }
 0x4b2   :  { %11293 = vmatpush3.bf16.msra.mxu0 %v12933_v12 }
 0x4b3   :  { %11294 = vmatprep.subr.bf16.mxu0 %v13177_v1 }
 0x4b6   :  { %11295 = vmatpush3.bf16.msra.mxu0 %v4165_v45  ;;  %v15664_v45 = vld [vmem:[%s17077_s1 + $0x118] sm:$0xff]  }
 0x4b7   :  { %11380 = vmatprep.subr.bf16.mxu0 %v13177_v1 }
 0x54a   :  { %v3739_v46 = vpop.f32.mrb[24].mxu1 }
 0x54b   :  { %v11220_v48 = vpop.f32.mrb[25].mxu1 }
 0x54c   :  { %v3667_v49 = vpop.f32.mrb[24].mxu0  ;;  %v3742_v50 = vpop.f32.mrb[26].mxu1  ;;  %v15423_v48 = vpack.c.bf16 %v8828_v47, %v8828_v47  ;;  %v15673_v47 = vld [vmem:[%s17077_s1 + $0x150] sm:$0xff]  }
 0x54d   :  { %v3740_v51 = vadd.f32 %v3739_v46, %v3667_v49  ;;  %v11206_v54 = vpop.f32.mrb[25].mxu0  ;;  %v11221_v55 = vpop.f32.mrb[27].mxu1  ;;  %v15417_v46 = vld [vmem:[%s17077_s1 + $0xb8] sm:$0xff]   ;;  %v15429_v49 = vld [vmem:[%s17077_s1 + $0xc0] sm:$0xff]   ;;  %v15438_v50 = vld [vmem:[%s17077_s1 + $0xc8] sm:$0xff]  }
 0x54e   :  { %v3670_v6 = vpop.f32.mrb[26].mxu0  ;;  %v15454_v54 = vld [vmem:[%s17077_s1 + $0xd8] sm:$0xff]   ;;  %v4601_v55 = vshll.u32 %v15316_v28, 16 }
 0x54f   :  { %v11207_v10 = vpop.f32.mrb[27].mxu0  ;;  %v15462_v6 = vld [vmem:[%s17077_s1 + $0xe0] sm:$0xff]  }
 0x550   :  { %v4603_v10 = vrot.slane %v4601_v55, 1  ;;  %v15688_v55 = vld [vmem:[%s17077_s1 + $0x158] sm:$0xff]  }
 0x552   :  { %v15473_v12 = vor.u32 %v4603_v10, %v4599_v8  ;;  %v15708_v8 = vld [vmem:[%s17077_s1 + $0x168] sm:$0xff]   ;;  %v15717_v10 = vld [vmem:[%s17077_s1 + $0x170] sm:$0xff]  }
 0x55e   :  { %v3911_v13 = vpop.f32.mrb[28].mxu1 }
 0x55f   :  { %v11248_v19 = vpop.f32.mrb[29].mxu1 }
 0x560   :  { %v3825_v21 = vpop.f32.mrb[28].mxu0  ;;  %v3914_v22 = vpop.f32.mrb[30].mxu1 }
 0x561   :  { %v3831_v27 = vadd.f32 %v3825_v21, %v3740_v51  ;;  %v11234_v63 = vpop.f32.mrb[29].mxu0  ;;  %v11249_v30 = vpop.f32.mrb[31].mxu1  ;;  %v15447_v51 = vld [vmem:[%s17077_s1 + $0xd0] sm:$0xff]  }
 0x562   :  { %v3828_v31 = vpop.f32.mrb[30].mxu0 }
 0x563   :  { %v11235_v32 = vpop.f32.mrb[31].mxu0  ;;  %v3917_v33 = vadd.f32 %v3911_v13, %v3831_v27  ;;  %v43_v13 = vld [vmem:[%s17084_s8] sm:$0x1] }
 0x564   :  { %v15547_v31 = vld [vmem:[%s17077_s1 + $0x120] sm:$0xff]  }
 0x574   :  { %v3997_v35 = vpop.f32.mrb[32].mxu0 }
 0x575   :  { %v4003_v36 = vadd.f32 %v3997_v35, %v3917_v33  ;;  %v11262_v37 = vpop.f32.mrb[33].mxu0  ;;  %v15560_v33 = vld [vmem:[%s17077_s1 + $0x128] sm:$0xff]   ;;  %v15580_v35 = vld [vmem:[%s17077_s1 + $0x138] sm:$0xff]  }
 0x576   :  { %v4000_v38 = vpop.f32.mrb[34].mxu0  ;;  %v15590_v37 = vld [vmem:[%s17077_s1 + $0x140] sm:$0xff]  }
 0x577   :  { %v4004_v39 = vadd.f32 %v4003_v36, %v42_v34  ;;  %v11263_v40 = vpop.f32.mrb[35].mxu0  ;;  %v15571_v34 = vld [vmem:[%s17077_s1 + $0x130] sm:$0xff]   ;;  %v5292_v36 = vshll.u32 %v15265_v15, 16  ;;  %v5290_v38 = vshrl.u32 %v15265_v15, 16 }
 0x578   :  { %v15600_v40 = vld [vmem:[%s17077_s1 + $0x148] sm:$0xff]  }
 0x579   :  { %v4005_v41 = vmax.f32 %v4004_v39, 0.0  ;;  %v5294_v39 = vrot.slane %v5292_v36, 1  ;;  %v15812_v36 = vld [vmem:[%s17077_s1 + $0x1b8] sm:$0xff]  }
 0x57a   :  { %17137 = vst [vmem:[#allocation7_spill] sm:$0xff] %v15812_v36 }
 0x57b   :  { %v4006_v59 = vpack.c.bf16 %v4005_v41, %v4005_v41  ;;  %v15603_v41 = vor.u32 %v5294_v39, %v5290_v38  ;;  %v15823_v38 = vld [vmem:[%s17077_s1 + $0x1c0] sm:$0xff]   ;;  %v15832_v39 = vld [vmem:[%s17077_s1 + $0x1c8] sm:$0xff]  }
 0x57c   :  { %17138 = vst [vmem:[#allocation8_spill] sm:$0xff] %v15823_v38  ;;  %17139 = vst [vmem:[#allocation10_spill] sm:$0xff] %v15832_v39 }
 0x57d   :  { %11281 = vmatmul.mubr.msk.bf16.vlgmr.msra.gmra.mrb[32].mxu1 %vm4067_vm6, %v4006_v59  ;;  %v15611_v59 = vld [vmem:[%s17077_s1 + $0xf0] sm:$0xff]  }
 0x57e   :  { %11301 = vmatpush3.bf16.msra.mxu1 %v15222_v52  ;;  %11312 = vmatprep.mubr.msk.bf16.mxu1 %vm13178_vm0, %v13177_v1 }
 0x57f   :  { %11302 = vmatprep.subr.bf16.mxu1 %v13177_v1 }
 0x582   :  { %11303 = vmatpush3.bf16.msra.mxu1 %v15229_v60 }
 0x583   :  { %11304 = vmatprep.subr.bf16.mxu1 %v13177_v1 }
 0x586   :  { %11305 = vmatpush3.bf16.msra.mxu1 %v15238_v0 }
 0x587   :  { %11306 = vmatprep.subr.bf16.mxu1 %v13177_v1 }
 0x58a   :  { %11307 = vmatpush3.bf16.msra.mxu1 %v15245_v2 }
 0x58b   :  { %11308 = vmatprep.subr.bf16.mxu1 %v13177_v1 }
 0x58e   :  { %11309 = vmatpush3.bf16.msra.mxu1 %v15252_v14 }
 0x58f   :  { %11310 = vmatprep.subr.bf16.mxu1 %v13177_v1 }
 0x592   :  { %11311 = vmatpush3.bf16.msra.mxu1 %v15259_v4 }
 0x593   :  { %11316 = vmatprep.subr.bf16.mxu1 %v13177_v1 }
 0x595   :  { %11313 = vmatmul.mubr.msk.bf16.vlgmr.msra.gmra.mrb[36].mxu1 %vm117_vm1, %v15265_v15 }
 0x596   :  { %11317 = vmatpush3.bf16.msra.mxu1 %v15271_v16  ;;  %11328 = vmatprep.mubr.msk.bf16.mxu1 %vm13178_vm0, %v13177_v1 }
 0x597   :  { %11318 = vmatprep.subr.bf16.mxu1 %v13177_v1 }
 0x59a   :  { %11319 = vmatpush3.bf16.msra.mxu1 %v15280_v17 }
 0x59b   :  { %11320 = vmatprep.subr.bf16.mxu1 %v13177_v1 }
 0x59e   :  { %11321 = vmatpush3.bf16.msra.mxu1 %v15289_v18 }
 0x59f   :  { %11322 = vmatprep.subr.bf16.mxu1 %v13177_v1 }
 0x5a2   :  { %11323 = vmatpush3.bf16.msra.mxu1 %v15296_v20 }
 0x5a3   :  { %11324 = vmatprep.subr.bf16.mxu1 %v13177_v1 }
 0x5a6   :  { %11325 = vmatpush3.bf16.msra.mxu1 %v15303_v23 }
 0x5a7   :  { %11326 = vmatprep.subr.bf16.mxu1 %v13177_v1 }
 0x5aa   :  { %11327 = vmatpush3.bf16.msra.mxu1 %v15310_v26 }
 0x5ab   :  { %11332 = vmatprep.subr.bf16.mxu1 %v13177_v1 }
 0x5ad   :  { %11329 = vmatmul.mubr.msk.bf16.vlgmr.msra.gmra.mrb[36].mxu1 %vm117_vm1, %v15316_v28 }
 0x5ae   :  { %11333 = vmatpush3.bf16.msra.mxu1 %v15322_v29  ;;  %11344 = vmatprep.mubr.msk.bf16.mxu1 %vm13178_vm0, %v13177_v1 }
 0x5af   :  { %11334 = vmatprep.subr.bf16.mxu1 %v13177_v1 }
 0x5b2   :  { %11335 = vmatpush3.bf16.msra.mxu1 %v15331_v53 }
 0x5b3   :  { %11336 = vmatprep.subr.bf16.mxu1 %v13177_v1 }
 0x5b6   :  { %11337 = vmatpush3.bf16.msra.mxu1 %v15340_v56 }
 0x5b7   :  { %11338 = vmatprep.subr.bf16.mxu1 %v13177_v1 }
 0x5ba   :  { %11339 = vmatpush3.bf16.msra.mxu1 %v15347_v57 }
 0x5bb   :  { %11340 = vmatprep.subr.bf16.mxu1 %v13177_v1 }
 0x5be   :  { %11341 = vmatpush3.bf16.msra.mxu1 %v15354_v61 }
 0x5bf   :  { %11342 = vmatprep.subr.bf16.mxu1 %v13177_v1 }
 0x5c2   :  { %11343 = vmatpush3.bf16.msra.mxu1 %v15361_v62 }
 0x5c3   :  { %11348 = vmatprep.subr.bf16.mxu1 %v13177_v1 }
 0x5c5   :  { %11345 = vmatmul.mubr.msk.bf16.vlgmr.msra.gmra.mrb[36].mxu1 %vm117_vm1, %v15367_v44 }
 0x5c6   :  { %11349 = vmatpush3.bf16.msra.mxu1 %v15373_v25  ;;  %11360 = vmatprep.mubr.msk.bf16.mxu1 %vm13178_vm0, %v13177_v1 }
 0x5c7   :  { %11350 = vmatprep.subr.bf16.mxu1 %v13177_v1 }
 0x5ca   :  { %11351 = vmatpush3.bf16.msra.mxu1 %v15382_v9 }
 0x5cb   :  { %11352 = vmatprep.subr.bf16.mxu1 %v13177_v1 }
 0x5ce   :  { %11353 = vmatpush3.bf16.msra.mxu1 %v15391_v3 }
 0x5cf   :  { %11354 = vmatprep.subr.bf16.mxu1 %v13177_v1 }
 0x5d2   :  { %11355 = vmatpush3.bf16.msra.mxu1 %v15398_v42 }
 0x5d3   :  { %11356 = vmatprep.subr.bf16.mxu1 %v13177_v1 }
 0x5d6   :  { %11357 = vmatpush3.bf16.msra.mxu1 %v15408_v43 }
 0x5d7   :  { %11358 = vmatprep.subr.bf16.mxu1 %v13177_v1 }
 0x5da   :  { %11359 = vmatpush3.bf16.msra.mxu1 %v15417_v46 }
 0x5db   :  { %11364 = vmatprep.subr.bf16.mxu1 %v13177_v1 }
 0x5dd   :  { %11361 = vmatmul.mubr.msk.bf16.vlgmr.msra.gmra.mrb[36].mxu1 %vm117_vm1, %v15423_v48 }
 0x5de   :  { %11365 = vmatpush3.bf16.msra.mxu1 %v15429_v49  ;;  %11376 = vmatprep.mubr.msk.bf16.mxu1 %vm13178_vm0, %v13177_v1 }
 0x5df   :  { %11366 = vmatprep.subr.bf16.mxu1 %v13177_v1 }
 0x5e2   :  { %11367 = vmatpush3.bf16.msra.mxu1 %v15438_v50 }
 0x5e3   :  { %11368 = vmatprep.subr.bf16.mxu1 %v13177_v1 }
 0x5e6   :  { %11369 = vmatpush3.bf16.msra.mxu1 %v15447_v51 }
 0x5e7   :  { %11370 = vmatprep.subr.bf16.mxu1 %v13177_v1 }
 0x5ea   :  { %11371 = vmatpush3.bf16.msra.mxu1 %v15454_v54 }
 0x5eb   :  { %11372 = vmatprep.subr.bf16.mxu1 %v13177_v1 }
 0x5ee   :  { %11373 = vmatpush3.bf16.msra.mxu1 %v15462_v6 }
 0x5ef   :  { %11374 = vmatprep.subr.bf16.mxu1 %v13177_v1 }
 0x5f2   :  { %11375 = vmatpush3.bf16.msra.mxu1 %v15470_v11 }
 0x5f3   :  { %11460 = vmatprep.subr.bf16.mxu1 %v13177_v1 }
 0x5f5   :  { %11377 = vmatmul.mubr.msk.bf16.vlgmr.msra.gmra.mrb[36].mxu1 %vm117_vm1, %v15473_v12 }
 0x5f6   :  { %11461 = vmatpush3.bf16.msra.mxu1 %v15222_v52  ;;  %11472 = vmatprep.mubr.msk.bf16.mxu1 %vm13178_vm0, %v13177_v1 }
 0x5f7   :  { %11462 = vmatprep.subr.bf16.mxu1 %v13177_v1 }
 0x5fa   :  { %11463 = vmatpush3.bf16.msra.mxu1 %v15229_v60 }
 0x5fb   :  { %11464 = vmatprep.subr.bf16.mxu1 %v13177_v1 }
 0x5fe   :  { %11465 = vmatpush3.bf16.msra.mxu1 %v15238_v0 }
 0x5ff   :  { %11466 = vmatprep.subr.bf16.mxu1 %v13177_v1 }
 0x602   :  { %11467 = vmatpush3.bf16.msra.mxu1 %v15245_v2 }
 0x603   :  { %11468 = vmatprep.subr.bf16.mxu1 %v13177_v1 }
 0x606   :  { %11469 = vmatpush3.bf16.msra.mxu1 %v15252_v14 }
 0x607   :  { %11470 = vmatprep.subr.bf16.mxu1 %v13177_v1 }
 0x60a   :  { %11471 = vmatpush3.bf16.msra.mxu1 %v15259_v4 }
 0x60b   :  { %11476 = vmatprep.subr.bf16.mxu1 %v13177_v1 }
 0x60d   :  { %11473 = vmatmul.mubr.msk.bf16.vlgmr.msra.gmra.mrb[40].mxu1 %vm117_vm1, %v15367_v44 }
 0x60e   :  { %11477 = vmatpush3.bf16.msra.mxu1 %v15271_v16  ;;  %11488 = vmatprep.mubr.msk.bf16.mxu1 %vm13178_vm0, %v13177_v1 }
 0x60f   :  { %11478 = vmatprep.subr.bf16.mxu1 %v13177_v1 }
 0x612   :  { %11479 = vmatpush3.bf16.msra.mxu1 %v15280_v17 }
 0x613   :  { %11480 = vmatprep.subr.bf16.mxu1 %v13177_v1 }
 0x616   :  { %11481 = vmatpush3.bf16.msra.mxu1 %v15289_v18 }
 0x617   :  { %11482 = vmatprep.subr.bf16.mxu1 %v13177_v1 }
 0x61a   :  { %11483 = vmatpush3.bf16.msra.mxu1 %v15296_v20 }
 0x61b   :  { %11484 = vmatprep.subr.bf16.mxu1 %v13177_v1 }
 0x61e   :  { %11485 = vmatpush3.bf16.msra.mxu1 %v15303_v23 }
 0x61f   :  { %11486 = vmatprep.subr.bf16.mxu1 %v13177_v1 }
 0x622   :  { %11487 = vmatpush3.bf16.msra.mxu1 %v15310_v26 }
 0x623   :  { %11492 = vmatprep.subr.bf16.mxu1 %v13177_v1 }
 0x625   :  { %11489 = vmatmul.mubr.msk.bf16.vlgmr.msra.gmra.mrb[40].mxu1 %vm117_vm1, %v15265_v15 }
 0x626   :  { %11493 = vmatpush3.bf16.msra.mxu1 %v15322_v29  ;;  %11504 = vmatprep.mubr.msk.bf16.mxu1 %vm13178_vm0, %v13177_v1 }
 0x627   :  { %11494 = vmatprep.subr.bf16.mxu1 %v13177_v1 }
 0x62a   :  { %11495 = vmatpush3.bf16.msra.mxu1 %v15331_v53 }
 0x62b   :  { %11496 = vmatprep.subr.bf16.mxu1 %v13177_v1 }
 0x62e   :  { %11497 = vmatpush3.bf16.msra.mxu1 %v15340_v56 }
 0x62f   :  { %11498 = vmatprep.subr.bf16.mxu1 %v13177_v1 }
 0x632   :  { %11499 = vmatpush3.bf16.msra.mxu1 %v15347_v57 }
 0x633   :  { %11500 = vmatprep.subr.bf16.mxu1 %v13177_v1 }
 0x636   :  { %11501 = vmatpush3.bf16.msra.mxu1 %v15354_v61 }
 0x637   :  { %11502 = vmatprep.subr.bf16.mxu1 %v13177_v1 }
 0x63a   :  { %11503 = vmatpush3.bf16.msra.mxu1 %v15361_v62 }
 0x63b   :  { %11508 = vmatprep.subr.bf16.mxu1 %v13177_v1 }
 0x63d   :  { %11505 = vmatmul.mubr.msk.bf16.vlgmr.msra.gmra.mrb[40].mxu1 %vm117_vm1, %v15423_v48 }
 0x63e   :  { %11509 = vmatpush3.bf16.msra.mxu1 %v15373_v25  ;;  %11520 = vmatprep.mubr.msk.bf16.mxu1 %vm13178_vm0, %v13177_v1 }
 0x63f   :  { %11510 = vmatprep.subr.bf16.mxu1 %v13177_v1 }
 0x642   :  { %11511 = vmatpush3.bf16.msra.mxu1 %v15382_v9 }
 0x643   :  { %11512 = vmatprep.subr.bf16.mxu1 %v13177_v1 }
 0x646   :  { %11513 = vmatpush3.bf16.msra.mxu1 %v15391_v3 }
 0x647   :  { %11514 = vmatprep.subr.bf16.mxu1 %v13177_v1 }
 0x64a   :  { %11515 = vmatpush3.bf16.msra.mxu1 %v15398_v42 }
 0x64b   :  { %11516 = vmatprep.subr.bf16.mxu1 %v13177_v1 }
 0x64e   :  { %11517 = vmatpush3.bf16.msra.mxu1 %v15408_v43 }
 0x64f   :  { %11518 = vmatprep.subr.bf16.mxu1 %v13177_v1 }
 0x650   :  { %v4109_v19 = vpop.f32.mrb[32].mxu1 }
 0x651   :  { %v4110_v21 = vadd.f32 %v4109_v19, %v43_v13  ;;  %v11282_v22 = vpop.f32.mrb[33].mxu1  ;;  %v15726_v13 = vld [vmem:[%s17077_s1 + $0x178] sm:$0xff]   ;;  %v15735_v19 = vld [vmem:[%s17077_s1 + $0x180] sm:$0xff]  }
 0x652   :  { %v4112_v27 = vpop.f32.mrb[34].mxu1  ;;  %11519 = vmatpush3.bf16.msra.mxu1 %v15417_v46  ;;  %v15761_v22 = vld [vmem:[%s17077_s1 + $0x190] sm:$0xff]  }
 0x653   :  { %v4115_v63 = vmax.f32 %v4110_v21, 0.0  ;;  %v11283_v30 = vpop.f32.mrb[35].mxu1  ;;  %11524 = vmatprep.subr.bf16.mxu1 %v13177_v1  ;;  %v15750_v21 = vld [vmem:[%s17077_s1 + $0x188] sm:$0xff]   ;;  %v15770_v27 = vld [vmem:[%s17077_s1 + $0x198] sm:$0xff]  }
 0x654   :  { %v15788_v30 = vld [vmem:[%s17077_s1 + $0x1a8] sm:$0xff]  }
 0x655   :  { %v4116_v32 = vpack.c.bf16 %v4115_v63, %v4115_v63  ;;  %11521 = vmatmul.mubr.msk.bf16.vlgmr.msra.gmra.mrb[40].mxu1 %vm117_vm1, %v15473_v12  ;;  %v15779_v63 = vld [vmem:[%s17077_s1 + $0x1a0] sm:$0xff]  }
 0x656   :  { %11525 = vmatpush3.bf16.msra.mxu1 %v15429_v49  ;;  %11536 = vmatprep.mubr.msk.bf16.mxu1 %vm13178_vm0, %v13177_v1 }
 0x657   :  { %11297 = vmatmul.mubr.msk.bf16.vlgmr.msra.gmra.mrb[36].mxu0 %vm2292_vm3, %v4116_v32  ;;  %11526 = vmatprep.subr.bf16.mxu1 %v13177_v1  ;;  %v15797_v32 = vld [vmem:[%s17077_s1 + $0x1b0] sm:$0xff]  }
 0x658   :  { %11381 = vmatpush3.bf16.msra.mxu0 %v15547_v31  ;;  %11392 = vmatprep.mubr.msk.bf16.mxu0 %vm13178_vm0, %v13177_v1 }
 0x659   :  { %11382 = vmatprep.subr.bf16.mxu0 %v13177_v1 }
 0x65a   :  { %11527 = vmatpush3.bf16.msra.mxu1 %v15438_v50 }
 0x65b   :  { %11528 = vmatprep.subr.bf16.mxu1 %v13177_v1 }
 0x65c   :  { %11383 = vmatpush3.bf16.msra.mxu0 %v15560_v33 }
 0x65d   :  { %11384 = vmatprep.subr.bf16.mxu0 %v13177_v1 }
 0x65e   :  { %11529 = vmatpush3.bf16.msra.mxu1 %v15447_v51 }
 0x65f   :  { %11530 = vmatprep.subr.bf16.mxu1 %v13177_v1 }
 0x660   :  { %11385 = vmatpush3.bf16.msra.mxu0 %v15571_v34 }
 0x661   :  { %11386 = vmatprep.subr.bf16.mxu0 %v13177_v1 }
 0x662   :  { %11531 = vmatpush3.bf16.msra.mxu1 %v15454_v54 }
 0x663   :  { %11532 = vmatprep.subr.bf16.mxu1 %v13177_v1 }
 0x664   :  { %11387 = vmatpush3.bf16.msra.mxu0 %v15580_v35 }
 0x665   :  { %11388 = vmatprep.subr.bf16.mxu0 %v13177_v1 }
 0x666   :  { %11533 = vmatpush3.bf16.msra.mxu1 %v15462_v6 }
 0x667   :  { %11534 = vmatprep.subr.bf16.mxu1 %v13177_v1 }
 0x668   :  { %11389 = vmatpush3.bf16.msra.mxu0 %v15590_v37 }
 0x669   :  { %11390 = vmatprep.subr.bf16.mxu0 %v13177_v1 }
 0x66a   :  { %11535 = vmatpush3.bf16.msra.mxu1 %v15470_v11 }
 0x66b   :  { %11620 = vmatprep.subr.bf16.mxu1 %v13177_v1 }
 0x66c   :  { %11391 = vmatpush3.bf16.msra.mxu0 %v15600_v40 }
 0x66d   :  { %11396 = vmatprep.subr.bf16.mxu0 %v13177_v1  ;;  %11537 = vmatmul.mubr.msk.bf16.vlgmr.msra.gmra.mrb[40].mxu1 %vm117_vm1, %v15603_v41 }
 0x66e   :  { %11621 = vmatpush3.bf16.msra.mxu1 %v15222_v52  ;;  %11632 = vmatprep.mubr.msk.bf16.mxu1 %vm13178_vm0, %v13177_v1 }
 0x66f   :  { %11393 = vmatmul.mubr.msk.bf16.vlgmr.msra.gmra.mrb[40].mxu0 %vm117_vm1, %v15265_v15  ;;  %11622 = vmatprep.subr.bf16.mxu1 %v13177_v1 }
 0x670   :  { %11397 = vmatpush3.bf16.msra.mxu0 %v15611_v59  ;;  %11408 = vmatprep.mubr.msk.bf16.mxu0 %vm13178_vm0, %v13177_v1 }
 0x671   :  { %11398 = vmatprep.subr.bf16.mxu0 %v13177_v1 }
 0x672   :  { %11623 = vmatpush3.bf16.msra.mxu1 %v15229_v60 }
 0x673   :  { %11624 = vmatprep.subr.bf16.mxu1 %v13177_v1 }
 0x674   :  { %11399 = vmatpush3.bf16.msra.mxu0 %v15626_v7 }
 0x675   :  { %11400 = vmatprep.subr.bf16.mxu0 %v13177_v1 }
 0x676   :  { %11625 = vmatpush3.bf16.msra.mxu1 %v15238_v0 }
 0x677   :  { %11626 = vmatprep.subr.bf16.mxu1 %v13177_v1 }
 0x678   :  { %11401 = vmatpush3.bf16.msra.mxu0 %v15637_v5 }
 0x679   :  { %11402 = vmatprep.subr.bf16.mxu0 %v13177_v1 }
 0x67a   :  { %11627 = vmatpush3.bf16.msra.mxu1 %v15245_v2 }
 0x67b   :  { %11628 = vmatprep.subr.bf16.mxu1 %v13177_v1 }
 0x67c   :  { %11403 = vmatpush3.bf16.msra.mxu0 %v15646_v24 }
 0x67d   :  { %11404 = vmatprep.subr.bf16.mxu0 %v13177_v1 }
 0x67e   :  { %11629 = vmatpush3.bf16.msra.mxu1 %v15252_v14 }
 0x67f   :  { %11630 = vmatprep.subr.bf16.mxu1 %v13177_v1 }
 0x680   :  { %11405 = vmatpush3.bf16.msra.mxu0 %v15655_v58 }
 0x681   :  { %11406 = vmatprep.subr.bf16.mxu0 %v13177_v1 }
 0x682   :  { %11631 = vmatpush3.bf16.msra.mxu1 %v15259_v4 }
 0x683   :  { %11636 = vmatprep.subr.bf16.mxu1 %v13177_v1 }
 0x684   :  { %11407 = vmatpush3.bf16.msra.mxu0 %v15664_v45 }
 0x685   :  { %11412 = vmatprep.subr.bf16.mxu0 %v13177_v1  ;;  %11633 = vmatmul.mubr.msk.bf16.vlgmr.msra.gmra.mrb[44].mxu1 %vm117_vm1, %v15423_v48 }
 0x686   :  { %11637 = vmatpush3.bf16.msra.mxu1 %v15271_v16  ;;  %11648 = vmatprep.mubr.msk.bf16.mxu1 %vm13178_vm0, %v13177_v1 }
 0x687   :  { %11409 = vmatmul.mubr.msk.bf16.vlgmr.msra.gmra.mrb[40].mxu0 %vm117_vm1, %v15316_v28  ;;  %11638 = vmatprep.subr.bf16.mxu1 %v13177_v1  ;;  %v15699_v28 = vld [vmem:[%s17077_s1 + $0x160] sm:$0xff]  }
 0x688   :  { %11413 = vmatpush3.bf16.msra.mxu0 %v15673_v47  ;;  %11424 = vmatprep.mubr.msk.bf16.mxu0 %vm13178_vm0, %v13177_v1 }
 0x689   :  { %11414 = vmatprep.subr.bf16.mxu0 %v13177_v1 }
 0x68a   :  { %11639 = vmatpush3.bf16.msra.mxu1 %v15280_v17 }
 0x68b   :  { %11640 = vmatprep.subr.bf16.mxu1 %v13177_v1 }
 0x68c   :  { %11415 = vmatpush3.bf16.msra.mxu0 %v15688_v55 }
 0x68d   :  { %11416 = vmatprep.subr.bf16.mxu0 %v13177_v1 }
 0x68e   :  { %11641 = vmatpush3.bf16.msra.mxu1 %v15289_v18 }
 0x68f   :  { %11642 = vmatprep.subr.bf16.mxu1 %v13177_v1 }
 0x690   :  { %11417 = vmatpush3.bf16.msra.mxu0 %v15699_v28 }
 0x691   :  { %11418 = vmatprep.subr.bf16.mxu0 %v13177_v1 }
 0x692   :  { %11643 = vmatpush3.bf16.msra.mxu1 %v15296_v20 }
 0x693   :  { %11644 = vmatprep.subr.bf16.mxu1 %v13177_v1 }
 0x694   :  { %11419 = vmatpush3.bf16.msra.mxu0 %v15708_v8 }
 0x695   :  { %11420 = vmatprep.subr.bf16.mxu0 %v13177_v1 }
 0x696   :  { %11645 = vmatpush3.bf16.msra.mxu1 %v15303_v23 }
 0x697   :  { %11646 = vmatprep.subr.bf16.mxu1 %v13177_v1 }
 0x698   :  { %11421 = vmatpush3.bf16.msra.mxu0 %v15717_v10 }
 0x699   :  { %11422 = vmatprep.subr.bf16.mxu0 %v13177_v1 }
 0x69a   :  { %11647 = vmatpush3.bf16.msra.mxu1 %v15310_v26 }
 0x69b   :  { %11652 = vmatprep.subr.bf16.mxu1 %v13177_v1 }
 0x69c   :  { %11423 = vmatpush3.bf16.msra.mxu0 %v15726_v13 }
 0x69d   :  { %11428 = vmatprep.subr.bf16.mxu0 %v13177_v1  ;;  %11649 = vmatmul.mubr.msk.bf16.vlgmr.msra.gmra.mrb[44].mxu1 %vm117_vm1, %v15367_v44 }
 0x69e   :  { %11653 = vmatpush3.bf16.msra.mxu1 %v15322_v29  ;;  %11664 = vmatprep.mubr.msk.bf16.mxu1 %vm13178_vm0, %v13177_v1 }
 0x69f   :  { %11425 = vmatmul.mubr.msk.bf16.vlgmr.msra.gmra.mrb[40].mxu0 %vm117_vm1, %v15367_v44  ;;  %11654 = vmatprep.subr.bf16.mxu1 %v13177_v1 }
 0x6a0   :  { %11429 = vmatpush3.bf16.msra.mxu0 %v15735_v19  ;;  %11440 = vmatprep.mubr.msk.bf16.mxu0 %vm13178_vm0, %v13177_v1 }
 0x6a1   :  { %11430 = vmatprep.subr.bf16.mxu0 %v13177_v1 }
 0x6a2   :  { %11655 = vmatpush3.bf16.msra.mxu1 %v15331_v53 }
 0x6a3   :  { %11656 = vmatprep.subr.bf16.mxu1 %v13177_v1 }
 0x6a4   :  { %11431 = vmatpush3.bf16.msra.mxu0 %v15750_v21 }
 0x6a5   :  { %11432 = vmatprep.subr.bf16.mxu0 %v13177_v1 }
 0x6a6   :  { %11657 = vmatpush3.bf16.msra.mxu1 %v15340_v56 }
 0x6a7   :  { %11658 = vmatprep.subr.bf16.mxu1 %v13177_v1 }
 0x6a8   :  { %11433 = vmatpush3.bf16.msra.mxu0 %v15761_v22 }
 0x6a9   :  { %11434 = vmatprep.subr.bf16.mxu0 %v13177_v1 }
 0x6aa   :  { %11659 = vmatpush3.bf16.msra.mxu1 %v15347_v57 }
 0x6ab   :  { %11660 = vmatprep.subr.bf16.mxu1 %v13177_v1 }
 0x6ac   :  { %11435 = vmatpush3.bf16.msra.mxu0 %v15770_v27 }
 0x6ad   :  { %11436 = vmatprep.subr.bf16.mxu0 %v13177_v1 }
 0x6ae   :  { %11661 = vmatpush3.bf16.msra.mxu1 %v15354_v61 }
 0x6af   :  { %11662 = vmatprep.subr.bf16.mxu1 %v13177_v1 }
 0x6b0   :  { %11437 = vmatpush3.bf16.msra.mxu0 %v15779_v63 }
 0x6b1   :  { %11438 = vmatprep.subr.bf16.mxu0 %v13177_v1 }
 0x6b2   :  { %11663 = vmatpush3.bf16.msra.mxu1 %v15361_v62 }
 0x6b3   :  { %11668 = vmatprep.subr.bf16.mxu1 %v13177_v1 }
 0x6b4   :  { %11439 = vmatpush3.bf16.msra.mxu0 %v15788_v30 }
 0x6b5   :  { %11444 = vmatprep.subr.bf16.mxu0 %v13177_v1  ;;  %11665 = vmatmul.mubr.msk.bf16.vlgmr.msra.gmra.mrb[44].mxu1 %vm117_vm1, %v15473_v12 }
 0x6b6   :  { %11669 = vmatpush3.bf16.msra.mxu1 %v15373_v25  ;;  %11680 = vmatprep.mubr.msk.bf16.mxu1 %vm13178_vm0, %v13177_v1 }
 0x6b7   :  { %11441 = vmatmul.mubr.msk.bf16.vlgmr.msra.gmra.mrb[40].mxu0 %vm117_vm1, %v15423_v48  ;;  %11670 = vmatprep.subr.bf16.mxu1 %v13177_v1 }
 0x6b8   :  { %11445 = vmatpush3.bf16.msra.mxu0 %v15797_v32  ;;  %11456 = vmatprep.mubr.msk.bf16.mxu0 %vm13178_vm0, %v13177_v1 }
 0x6b9   :  { %11446 = vmatprep.subr.bf16.mxu0 %v13177_v1 }
 0x6ba   :  { %11671 = vmatpush3.bf16.msra.mxu1 %v15382_v9 }
 0x6bb   :  { %11672 = vmatprep.subr.bf16.mxu1 %v13177_v1 }
 0x6bc   :  { %11447 = vmatpush3.bf16.msra.mxu0 %v15812_v36 }
 0x6bd   :  { %11448 = vmatprep.subr.bf16.mxu0 %v13177_v1 }
 0x6be   :  { %11673 = vmatpush3.bf16.msra.mxu1 %v15391_v3  ;;  %v15841_v3 = vld [vmem:[%s17077_s1 + $0x1d0] sm:$0xff]  }
 0x6bf   :  { %11674 = vmatprep.subr.bf16.mxu1 %v13177_v1 }
 0x6c0   :  { %11449 = vmatpush3.bf16.msra.mxu0 %v15823_v38 }
 0x6c1   :  { %11450 = vmatprep.subr.bf16.mxu0 %v13177_v1 }
 0x6c2   :  { %11675 = vmatpush3.bf16.msra.mxu1 %v15398_v42  ;;  %v15850_v42 = vld [vmem:[%s17077_s1 + $0x1d8] sm:$0xff]   ;;  %s13179_s1 = smov [#allocation2]  }
 0x6c3   :  { %11676 = vmatprep.subr.bf16.mxu1 %v13177_v1  ;;  %s8339_s21 = sshll.u32 %s13179_s1, 4  ;;  %s8340_s21 = int_to_ptr.vmem [resolvable:$true] %s8339_s21 }
 0x6c4   :  { %11451 = vmatpush3.bf16.msra.mxu0 %v15832_v39  ;;  %p13158_p1 = scmp.lt.s32.totalorder %s8340_s21, %s8340_s21 }
 0x6c5   :  { %11452 = vmatprep.subr.bf16.mxu0 %v13177_v1 }
 0x6c6   :  { %11677 = vmatpush3.bf16.msra.mxu1 %v15408_v43 }
 0x6c7   :  { %11678 = vmatprep.subr.bf16.mxu1 %v13177_v1 }
 0x6c8   :  { %11453 = vmatpush3.bf16.msra.mxu0 %v15841_v3  ;;  %v15852_v38 = vpop.f32.mrb[36].mxu1 }
 0x6c9   :  { %17140 = vst [vmem:[#allocation11_spill] sm:$0xff] %v15852_v38  ;;  %11454 = vmatprep.subr.bf16.mxu0 %v13177_v1  ;;  %v11378_v39 = vpop.f32.mrb[37].mxu1 }
 0x6ca   :  { %v4681_v36 = vpop.f32.mrb[38].mxu1  ;;  %11679 = vmatpush3.bf16.msra.mxu1 %v15417_v46 }
 0x6cb   :  { %v11379_v9 = vpop.f32.mrb[39].mxu1  ;;  %11684 = vmatprep.subr.bf16.mxu1 %v13177_v1  ;;  %v5710_v36 = vshrl.u32 %v15367_v44, 16 }
 0x6cc   :  { %11455 = vmatpush3.bf16.msra.mxu0 %v15850_v42  ;;  %v5712_v9 = vshll.u32 %v15367_v44, 16 }
 0x6cd   :  { %11540 = vmatprep.subr.bf16.mxu0 %v13177_v1  ;;  %11681 = vmatmul.mubr.msk.bf16.vlgmr.msra.gmra.mrb[44].mxu1 %vm117_vm1, %v15603_v41 }
 0x6ce   :  { %11685 = vmatpush3.bf16.msra.mxu1 %v15429_v49  ;;  %11696 = vmatprep.mubr.msk.bf16.mxu1 %vm13178_vm0, %v13177_v1  ;;  %v5714_v39 = vrot.slane %v5712_v9, 1 }
 0x6cf   :  { %11457 = vmatmul.mubr.msk.bf16.vlgmr.msra.gmra.mrb[40].mxu0 %vm117_vm1, %v15473_v12  ;;  %11686 = vmatprep.subr.bf16.mxu1 %v13177_v1 }
 0x6d0   :  { %11541 = vmatpush3.bf16.msra.mxu0 %v15547_v31  ;;  %11552 = vmatprep.mubr.msk.bf16.mxu0 %vm13178_vm0, %v13177_v1  ;;  %v15889_v38 = vor.u32 %v5714_v39, %v5710_v36 }
 0x6d1   :  { %11542 = vmatprep.subr.bf16.mxu0 %v13177_v1 }
 0x6d2   :  { %11687 = vmatpush3.bf16.msra.mxu1 %v15438_v50 }
 0x6d3   :  { %11688 = vmatprep.subr.bf16.mxu1 %v13177_v1 }
 0x6d4   :  { %11543 = vmatpush3.bf16.msra.mxu0 %v15560_v33 }
 0x6d5   :  { %11544 = vmatprep.subr.bf16.mxu0 %v13177_v1 }
 0x6d6   :  { %11689 = vmatpush3.bf16.msra.mxu1 %v15447_v51 }
 0x6d7   :  { %11690 = vmatprep.subr.bf16.mxu1 %v13177_v1 }
 0x6d8   :  { %11545 = vmatpush3.bf16.msra.mxu0 %v15571_v34 }
 0x6d9   :  { %11546 = vmatprep.subr.bf16.mxu0 %v13177_v1 }
 0x6da   :  { %11691 = vmatpush3.bf16.msra.mxu1 %v15454_v54 }
 0x6db   :  { %11692 = vmatprep.subr.bf16.mxu1 %v13177_v1 }
 0x6dc   :  { %11547 = vmatpush3.bf16.msra.mxu0 %v15580_v35 }
 0x6dd   :  { %11548 = vmatprep.subr.bf16.mxu0 %v13177_v1 }
 0x6de   :  { %11693 = vmatpush3.bf16.msra.mxu1 %v15462_v6 }
 0x6df   :  { %11694 = vmatprep.subr.bf16.mxu1 %v13177_v1 }
 0x6e0   :  { %11549 = vmatpush3.bf16.msra.mxu0 %v15590_v37 }
 0x6e1   :  { %11550 = vmatprep.subr.bf16.mxu0 %v13177_v1 }
 0x6e2   :  { %11695 = vmatpush3.bf16.msra.mxu1 %v15470_v11 }
 0x6e3   :  { %11780 = vmatprep.subr.bf16.mxu1 %v13177_v1 }
 0x6e4   :  { %11551 = vmatpush3.bf16.msra.mxu0 %v15600_v40 }
 0x6e5   :  { %11556 = vmatprep.subr.bf16.mxu0 %v13177_v1  ;;  %11697 = vmatmul.mubr.msk.bf16.vlgmr.msra.gmra.mrb[44].mxu1 %vm117_vm1, %v15889_v38 }
 0x6e6   :  { %11781 = vmatpush3.bf16.msra.mxu1 %v15222_v52  ;;  %11792 = vmatprep.mubr.msk.bf16.mxu1 %vm13178_vm0, %v13177_v1  ;;  %v44_v52 = vld [vmem:[%s17086_s10] sm:$0x1] }
 0x6e7   :  { %11553 = vmatmul.mubr.msk.bf16.vlgmr.msra.gmra.mrb[44].mxu0 %vm117_vm1, %v15367_v44  ;;  %11782 = vmatprep.subr.bf16.mxu1 %v13177_v1 }
 0x6e8   :  { %11557 = vmatpush3.bf16.msra.mxu0 %v15611_v59  ;;  %11568 = vmatprep.mubr.msk.bf16.mxu0 %vm13178_vm0, %v13177_v1 }
 0x6e9   :  { %11558 = vmatprep.subr.bf16.mxu0 %v13177_v1 }
 0x6ea   :  { %11783 = vmatpush3.bf16.msra.mxu1 %v15229_v60 }
 0x6eb   :  { %11784 = vmatprep.subr.bf16.mxu1 %v13177_v1 }
 0x6ec   :  { %11559 = vmatpush3.bf16.msra.mxu0 %v15626_v7 }
 0x6ed   :  { %11560 = vmatprep.subr.bf16.mxu0 %v13177_v1 }
 0x6ee   :  { %11785 = vmatpush3.bf16.msra.mxu1 %v15238_v0 }
 0x6ef   :  { %11786 = vmatprep.subr.bf16.mxu1 %v13177_v1 }
 0x6f0   :  { %11561 = vmatpush3.bf16.msra.mxu0 %v15637_v5 }
 0x6f1   :  { %11562 = vmatprep.subr.bf16.mxu0 %v13177_v1 }
 0x6f2   :  { %11787 = vmatpush3.bf16.msra.mxu1 %v15245_v2 }
 0x6f3   :  { %11788 = vmatprep.subr.bf16.mxu1 %v13177_v1 }
 0x6f4   :  { %11563 = vmatpush3.bf16.msra.mxu0 %v15646_v24 }
 0x6f5   :  { %11564 = vmatprep.subr.bf16.mxu0 %v13177_v1 }
 0x6f6   :  { %11789 = vmatpush3.bf16.msra.mxu1 %v15252_v14 }
 0x6f7   :  { %11790 = vmatprep.subr.bf16.mxu1 %v13177_v1 }
 0x6f8   :  { %11565 = vmatpush3.bf16.msra.mxu0 %v15655_v58 }
 0x6f9   :  { %11566 = vmatprep.subr.bf16.mxu0 %v13177_v1 }
 0x6fa   :  { %11791 = vmatpush3.bf16.msra.mxu1 %v15259_v4 }
 0x6fb   :  { %11796 = vmatprep.subr.bf16.mxu1 %v13177_v1 }
 0x6fc   :  { %11567 = vmatpush3.bf16.msra.mxu0 %v15664_v45 }
 0x6fd   :  { %11572 = vmatprep.subr.bf16.mxu0 %v13177_v1  ;;  %11793 = vmatmul.mubr.msk.bf16.vlgmr.msra.gmra.mrb[48].mxu1 %vm117_vm1, %v15473_v12 }
 0x6fe   :  { %11797 = vmatpush3.bf16.msra.mxu1 %v15271_v16  ;;  %11808 = vmatprep.mubr.msk.bf16.mxu1 %vm13178_vm0, %v13177_v1  ;;  %v17142_v16 = vld [vmem:[#allocation7_spill] sm:$0xff] }
 0x6ff   :  { %11569 = vmatmul.mubr.msk.bf16.vlgmr.msra.gmra.mrb[44].mxu0 %vm117_vm1, %v15265_v15  ;;  %11798 = vmatprep.subr.bf16.mxu1 %v13177_v1  ;;  %v17141_v15 = vld [vmem:[#allocation9_spill] sm:$0xff] }
 0x700   :  { %11573 = vmatpush3.bf16.msra.mxu0 %v15673_v47  ;;  %11584 = vmatprep.mubr.msk.bf16.mxu0 %vm13178_vm0, %v13177_v1 }
 0x701   :  { %11574 = vmatprep.subr.bf16.mxu0 %v13177_v1 }
 0x702   :  { %11799 = vmatpush3.bf16.msra.mxu1 %v15280_v17  ;;  %v17143_v17 = vld [vmem:[#allocation5_spill] sm:$0xff] }
 0x703   :  { %11800 = vmatprep.subr.bf16.mxu1 %v13177_v1 }
 0x704   :  { %11575 = vmatpush3.bf16.msra.mxu0 %v15688_v55 }
 0x705   :  { %11576 = vmatprep.subr.bf16.mxu0 %v13177_v1 }
 0x706   :  { %11801 = vmatpush3.bf16.msra.mxu1 %v15289_v18  ;;  %v17144_v18 = vld [vmem:[#allocation8_spill] sm:$0xff] }
 0x707   :  { %11802 = vmatprep.subr.bf16.mxu1 %v13177_v1 }
 0x708   :  { %11577 = vmatpush3.bf16.msra.mxu0 %v15699_v28 }
 0x709   :  { %11578 = vmatprep.subr.bf16.mxu0 %v13177_v1 }
 0x70a   :  { %11803 = vmatpush3.bf16.msra.mxu1 %v15296_v20  ;;  %v17145_v20 = vld [vmem:[#allocation6_spill] sm:$0xff] }
 0x70b   :  { %11804 = vmatprep.subr.bf16.mxu1 %v13177_v1 }
 0x70c   :  { %11579 = vmatpush3.bf16.msra.mxu0 %v15708_v8 }
 0x70d   :  { %11580 = vmatprep.subr.bf16.mxu0 %v13177_v1 }
 0x70e   :  { %11805 = vmatpush3.bf16.msra.mxu1 %v15303_v23  ;;  %v17146_v23 = vld [vmem:[#allocation10_spill] sm:$0xff] }
 0x70f   :  { %11806 = vmatprep.subr.bf16.mxu1 %v13177_v1 }
 0x710   :  { %11581 = vmatpush3.bf16.msra.mxu0 %v15717_v10 }
 0x711   :  { %11582 = vmatprep.subr.bf16.mxu0 %v13177_v1 }
 0x712   :  { %11807 = vmatpush3.bf16.msra.mxu1 %v15310_v26 }
 0x713   :  { %11812 = vmatprep.subr.bf16.mxu1 %v13177_v1 }
 0x714   :  { %11583 = vmatpush3.bf16.msra.mxu0 %v15726_v13 }
 0x715   :  { %11588 = vmatprep.subr.bf16.mxu0 %v13177_v1  ;;  %11809 = vmatmul.mubr.msk.bf16.vlgmr.msra.gmra.mrb[48].mxu1 %vm117_vm1, %v15423_v48 }
 0x716   :  { %11813 = vmatpush3.bf16.msra.mxu1 %v15322_v29  ;;  %11824 = vmatprep.mubr.msk.bf16.mxu1 %vm13178_vm0, %v13177_v1 }
 0x717   :  { %11585 = vmatmul.mubr.msk.bf16.vlgmr.msra.gmra.mrb[44].mxu0 %vm117_vm1, %v15423_v48  ;;  %11814 = vmatprep.subr.bf16.mxu1 %v13177_v1 }
 0x718   :  { %11589 = vmatpush3.bf16.msra.mxu0 %v15735_v19  ;;  %11600 = vmatprep.mubr.msk.bf16.mxu0 %vm13178_vm0, %v13177_v1 }
 0x719   :  { %11590 = vmatprep.subr.bf16.mxu0 %v13177_v1 }
 0x71a   :  { %11815 = vmatpush3.bf16.msra.mxu1 %v15331_v53 }
 0x71b   :  { %11816 = vmatprep.subr.bf16.mxu1 %v13177_v1 }
 0x71c   :  { %11591 = vmatpush3.bf16.msra.mxu0 %v15750_v21 }
 0x71d   :  { %11592 = vmatprep.subr.bf16.mxu0 %v13177_v1 }
 0x71e   :  { %11817 = vmatpush3.bf16.msra.mxu1 %v15340_v56 }
 0x71f   :  { %11818 = vmatprep.subr.bf16.mxu1 %v13177_v1 }
 0x720   :  { %11593 = vmatpush3.bf16.msra.mxu0 %v15761_v22 }
 0x721   :  { %11594 = vmatprep.subr.bf16.mxu0 %v13177_v1 }
 0x722   :  { %11819 = vmatpush3.bf16.msra.mxu1 %v15347_v57  ;;  %v6127_v57 = vshll.u32 %v15423_v48, 16 }
 0x723   :  { %11820 = vmatprep.subr.bf16.mxu1 %v13177_v1 }
 0x724   :  { %11595 = vmatpush3.bf16.msra.mxu0 %v15770_v27 }
 0x725   :  { %11596 = vmatprep.subr.bf16.mxu0 %v13177_v1 }
 0x726   :  { %11821 = vmatpush3.bf16.msra.mxu1 %v15354_v61  ;;  %v6125_v61 = vshrl.u32 %v15423_v48, 16 }
 0x727   :  { %11822 = vmatprep.subr.bf16.mxu1 %v13177_v1 }
 0x728   :  { %11597 = vmatpush3.bf16.msra.mxu0 %v15779_v63 }
 0x729   :  { %11598 = vmatprep.subr.bf16.mxu0 %v13177_v1 }
 0x72a   :  { %v4201_v60 = vpop.f32.mrb[36].mxu0  ;;  %11823 = vmatpush3.bf16.msra.mxu1 %v15361_v62  ;;  %v6129_v62 = vrot.slane %v6127_v57, 1 }
 0x72b   :  { %v4202_v0 = vadd.f32 %v4201_v60, %v44_v52  ;;  %v11298_v2 = vpop.f32.mrb[37].mxu0  ;;  %11828 = vmatprep.subr.bf16.mxu1 %v13177_v1 }
 0x72c   :  { %11599 = vmatpush3.bf16.msra.mxu0 %v15788_v30  ;;  %v4204_v14 = vpop.f32.mrb[38].mxu0 }
 0x72d   :  { %4208 = vst.msk [vmem:[#allocation2] sm:$0x1] %vm4207_vm7, %v4202_v0  ;;  %v11299_v4 = vpop.f32.mrb[39].mxu0  ;;  %11604 = vmatprep.subr.bf16.mxu0 %v13177_v1  ;;  %11825 = vmatmul.mubr.msk.bf16.vlgmr.msra.gmra.mrb[48].mxu1 %vm117_vm1, %v15603_v41  ;;  %v13148_v0 = vld [vmem:[%s17078_s2] ss:$0 sm:$0xff] }
 0x72e   :  { %11829 = vmatpush3.bf16.msra.mxu1 %v15373_v25  ;;  %11840 = vmatprep.mubr.msk.bf16.mxu1 %vm13178_vm0, %v13177_v1  ;;  %v16059_v25 = vor.u32 %v6129_v62, %v6125_v61  ;;  %v16322_v4 = vld [vmem:[%s17079_s3] sm:$0xff]   ;;  %v12994_v61 = vld [vmem:[%s17079_s3 + $0x28] ss:$0 sps:$4 sm:$0x33]  }
 0x72f   :  { %11601 = vmatmul.mubr.msk.bf16.vlgmr.msra.gmra.mrb[44].mxu0 %vm117_vm1, %v15473_v12  ;;  %11830 = vmatprep.subr.bf16.mxu1 %v13177_v1  ;;  %v12995_v62 = vld [vmem:[%s17079_s3 + $0x104] ss:$0 sps:$4 sm:$0x33]  }
 0x730   :  { %11605 = vmatpush3.bf16.msra.mxu0 %v15797_v32  ;;  %11616 = vmatprep.mubr.msk.bf16.mxu0 %vm13178_vm0, %v13177_v1 }
 0x731   :  { %11606 = vmatprep.subr.bf16.mxu0 %v13177_v1 }
 0x732   :  { %11831 = vmatpush3.bf16.msra.mxu1 %v17141_v15  ;;  %v16327_v15 = vld [vmem:[%s17079_s3 + $0xdc] sm:$0xff]  }
 0x733   :  { %11832 = vmatprep.subr.bf16.mxu1 %v13177_v1 }
 0x734   :  { %11607 = vmatpush3.bf16.msra.mxu0 %v17142_v16 }
 0x735   :  { %11608 = vmatprep.subr.bf16.mxu0 %v13177_v1 }
 0x736   :  { %11833 = vmatpush3.bf16.msra.mxu1 %v17143_v17  ;;  %v16340_v17 = vld [vmem:[%s17079_s3 + $0x8] sm:$0xff]  }
 0x737   :  { %11834 = vmatprep.subr.bf16.mxu1 %v13177_v1 }
 0x738   :  { %11609 = vmatpush3.bf16.msra.mxu0 %v17144_v18 }
 0x739   :  { %11610 = vmatprep.subr.bf16.mxu0 %v13177_v1 }
 0x73a   :  { %11835 = vmatpush3.bf16.msra.mxu1 %v17145_v20  ;;  %v16358_v20 = vld [vmem:[%s17079_s3 + $0x10] sm:$0xff]  }
 0x73b   :  { %11836 = vmatprep.subr.bf16.mxu1 %v13177_v1 }
 0x73c   :  { %11611 = vmatpush3.bf16.msra.mxu0 %v17146_v23 }
 0x73d   :  { %11612 = vmatprep.subr.bf16.mxu0 %v13177_v1 }
 0x73e   :  { %11837 = vmatpush3.bf16.msra.mxu1 %v15408_v43  ;;  %v17147_v43 = vld [vmem:[#allocation11_spill] sm:$0xff] }
 0x73f   :  { %11838 = vmatprep.subr.bf16.mxu1 %v13177_v1 }
 0x740   :  { %11613 = vmatpush3.bf16.msra.mxu0 %v15841_v3  ;;  %v16022_v26 = vpop.f32.mrb[40].mxu1 }
 0x741   :  { %11614 = vmatprep.subr.bf16.mxu0 %v13177_v1  ;;  %v11538_v29 = vpop.f32.mrb[41].mxu1 }
 0x742   :  { %v5336_v53 = vpop.f32.mrb[42].mxu1  ;;  %11839 = vmatpush3.bf16.msra.mxu1 %v15417_v46  ;;  %v16377_v29 = vld [vmem:[%s17079_s3 + $0xf4] sm:$0xff]  }
 0x743   :  { %v11539_v56 = vpop.f32.mrb[43].mxu1  ;;  %11844 = vmatprep.subr.bf16.mxu1 %v13177_v1  ;;  %v16386_v53 = vld [vmem:[%s17079_s3 + $0x20] sm:$0xff]  }
 0x744   :  { %11615 = vmatpush3.bf16.msra.mxu0 %v15850_v42  ;;  %v16391_v56 = vld [vmem:[%s17079_s3 + $0xfc] sm:$0xff]  }
 0x745   :  { %11700 = vmatprep.subr.bf16.mxu0 %v13177_v1  ;;  %11841 = vmatmul.mubr.msk.bf16.vlgmr.msra.gmra.mrb[48].mxu1 %vm117_vm1, %v15889_v38 }
 0x746   :  { %11845 = vmatpush3.bf16.msra.mxu1 %v15429_v49  ;;  %11856 = vmatprep.mubr.msk.bf16.mxu1 %vm13178_vm0, %v13177_v1 }
 0x747   :  { %11617 = vmatmul.mubr.msk.bf16.vlgmr.msra.gmra.mrb[44].mxu0 %vm117_vm1, %v15603_v41  ;;  %11846 = vmatprep.subr.bf16.mxu1 %v13177_v1 }
 0x748   :  { %11701 = vmatpush3.bf16.msra.mxu0 %v15547_v31  ;;  %11712 = vmatprep.mubr.msk.bf16.mxu0 %vm13178_vm0, %v13177_v1 }
 0x749   :  { %11702 = vmatprep.subr.bf16.mxu0 %v13177_v1 }
 0x74a   :  { %11847 = vmatpush3.bf16.msra.mxu1 %v15438_v50 }
 0x74b   :  { %11848 = vmatprep.subr.bf16.mxu1 %v13177_v1 }
 0x74c   :  { %11703 = vmatpush3.bf16.msra.mxu0 %v15560_v33 }
 0x74d   :  { %11704 = vmatprep.subr.bf16.mxu0 %v13177_v1 }
 0x74e   :  { %11849 = vmatpush3.bf16.msra.mxu1 %v15447_v51 }
 0x74f   :  { %11850 = vmatprep.subr.bf16.mxu1 %v13177_v1 }
 0x750   :  { %11705 = vmatpush3.bf16.msra.mxu0 %v15571_v34 }
 0x751   :  { %11706 = vmatprep.subr.bf16.mxu0 %v13177_v1 }
 0x752   :  { %11851 = vmatpush3.bf16.msra.mxu1 %v15454_v54 }
 0x753   :  { %11852 = vmatprep.subr.bf16.mxu1 %v13177_v1 }
 0x754   :  { %11707 = vmatpush3.bf16.msra.mxu0 %v15580_v35 }
 0x755   :  { %11708 = vmatprep.subr.bf16.mxu0 %v13177_v1 }
 0x756   :  { %11853 = vmatpush3.bf16.msra.mxu1 %v15462_v6 }
 0x757   :  { %11854 = vmatprep.subr.bf16.mxu1 %v13177_v1 }
 0x758   :  { %11709 = vmatpush3.bf16.msra.mxu0 %v15590_v37 }
 0x759   :  { %11710 = vmatprep.subr.bf16.mxu0 %v13177_v1 }
 0x75a   :  { %11855 = vmatpush3.bf16.msra.mxu1 %v15470_v11 }
 0x75b   :  { %11940 = vmatprep.subr.bf16.mxu1 %v13177_v1 }
 0x75c   :  { %11711 = vmatpush3.bf16.msra.mxu0 %v15600_v40 }
 0x75d   :  { %11716 = vmatprep.subr.bf16.mxu0 %v13177_v1  ;;  %11857 = vmatmul.mubr.msk.bf16.vlgmr.msra.gmra.mrb[48].mxu1 %vm117_vm1, %v16059_v25 }
 0x75e   :  { %11952 = vmatprep.mubr.msk.bf16.mxu1 %vm13178_vm0, %v13177_v1 }
 0x75f   :  { %11713 = vmatmul.mubr.msk.bf16.vlgmr.msra.gmra.mrb[48].mxu0 %vm117_vm1, %v15423_v48 }
 0x760   :  { %11717 = vmatpush3.bf16.msra.mxu0 %v15611_v59  ;;  %11728 = vmatprep.mubr.msk.bf16.mxu0 %vm13178_vm0, %v13177_v1 }
 0x761   :  { %11718 = vmatprep.subr.bf16.mxu0 %v13177_v1 }
 0x764   :  { %11719 = vmatpush3.bf16.msra.mxu0 %v15626_v7 }
 0x765   :  { %11720 = vmatprep.subr.bf16.mxu0 %v13177_v1 }
 0x768   :  { %11721 = vmatpush3.bf16.msra.mxu0 %v15637_v5 }
 0x769   :  { %11722 = vmatprep.subr.bf16.mxu0 %v13177_v1 }
 0x76c   :  { %11723 = vmatpush3.bf16.msra.mxu0 %v15646_v24 }
 0x76d   :  { %11724 = vmatprep.subr.bf16.mxu0 %v13177_v1 }
 0x770   :  { %11725 = vmatpush3.bf16.msra.mxu0 %v15655_v58 }
 0x771   :  { %11726 = vmatprep.subr.bf16.mxu0 %v13177_v1 }
 0x774   :  { %11727 = vmatpush3.bf16.msra.mxu0 %v15664_v45 }
 0x775   :  { %11732 = vmatprep.subr.bf16.mxu0 %v13177_v1 }
 0x777   :  { %11729 = vmatmul.mubr.msk.bf16.vlgmr.msra.gmra.mrb[48].mxu0 %vm117_vm1, %v15367_v44 }
 0x778   :  { %11733 = vmatpush3.bf16.msra.mxu0 %v15673_v47  ;;  %11744 = vmatprep.mubr.msk.bf16.mxu0 %vm13178_vm0, %v13177_v1 }
 0x779   :  { %11734 = vmatprep.subr.bf16.mxu0 %v13177_v1 }
 0x77c   :  { %11735 = vmatpush3.bf16.msra.mxu0 %v15688_v55 }
 0x77d   :  { %11736 = vmatprep.subr.bf16.mxu0 %v13177_v1 }
 0x780   :  { %11737 = vmatpush3.bf16.msra.mxu0 %v15699_v28 }
 0x781   :  { %11738 = vmatprep.subr.bf16.mxu0 %v13177_v1 }
 0x784   :  { %11739 = vmatpush3.bf16.msra.mxu0 %v15708_v8 }
 0x785   :  { %11740 = vmatprep.subr.bf16.mxu0 %v13177_v1 }
 0x788   :  { %11741 = vmatpush3.bf16.msra.mxu0 %v15717_v10 }
 0x789   :  { %11742 = vmatprep.subr.bf16.mxu0 %v13177_v1 }
 0x78c   :  { %11743 = vmatpush3.bf16.msra.mxu0 %v15726_v13 }
 0x78d   :  { %11748 = vmatprep.subr.bf16.mxu0 %v13177_v1 }
 0x78f   :  { %11745 = vmatmul.mubr.msk.bf16.vlgmr.msra.gmra.mrb[48].mxu0 %vm117_vm1, %v15473_v12 }
 0x790   :  { %11749 = vmatpush3.bf16.msra.mxu0 %v15735_v19  ;;  %11760 = vmatprep.mubr.msk.bf16.mxu0 %vm13178_vm0, %v13177_v1 }
 0x791   :  { %11750 = vmatprep.subr.bf16.mxu0 %v13177_v1 }
 0x794   :  { %11751 = vmatpush3.bf16.msra.mxu0 %v15750_v21 }
 0x795   :  { %11752 = vmatprep.subr.bf16.mxu0 %v13177_v1 }
 0x798   :  { %11753 = vmatpush3.bf16.msra.mxu0 %v15761_v22 }
 0x799   :  { %11754 = vmatprep.subr.bf16.mxu0 %v13177_v1 }
 0x79c   :  { %11755 = vmatpush3.bf16.msra.mxu0 %v15770_v27 }
 0x79d   :  { %11756 = vmatprep.subr.bf16.mxu0 %v13177_v1 }
 0x7a0   :  { %11757 = vmatpush3.bf16.msra.mxu0 %v15779_v63 }
 0x7a1   :  { %11758 = vmatprep.subr.bf16.mxu0 %v13177_v1 }
 0x7a2   :  { %v16115_v44 = vpop.f32.mrb[40].mxu0 }
 0x7a3   :  { %v5543_v46 = vmax.f32 %v17147_v43, %v16115_v44  ;;  %v11458_v49 = vpop.f32.mrb[41].mxu0  ;;  %v16407_v44 = vsel %vm2296_vm2, %v12994_v61, 0  ;;  %v16410_v43 = vsel %vm2296_vm2, %v12995_v62, 0  ;;  %v16613_v62 = vld [vmem:[%s17079_s3 + $0xb0] sm:$0xff]  }
 0x7a4   :  { %v5124_v50 = vpop.f32.mrb[42].mxu0  ;;  %11759 = vmatpush3.bf16.msra.mxu0 %v15788_v30  ;;  %v16422_v49 = vld [vmem:[%s17079_s3 + $0x134] sm:$0xff]  }
 0x7a5   :  { %v11459_v51 = vpop.f32.mrb[43].mxu0  ;;  %11764 = vmatprep.subr.bf16.mxu0 %v13177_v1 }
 0x7a6   :  { %v16437_v51 = vld [vmem:[%s17079_s3 + $0x60] sm:$0xff]  }
 0x7a7   :  { %11761 = vmatmul.mubr.msk.bf16.vlgmr.msra.gmra.mrb[48].mxu0 %vm117_vm1, %v15603_v41 }
 0x7a8   :  { %11765 = vmatpush3.bf16.msra.mxu0 %v15797_v32  ;;  %11776 = vmatprep.mubr.msk.bf16.mxu0 %vm13178_vm0, %v13177_v1 }
 0x7a9   :  { %11766 = vmatprep.subr.bf16.mxu0 %v13177_v1 }
 0x7ac   :  { %11767 = vmatpush3.bf16.msra.mxu0 %v17142_v16 }
 0x7ad   :  { %11768 = vmatprep.subr.bf16.mxu0 %v13177_v1 }
 0x7b0   :  { %11769 = vmatpush3.bf16.msra.mxu0 %v17144_v18 }
 0x7b1   :  { %11770 = vmatprep.subr.bf16.mxu0 %v13177_v1 }
 0x7b4   :  { %11771 = vmatpush3.bf16.msra.mxu0 %v17146_v23 }
 0x7b5   :  { %11772 = vmatprep.subr.bf16.mxu0 %v13177_v1 }
 0x7b8   :  { %11773 = vmatpush3.bf16.msra.mxu0 %v15841_v3  ;;  %v16134_v54 = vpop.f32.mrb[44].mxu1 }
 0x7b9   :  { %11774 = vmatprep.subr.bf16.mxu0 %v13177_v1  ;;  %v11698_v6 = vpop.f32.mrb[45].mxu1 }
 0x7ba   :  { %v5756_v11 = vpop.f32.mrb[46].mxu1  ;;  %v16455_v6 = vld [vmem:[%s17079_s3 + $0x68] sm:$0xff]  }
 0x7bb   :  { %v11699_v9 = vpop.f32.mrb[47].mxu1  ;;  %v16460_v11 = vld [vmem:[%s17079_s3 + $0x144] sm:$0xff]  }
 0x7bc   :  { %11775 = vmatpush3.bf16.msra.mxu0 %v15850_v42  ;;  %v16469_v9 = vld [vmem:[%s17079_s3 + $0x70] sm:$0xff]  }
 0x7bd   :  { %11860 = vmatprep.subr.bf16.mxu0 %v13177_v1 }
 0x7bf   :  { %11777 = vmatmul.mubr.msk.bf16.vlgmr.msra.gmra.mrb[48].mxu0 %vm117_vm1, %v15889_v38 }
 0x7c0   :  { %11861 = vmatpush3.bf16.msra.mxu0 %v15547_v31  ;;  %11872 = vmatprep.mubr.msk.bf16.mxu0 %vm13178_vm0, %v13177_v1 }
 0x7c1   :  { %11862 = vmatprep.subr.bf16.mxu0 %v13177_v1 }
 0x7c4   :  { %11863 = vmatpush3.bf16.msra.mxu0 %v15560_v33 }
 0x7c5   :  { %11864 = vmatprep.subr.bf16.mxu0 %v13177_v1 }
 0x7c8   :  { %11865 = vmatpush3.bf16.msra.mxu0 %v15571_v34 }
 0x7c9   :  { %11866 = vmatprep.subr.bf16.mxu0 %v13177_v1 }
 0x7cc   :  { %11867 = vmatpush3.bf16.msra.mxu0 %v15580_v35  ;;  %v16218_v35 = vld [vmem:[%s17079_s3 + $0x3c] sm:$0xff]  }
 0x7cd   :  { %11868 = vmatprep.subr.bf16.mxu0 %v13177_v1 }
 0x7d0   :  { %11869 = vmatpush3.bf16.msra.mxu0 %v15590_v37 }
 0x7d1   :  { %11870 = vmatprep.subr.bf16.mxu0 %v13177_v1 }
 0x7d4   :  { %11871 = vmatpush3.bf16.msra.mxu0 %v15600_v40 }
 0x7d5   :  { %11876 = vmatprep.subr.bf16.mxu0 %v13177_v1 }
 0x7d7   :  { %11873 = vmatmul.mubr.msk.bf16.vlgmr.msra.gmra.mrb[52].mxu0 %vm117_vm1, %v15473_v12  ;;  %v16208_v12 = vld [vmem:[%s17079_s3 + $0x34] sm:$0xff]  }
 0x7d8   :  { %11877 = vmatpush3.bf16.msra.mxu0 %v15611_v59  ;;  %11888 = vmatprep.mubr.msk.bf16.mxu0 %vm13178_vm0, %v13177_v1  ;;  %v16234_v59 = vld [vmem:[%s17079_s3 + $0x44] sm:$0xff]  }
 0x7d9   :  { %11878 = vmatprep.subr.bf16.mxu0 %v13177_v1 }
 0x7dc   :  { %11879 = vmatpush3.bf16.msra.mxu0 %v15626_v7 }
 0x7dd   :  { %11880 = vmatprep.subr.bf16.mxu0 %v13177_v1 }
 0x7e0   :  { %11881 = vmatpush3.bf16.msra.mxu0 %v15637_v5 }
 0x7e1   :  { %11882 = vmatprep.subr.bf16.mxu0 %v13177_v1 }
 0x7e4   :  { %11883 = vmatpush3.bf16.msra.mxu0 %v15646_v24 }
 0x7e5   :  { %11884 = vmatprep.subr.bf16.mxu0 %v13177_v1 }
 0x7e8   :  { %11885 = vmatpush3.bf16.msra.mxu0 %v15655_v58 }
 0x7e9   :  { %11886 = vmatprep.subr.bf16.mxu0 %v13177_v1 }
 0x7ec   :  { %11887 = vmatpush3.bf16.msra.mxu0 %v15664_v45  ;;  %v16255_v45 = vld [vmem:[%s17079_s3 + $0x108] sm:$0xff]  }
 0x7ed   :  { %11892 = vmatprep.subr.bf16.mxu0 %v13177_v1 }
 0x7ef   :  { %11889 = vmatmul.mubr.msk.bf16.vlgmr.msra.gmra.mrb[52].mxu0 %vm117_vm1, %v15423_v48  ;;  %v16202_v48 = vld [vmem:[%s17079_s3 + $0x2c] sm:$0xff]  }
 0x7f0   :  { %11893 = vmatpush3.bf16.msra.mxu0 %v15673_v47  ;;  %11904 = vmatprep.mubr.msk.bf16.mxu0 %vm13178_vm0, %v13177_v1  ;;  %v16280_v47 = vld [vmem:[%s17079_s3 + $0x120] sm:$0xff]  }
 0x7f1   :  { %11894 = vmatprep.subr.bf16.mxu0 %v13177_v1  ;;  %11941 = vmatpush3.bf16.msra.mxu1 %v16202_v48 }
 0x7f2   :  { %11942 = vmatprep.subr.bf16.mxu1 %v13177_v1 }
 0x7f4   :  { %11895 = vmatpush3.bf16.msra.mxu0 %v15688_v55  ;;  %v16288_v55 = vld [vmem:[%s17079_s3 + $0x4c] sm:$0xff]  }
 0x7f5   :  { %11896 = vmatprep.subr.bf16.mxu0 %v13177_v1  ;;  %11943 = vmatpush3.bf16.msra.mxu1 %v16208_v12 }
 0x7f6   :  { %11944 = vmatprep.subr.bf16.mxu1 %v13177_v1 }
 0x7f8   :  { %11897 = vmatpush3.bf16.msra.mxu0 %v15699_v28  ;;  %v16293_v28 = vld [vmem:[%s17079_s3 + $0x128] sm:$0xff]  }
 0x7f9   :  { %11898 = vmatprep.subr.bf16.mxu0 %v13177_v1  ;;  %11945 = vmatpush3.bf16.msra.mxu1 %v16218_v35 }
 0x7fa   :  { %11946 = vmatprep.subr.bf16.mxu1 %v13177_v1 }
 0x7fc   :  { %11899 = vmatpush3.bf16.msra.mxu0 %v15708_v8  ;;  %v12982_v8 = vld [vmem:[%s17079_s3 + $0x54] ss:$0 sps:$4 sm:$0x33]  }
 0x7fd   :  { %11900 = vmatprep.subr.bf16.mxu0 %v13177_v1  ;;  %11947 = vmatpush3.bf16.msra.mxu1 %v16234_v59 }
 0x7fe   :  { %11948 = vmatprep.subr.bf16.mxu1 %v13177_v1 }
 0x800   :  { %11901 = vmatpush3.bf16.msra.mxu0 %v15717_v10  ;;  %v12983_v10 = vld [vmem:[%s17079_s3 + $0x130] ss:$0 sps:$4 sm:$0x33]  }
 0x801   :  { %11902 = vmatprep.subr.bf16.mxu0 %v13177_v1  ;;  %11949 = vmatpush3.bf16.msra.mxu1 %v16288_v55 }
 0x802   :  { %11950 = vmatprep.subr.bf16.mxu1 %v13177_v1 }
 0x804   :  { %11903 = vmatpush3.bf16.msra.mxu0 %v15726_v13  ;;  %v16306_v13 = vsel %vm2296_vm2, %v12982_v8, 0  ;;  %v16515_v8 = vld [vmem:[%s17079_s3 + $0x84] sm:$0xff]  }
 0x805   :  { %11908 = vmatprep.subr.bf16.mxu0 %v13177_v1  ;;  %11951 = vmatpush3.bf16.msra.mxu1 %v16306_v13 }
 0x806   :  { %11956 = vmatprep.subr.bf16.mxu1 %v13177_v1 }
 0x807   :  { %11905 = vmatmul.mubr.msk.bf16.vlgmr.msra.gmra.mrb[52].mxu0 %vm117_vm1, %v15603_v41 }
 0x808   :  { %11909 = vmatpush3.bf16.msra.mxu0 %v15735_v19  ;;  %11920 = vmatprep.mubr.msk.bf16.mxu0 %vm13178_vm0, %v13177_v1  ;;  %v16309_v19 = vsel %vm2296_vm2, %v12983_v10, 0  ;;  %v16520_v10 = vld [vmem:[%s17079_s3 + $0x160] sm:$0xff]  }
 0x809   :  { %11910 = vmatprep.subr.bf16.mxu0 %v13177_v1 }
 0x80c   :  { %11911 = vmatpush3.bf16.msra.mxu0 %v15750_v21 }
 0x80d   :  { %11912 = vmatprep.subr.bf16.mxu0 %v13177_v1 }
 0x810   :  { %11913 = vmatpush3.bf16.msra.mxu0 %v15761_v22 }
 0x811   :  { %11914 = vmatprep.subr.bf16.mxu0 %v13177_v1 }
 0x814   :  { %11915 = vmatpush3.bf16.msra.mxu0 %v15770_v27 }
 0x815   :  { %11916 = vmatprep.subr.bf16.mxu0 %v13177_v1 }
 0x818   :  { %11917 = vmatpush3.bf16.msra.mxu0 %v15779_v63 }
 0x819   :  { %11918 = vmatprep.subr.bf16.mxu0 %v13177_v1 }
 0x81a   :  { %v5536_v31 = vpop.f32.mrb[44].mxu0 }
 0x81b   :  { %v5544_v33 = vmax.f32 %v16022_v26, %v5536_v31  ;;  %v11618_v34 = vpop.f32.mrb[45].mxu0  ;;  %v16372_v26 = vld [vmem:[%s17079_s3 + $0x18] sm:$0xff]   ;;  %v16474_v31 = vld [vmem:[%s17079_s3 + $0x14c] sm:$0xff]  }
 0x81c   :  { %v5539_v37 = vpop.f32.mrb[46].mxu0  ;;  %11919 = vmatpush3.bf16.msra.mxu0 %v15788_v30  ;;  %v16488_v34 = vld [vmem:[%s17079_s3 + $0x154] sm:$0xff]  }
 0x81d   :  { %v16225_v40 = vmax.f32 %v5543_v46, %v5544_v33  ;;  %v11619_v41 = vpop.f32.mrb[47].mxu0  ;;  %11924 = vmatprep.subr.bf16.mxu0 %v13177_v1  ;;  %v16417_v46 = vld [vmem:[%s17079_s3 + $0x58] sm:$0xff]  }
 0x81e   :  { %v16483_v33 = vld [vmem:[%s17079_s3 + $0x78] sm:$0xff]  }
 0x81f   :  { %11921 = vmatmul.mubr.msk.bf16.vlgmr.msra.gmra.mrb[52].mxu0 %vm117_vm1, %v15889_v38  ;;  %v5546_v57 = vadd.f32 %v13148_v0, %v16225_v40  ;;  %v13006_v40 = vld [vmem:[%s17079_s3 + $0x80] ss:$0 sps:$4 sm:$0x33]   ;;  %v13007_v41 = vld [vmem:[%s17079_s3 + $0x15c] ss:$0 sps:$4 sm:$0x33]  }
 0x820   :  { %11925 = vmatpush3.bf16.msra.mxu0 %v15797_v32  ;;  %11936 = vmatprep.mubr.msk.bf16.mxu0 %vm13178_vm0, %v13177_v1 }
 0x821   :  { %11926 = vmatprep.subr.bf16.mxu0 %v13177_v1 }
 0x824   :  { %11927 = vmatpush3.bf16.msra.mxu0 %v17142_v16 }
 0x825   :  { %11928 = vmatprep.subr.bf16.mxu0 %v13177_v1 }
 0x828   :  { %11929 = vmatpush3.bf16.msra.mxu0 %v17144_v18  ;;  %v16345_v18 = vld [vmem:[%s17079_s3 + $0xe4] sm:$0xff]  }
 0x829   :  { %11930 = vmatprep.subr.bf16.mxu0 %v13177_v1 }
 0x82c   :  { %11931 = vmatpush3.bf16.msra.mxu0 %v17146_v23  ;;  %v16363_v23 = vld [vmem:[%s17079_s3 + $0xec] sm:$0xff]  }
 0x82d   :  { %11932 = vmatprep.subr.bf16.mxu0 %v13177_v1 }
 0x830   :  { %11933 = vmatpush3.bf16.msra.mxu0 %v15841_v3  ;;  %v6168_v7 = vpop.f32.mrb[48].mxu1  ;;  %v16264_v3 = vld [vmem:[%s17079_s3 + $0x110] sm:$0xff]  }
 0x831   :  { %11934 = vmatprep.subr.bf16.mxu0 %v13177_v1  ;;  %v11858_v5 = vpop.f32.mrb[49].mxu1 }
 0x832   :  { %v6171_v24 = vpop.f32.mrb[50].mxu1  ;;  %v16507_v5 = vsel %vm2296_vm2, %v13007_v41, 0  ;;  %v16638_v41 = vld [vmem:[%s17079_s3 + $0x194] sm:$0xff]  }
 0x833   :  { %v11859_v58 = vpop.f32.mrb[51].mxu1 }
 0x834   :  { %11935 = vmatpush3.bf16.msra.mxu0 %v15850_v42  ;;  %v16273_v42 = vld [vmem:[%s17079_s3 + $0x118] sm:$0xff]  }
 0x835   :  { %12020 = vmatprep.subr.bf16.mxu0 %v13177_v1 }
 0x837   :  { %11937 = vmatmul.mubr.msk.bf16.vlgmr.msra.gmra.mrb[52].mxu0 %vm117_vm1, %v16059_v25  ;;  %v5547_v25 = vmax.f32 %v5546_v57, 0.0 }
 0x838   :  { %12021 = vmatpush3.bf16.msra.mxu0 %v16255_v45  ;;  %12032 = vmatprep.mubr.msk.bf16.mxu0 %vm13178_vm0, %v13177_v1 }
 0x839   :  { %12022 = vmatprep.subr.bf16.mxu0 %v13177_v1  ;;  %v16424_v50 = vpack.c.bf16 %v5547_v25, %v5547_v25  ;;  %v16618_v25 = vld [vmem:[%s17079_s3 + $0x18c] sm:$0xff]  }
 0x83b   :  { %v6578_v37 = vshll.u32 %v16424_v50, 16  ;;  %v6576_v58 = vshrl.u32 %v16424_v50, 16 }
 0x83c   :  { %12023 = vmatpush3.bf16.msra.mxu0 %v16264_v3 }
 0x83d   :  { %12024 = vmatprep.subr.bf16.mxu0 %v13177_v1  ;;  %v6580_v24 = vrot.slane %v6578_v37, 1 }
 0x840   :  { %12025 = vmatpush3.bf16.msra.mxu0 %v16273_v42 }
 0x841   :  { %12026 = vmatprep.subr.bf16.mxu0 %v13177_v1 }
 0x844   :  { %12027 = vmatpush3.bf16.msra.mxu0 %v16280_v47 }
 0x845   :  { %12028 = vmatprep.subr.bf16.mxu0 %v13177_v1 }
 0x848   :  { %12029 = vmatpush3.bf16.msra.mxu0 %v16293_v28 }
 0x849   :  { %12030 = vmatprep.subr.bf16.mxu0 %v13177_v1 }
 0x84c   :  { %12031 = vmatpush3.bf16.msra.mxu0 %v16309_v19 }
 0x84d   :  { %12036 = vmatprep.subr.bf16.mxu0 %v13177_v1 }
 0x892   :  { %v5956_v21 = vpop.f32.mrb[48].mxu0 }
 0x893   :  { %v6378_v22 = vmax.f32 %v16134_v54, %v5956_v21  ;;  %v11778_v27 = vpop.f32.mrb[49].mxu0  ;;  %v16442_v54 = vld [vmem:[%s17079_s3 + $0x13c] sm:$0xff]   ;;  %v16522_v21 = vor.u32 %v6580_v24, %v6576_v58 }
 0x894   :  { %v5959_v63 = vpop.f32.mrb[50].mxu0  ;;  %v16540_v27 = vld [vmem:[%s17079_s3 + $0x168] sm:$0xff]   ;;  %v16651_v24 = vld [vmem:[%s17079_s3 + $0xc0] sm:$0xff]  }
 0x895   :  { %v11779_v30 = vpop.f32.mrb[51].mxu0  ;;  %v16553_v63 = vld [vmem:[%s17079_s3 + $0x94] sm:$0xff]   ;;  %17148 = vst [vmem:[#allocation9_spill] sm:$0xff] %v16651_v24  ;;  %v16656_v58 = vld [vmem:[%s17079_s3 + $0x19c] sm:$0xff]  }
 0x896   :  { %v16558_v30 = vld [vmem:[%s17079_s3 + $0x170] sm:$0xff]   ;;  %17149 = vst [vmem:[#allocation7_spill] sm:$0xff] %v16656_v58 }
 0x90a   :  { %v6371_v32 = vpop.f32.mrb[52].mxu0 }
 0x90b   :  { %v6379_v38 = vmax.f32 %v6168_v7, %v6371_v32  ;;  %v11938_v36 = vpop.f32.mrb[53].mxu0  ;;  %v16504_v7 = vsel %vm2296_vm2, %v13006_v40, 0  ;;  %v16567_v32 = vld [vmem:[%s17079_s3 + $0x9c] sm:$0xff]  }
 0x90c   :  { %v6374_v39 = vpop.f32.mrb[54].mxu0  ;;  %v16581_v36 = vld [vmem:[%s17079_s3 + $0xa4] sm:$0xff]   ;;  %v16633_v40 = vld [vmem:[%s17079_s3 + $0xb8] sm:$0xff]  }
 0x90d   :  { %v6380_v52 = vmax.f32 %v6378_v22, %v6379_v38  ;;  %v11939_v60 = vpop.f32.mrb[55].mxu0  ;;  %v16535_v22 = vld [vmem:[%s17079_s3 + $0x8c] sm:$0xff]   ;;  %v16572_v38 = vld [vmem:[%s17079_s3 + $0x178] sm:$0xff]   ;;  %v16586_v39 = vld [vmem:[%s17079_s3 + $0x180] sm:$0xff]  }
 0x90e   :  { %v13019_v60 = vld [vmem:[%s17079_s3 + $0x188] ss:$0 sps:$4 sm:$0x33]  }
 0x90f   :  { %v6381_v2 = vadd.f32 %v13148_v0, %v6380_v52  ;;  %v13018_v52 = vld [vmem:[%s17079_s3 + $0xac] ss:$0 sps:$4 sm:$0x33]  }
 0x911   :  { %v6382_v14 = vmax.f32 %v6381_v2, 0.0  ;;  %v16602_v2 = vsel %vm2296_vm2, %v13018_v52, 0  ;;  %v16665_v52 = vld [vmem:[%s17079_s3 + $0xc8] sm:$0xff]  }
 0x912   :  { %17150 = vst [vmem:[#allocation5_spill] sm:$0xff] %v16665_v52 }
 0x913   :  { %v16329_v16 = vpack.c.bf16 %v6382_v14, %v6382_v14  ;;  %v16605_v14 = vsel %vm2296_vm2, %v13019_v60, 0  ;;  %v16670_v60 = vld [vmem:[%s17079_s3 + $0x1a4] sm:$0xff]  }
 0x914   :  { %17151 = vst [vmem:[#allocation8_spill] sm:$0xff] %v16670_v60 }
 0x915   :  { %11953 = vmatmul.mubr.msk.bf16.vlgmr.msra.gmra.mrb[52].mxu1 %vm2292_vm3, %v16329_v16  ;;  %12033 = vmatmul.mubr.msk.bf16.vlgmr.msra.gmra.mrb[56].mxu0 %vm2292_vm3, %v16329_v16  ;;  %v6675_v0 = vshll.u32 %v16329_v16, 16  ;;  %v6673_v61 = vshrl.u32 %v16329_v16, 16 }
 0x916   :  { %11957 = vmatpush3.bf16.msra.mxu1 %v16322_v4  ;;  %12037 = vmatpush3.bf16.msra.mxu0 %v16327_v15 }
 0x917   :  { %11958 = vmatprep.subr.bf16.mxu1 %v13177_v1  ;;  %12038 = vmatprep.subr.bf16.mxu0 %v13177_v1  ;;  %v6677_v57 = vrot.slane %v6675_v0, 1  ;;  %v16679_v0 = vld [vmem:[%s17079_s3 + $0xd0] sm:$0xff]  }
 0x918   :  { %11968 = vmatprep.mubr.msk.bf16.mxu1 %vm13178_vm0, %v13177_v1  ;;  %12048 = vmatprep.mubr.msk.bf16.mxu0 %vm13178_vm0, %v13177_v1 }
 0x919   :  { %v16620_v37 = vor.u32 %v6677_v57, %v6673_v61  ;;  %v16684_v57 = vld [vmem:[%s17079_s3 + $0x1ac] sm:$0xff]   ;;  %v13030_v61 = vld [vmem:[%s17079_s3 + $0xd8] ss:$0 sps:$4 sm:$0x33]  }
 0x91a   :  { %11959 = vmatpush3.bf16.msra.mxu1 %v16340_v17  ;;  %12039 = vmatpush3.bf16.msra.mxu0 %v16345_v18 }
 0x91b   :  { %11960 = vmatprep.subr.bf16.mxu1 %v13177_v1  ;;  %12040 = vmatprep.subr.bf16.mxu0 %v13177_v1 }
 0x91e   :  { %11961 = vmatpush3.bf16.msra.mxu1 %v16358_v20  ;;  %12041 = vmatpush3.bf16.msra.mxu0 %v16363_v23 }
 0x91f   :  { %11962 = vmatprep.subr.bf16.mxu1 %v13177_v1  ;;  %12042 = vmatprep.subr.bf16.mxu0 %v13177_v1 }
 0x922   :  { %11963 = vmatpush3.bf16.msra.mxu1 %v16372_v26  ;;  %12043 = vmatpush3.bf16.msra.mxu0 %v16377_v29 }
 0x923   :  { %11964 = vmatprep.subr.bf16.mxu1 %v13177_v1  ;;  %12044 = vmatprep.subr.bf16.mxu0 %v13177_v1 }
 0x926   :  { %11965 = vmatpush3.bf16.msra.mxu1 %v16386_v53  ;;  %12045 = vmatpush3.bf16.msra.mxu0 %v16391_v56 }
 0x927   :  { %11966 = vmatprep.subr.bf16.mxu1 %v13177_v1  ;;  %12046 = vmatprep.subr.bf16.mxu0 %v13177_v1 }
 0x92a   :  { %11967 = vmatpush3.bf16.msra.mxu1 %v16407_v44  ;;  %12047 = vmatpush3.bf16.msra.mxu0 %v16410_v43 }
 0x92b   :  { %11972 = vmatprep.subr.bf16.mxu1 %v13177_v1  ;;  %12052 = vmatprep.subr.bf16.mxu0 %v13177_v1 }
 0x92d   :  { %11969 = vmatmul.mubr.msk.bf16.vlgmr.msra.gmra.mrb[52].mxu1 %vm2292_vm3, %v16424_v50  ;;  %12049 = vmatmul.mubr.msk.bf16.vlgmr.msra.gmra.mrb[56].mxu0 %vm2292_vm3, %v16424_v50 }
 0x92e   :  { %11973 = vmatpush3.bf16.msra.mxu1 %v16417_v46  ;;  %12053 = vmatpush3.bf16.msra.mxu0 %v16422_v49 }
 0x92f   :  { %11974 = vmatprep.subr.bf16.mxu1 %v13177_v1  ;;  %12054 = vmatprep.subr.bf16.mxu0 %v13177_v1 }
 0x930   :  { %11984 = vmatprep.mubr.msk.bf16.mxu1 %vm13178_vm0, %v13177_v1  ;;  %12064 = vmatprep.mubr.msk.bf16.mxu0 %vm13178_vm0, %v13177_v1 }
 0x932   :  { %11975 = vmatpush3.bf16.msra.mxu1 %v16437_v51  ;;  %12055 = vmatpush3.bf16.msra.mxu0 %v16442_v54 }
 0x933   :  { %11976 = vmatprep.subr.bf16.mxu1 %v13177_v1  ;;  %12056 = vmatprep.subr.bf16.mxu0 %v13177_v1 }
 0x936   :  { %11977 = vmatpush3.bf16.msra.mxu1 %v16455_v6  ;;  %12057 = vmatpush3.bf16.msra.mxu0 %v16460_v11 }
 0x937   :  { %11978 = vmatprep.subr.bf16.mxu1 %v13177_v1  ;;  %12058 = vmatprep.subr.bf16.mxu0 %v13177_v1 }
 0x93a   :  { %11979 = vmatpush3.bf16.msra.mxu1 %v16469_v9  ;;  %12059 = vmatpush3.bf16.msra.mxu0 %v16474_v31 }
 0x93b   :  { %11980 = vmatprep.subr.bf16.mxu1 %v13177_v1  ;;  %12060 = vmatprep.subr.bf16.mxu0 %v13177_v1 }
 0x93e   :  { %11981 = vmatpush3.bf16.msra.mxu1 %v16483_v33  ;;  %12061 = vmatpush3.bf16.msra.mxu0 %v16488_v34 }
 0x93f   :  { %11982 = vmatprep.subr.bf16.mxu1 %v13177_v1  ;;  %12062 = vmatprep.subr.bf16.mxu0 %v13177_v1 }
 0x942   :  { %11983 = vmatpush3.bf16.msra.mxu1 %v16504_v7  ;;  %12063 = vmatpush3.bf16.msra.mxu0 %v16507_v5 }
 0x943   :  { %11988 = vmatprep.subr.bf16.mxu1 %v13177_v1  ;;  %12068 = vmatprep.subr.bf16.mxu0 %v13177_v1 }
 0x945   :  { %11985 = vmatmul.mubr.msk.bf16.vlgmr.msra.gmra.mrb[52].mxu1 %vm2292_vm3, %v16522_v21  ;;  %12065 = vmatmul.mubr.msk.bf16.vlgmr.msra.gmra.mrb[56].mxu0 %vm2292_vm3, %v16522_v21 }
 0x946   :  { %11989 = vmatpush3.bf16.msra.mxu1 %v16515_v8  ;;  %12069 = vmatpush3.bf16.msra.mxu0 %v16520_v10 }
 0x947   :  { %11990 = vmatprep.subr.bf16.mxu1 %v13177_v1  ;;  %12070 = vmatprep.subr.bf16.mxu0 %v13177_v1 }
 0x948   :  { %12000 = vmatprep.mubr.msk.bf16.mxu1 %vm13178_vm0, %v13177_v1  ;;  %12080 = vmatprep.mubr.msk.bf16.mxu0 %vm13178_vm0, %v13177_v1 }
 0x94a   :  { %11991 = vmatpush3.bf16.msra.mxu1 %v16535_v22  ;;  %12071 = vmatpush3.bf16.msra.mxu0 %v16540_v27 }
 0x94b   :  { %11992 = vmatprep.subr.bf16.mxu1 %v13177_v1  ;;  %12072 = vmatprep.subr.bf16.mxu0 %v13177_v1 }
 0x94e   :  { %11993 = vmatpush3.bf16.msra.mxu1 %v16553_v63  ;;  %12073 = vmatpush3.bf16.msra.mxu0 %v16558_v30 }
 0x94f   :  { %11994 = vmatprep.subr.bf16.mxu1 %v13177_v1  ;;  %12074 = vmatprep.subr.bf16.mxu0 %v13177_v1 }
 0x952   :  { %11995 = vmatpush3.bf16.msra.mxu1 %v16567_v32  ;;  %12075 = vmatpush3.bf16.msra.mxu0 %v16572_v38 }
 0x953   :  { %11996 = vmatprep.subr.bf16.mxu1 %v13177_v1  ;;  %12076 = vmatprep.subr.bf16.mxu0 %v13177_v1 }
 0x956   :  { %11997 = vmatpush3.bf16.msra.mxu1 %v16581_v36  ;;  %12077 = vmatpush3.bf16.msra.mxu0 %v16586_v39 }
 0x957   :  { %11998 = vmatprep.subr.bf16.mxu1 %v13177_v1  ;;  %12078 = vmatprep.subr.bf16.mxu0 %v13177_v1 }
 0x95a   :  { %11999 = vmatpush3.bf16.msra.mxu1 %v16602_v2  ;;  %12079 = vmatpush3.bf16.msra.mxu0 %v16605_v14 }
 0x95b   :  { %12004 = vmatprep.subr.bf16.mxu1 %v13177_v1  ;;  %12084 = vmatprep.subr.bf16.mxu0 %v13177_v1 }
 0x95d   :  { %12001 = vmatmul.mubr.msk.bf16.vlgmr.msra.gmra.mrb[52].mxu1 %vm2292_vm3, %v16620_v37  ;;  %12081 = vmatmul.mubr.msk.bf16.vlgmr.msra.gmra.mrb[56].mxu0 %vm2292_vm3, %v16620_v37 }
 0x95e   :  { %12005 = vmatpush3.bf16.msra.mxu1 %v16613_v62  ;;  %12085 = vmatpush3.bf16.msra.mxu0 %v16618_v25 }
 0x95f   :  { %12006 = vmatprep.subr.bf16.mxu1 %v13177_v1  ;;  %12086 = vmatprep.subr.bf16.mxu0 %v13177_v1 }
 0x960   :  { %12016 = vmatprep.mubr.msk.bf16.mxu1 %vm13178_vm0, %v13177_v1  ;;  %12096 = vmatprep.mubr.msk.bf16.mxu0 %vm13178_vm0, %v13177_v1 }
 0x962   :  { %12007 = vmatpush3.bf16.msra.mxu1 %v16633_v40  ;;  %12087 = vmatpush3.bf16.msra.mxu0 %v16638_v41 }
 0x963   :  { %12008 = vmatprep.subr.bf16.mxu1 %v13177_v1  ;;  %12088 = vmatprep.subr.bf16.mxu0 %v13177_v1 }
 0x966   :  { %12009 = vmatpush3.bf16.msra.mxu1 %v16651_v24  ;;  %12089 = vmatpush3.bf16.msra.mxu0 %v16656_v58  ;;  %v16707_v24 = vrot.slane %v16424_v50, 1 }
 0x967   :  { %12010 = vmatprep.subr.bf16.mxu1 %v13177_v1  ;;  %12090 = vmatprep.subr.bf16.mxu0 %v13177_v1 }
 0x96a   :  { %12011 = vmatpush3.bf16.msra.mxu1 %v16665_v52  ;;  %12091 = vmatpush3.bf16.msra.mxu0 %v16670_v60  ;;  %v13031_v60 = vld [vmem:[%s17079_s3 + $0x1b4] ss:$0 sps:$4 sm:$0x33]   ;;  %v16699_v52 = vsel %vm2296_vm2, %v13030_v61, 0  ;;  %v13062_v61 = vld [vmem:[%s17083_s7 + $0x28] sm:$0xff]  }
 0x96b   :  { %12012 = vmatprep.subr.bf16.mxu1 %v13177_v1  ;;  %12092 = vmatprep.subr.bf16.mxu0 %v13177_v1  ;;  %v16702_v58 = vsel %vm2296_vm2, %v13031_v60, 0  ;;  %v13059_v60 = vld [vmem:[%s17083_s7 + $0x10] sm:$0xff]  }
 0x96e   :  { %12013 = vmatpush3.bf16.msra.mxu1 %v16679_v0  ;;  %12093 = vmatpush3.bf16.msra.mxu0 %v16684_v57 }
 0x96f   :  { %12014 = vmatprep.subr.bf16.mxu1 %v13177_v1  ;;  %12094 = vmatprep.subr.bf16.mxu0 %v13177_v1 }
 0x972   :  { %12015 = vmatpush3.bf16.msra.mxu1 %v16699_v52  ;;  %12095 = vmatpush3.bf16.msra.mxu0 %v16702_v58 }
 0x973   :  { %12100 = vmatprep.subr.bf16.mxu1 %v13177_v1  ;;  %12180 = vmatprep.subr.bf16.mxu0 %v13177_v1 }
 0x975   :  { %12017 = vmatmul.mubr.msk.bf16.vlgmr.msra.gmra.mrb[52].mxu1 %vm2292_vm3, %v16707_v24  ;;  %12097 = vmatmul.mubr.msk.bf16.vlgmr.msra.gmra.mrb[56].mxu0 %vm2292_vm3, %v16707_v24 }
 0x976   :  { %12101 = vmatpush3.bf16.msra.mxu1 %v16202_v48  ;;  %12181 = vmatpush3.bf16.msra.mxu0 %v16255_v45  ;;  %v17152_v48 = vld [vmem:[#allocation9_spill] sm:$0xff] }
 0x977   :  { %12102 = vmatprep.subr.bf16.mxu1 %v13177_v1  ;;  %12182 = vmatprep.subr.bf16.mxu0 %v13177_v1  ;;  %v13032_v45 = vld [vmem:[%s17081_s5] sm:$0xff]  }
 0x978   :  { %12112 = vmatprep.mubr.msk.bf16.mxu1 %vm13178_vm0, %v13177_v1  ;;  %12192 = vmatprep.mubr.msk.bf16.mxu0 %vm13178_vm0, %v13177_v1 }
 0x97a   :  { %12103 = vmatpush3.bf16.msra.mxu1 %v16208_v12  ;;  %12183 = vmatpush3.bf16.msra.mxu0 %v16264_v3  ;;  %v17153_v12 = vld [vmem:[#allocation7_spill] sm:$0xff]  ;;  %v13033_v3 = vld [vmem:[%s17081_s5 + $0x28] sm:$0xff]  }
 0x97b   :  { %12104 = vmatprep.subr.bf16.mxu1 %v13177_v1  ;;  %12184 = vmatprep.subr.bf16.mxu0 %v13177_v1 }
 0x97e   :  { %12105 = vmatpush3.bf16.msra.mxu1 %v16218_v35  ;;  %12185 = vmatpush3.bf16.msra.mxu0 %v16273_v42  ;;  %v17154_v35 = vld [vmem:[#allocation5_spill] sm:$0xff]  ;;  %v7453_v42 = vrot.slane %v16329_v16, 1 }
 0x97f   :  { %12106 = vmatprep.subr.bf16.mxu1 %v13177_v1  ;;  %12186 = vmatprep.subr.bf16.mxu0 %v13177_v1 }
 0x982   :  { %12107 = vmatpush3.bf16.msra.mxu1 %v16234_v59  ;;  %12187 = vmatpush3.bf16.msra.mxu0 %v16280_v47  ;;  %v17155_v59 = vld [vmem:[#allocation8_spill] sm:$0xff]  ;;  %v13034_v47 = vld [vmem:[%s17081_s5 + $0x8] sm:$0xff]  }
 0x983   :  { %12108 = vmatprep.subr.bf16.mxu1 %v13177_v1  ;;  %12188 = vmatprep.subr.bf16.mxu0 %v13177_v1 }
 0x986   :  { %12109 = vmatpush3.bf16.msra.mxu1 %v16288_v55  ;;  %12189 = vmatpush3.bf16.msra.mxu0 %v16293_v28  ;;  %v13035_v55 = vld [vmem:[%s17081_s5 + $0x30] sm:$0xff]  }
 0x987   :  { %12110 = vmatprep.subr.bf16.mxu1 %v13177_v1  ;;  %12190 = vmatprep.subr.bf16.mxu0 %v13177_v1  ;;  %v13036_v28 = vld [vmem:[%s17081_s5 + $0x10] sm:$0xff]  }
 0x98a   :  { %12111 = vmatpush3.bf16.msra.mxu1 %v16306_v13  ;;  %12191 = vmatpush3.bf16.msra.mxu0 %v16309_v19  ;;  %v13037_v13 = vld [vmem:[%s17081_s5 + $0x38] sm:$0xff]  }
 0x98b   :  { %12116 = vmatprep.subr.bf16.mxu1 %v13177_v1  ;;  %12196 = vmatprep.subr.bf16.mxu0 %v13177_v1  ;;  %v13038_v19 = vld [vmem:[%s17081_s5 + $0x18] sm:$0xff]  }
 0x98d   :  { %12113 = vmatmul.mubr.msk.bf16.vlgmr.msra.gmra.mrb[56].mxu1 %vm2292_vm3, %v16522_v21  ;;  %12193 = vmatmul.mubr.msk.bf16.vlgmr.msra.gmra.mrb[60].mxu0 %vm2292_vm3, %v16522_v21 }
 0x98e   :  { %12117 = vmatpush3.bf16.msra.mxu1 %v16322_v4  ;;  %12197 = vmatpush3.bf16.msra.mxu0 %v16327_v15  ;;  %v13039_v4 = vld [vmem:[%s17081_s5 + $0x40] sm:$0xff]  }
 0x98f   :  { %12118 = vmatprep.subr.bf16.mxu1 %v13177_v1  ;;  %12198 = vmatprep.subr.bf16.mxu0 %v13177_v1  ;;  %v13040_v15 = vld [vmem:[%s17081_s5 + $0x20] sm:$0xff]  }
 0x990   :  { %12128 = vmatprep.mubr.msk.bf16.mxu1 %vm13178_vm0, %v13177_v1  ;;  %12208 = vmatprep.mubr.msk.bf16.mxu0 %vm13178_vm0, %v13177_v1 }
 0x992   :  { %12119 = vmatpush3.bf16.msra.mxu1 %v16340_v17  ;;  %12199 = vmatpush3.bf16.msra.mxu0 %v16345_v18 }
 0x993   :  { %12120 = vmatprep.subr.bf16.mxu1 %v13177_v1  ;;  %12200 = vmatprep.subr.bf16.mxu0 %v13177_v1 }
 0x996   :  { %12121 = vmatpush3.bf16.msra.mxu1 %v16358_v20  ;;  %12201 = vmatpush3.bf16.msra.mxu0 %v16363_v23 }
 0x997   :  { %12122 = vmatprep.subr.bf16.mxu1 %v13177_v1  ;;  %12202 = vmatprep.subr.bf16.mxu0 %v13177_v1 }
 0x99a   :  { %12123 = vmatpush3.bf16.msra.mxu1 %v16372_v26  ;;  %12203 = vmatpush3.bf16.msra.mxu0 %v16377_v29 }
 0x99b   :  { %12124 = vmatprep.subr.bf16.mxu1 %v13177_v1  ;;  %12204 = vmatprep.subr.bf16.mxu0 %v13177_v1 }
 0x99e   :  { %12125 = vmatpush3.bf16.msra.mxu1 %v16386_v53  ;;  %12205 = vmatpush3.bf16.msra.mxu0 %v16391_v56 }
 0x99f   :  { %12126 = vmatprep.subr.bf16.mxu1 %v13177_v1  ;;  %12206 = vmatprep.subr.bf16.mxu0 %v13177_v1 }
 0x9a2   :  { %12127 = vmatpush3.bf16.msra.mxu1 %v16407_v44  ;;  %12207 = vmatpush3.bf16.msra.mxu0 %v16410_v43 }
 0x9a3   :  { %12132 = vmatprep.subr.bf16.mxu1 %v13177_v1  ;;  %12212 = vmatprep.subr.bf16.mxu0 %v13177_v1 }
 0x9a5   :  { %12129 = vmatmul.mubr.msk.bf16.vlgmr.msra.gmra.mrb[56].mxu1 %vm2292_vm3, %v16329_v16  ;;  %12209 = vmatmul.mubr.msk.bf16.vlgmr.msra.gmra.mrb[60].mxu0 %vm2292_vm3, %v16329_v16  ;;  %v13041_v16 = vld [vmem:[%s17081_s5 + $0x48] sm:$0xff]  }
 0x9a6   :  { %12133 = vmatpush3.bf16.msra.mxu1 %v16417_v46  ;;  %12213 = vmatpush3.bf16.msra.mxu0 %v16422_v49 }
 0x9a7   :  { %12134 = vmatprep.subr.bf16.mxu1 %v13177_v1  ;;  %12214 = vmatprep.subr.bf16.mxu0 %v13177_v1 }
 0x9a8   :  { %12144 = vmatprep.mubr.msk.bf16.mxu1 %vm13178_vm0, %v13177_v1  ;;  %12224 = vmatprep.mubr.msk.bf16.mxu0 %vm13178_vm0, %v13177_v1 }
 0x9aa   :  { %12135 = vmatpush3.bf16.msra.mxu1 %v16437_v51  ;;  %12215 = vmatpush3.bf16.msra.mxu0 %v16442_v54 }
 0x9ab   :  { %12136 = vmatprep.subr.bf16.mxu1 %v13177_v1  ;;  %12216 = vmatprep.subr.bf16.mxu0 %v13177_v1 }
 0x9ae   :  { %12137 = vmatpush3.bf16.msra.mxu1 %v16455_v6  ;;  %12217 = vmatpush3.bf16.msra.mxu0 %v16460_v11 }
 0x9af   :  { %12138 = vmatprep.subr.bf16.mxu1 %v13177_v1  ;;  %12218 = vmatprep.subr.bf16.mxu0 %v13177_v1 }
 0x9b2   :  { %12139 = vmatpush3.bf16.msra.mxu1 %v16469_v9  ;;  %12219 = vmatpush3.bf16.msra.mxu0 %v16474_v31 }
 0x9b3   :  { %12140 = vmatprep.subr.bf16.mxu1 %v13177_v1  ;;  %12220 = vmatprep.subr.bf16.mxu0 %v13177_v1 }
 0x9b6   :  { %12141 = vmatpush3.bf16.msra.mxu1 %v16483_v33  ;;  %12221 = vmatpush3.bf16.msra.mxu0 %v16488_v34  ;;  %v13149_v33 = vld [vmem:[%s17080_s4] ss:$0 sm:$0xff] }
 0x9b7   :  { %12142 = vmatprep.subr.bf16.mxu1 %v13177_v1  ;;  %12222 = vmatprep.subr.bf16.mxu0 %v13177_v1 }
 0x9ba   :  { %12143 = vmatpush3.bf16.msra.mxu1 %v16504_v7  ;;  %12223 = vmatpush3.bf16.msra.mxu0 %v16507_v5  ;;  %v13042_v5 = vld [vmem:[%s17081_s5 + $0x78] sm:$0xff]  }
 0x9bb   :  { %12148 = vmatprep.subr.bf16.mxu1 %v13177_v1  ;;  %12228 = vmatprep.subr.bf16.mxu0 %v13177_v1 }
 0x9bd   :  { %12145 = vmatmul.mubr.msk.bf16.vlgmr.msra.gmra.mrb[56].mxu1 %vm2292_vm3, %v16620_v37  ;;  %12225 = vmatmul.mubr.msk.bf16.vlgmr.msra.gmra.mrb[60].mxu0 %vm2292_vm3, %v16620_v37  ;;  %v13054_v37 = vld [vmem:[%s17081_s5 + $0xb0] sm:$0xff]  }
 0x9be   :  { %12149 = vmatpush3.bf16.msra.mxu1 %v16515_v8  ;;  %12229 = vmatpush3.bf16.msra.mxu0 %v16520_v10  ;;  %v13043_v10 = vld [vmem:[%s17081_s5 + $0x50] sm:$0xff]  }
 0x9bf   :  { %12150 = vmatprep.subr.bf16.mxu1 %v13177_v1  ;;  %12230 = vmatprep.subr.bf16.mxu0 %v13177_v1 }
 0x9c0   :  { %12160 = vmatprep.mubr.msk.bf16.mxu1 %vm13178_vm0, %v13177_v1  ;;  %12240 = vmatprep.mubr.msk.bf16.mxu0 %vm13178_vm0, %v13177_v1 }
 0x9c2   :  { %12151 = vmatpush3.bf16.msra.mxu1 %v16535_v22  ;;  %12231 = vmatpush3.bf16.msra.mxu0 %v16540_v27  ;;  %v13044_v22 = vld [vmem:[%s17081_s5 + $0x80] sm:$0xff]   ;;  %v13045_v27 = vld [vmem:[%s17081_s5 + $0x58] sm:$0xff]  }
 0x9c3   :  { %12152 = vmatprep.subr.bf16.mxu1 %v13177_v1  ;;  %12232 = vmatprep.subr.bf16.mxu0 %v13177_v1 }
 0x9c6   :  { %12153 = vmatpush3.bf16.msra.mxu1 %v16553_v63  ;;  %12233 = vmatpush3.bf16.msra.mxu0 %v16558_v30  ;;  %v13046_v63 = vld [vmem:[%s17081_s5 + $0x88] sm:$0xff]   ;;  %v13047_v30 = vld [vmem:[%s17081_s5 + $0x60] sm:$0xff]  }
 0x9c7   :  { %12154 = vmatprep.subr.bf16.mxu1 %v13177_v1  ;;  %12234 = vmatprep.subr.bf16.mxu0 %v13177_v1 }
 0x9ca   :  { %12155 = vmatpush3.bf16.msra.mxu1 %v16567_v32  ;;  %12235 = vmatpush3.bf16.msra.mxu0 %v16572_v38  ;;  %v13048_v32 = vld [vmem:[%s17081_s5 + $0x90] sm:$0xff]   ;;  %v13049_v38 = vld [vmem:[%s17081_s5 + $0x68] sm:$0xff]  }
 0x9cb   :  { %12156 = vmatprep.subr.bf16.mxu1 %v13177_v1  ;;  %12236 = vmatprep.subr.bf16.mxu0 %v13177_v1 }
 0x9ce   :  { %12157 = vmatpush3.bf16.msra.mxu1 %v16581_v36  ;;  %12237 = vmatpush3.bf16.msra.mxu0 %v16586_v39  ;;  %v13050_v36 = vld [vmem:[%s17081_s5 + $0x98] sm:$0xff]   ;;  %v13051_v39 = vld [vmem:[%s17081_s5 + $0x70] sm:$0xff]  }
 0x9cf   :  { %12158 = vmatprep.subr.bf16.mxu1 %v13177_v1  ;;  %12238 = vmatprep.subr.bf16.mxu0 %v13177_v1 }
 0x9d2   :  { %12159 = vmatpush3.bf16.msra.mxu1 %v16602_v2  ;;  %12239 = vmatpush3.bf16.msra.mxu0 %v16605_v14  ;;  %v13052_v14 = vld [vmem:[%s17081_s5 + $0xa0] sm:$0xff]  }
 0x9d3   :  { %12164 = vmatprep.subr.bf16.mxu1 %v13177_v1  ;;  %12244 = vmatprep.subr.bf16.mxu0 %v13177_v1 }
 0x9d5   :  { %12161 = vmatmul.mubr.msk.bf16.vlgmr.msra.gmra.mrb[56].mxu1 %vm2292_vm3, %v16707_v24  ;;  %12241 = vmatmul.mubr.msk.bf16.vlgmr.msra.gmra.mrb[60].mxu0 %vm2292_vm3, %v16707_v24 }
 0x9d6   :  { %12165 = vmatpush3.bf16.msra.mxu1 %v16613_v62  ;;  %12245 = vmatpush3.bf16.msra.mxu0 %v16618_v25  ;;  %v13053_v25 = vld [vmem:[%s17081_s5 + $0xa8] sm:$0xff]  }
 0x9d7   :  { %12166 = vmatprep.subr.bf16.mxu1 %v13177_v1  ;;  %12246 = vmatprep.subr.bf16.mxu0 %v13177_v1 }
 0x9d8   :  { %12176 = vmatprep.mubr.msk.bf16.mxu1 %vm13178_vm0, %v13177_v1  ;;  %12256 = vmatprep.mubr.msk.bf16.mxu0 %vm13178_vm0, %v13177_v1 }
 0x9da   :  { %12167 = vmatpush3.bf16.msra.mxu1 %v16633_v40  ;;  %12247 = vmatpush3.bf16.msra.mxu0 %v16638_v41  ;;  %v13055_v40 = vld [vmem:[%s17081_s5 + $0xb8] sm:$0xff]   ;;  %v13056_v41 = vld [vmem:[%s17081_s5 + $0xc0] sm:$0xff]  }
 0x9db   :  { %12168 = vmatprep.subr.bf16.mxu1 %v13177_v1  ;;  %12248 = vmatprep.subr.bf16.mxu0 %v13177_v1 }
 0x9de   :  { %12169 = vmatpush3.bf16.msra.mxu1 %v17152_v48  ;;  %12249 = vmatpush3.bf16.msra.mxu0 %v17153_v12  ;;  %v13063_v48 = vld [vmem:[%s17083_s7 + $0x30] sm:$0xff]   ;;  %v13064_v12 = vld [vmem:[%s17083_s7 + $0x38] ss:$0 sps:$4 sm:$0xff]  }
 0x9df   :  { %12170 = vmatprep.subr.bf16.mxu1 %v13177_v1  ;;  %12250 = vmatprep.subr.bf16.mxu0 %v13177_v1 }
 0x9e2   :  { %12171 = vmatpush3.bf16.msra.mxu1 %v17154_v35  ;;  %12251 = vmatpush3.bf16.msra.mxu0 %v17155_v59  ;;  %v8198_v35 = vsel %vm4071_vm5, %v13064_v12, 0  ;;  %v13065_v59 = vld [vmem:[%s17085_s9] sm:$0xff]  }
 0x9e3   :  { %12172 = vmatprep.subr.bf16.mxu1 %v13177_v1  ;;  %12252 = vmatprep.subr.bf16.mxu0 %v13177_v1 }
 0x9e6   :  { %12173 = vmatpush3.bf16.msra.mxu1 %v16679_v0  ;;  %12253 = vmatpush3.bf16.msra.mxu0 %v16684_v57  ;;  %v13060_v0 = vld [vmem:[%s17083_s7 + $0x18] sm:$0xff]   ;;  %v13061_v57 = vld [vmem:[%s17083_s7 + $0x20] sm:$0xff]  }
 0x9e7   :  { %12174 = vmatprep.subr.bf16.mxu1 %v13177_v1  ;;  %12254 = vmatprep.subr.bf16.mxu0 %v13177_v1 }
 0x9ea   :  { %12175 = vmatpush3.bf16.msra.mxu1 %v16699_v52  ;;  %12255 = vmatpush3.bf16.msra.mxu0 %v16702_v58  ;;  %v13057_v58 = vld [vmem:[%s17083_s7] sm:$0xff]   ;;  %v13058_v52 = vld [vmem:[%s17083_s7 + $0x8] sm:$0xff]  }
 0x9eb   :  { %12274 = vmatprep.subr.bf16.mxu0 %v13177_v1  ;;  %12260 = vmatprep.subr.bf16.mxu1 %v13177_v1 }
 0x9ed   :  { %12177 = vmatmul.mubr.msk.bf16.vlgmr.msra.gmra.mrb[56].mxu1 %vm2292_vm3, %v7453_v42  ;;  %12257 = vmatmul.mubr.msk.bf16.vlgmr.msra.gmra.mrb[60].mxu0 %vm2292_vm3, %v7453_v42  ;;  %v13068_v42 = vld [vmem:[%s17085_s9 + $0x18] sm:$0xff]  }
 0x9ee   :  { %12275 = vmatpush3.bf16.msra.mxu0 %v13032_v45  ;;  %12261 = vmatpush3.bf16.msra.mxu1 %v13033_v3  ;;  %v13066_v45 = vld [vmem:[%s17085_s9 + $0x8] sm:$0xff]   ;;  %v13067_v3 = vld [vmem:[%s17085_s9 + $0x10] sm:$0xff]  }
 0x9ef   :  { %12276 = vmatprep.subr.bf16.mxu0 %v13177_v1  ;;  %12262 = vmatprep.subr.bf16.mxu1 %v13177_v1 }
 0x9f0   :  { %12284 = vmatprep.mubr.msk.bf16.mxu0 %vm13178_vm0, %v13177_v1  ;;  %12270 = vmatprep.mubr.msk.bf16.mxu1 %vm13178_vm0, %v13177_v1 }
 0x9f2   :  { %12277 = vmatpush3.bf16.msra.mxu0 %v13034_v47  ;;  %12263 = vmatpush3.bf16.msra.mxu1 %v13035_v55 }
 0x9f3   :  { %12278 = vmatprep.subr.bf16.mxu0 %v13177_v1  ;;  %12264 = vmatprep.subr.bf16.mxu1 %v13177_v1 }
 0x9f6   :  { %12279 = vmatpush3.bf16.msra.mxu0 %v13036_v28  ;;  %12265 = vmatpush3.bf16.msra.mxu1 %v13037_v13 }
 0x9f7   :  { %12280 = vmatprep.subr.bf16.mxu0 %v13177_v1  ;;  %12266 = vmatprep.subr.bf16.mxu1 %v13177_v1 }
 0x9fa   :  { %12281 = vmatpush3.bf16.msra.mxu0 %v13038_v19  ;;  %12267 = vmatpush3.bf16.msra.mxu1 %v13039_v4 }
 0x9fb   :  { %12282 = vmatprep.subr.bf16.mxu0 %v13177_v1  ;;  %12268 = vmatprep.subr.bf16.mxu1 %v13177_v1 }
 0x9fe   :  { %12283 = vmatpush3.bf16.msra.mxu0 %v13040_v15  ;;  %12269 = vmatpush3.bf16.msra.mxu1 %v13041_v16 }
 0x9ff   :  { %12302 = vmatprep.subr.bf16.mxu0 %v13177_v1  ;;  %12288 = vmatprep.subr.bf16.mxu1 %v13177_v1 }
 0xa48   :  { %v6845_v17 = vpop.f32.mrb[52].mxu1  ;;  %v7283_v18 = vpop.f32.mrb[56].mxu0 }
 0xa49   :  { %v7701_v20 = vmax.f32 %v6845_v17, %v7283_v18  ;;  %v12018_v23 = vpop.f32.mrb[53].mxu1  ;;  %v12098_v26 = vpop.f32.mrb[57].mxu0 }
 0xa4a   :  { %v6848_v29 = vpop.f32.mrb[54].mxu1  ;;  %v7286_v53 = vpop.f32.mrb[58].mxu0 }
 0xa4b   :  { %v12019_v56 = vpop.f32.mrb[55].mxu1  ;;  %v12099_v44 = vpop.f32.mrb[59].mxu0 }
 0xac0   :  { %v7491_v43 = vpop.f32.mrb[56].mxu1  ;;  %v7694_v46 = vpop.f32.mrb[60].mxu0 }
 0xac1   :  { %v7702_v49 = vmax.f32 %v7491_v43, %v7694_v46  ;;  %v12178_v50 = vpop.f32.mrb[57].mxu1  ;;  %v12258_v51 = vpop.f32.mrb[61].mxu0 }
 0xac2   :  { %v7494_v54 = vpop.f32.mrb[58].mxu1  ;;  %v7697_v6 = vpop.f32.mrb[62].mxu0 }
 0xac3   :  { %v7703_v11 = vmax.f32 %v7701_v20, %v7702_v49  ;;  %v12179_v9 = vpop.f32.mrb[59].mxu1  ;;  %v12259_v31 = vpop.f32.mrb[63].mxu0  ;;  %v13150_v6 = vld [vmem:[%s17082_s6] sm:$0x1] }
 0xac5   :  { %v7704_v34 = vadd.f32 %v13149_v33, %v7703_v11 }
 0xac7   :  { %v7705_v7 = vmax.f32 %v7704_v34, 0.0  ;;  %v13069_v34 = vld [vmem:[%s17085_s9 + $0x20] sm:$0xff]  }
 0xac9   :  { %v7706_v8 = vpack.c.bf16 %v7705_v7, %v7705_v7  ;;  %v13070_v7 = vld [vmem:[%s17085_s9 + $0x28] ss:$0 sps:$4 sm:$0x33]  }
 0xacb   :  { %12285 = vmatmul.mubr.msk.bf16.vlgmr.msra.gmra.mrb[64].mxu0 %vm3629_vm4, %v7706_v8  ;;  %v7728_v21 = vshrl.u32 %v7706_v8, 16  ;;  %v7886_v62 = vrot.slane %v7706_v8, 1  ;;  %v8056_v24 = vrot.slane %v7706_v8, 2 }
 0xacc   :  { %12303 = vmatpush3.bf16.msra.mxu0 %v13042_v5  ;;  %12312 = vmatprep.mubr.msk.bf16.mxu0 %vm13178_vm0, %v13177_v1  ;;  %v8290_v5 = vsel %vm2296_vm2, %v13070_v7, 0 }
 0xacd   :  { %12271 = vmatmul.mubr.msk.bf16.vlgmr.msra.gmra.mrb[60].mxu1 %vm3629_vm4, %v7728_v21  ;;  %12304 = vmatprep.subr.bf16.mxu0 %v13177_v1  ;;  %v7971_v2 = vrot.slane %v7728_v21, 1 }
 0xace   :  { %12289 = vmatpush3.bf16.msra.mxu1 %v13043_v10  ;;  %12298 = vmatprep.mubr.msk.bf16.mxu1 %vm13178_vm0, %v13177_v1  ;;  %v13151_v10 = vld [vmem:[%s17084_s8] sm:$0x1]  ;;  %s13153_s8 = scalar_lea.vmem %s8340_s21, 32 }
 0xacf   :  { %12290 = vmatprep.subr.bf16.mxu1 %v13177_v1  ;;  %p13154_p0 = scmp.ne.s32.totalorder %s8340_s21, %s13153_s8  ;;  %p13159_p2 = scmp.lt.s32.totalorder %s13153_s8, %s13153_s8 }
 0xad0   :  { %12305 = vmatpush3.bf16.msra.mxu0 %v13044_v22 }
 0xad1   :  { %12306 = vmatprep.subr.bf16.mxu0 %v13177_v1  ;;  %p13160_p3 = por %p13159_p2, %p13158_p1 }
 0xad2   :  { %12291 = vmatpush3.bf16.msra.mxu1 %v13045_v27 }
 0xad3   :  { %12292 = vmatprep.subr.bf16.mxu1 %v13177_v1  ;;  %p13161_p4 = pnand %p13160_p3, %p13154_p0 }
 0xad4   :  { %12307 = vmatpush3.bf16.msra.mxu0 %v13046_v63 }
 0xad5   :  { %12308 = vmatprep.subr.bf16.mxu0 %v13177_v1 }
 0xad6   :  { %12293 = vmatpush3.bf16.msra.mxu1 %v13047_v30 }
 0xad7   :  { %12294 = vmatprep.subr.bf16.mxu1 %v13177_v1 }
 0xad8   :  { %12309 = vmatpush3.bf16.msra.mxu0 %v13048_v32 }
 0xad9   :  { %12310 = vmatprep.subr.bf16.mxu0 %v13177_v1 }
 0xada   :  { %12295 = vmatpush3.bf16.msra.mxu1 %v13049_v38  ;;  %v13152_v38 = vld [vmem:[%s17086_s10] sm:$0x1] }
 0xadb   :  { %12296 = vmatprep.subr.bf16.mxu1 %v13177_v1 }
 0xadc   :  { %12311 = vmatpush3.bf16.msra.mxu0 %v13050_v36 }
 0xadd   :  { %12330 = vmatprep.subr.bf16.mxu0 %v13177_v1 }
 0xade   :  { %12297 = vmatpush3.bf16.msra.mxu1 %v13051_v39 }
 0xadf   :  { %12313 = vmatmul.mubr.msk.bf16.vlgmr.msra.gmra.mrb[68].mxu0 %vm3629_vm4, %v7971_v2  ;;  %12316 = vmatprep.subr.bf16.mxu1 %v13177_v1 }
 0xae0   :  { %12346 = vmatprep.mubr.msk.bf16.mxu0 %vm13178_vm0, %v13177_v1  ;;  %12331 = vmatpush3.bf16.msra.mxu0 %v13057_v58 }
 0xae1   :  { %12299 = vmatmul.mubr.msk.bf16.vlgmr.msra.gmra.mrb[64].mxu1 %vm3629_vm4, %v7886_v62  ;;  %12332 = vmatprep.subr.bf16.mxu0 %v13177_v1 }
 0xae2   :  { %12317 = vmatpush3.bf16.msra.mxu1 %v13052_v14  ;;  %12326 = vmatprep.mubr.msk.bf16.mxu1 %vm13178_vm0, %v13177_v1 }
 0xae3   :  { %12318 = vmatprep.subr.bf16.mxu1 %v13177_v1 }
 0xae4   :  { %12333 = vmatpush3.bf16.msra.mxu0 %v13058_v52 }
 0xae5   :  { %12334 = vmatprep.subr.bf16.mxu0 %v13177_v1 }
 0xae6   :  { %12319 = vmatpush3.bf16.msra.mxu1 %v13053_v25 }
 0xae7   :  { %12320 = vmatprep.subr.bf16.mxu1 %v13177_v1 }
 0xae8   :  { %12335 = vmatpush3.bf16.msra.mxu0 %v13059_v60 }
 0xae9   :  { %12336 = vmatprep.subr.bf16.mxu0 %v13177_v1 }
 0xaea   :  { %12321 = vmatpush3.bf16.msra.mxu1 %v13054_v37 }
 0xaeb   :  { %12322 = vmatprep.subr.bf16.mxu1 %v13177_v1 }
 0xaec   :  { %12337 = vmatpush3.bf16.msra.mxu0 %v13060_v0 }
 0xaed   :  { %12338 = vmatprep.subr.bf16.mxu0 %v13177_v1 }
 0xaee   :  { %12323 = vmatpush3.bf16.msra.mxu1 %v13055_v40 }
 0xaef   :  { %12324 = vmatprep.subr.bf16.mxu1 %v13177_v1 }
 0xaf0   :  { %12339 = vmatpush3.bf16.msra.mxu0 %v13061_v57 }
 0xaf1   :  { %12340 = vmatprep.subr.bf16.mxu0 %v13177_v1 }
 0xaf2   :  { %12325 = vmatpush3.bf16.msra.mxu1 %v13056_v41 }
 0xaf3   :  { %12350 = vmatprep.subr.bf16.mxu1 %v13177_v1 }
 0xaf4   :  { %12341 = vmatpush3.bf16.msra.mxu0 %v13062_v61 }
 0xaf5   :  { %12327 = vmatmul.mubr.msk.bf16.vlgmr.msra.gmra.mrb[68].mxu1 %vm3629_vm4, %v8056_v24  ;;  %12342 = vmatprep.subr.bf16.mxu0 %v13177_v1 }
 0xaf6   :  { %12362 = vmatprep.mubr.msk.bf16.mxu1 %vm13178_vm0, %v13177_v1  ;;  %12351 = vmatpush3.bf16.msra.mxu1 %v13065_v59 }
 0xaf7   :  { %12352 = vmatprep.subr.bf16.mxu1 %v13177_v1 }
 0xaf8   :  { %12343 = vmatpush3.bf16.msra.mxu0 %v13063_v48 }
 0xaf9   :  { %12344 = vmatprep.subr.bf16.mxu0 %v13177_v1 }
 0xafa   :  { %12353 = vmatpush3.bf16.msra.mxu1 %v13066_v45 }
 0xafb   :  { %12354 = vmatprep.subr.bf16.mxu1 %v13177_v1 }
 0xafc   :  { %12345 = vmatpush3.bf16.msra.mxu0 %v8198_v35 }
 0xafe   :  { %12355 = vmatpush3.bf16.msra.mxu1 %v13067_v3 }
 0xaff   :  { %12356 = vmatprep.subr.bf16.mxu1 %v13177_v1 }
 0xb02   :  { %12357 = vmatpush3.bf16.msra.mxu1 %v13068_v42 }
 0xb03   :  { %12358 = vmatprep.subr.bf16.mxu1 %v13177_v1 }
 0xb06   :  { %12359 = vmatpush3.bf16.msra.mxu1 %v13069_v34 }
 0xb07   :  { %12360 = vmatprep.subr.bf16.mxu1 %v13177_v1 }
 0xb0a   :  { %12361 = vmatpush3.bf16.msra.mxu1 %v8290_v5 }
 0xb9e   :  { %v7869_v47 = vpop.f32.mrb[64].mxu0 }
 0xb9f   :  { %v12286_v55 = vpop.f32.mrb[65].mxu0 }
 0xba0   :  { %v7797_v28 = vpop.f32.mrb[60].mxu1  ;;  %v7872_v13 = vpop.f32.mrb[66].mxu0 }
 0xba1   :  { %v7870_v19 = vadd.f32 %v7869_v47, %v7797_v28  ;;  %v12272_v4 = vpop.f32.mrb[61].mxu1  ;;  %v12287_v15 = vpop.f32.mrb[67].mxu0 }
 0xba2   :  { %v7800_v16 = vpop.f32.mrb[62].mxu1 }
 0xba3   :  { %v12273_v17 = vpop.f32.mrb[63].mxu1 }
 0xbb2   :  { %v8039_v18 = vpop.f32.mrb[68].mxu0 }
 0xbb3   :  { %v12314_v20 = vpop.f32.mrb[69].mxu0 }
 0xbb4   :  { %v7954_v23 = vpop.f32.mrb[64].mxu1  ;;  %v8042_v26 = vpop.f32.mrb[70].mxu0 }
 0xbb5   :  { %v7960_v29 = vadd.f32 %v7954_v23, %v7870_v19  ;;  %v12300_v53 = vpop.f32.mrb[65].mxu1  ;;  %v12315_v56 = vpop.f32.mrb[71].mxu0 }
 0xbb6   :  { %v7957_v44 = vpop.f32.mrb[66].mxu1 }
 0xbb7   :  { %v12301_v43 = vpop.f32.mrb[67].mxu1  ;;  %v8045_v46 = vadd.f32 %v8039_v18, %v7960_v29 }
 0xbc8   :  { %v8124_v49 = vpop.f32.mrb[68].mxu1 }
 0xbc9   :  { %v8130_v50 = vadd.f32 %v8124_v49, %v8045_v46  ;;  %v12328_v51 = vpop.f32.mrb[69].mxu1 }
 0xbca   :  { %v8127_v54 = vpop.f32.mrb[70].mxu1 }
 0xbcb   :  { %v8131_v11 = vadd.f32 %v13150_v6, %v8130_v50  ;;  %v12329_v9 = vpop.f32.mrb[71].mxu1 }
 0xbcd   :  { %v8132_v31 = vmax.f32 %v8131_v11, 0.0 }
 0xbcf   :  { %v8133_v33 = vpack.c.bf16 %v8132_v31, %v8132_v31 }
 0xbd1   :  { %12347 = vmatmul.mubr.msk.bf16.vlgmr.msra.gmra.mrb[72].mxu0 %vm4067_vm6, %v8133_v33 }
 0xca4   :  { %v8234_v8 = vpop.f32.mrb[72].mxu0 }
 0xca5   :  { %v8235_v21 = vadd.f32 %v13151_v10, %v8234_v8  ;;  %v12348_v22 = vpop.f32.mrb[73].mxu0 }
 0xca6   :  { %v8237_v27 = vpop.f32.mrb[74].mxu0 }
 0xca7   :  { %v8240_v63 = vmax.f32 %v8235_v21, 0.0  ;;  %v12349_v30 = vpop.f32.mrb[75].mxu0 }
 0xca9   :  { %v8241_v32 = vpack.c.bf16 %v8240_v63, %v8240_v63 }
 0xcab   :  { %12363 = vmatmul.mubr.msk.bf16.vlgmr.msra.gmra.mrb[72].mxu1 %vm2292_vm3, %v8241_v32 }
 0xd7e   :  { %v8326_v1 = vpop.f32.mrb[72].mxu1 }
 0xd7f   :  { %v8327_v36 = vadd.f32 %v13152_v38, %v8326_v1  ;;  %v12364_v39 = vpop.f32.mrb[73].mxu1 }
 0xd80   :  { %v8329_v2 = vpop.f32.mrb[74].mxu1 }
 0xd81   :  { %8332 = vst.msk [vmem:[#allocation2 + $0x1] sm:$0x1] %vm4207_vm7, %v8327_v36  ;;  %v12365_v14 = vpop.f32.mrb[75].mxu1 }
 0xd82   :  { %13164 = shalt.err (!%p13161_p4)
}
 0xd83   :  { %s13165_s25 = scalar_lea.hbm %s17087_s11, 32 }
 0xd84   :  { %p13166_p5 = scmp.ne.s32.totalorder %s17087_s11, %s13165_s25  ;;  %p13169_p6 = scmp.lt.u32.totalorder %s13165_s25, %s17087_s11 }
 0xd86   :  { %p13171_p7 = pnand %p13169_p6, %p13166_p5 }
 0xd88   :  { %13174 = shalt.err (!%p13171_p7)
}
 0xd89   :  { %8342 = dma.vmem_to_hbm [thread:$0]  %s8340_s21, 32, %s17087_s11, [#allocation3]  }
 0xd8a   :  { %13175 = dma.done.wait [#allocation3], 32  }
 0xd8b   :  { %13176 = vsyncadd [#allocation3], 4294967264 }
 0xd8c   :  { %8346 = vsyncpa [#allocation3], 1 }

</bundles_post_ra>
